<compile_context>
chip_gen: v6e
topology: v6e:2x2x1
jax: 0.10.0
libtpu: 0.0.40
codegen_flags: <defaults>
</compile_context>

<pallas_src>
import jax
import jax.numpy as jnp
from jax import lax
from jax.experimental import pallas as pl
from jax.experimental.pallas import tpu as pltpu

# model hyper-parameters (match the PyTorch module defaults)
S_DIM = 10        # space_dimensions
F_LR_DIM = 21     # propagate_dimensions
F_OUT_DIM = 42    # GravNetConv out_channels
N_NEIGHBORS = 40  # first block; blocks 2-4 use 2*N_NEIGHBORS
K_LIST = (N_NEIGHBORS, 2 * N_NEIGHBORS, 2 * N_NEIGHBORS, 2 * N_NEIGHBORS)
IN_FEATS = 7      # raw per-node features (concat with global mean -> 14)

_BISECT_ITERS = 26  # k-th-distance bisection sweeps (range shrinks by 2^26 -> ~ulp level)


def _vmem_limit_bytes():
    """Chip-aware scoped-VMEM budget: ~96 MiB on v5e/v6e (128 MiB phys), 48 MiB on v7x."""
    try:
        cap = int(pltpu.get_tpu_info().vmem_capacity_bytes)
    except Exception:
        cap = 64 * 1024 * 1024  # conservative (v7x physical VMEM per core)
    return min((cap // 4) * 3, 100 * 1024 * 1024)


_VMEM_LIMIT = _vmem_limit_bytes()


def _tile(n, cap):
    """Largest tile <= cap that divides n and is a multiple of 8 (else n)."""
    if n <= cap:
        return n
    t = (cap // 8) * 8
    while t >= 8:
        if n % t == 0:
            return t
        t -= 8
    # TODO(synk): pad N to a tile multiple (+ node masks) instead of degrading to one full-N
    # tile when N has no nice divisor.
    return n


def _tile_lane(n, cap):
    """Largest tile <= cap that divides n and is a multiple of 128 (else n)."""
    if n <= cap:
        return n
    t = (cap // 128) * 128
    while t >= 128:
        if n % t == 0:
            return t
        t -= 128
    return n


def _pick_tq(n, batch, cap):
    """Lane-tile for the target-node axis; guarantees >= 2 parallel grid steps when B == 1
    (so both v7x TensorCores get fed) whenever N allows it."""
    tq = _tile_lane(n, cap)
    if batch == 1 and n // tq < 2 and n >= 256:
        tq = _tile_lane(n, max(128, n // 2))
    return tq


# ----------------------------------------------------------------------------
# Kernel 1: fused block MLP (l1+tanh -> l2+tanh -> l3+tanh -> s, h, x-part of out-linear)
# ----------------------------------------------------------------------------
def _block_mlp_kernel(x_ref, gmp_ref,
                      w1x_ref, w2_ref, b2_ref, w3_ref, b3_ref,
                      ws_ref, bs_ref, wh_ref, bh_ref, wox_ref, box_ref,
                      s_ref, h_ref, xo_ref):
    f32, bf16 = jnp.float32, jnp.bfloat16
    x = x_ref[0].astype(bf16)                     # (TM, Fin)
    # Linear(cat([x, global_mean])): the gm half (gm @ W1g + b1) was precomputed per batch in
    # the wrapper and arrives as a resident (1, 64) row -> one matmul + one broadcast-add.
    z = jnp.dot(x, w1x_ref[...], preferred_element_type=f32) + gmp_ref[0]
    z = jnp.tanh(z)
    z = jnp.tanh(jnp.dot(z.astype(bf16), w2_ref[...], preferred_element_type=f32)
                 + b2_ref[...])
    z = jnp.tanh(jnp.dot(z.astype(bf16), w3_ref[...], preferred_element_type=f32)
                 + b3_ref[...])
    zb = z.astype(bf16)                           # (TM, 64)
    s_ref[0] = jnp.dot(zb, ws_ref[...], preferred_element_type=f32) + bs_ref[...]
    h_ref[0] = jnp.dot(zb, wh_ref[...], preferred_element_type=f32) + bh_ref[...]
    # "x" slice of the GravNetConv output linear (+ its bias), so z3 never hits HBM.
    xo_ref[0] = jnp.dot(zb, wox_ref[...], preferred_element_type=f32) + box_ref[...]


def fused_block_mlp(x, gmp, bp):
    """x: (B,N,Fin), gmp: (B,1,64) -> s (B,N,S), h (B,N,P), xo (B,N,F_OUT)."""
    B, N, fin = x.shape
    tm = _tile(N, 1024)
    grid = (B, N // tm)

    def xmap(b, i): return (b, i, 0)
    def gmap(b, i): return (b, 0, 0)
    wspec = lambda a: pl.BlockSpec(a.shape, lambda b, i: (0, 0))

    in_specs = [
        pl.BlockSpec((1, tm, fin), xmap),
        pl.BlockSpec((1, 1, 64), gmap),
        wspec(bp["w1x"]),
        wspec(bp["w2"]), wspec(bp["b2"]),
        wspec(bp["w3"]), wspec(bp["b3"]),
        wspec(bp["ws"]), wspec(bp["bs"]),
        wspec(bp["wh"]), wspec(bp["bh"]),
        wspec(bp["wox"]), wspec(bp["box"]),
    ]
    out_specs = (
        pl.BlockSpec((1, tm, S_DIM), xmap),
        pl.BlockSpec((1, tm, F_LR_DIM), xmap),
        pl.BlockSpec((1, tm, F_OUT_DIM), xmap),
    )
    out_shape = (
        jax.ShapeDtypeStruct((B, N, S_DIM), jnp.float32),
        jax.ShapeDtypeStruct((B, N, F_LR_DIM), jnp.float32),
        jax.ShapeDtypeStruct((B, N, F_OUT_DIM), jnp.float32),
    )
    return pl.pallas_call(
        _block_mlp_kernel,
        grid=grid,
        in_specs=in_specs,
        out_specs=out_specs,
        out_shape=out_shape,
        compiler_params=pltpu.CompilerParams(
            dimension_semantics=("parallel", "parallel"),
            vmem_limit_bytes=_VMEM_LIMIT),
    )(x, gmp, bp["w1x"], bp["w2"], bp["b2"], bp["w3"], bp["b3"],
      bp["ws"], bp["bs"], bp["wh"], bp["bh"], bp["wox"], bp["box"])


# ----------------------------------------------------------------------------
# Kernel 2: k-th-neighbor distance threshold (in-kernel bisection; no (B,N,N) array, no sort)
# ----------------------------------------------------------------------------
def _make_knn_threshold_kernel(k):
    kf = float(k)

    def kernel(st_ref, sa_ref, ssqt_ref, thr_ref):
        f32 = jnp.float32
        s_t = st_ref[0]                                           # (tq, S)
        s_a = sa_ref[0]                                           # (N, S)
        sq_a = jnp.sum(s_a * s_a, axis=-1, keepdims=True)         # (N, 1)
        cross = lax.dot_general(s_a, s_t, (((1,), (1,)), ((), ())),
                                preferred_element_type=f32)       # (N, tq)
        # identical arithmetic to the aggregate kernel -> bit-identical d values
        d = jnp.maximum(sq_a + ssqt_ref[0] - 2.0 * cross, 0.0)    # (N, tq)

        hi = jnp.max(d, axis=0, keepdims=True)                    # (1, tq): count(d<=hi)=N>=k
        lo = jnp.zeros_like(hi)

        def body(_, carry):
            lo_c, hi_c = carry
            mid = 0.5 * (lo_c + hi_c)
            cnt = jnp.sum((d <= mid).astype(f32), axis=0, keepdims=True)
            ge = cnt >= kf
            return jnp.where(ge, lo_c, mid), jnp.where(ge, mid, hi_c)

        _, hi = lax.fori_loop(0, _BISECT_ITERS, body, (lo, hi))
        # Invariant: count(d <= hi) >= k, and hi converges onto the k-th smallest distance
        # from above, so the aggregate kernel keeps at least k neighbours (ties included).
        thr_ref[0] = hi

    return kernel


def knn_threshold(s, ssq_row, k):
    """s: (B,N,S), ssq_row: (B,1,N) -> per-target k-th-distance threshold (B,1,N)."""
    B, N, S = s.shape
    # Resident (N, tq) distance plane: shrink tq for very large N so it stays a few MiB.
    cap = 256 if N <= 8192 else 128
    tq = _pick_tq(N, B, cap)
    grid = (B, N // tq)
    return pl.pallas_call(
        _make_knn_threshold_kernel(k),
        grid=grid,
        in_specs=[pl.BlockSpec((1, tq, S), lambda b, i: (b, i, 0)),
                  pl.BlockSpec((1, N, S), lambda b, i: (b, 0, 0)),
                  pl.BlockSpec((1, 1, tq), lambda b, i: (b, 0, i))],
        out_specs=pl.BlockSpec((1, 1, tq), lambda b, i: (b, 0, i)),
        out_shape=jax.ShapeDtypeStruct((B, 1, N), jnp.float32),
        compiler_params=pltpu.CompilerParams(
            dimension_semantics=("parallel", "parallel"),
            vmem_limit_bytes=_VMEM_LIMIT),
    )(s, s, ssq_row)


# ----------------------------------------------------------------------------
# Kernel 3: source-chunked neighbor aggregation + GravNetConv output linear
# ----------------------------------------------------------------------------
def _aggregate_out_kernel(st_ref, ssqt_ref, thr_ref, sc_ref, hc_ref, xo_ref,
                          wom_ref, womax_ref, o_ref,
                          mean_scr, cnt_scr, max_scr):
    f32, bf16 = jnp.float32, jnp.bfloat16
    j = pl.program_id(2)

    @pl.when(j == 0)
    def _():
        mean_scr[...] = jnp.zeros_like(mean_scr)
        cnt_scr[...] = jnp.zeros_like(cnt_scr)
        max_scr[...] = jnp.full_like(max_scr, -1e30)

    s_t = st_ref[0]                                               # (tq, S) target tile
    s_c = sc_ref[0]                                               # (tn, S) source chunk
    h_c = hc_ref[0]                                               # (tn, P) source chunk, f32

    # ---- one source-major distance / exp / mask chain per chunk (shared by mean & max) ----
    sq_c = jnp.sum(s_c * s_c, axis=-1, keepdims=True)             # (tn, 1)
    cross = lax.dot_general(s_c, s_t, (((1,), (1,)), ((), ())),
                            preferred_element_type=f32)           # (tn, tq)
    d = jnp.maximum(sq_c + ssqt_ref[0] - 2.0 * cross, 0.0)        # (tn, tq)
    # NOTE: ties at the k-th distance are all kept (superset of exact k-NN; self included).
    nbr = (d <= thr_ref[0]).astype(f32)
    w = jnp.exp(-10.0 * d) * nbr                                  # exp(-10 d^2) edge weights
    neg = (nbr - 1.0) * 1e30                                      # 0 for nbrs, -1e30 otherwise

    # ---- weighted MEAN numerator + neighbour count (MXU, accumulated over chunks) ----
    mean_scr[...] += lax.dot_general(w.astype(bf16), h_c.astype(bf16),
                                     (((0,), (0,)), ((), ())),
                                     preferred_element_type=f32)  # (tq, P)
    ones_col = jnp.ones((s_c.shape[0], 1), f32)
    cnt_scr[...] += lax.dot_general(nbr, ones_col, (((0,), (0,)), ((), ())),
                                    preferred_element_type=f32)   # (tq, 1) count column

    # ---- weighted MAX: running max over source chunks (VPU), lane-dense (1, tq) rows ----
    P = h_c.shape[-1]
    for f in range(P):                                            # static unroll, P = 21
        contrib = w * h_c[:, f:f + 1] + neg                       # (tn, tq)   VPU
        red = jnp.max(contrib, axis=0, keepdims=True)             # (1, tq) sublane reduce
        max_scr[f:f + 1, :] = jnp.maximum(max_scr[f:f + 1, :], red)

    # ---- last chunk: remaining [mean | max] thirds of the GravNetConv output linear ----
    @pl.when(j == pl.num_programs(2) - 1)
    def _():
        inv = pl.reciprocal(jnp.maximum(cnt_scr[...], 1.0), approx=True)   # (tq, 1)
        mean_agg = mean_scr[...] * inv                                     # (tq, P)
        mean_c = jnp.dot(mean_agg.astype(bf16), wom_ref[...],
                         preferred_element_type=f32)                       # (tq, F_OUT)
        max_c = lax.dot_general(max_scr[...].astype(bf16), womax_ref[...],
                                (((0,), (0,)), ((), ())),
                                preferred_element_type=f32)                # (tq, F_OUT)
        o_ref[0] = xo_ref[0] + mean_c + max_c


def gravnet_aggregate_out(s, ssq_row, thr_row, h, xo, wom, womax):
    """Fused GravNet aggregation + output linear.  Returns (B, N, F_OUT_DIM)."""
    # TODO(synk): for N >> k a gathered O(N*k) aggregation (reusing neighbour indices) would
    # beat this O(N^2 / chunked) masked path; needs a data-dependent gather pass.
    B, N, S = s.shape
    P = h.shape[-1]
    tq = _pick_tq(N, B, 256)          # target tile (lane axis of the chunk planes)
    tn = _tile(N, 1024)               # source chunk (sublane axis); VMEM independent of N
    grid = (B, N // tq, N // tn)

    def tmap(b, i, j): return (b, i, 0)
    def rmap(b, i, j): return (b, 0, i)
    def cmap(b, i, j): return (b, j, 0)
    def wmap(b, i, j): return (0, 0)

    return pl.pallas_call(
        _aggregate_out_kernel,
        grid=grid,
        in_specs=[pl.BlockSpec((1, tq, S), tmap),            # s, target tile (resident)
                  pl.BlockSpec((1, 1, tq), rmap),            # |s_t|^2 row (resident)
                  pl.BlockSpec((1, 1, tq), rmap),            # k-th-distance threshold row
                  pl.BlockSpec((1, tn, S), cmap),            # s, source chunk (pipelined)
                  pl.BlockSpec((1, tn, P), cmap),            # h, source chunk (pipelined)
                  pl.BlockSpec((1, tq, F_OUT_DIM), tmap),    # z3 @ W_out_x + b_out
                  pl.BlockSpec(wom.shape, wmap),
                  pl.BlockSpec(womax.shape, wmap)],
        out_specs=pl.BlockSpec((1, tq, F_OUT_DIM), tmap),
        out_shape=jax.ShapeDtypeStruct((B, N, F_OUT_DIM), jnp.float32),
        scratch_shapes=[pltpu.VMEM((tq, P), jnp.float32),    # mean numerator
                        pltpu.VMEM((tq, 1), jnp.float32),    # neighbour count
                        pltpu.VMEM((P, tq), jnp.float32)],   # running weighted max
        compiler_params=pltpu.CompilerParams(
            dimension_semantics=("parallel", "parallel", "arbitrary"),
            vmem_limit_bytes=_VMEM_LIMIT),
    )(s, ssq_row, thr_row, s, h, xo, wom, womax)


# ----------------------------------------------------------------------------
# Kernel 4: fused head MLP (Linear + LeakyReLU x2), fed directly by the 4 block outputs
# ----------------------------------------------------------------------------
def _head_kernel(f1_ref, f2_ref, f3_ref, f4_ref,
                 w1a_ref, w1b_ref, w1c_ref, w1d_ref, b1_ref,
                 w2_ref, b2_ref, o_ref):
    f32, bf16 = jnp.float32, jnp.bfloat16
    # head W1 split into four 42-row slices summed in-kernel == Linear over the 168-concat,
    # without re-reading the concatenated embedding from HBM.
    y = (jnp.dot(f1_ref[...].astype(bf16), w1a_ref[...], preferred_element_type=f32)
         + jnp.dot(f2_ref[...].astype(bf16), w1b_ref[...], preferred_element_type=f32)
         + jnp.dot(f3_ref[...].astype(bf16), w1c_ref[...], preferred_element_type=f32)
         + jnp.dot(f4_ref[...].astype(bf16), w1d_ref[...], preferred_element_type=f32)
         + b1_ref[...])
    y = jnp.where(y >= 0.0, y, 0.01 * y)
    y = jnp.dot(y.astype(bf16), w2_ref[...], preferred_element_type=f32) + b2_ref[...]
    o_ref[...] = jnp.where(y >= 0.0, y, 0.01 * y)


def head_mlp(feats2d, hp):
    M = feats2d[0].shape[0]
    tm = _tile(M, 1024)
    grid = (M // tm,)
    fspec = pl.BlockSpec((tm, F_OUT_DIM), lambda i: (i, 0))
    wspec = lambda a: pl.BlockSpec(a.shape, lambda i: (0, 0))
    return pl.pallas_call(
        _head_kernel,
        grid=grid,
        in_specs=[fspec, fspec, fspec, fspec,
                  wspec(hp["w1a"]), wspec(hp["w1b"]), wspec(hp["w1c"]), wspec(hp["w1d"]),
                  wspec(hp["b1"]), wspec(hp["w2"]), wspec(hp["b2"])],
        out_specs=pl.BlockSpec((tm, 100), lambda i: (i, 0)),
        out_shape=jax.ShapeDtypeStruct((M, 100), jnp.float32),
        compiler_params=pltpu.CompilerParams(
            dimension_semantics=("parallel",),
            vmem_limit_bytes=_VMEM_LIMIT),
    )(*feats2d, hp["w1a"], hp["w1b"], hp["w1c"], hp["w1d"], hp["b1"], hp["w2"], hp["b2"])


# ----------------------------------------------------------------------------
# GravNet block / model forward (glue in plain JAX, compute in Pallas kernels)
# ----------------------------------------------------------------------------
def gravnet_block(x, bp, k):
    """One GravNetClustering block: 3x(Linear+tanh) then GravNetConv. x: (B,N,Fin)->(B,N,42)."""
    gm = jnp.mean(x, axis=1, keepdims=True)                      # per-event global mean (tiny)
    gmp = jnp.matmul(gm, bp["w1g"]) + bp["b1"]                   # (B,1,64): gm half of Linear1
    s, h, xo = fused_block_mlp(x, gmp, bp)                       # (B,N,10),(B,N,21),(B,N,42)

    ssq_row = jnp.swapaxes(jnp.sum(s * s, axis=-1, keepdims=True), 1, 2)   # (B,1,N), tiny

    # TODO(synk): exact-k kNN has no Pallas TPU primitive; the bisected k-th-distance
    # threshold keeps all ties (neighbour superset) and the mean divides by the kept count.
    thr = knn_threshold(s, ssq_row, k)                           # (B,1,N); no N^2 HBM traffic
    return gravnet_aggregate_out(s, ssq_row, thr, h, xo, bp["wom"], bp["womax"])


def forward(params, x):
    """x: (B, N, 7) -> (out (B, N, 100), embedding (B, N, 168))."""
    feats = []
    hcur = x
    for bp, k in zip(params["blocks"], K_LIST):
        hcur = gravnet_block(hcur, bp, k)
        feats.append(hcur)
    emb = jnp.concatenate(feats, axis=-1)                        # (B, N, 4*F_OUT_DIM)
    B, N, _ = emb.shape
    flat = [f.reshape(B * N, F_OUT_DIM) for f in feats]
    y = head_mlp(flat, params["head"])
    return y.reshape(B, N, 100), emb


# ----------------------------------------------------------------------------
# Deterministic parameter init (torch-style uniform(-1/sqrt(fan_in), ..)), then split/cast
# into the kernel-ready layout (split concat-weights, bf16 matmul weights, (1,K) biases).
# ----------------------------------------------------------------------------
def _init_dense(key, fin, fout):
    k1, k2 = jax.random.split(key)
    bound = float(fin) ** -0.5
    w = jax.random.uniform(k1, (fin, fout), jnp.float32, -bound, bound)
    b = jax.random.uniform(k2, (fout,), jnp.float32, -bound, bound)
    return w, b


def init_params(key):
    bf16 = jnp.bfloat16
    in_dims = [2 * IN_FEATS] + [2 * F_OUT_DIM] * 3
    blocks = []
    for i in range(4):
        key, k1, k2, k3, k4, k5, k6 = jax.random.split(key, 7)
        fin2 = in_dims[i]            # width of cat([x, global_mean])
        fin = fin2 // 2
        w1, b1 = _init_dense(k1, fin2, 64)
        w2, b2 = _init_dense(k2, 64, 128)
        w3, b3 = _init_dense(k3, 128, 64)
        ws, bs = _init_dense(k4, 64, S_DIM)
        wh, bh = _init_dense(k5, 64, F_LR_DIM)
        wo, bo = _init_dense(k6, 64 + 2 * F_LR_DIM, F_OUT_DIM)
        blocks.append({
            # Linear(cat([x, gm])) split row-wise: x part goes to the kernel, the gm part
            # (+ bias) is applied once per event in the wrapper and passed as a (B,1,64) row.
            "w1x": w1[:fin].astype(bf16),
            "w1g": w1[fin:],                       # f32, wrapper-side gm projection
            "b1": b1.reshape(1, -1),               # f32, folded into the gm projection
            "w2": w2.astype(bf16), "b2": b2.reshape(1, -1),
            "w3": w3.astype(bf16), "b3": b3.reshape(1, -1),
            "ws": ws.astype(bf16), "bs": bs.reshape(1, -1),
            "wh": wh.astype(bf16), "bh": bh.reshape(1, -1),
            # GravNetConv out-linear split row-wise into [x | mean | max] parts.
            "wox": wo[:64].astype(bf16), "box": bo.reshape(1, -1),
            "wom": wo[64:64 + F_LR_DIM].astype(bf16),
            "womax": wo[64 + F_LR_DIM:].astype(bf16),
        })
    key, k1, k2 = jax.random.split(key, 3)
    hw1, hb1 = _init_dense(k1, 4 * F_OUT_DIM, 64)
    hw2, hb2 = _init_dense(k2, 64, 100)
    head = {
        # head W1 split into the four per-block 42-row slices (summed in-kernel).
        "w1a": hw1[0 * F_OUT_DIM:1 * F_OUT_DIM].astype(bf16),
        "w1b": hw1[1 * F_OUT_DIM:2 * F_OUT_DIM].astype(bf16),
        "w1c": hw1[2 * F_OUT_DIM:3 * F_OUT_DIM].astype(bf16),
        "w1d": hw1[3 * F_OUT_DIM:4 * F_OUT_DIM].astype(bf16),
        "b1": hb1.reshape(1, -1),
        "w2": hw2.astype(bf16), "b2": hb2.reshape(1, -1),
    }
    return {"blocks": blocks, "head": head}


# ----------------------------------------------------------------------------
if __name__ == "__main__":
    key = jax.random.PRNGKey(0)
    pkey, xkey = jax.random.split(key)
    params = init_params(pkey)

    B, N = 2, 128  # small shapes; N >= 2*N_NEIGHBORS so every k-NN query is well-defined
    x = jax.random.normal(xkey, (B, N, IN_FEATS), jnp.float32)

    fwd = jax.jit(forward)
    out, emb = fwd(params, x)
    jax.block_until_ready((out, emb))

    assert out.shape == (B, N, 100), out.shape
    assert emb.shape == (B, N, 4 * F_OUT_DIM), emb.shape
    assert bool(jnp.all(jnp.isfinite(out))) and bool(jnp.all(jnp.isfinite(emb)))
    print("KERNEL_OK")
</pallas_src>

<mosaic_0001>
module attributes {stable_mosaic.version = 11 : i64} {
  func.func @_block_mlp_kernel(%arg0: i32, %arg1: i32, %arg2: memref<1x128x7xf32, #tpu.memory_space<vmem>>, %arg3: memref<1x1x64xf32, #tpu.memory_space<vmem>>, %arg4: memref<7x64xbf16, #tpu.memory_space<vmem>>, %arg5: memref<64x128xbf16, #tpu.memory_space<vmem>>, %arg6: memref<1x128xf32, #tpu.memory_space<vmem>>, %arg7: memref<128x64xbf16, #tpu.memory_space<vmem>>, %arg8: memref<1x64xf32, #tpu.memory_space<vmem>>, %arg9: memref<64x10xbf16, #tpu.memory_space<vmem>>, %arg10: memref<1x10xf32, #tpu.memory_space<vmem>>, %arg11: memref<64x21xbf16, #tpu.memory_space<vmem>>, %arg12: memref<1x21xf32, #tpu.memory_space<vmem>>, %arg13: memref<64x42xbf16, #tpu.memory_space<vmem>>, %arg14: memref<1x42xf32, #tpu.memory_space<vmem>>, %arg15: memref<1x128x10xf32, #tpu.memory_space<vmem>>, %arg16: memref<1x128x21xf32, #tpu.memory_space<vmem>>, %arg17: memref<1x128x42xf32, #tpu.memory_space<vmem>>) attributes {dimension_semantics = [#tpu.dimension_semantics<parallel>, #tpu.dimension_semantics<parallel>], iteration_bounds = array<i64: 2, 1>, scalar_prefetch = 0 : i64, scratch_operands = 0 : i64, tpu.core_type = #tpu.core_type<tc>, window_params = [{transform_indices = @transform_0, window_bounds = array<i64: 1, 128, 7>}, {transform_indices = @transform_1, window_bounds = array<i64: 1, 1, 64>}, {pipeline_mode = #tpu.pipeline_mode<synchronous>, transform_indices = @transform_2, window_bounds = array<i64: 7, 64>}, {pipeline_mode = #tpu.pipeline_mode<synchronous>, transform_indices = @transform_3, window_bounds = array<i64: 64, 128>}, {pipeline_mode = #tpu.pipeline_mode<synchronous>, transform_indices = @transform_4, window_bounds = array<i64: 1, 128>}, {pipeline_mode = #tpu.pipeline_mode<synchronous>, transform_indices = @transform_5, window_bounds = array<i64: 128, 64>}, {pipeline_mode = #tpu.pipeline_mode<synchronous>, transform_indices = @transform_6, window_bounds = array<i64: 1, 64>}, {pipeline_mode = #tpu.pipeline_mode<synchronous>, transform_indices = @transform_7, window_bounds = array<i64: 64, 10>}, {pipeline_mode = #tpu.pipeline_mode<synchronous>, transform_indices = @transform_8, window_bounds = array<i64: 1, 10>}, {pipeline_mode = #tpu.pipeline_mode<synchronous>, transform_indices = @transform_9, window_bounds = array<i64: 64, 21>}, {pipeline_mode = #tpu.pipeline_mode<synchronous>, transform_indices = @transform_10, window_bounds = array<i64: 1, 21>}, {pipeline_mode = #tpu.pipeline_mode<synchronous>, transform_indices = @transform_11, window_bounds = array<i64: 64, 42>}, {pipeline_mode = #tpu.pipeline_mode<synchronous>, transform_indices = @transform_12, window_bounds = array<i64: 1, 42>}, {transform_indices = @transform_13, window_bounds = array<i64: 1, 128, 10>}, {transform_indices = @transform_14, window_bounds = array<i64: 1, 128, 21>}, {transform_indices = @transform_15, window_bounds = array<i64: 1, 128, 42>}]} {
    %c0 = arith.constant 0 : index
    %c0_0 = arith.constant 0 : index
    %c0_1 = arith.constant 0 : index
    %0 = vector.load %arg2[%c0, %c0_0, %c0_1] : memref<1x128x7xf32, #tpu.memory_space<vmem>>, vector<1x128x7xf32>
    %1 = vector.shape_cast %0 : vector<1x128x7xf32> to vector<128x7xf32>
    %2 = arith.truncf %1 : vector<128x7xf32> to vector<128x7xbf16>
    %c0_2 = arith.constant 0 : index
    %c0_3 = arith.constant 0 : index
    %3 = vector.load %arg4[%c0_2, %c0_3] : memref<7x64xbf16, #tpu.memory_space<vmem>>, vector<7x64xbf16>
    %cst = arith.constant dense<0.000000e+00> : vector<128x64xf32>
    %4 = tpu.matmul %2, %3, %cst {dimension_numbers = #tpu.dot_dimension_numbers<[1], [0], [0], [1], [0, 0, 1, 1], [], []>} : vector<128x7xbf16>, vector<7x64xbf16>, vector<128x64xf32> -> vector<128x64xf32>
    %c0_4 = arith.constant 0 : index
    %c0_5 = arith.constant 0 : index
    %c0_6 = arith.constant 0 : index
    %5 = vector.load %arg3[%c0_4, %c0_5, %c0_6] : memref<1x1x64xf32, #tpu.memory_space<vmem>>, vector<1x1x64xf32>
    %6 = vector.shape_cast %5 : vector<1x1x64xf32> to vector<1x64xf32>
    %7 = vector.broadcast %6 : vector<1x64xf32> to vector<128x64xf32>
    %8 = arith.addf %4, %7 : vector<128x64xf32>
    %9 = math.tanh %8 : vector<128x64xf32>
    %10 = arith.truncf %9 : vector<128x64xf32> to vector<128x64xbf16>
    %c0_7 = arith.constant 0 : index
    %c0_8 = arith.constant 0 : index
    %11 = vector.load %arg5[%c0_7, %c0_8] : memref<64x128xbf16, #tpu.memory_space<vmem>>, vector<64x128xbf16>
    %cst_9 = arith.constant dense<0.000000e+00> : vector<128x128xf32>
    %12 = tpu.matmul %10, %11, %cst_9 {dimension_numbers = #tpu.dot_dimension_numbers<[1], [0], [0], [1], [0, 0, 1, 1], [], []>} : vector<128x64xbf16>, vector<64x128xbf16>, vector<128x128xf32> -> vector<128x128xf32>
    %c0_10 = arith.constant 0 : index
    %c0_11 = arith.constant 0 : index
    %13 = vector.load %arg6[%c0_10, %c0_11] : memref<1x128xf32, #tpu.memory_space<vmem>>, vector<1x128xf32>
    %14 = vector.broadcast %13 : vector<1x128xf32> to vector<128x128xf32>
    %15 = arith.addf %12, %14 : vector<128x128xf32>
    %16 = math.tanh %15 : vector<128x128xf32>
    %17 = arith.truncf %16 : vector<128x128xf32> to vector<128x128xbf16>
    %c0_12 = arith.constant 0 : index
    %c0_13 = arith.constant 0 : index
    %18 = vector.load %arg7[%c0_12, %c0_13] : memref<128x64xbf16, #tpu.memory_space<vmem>>, vector<128x64xbf16>
    %cst_14 = arith.constant dense<0.000000e+00> : vector<128x64xf32>
    %19 = tpu.matmul %17, %18, %cst_14 {dimension_numbers = #tpu.dot_dimension_numbers<[1], [0], [0], [1], [0, 0, 1, 1], [], []>} : vector<128x128xbf16>, vector<128x64xbf16>, vector<128x64xf32> -> vector<128x64xf32>
    %c0_15 = arith.constant 0 : index
    %c0_16 = arith.constant 0 : index
    %20 = vector.load %arg8[%c0_15, %c0_16] : memref<1x64xf32, #tpu.memory_space<vmem>>, vector<1x64xf32>
    %21 = vector.broadcast %20 : vector<1x64xf32> to vector<128x64xf32>
    %22 = arith.addf %19, %21 : vector<128x64xf32>
    %23 = math.tanh %22 : vector<128x64xf32>
    %24 = arith.truncf %23 : vector<128x64xf32> to vector<128x64xbf16>
    %c0_17 = arith.constant 0 : index
    %c0_18 = arith.constant 0 : index
    %25 = vector.load %arg9[%c0_17, %c0_18] : memref<64x10xbf16, #tpu.memory_space<vmem>>, vector<64x10xbf16>
    %cst_19 = arith.constant dense<0.000000e+00> : vector<128x10xf32>
    %26 = tpu.matmul %24, %25, %cst_19 {dimension_numbers = #tpu.dot_dimension_numbers<[1], [0], [0], [1], [0, 0, 1, 1], [], []>} : vector<128x64xbf16>, vector<64x10xbf16>, vector<128x10xf32> -> vector<128x10xf32>
    %c0_20 = arith.constant 0 : index
    %c0_21 = arith.constant 0 : index
    %27 = vector.load %arg10[%c0_20, %c0_21] : memref<1x10xf32, #tpu.memory_space<vmem>>, vector<1x10xf32>
    %28 = vector.broadcast %27 : vector<1x10xf32> to vector<128x10xf32>
    %29 = arith.addf %26, %28 : vector<128x10xf32>
    %c0_22 = arith.constant 0 : index
    %c0_23 = arith.constant 0 : index
    %c0_24 = arith.constant 0 : index
    %30 = vector.load %arg15[%c0_22, %c0_23, %c0_24] : memref<1x128x10xf32, #tpu.memory_space<vmem>>, vector<1x128x10xf32>
    %31 = vector.shape_cast %30 : vector<1x128x10xf32> to vector<128x10xf32>
    %32 = vector.shape_cast %29 : vector<128x10xf32> to vector<1x128x10xf32>
    tpu.vector_store %arg15[%c0_22, %c0_23, %c0_24], %32 {strides = array<i32>} : memref<1x128x10xf32, #tpu.memory_space<vmem>>, vector<1x128x10xf32>,
    %c0_25 = arith.constant 0 : index
    %c0_26 = arith.constant 0 : index
    %33 = vector.load %arg11[%c0_25, %c0_26] : memref<64x21xbf16, #tpu.memory_space<vmem>>, vector<64x21xbf16>
    %cst_27 = arith.constant dense<0.000000e+00> : vector<128x21xf32>
    %34 = tpu.matmul %24, %33, %cst_27 {dimension_numbers = #tpu.dot_dimension_numbers<[1], [0], [0], [1], [0, 0, 1, 1], [], []>} : vector<128x64xbf16>, vector<64x21xbf16>, vector<128x21xf32> -> vector<128x21xf32>
    %c0_28 = arith.constant 0 : index
    %c0_29 = arith.constant 0 : index
    %35 = vector.load %arg12[%c0_28, %c0_29] : memref<1x21xf32, #tpu.memory_space<vmem>>, vector<1x21xf32>
    %36 = vector.broadcast %35 : vector<1x21xf32> to vector<128x21xf32>
    %37 = arith.addf %34, %36 : vector<128x21xf32>
    %c0_30 = arith.constant 0 : index
    %c0_31 = arith.constant 0 : index
    %c0_32 = arith.constant 0 : index
    %38 = vector.load %arg16[%c0_30, %c0_31, %c0_32] : memref<1x128x21xf32, #tpu.memory_space<vmem>>, vector<1x128x21xf32>
    %39 = vector.shape_cast %38 : vector<1x128x21xf32> to vector<128x21xf32>
    %40 = vector.shape_cast %37 : vector<128x21xf32> to vector<1x128x21xf32>
    tpu.vector_store %arg16[%c0_30, %c0_31, %c0_32], %40 {strides = array<i32>} : memref<1x128x21xf32, #tpu.memory_space<vmem>>, vector<1x128x21xf32>,
    %c0_33 = arith.constant 0 : index
    %c0_34 = arith.constant 0 : index
    %41 = vector.load %arg13[%c0_33, %c0_34] : memref<64x42xbf16, #tpu.memory_space<vmem>>, vector<64x42xbf16>
    %cst_35 = arith.constant dense<0.000000e+00> : vector<128x42xf32>
    %42 = tpu.matmul %24, %41, %cst_35 {dimension_numbers = #tpu.dot_dimension_numbers<[1], [0], [0], [1], [0, 0, 1, 1], [], []>} : vector<128x64xbf16>, vector<64x42xbf16>, vector<128x42xf32> -> vector<128x42xf32>
    %c0_36 = arith.constant 0 : index
    %c0_37 = arith.constant 0 : index
    %43 = vector.load %arg14[%c0_36, %c0_37] : memref<1x42xf32, #tpu.memory_space<vmem>>, vector<1x42xf32>
    %44 = vector.broadcast %43 : vector<1x42xf32> to vector<128x42xf32>
    %45 = arith.addf %42, %44 : vector<128x42xf32>
    %c0_38 = arith.constant 0 : index
    %c0_39 = arith.constant 0 : index
    %c0_40 = arith.constant 0 : index
    %46 = vector.load %arg17[%c0_38, %c0_39, %c0_40] : memref<1x128x42xf32, #tpu.memory_space<vmem>>, vector<1x128x42xf32>
    %47 = vector.shape_cast %46 : vector<1x128x42xf32> to vector<128x42xf32>
    %48 = vector.shape_cast %45 : vector<128x42xf32> to vector<1x128x42xf32>
    tpu.vector_store %arg17[%c0_38, %c0_39, %c0_40], %48 {strides = array<i32>} : memref<1x128x42xf32, #tpu.memory_space<vmem>>, vector<1x128x42xf32>,
    return
  }
  func.func @transform_0(%arg0: i32, %arg1: i32) -> (i32, i32, i32) {
    %c0_i32 = arith.constant 0 : i32
    %c0_i32_0 = arith.constant 0 : i32
    return %arg0, %arg1, %c0_i32 : i32, i32, i32
  }
  func.func @transform_1(%arg0: i32, %arg1: i32) -> (i32, i32, i32) {
    %c0_i32 = arith.constant 0 : i32
    %c0_i32_0 = arith.constant 0 : i32
    %c0_i32_1 = arith.constant 0 : i32
    return %arg0, %c0_i32, %c0_i32_0 : i32, i32, i32
  }
  func.func @transform_2(%arg0: i32, %arg1: i32) -> (i32, i32) {
    %c0_i32 = arith.constant 0 : i32
    %c0_i32_0 = arith.constant 0 : i32
    %c0_i32_1 = arith.constant 0 : i32
    return %c0_i32, %c0_i32_0 : i32, i32
  }
  func.func @transform_3(%arg0: i32, %arg1: i32) -> (i32, i32) {
    %c0_i32 = arith.constant 0 : i32
    %c0_i32_0 = arith.constant 0 : i32
    %c0_i32_1 = arith.constant 0 : i32
    return %c0_i32, %c0_i32_0 : i32, i32
  }
  func.func @transform_4(%arg0: i32, %arg1: i32) -> (i32, i32) {
    %c0_i32 = arith.constant 0 : i32
    %c0_i32_0 = arith.constant 0 : i32
    %c0_i32_1 = arith.constant 0 : i32
    return %c0_i32, %c0_i32_0 : i32, i32
  }
  func.func @transform_5(%arg0: i32, %arg1: i32) -> (i32, i32) {
    %c0_i32 = arith.constant 0 : i32
    %c0_i32_0 = arith.constant 0 : i32
    %c0_i32_1 = arith.constant 0 : i32
    return %c0_i32, %c0_i32_0 : i32, i32
  }
  func.func @transform_6(%arg0: i32, %arg1: i32) -> (i32, i32) {
    %c0_i32 = arith.constant 0 : i32
    %c0_i32_0 = arith.constant 0 : i32
    %c0_i32_1 = arith.constant 0 : i32
    return %c0_i32, %c0_i32_0 : i32, i32
  }
  func.func @transform_7(%arg0: i32, %arg1: i32) -> (i32, i32) {
    %c0_i32 = arith.constant 0 : i32
    %c0_i32_0 = arith.constant 0 : i32
    %c0_i32_1 = arith.constant 0 : i32
    return %c0_i32, %c0_i32_0 : i32, i32
  }
  func.func @transform_8(%arg0: i32, %arg1: i32) -> (i32, i32) {
    %c0_i32 = arith.constant 0 : i32
    %c0_i32_0 = arith.constant 0 : i32
    %c0_i32_1 = arith.constant 0 : i32
    return %c0_i32, %c0_i32_0 : i32, i32
  }
  func.func @transform_9(%arg0: i32, %arg1: i32) -> (i32, i32) {
    %c0_i32 = arith.constant 0 : i32
    %c0_i32_0 = arith.constant 0 : i32
    %c0_i32_1 = arith.constant 0 : i32
    return %c0_i32, %c0_i32_0 : i32, i32
  }
  func.func @transform_10(%arg0: i32, %arg1: i32) -> (i32, i32) {
    %c0_i32 = arith.constant 0 : i32
    %c0_i32_0 = arith.constant 0 : i32
    %c0_i32_1 = arith.constant 0 : i32
    return %c0_i32, %c0_i32_0 : i32, i32
  }
  func.func @transform_11(%arg0: i32, %arg1: i32) -> (i32, i32) {
    %c0_i32 = arith.constant 0 : i32
    %c0_i32_0 = arith.constant 0 : i32
    %c0_i32_1 = arith.constant 0 : i32
    return %c0_i32, %c0_i32_0 : i32, i32
  }
  func.func @transform_12(%arg0: i32, %arg1: i32) -> (i32, i32) {
    %c0_i32 = arith.constant 0 : i32
    %c0_i32_0 = arith.constant 0 : i32
    %c0_i32_1 = arith.constant 0 : i32
    return %c0_i32, %c0_i32_0 : i32, i32
  }
  func.func @transform_13(%arg0: i32, %arg1: i32) -> (i32, i32, i32) {
    %c0_i32 = arith.constant 0 : i32
    %c0_i32_0 = arith.constant 0 : i32
    return %arg0, %arg1, %c0_i32 : i32, i32, i32
  }
  func.func @transform_14(%arg0: i32, %arg1: i32) -> (i32, i32, i32) {
    %c0_i32 = arith.constant 0 : i32
    %c0_i32_0 = arith.constant 0 : i32
    return %arg0, %arg1, %c0_i32 : i32, i32, i32
  }
  func.func @transform_15(%arg0: i32, %arg1: i32) -> (i32, i32, i32) {
    %c0_i32 = arith.constant 0 : i32
    %c0_i32_0 = arith.constant 0 : i32
    return %arg0, %arg1, %c0_i32 : i32, i32, i32
  }
}

module attributes {stable_mosaic.version = 11 : i64} {
  func.func @kernel(%arg0: i32, %arg1: i32, %arg2: memref<1x128x10xf32, #tpu.memory_space<vmem>>, %arg3: memref<1x128x10xf32, #tpu.memory_space<vmem>>, %arg4: memref<1x1x128xf32, #tpu.memory_space<vmem>>, %arg5: memref<1x1x128xf32, #tpu.memory_space<vmem>>) attributes {dimension_semantics = [#tpu.dimension_semantics<parallel>, #tpu.dimension_semantics<parallel>], iteration_bounds = array<i64: 2, 1>, scalar_prefetch = 0 : i64, scratch_operands = 0 : i64, tpu.core_type = #tpu.core_type<tc>, window_params = [{transform_indices = @transform_0, window_bounds = array<i64: 1, 128, 10>}, {transform_indices = @transform_1, window_bounds = array<i64: 1, 128, 10>}, {transform_indices = @transform_2, window_bounds = array<i64: 1, 1, 128>}, {transform_indices = @transform_3, window_bounds = array<i64: 1, 1, 128>}]} {
    %c0 = arith.constant 0 : index
    %c0_0 = arith.constant 0 : index
    %c0_1 = arith.constant 0 : index
    %0 = vector.load %arg2[%c0, %c0_0, %c0_1] : memref<1x128x10xf32, #tpu.memory_space<vmem>>, vector<1x128x10xf32>
    %1 = vector.shape_cast %0 : vector<1x128x10xf32> to vector<128x10xf32>
    %c0_2 = arith.constant 0 : index
    %c0_3 = arith.constant 0 : index
    %c0_4 = arith.constant 0 : index
    %2 = vector.load %arg3[%c0_2, %c0_3, %c0_4] : memref<1x128x10xf32, #tpu.memory_space<vmem>>, vector<1x128x10xf32>
    %3 = vector.shape_cast %2 : vector<1x128x10xf32> to vector<128x10xf32>
    %4 = arith.mulf %3, %3 : vector<128x10xf32>
    %cst = arith.constant dense<0.000000e+00> : vector<128xf32>
    %5 = vector.multi_reduction <add>, %4, %cst [1] : vector<128x10xf32> to vector<128xf32>
    %6 = vector.shape_cast %5 : vector<128xf32> to vector<128x1xf32>
    %cst_5 = arith.constant dense<0.000000e+00> : vector<128x128xf32>
    %7 = tpu.matmul %3, %1, %cst_5 {dimension_numbers = #tpu.dot_dimension_numbers<[1], [1], [0], [0], [0, 0, 1, 0], [], []>} : vector<128x10xf32>, vector<128x10xf32>, vector<128x128xf32> -> vector<128x128xf32>
    %c0_6 = arith.constant 0 : index
    %c0_7 = arith.constant 0 : index
    %c0_8 = arith.constant 0 : index
    %8 = vector.load %arg4[%c0_6, %c0_7, %c0_8] : memref<1x1x128xf32, #tpu.memory_space<vmem>>, vector<1x1x128xf32>
    %9 = vector.shape_cast %8 : vector<1x1x128xf32> to vector<1x128xf32>
    %10 = vector.broadcast %6 : vector<128x1xf32> to vector<128x128xf32>
    %11 = vector.broadcast %9 : vector<1x128xf32> to vector<128x128xf32>
    %12 = arith.addf %10, %11 : vector<128x128xf32>
    %cst_9 = arith.constant 2.000000e+00 : f32
    %13 = vector.broadcast %cst_9 : f32 to vector<128x128xf32>
    %14 = arith.mulf %13, %7 : vector<128x128xf32>
    %15 = arith.subf %12, %14 : vector<128x128xf32>
    %cst_10 = arith.constant 0.000000e+00 : f32
    %16 = vector.broadcast %cst_10 : f32 to vector<128x128xf32>
    %17 = arith.maximumf %15, %16 : vector<128x128xf32>
    %cst_11 = arith.constant dense<0xFF800000> : vector<128xf32>
    %18 = vector.multi_reduction <maximumf>, %17, %cst_11 [0] : vector<128x128xf32> to vector<128xf32>
    %19 = vector.shape_cast %18 : vector<128xf32> to vector<1x128xf32>
    %cst_12 = arith.constant 0.000000e+00 : f32
    %20 = vector.broadcast %cst_12 : f32 to vector<1x128xf32>
    %c0_i32 = arith.constant 0 : i32
    %c26_i32 = arith.constant 26 : i32
    %21 = arith.addi %c0_i32, %c26_i32 : i32
    %c1_i32 = arith.constant 1 : i32
    %22:2 = scf.for %arg6 = %c0_i32 to %21 step %c1_i32 iter_args(%arg7 = %20, %arg8 = %19) -> (vector<1x128xf32>, vector<1x128xf32>)  : i32 {
      %26 = arith.addf %arg7, %arg8 : vector<1x128xf32>
      %cst_16 = arith.constant 5.000000e-01 : f32
      %27 = vector.broadcast %cst_16 : f32 to vector<1x128xf32>
      %28 = arith.mulf %27, %26 : vector<1x128xf32>
      %29 = vector.broadcast %28 : vector<1x128xf32> to vector<128x128xf32>
      %30 = arith.cmpf ole, %17, %29 : vector<128x128xf32>
      %31 = arith.extui %30 : vector<128x128xi1> to vector<128x128xi32>
      %32 = arith.sitofp %31 : vector<128x128xi32> to vector<128x128xf32>
      %cst_17 = arith.constant dense<0.000000e+00> : vector<128xf32>
      %33 = vector.multi_reduction <add>, %32, %cst_17 [0] : vector<128x128xf32> to vector<128xf32>
      %34 = vector.shape_cast %33 : vector<128xf32> to vector<1x128xf32>
      %cst_18 = arith.constant 4.000000e+01 : f32
      %35 = vector.broadcast %cst_18 : f32 to vector<1x128xf32>
      %36 = arith.cmpf oge, %34, %35 : vector<1x128xf32>
      %37 = arith.select %36, %arg7, %28 : vector<1x128xi1>, vector<1x128xf32>
      %38 = arith.select %36, %28, %arg8 : vector<1x128xi1>, vector<1x128xf32>
      scf.yield %37, %38 : vector<1x128xf32>, vector<1x128xf32>
    }
    %c0_13 = arith.constant 0 : index
    %c0_14 = arith.constant 0 : index
    %c0_15 = arith.constant 0 : index
    %23 = vector.load %arg5[%c0_13, %c0_14, %c0_15] : memref<1x1x128xf32, #tpu.memory_space<vmem>>, vector<1x1x128xf32>
    %24 = vector.shape_cast %23 : vector<1x1x128xf32> to vector<1x128xf32>
    %25 = vector.shape_cast %22#1 : vector<1x128xf32> to vector<1x1x128xf32>
    tpu.vector_store %arg5[%c0_13, %c0_14, %c0_15], %25 {strides = array<i32>} : memref<1x1x128xf32, #tpu.memory_space<vmem>>, vector<1x1x128xf32>,
    return
  }
  func.func @transform_0(%arg0: i32, %arg1: i32) -> (i32, i32, i32) {
    %c0_i32 = arith.constant 0 : i32
    %c0_i32_0 = arith.constant 0 : i32
    return %arg0, %arg1, %c0_i32 : i32, i32, i32
  }
  func.func @transform_1(%arg0: i32, %arg1: i32) -> (i32, i32, i32) {
    %c0_i32 = arith.constant 0 : i32
    %c0_i32_0 = arith.constant 0 : i32
    %c0_i32_1 = arith.constant 0 : i32
    return %arg0, %c0_i32, %c0_i32_0 : i32, i32, i32
  }
  func.func @transform_2(%arg0: i32, %arg1: i32) -> (i32, i32, i32) {
    %c0_i32 = arith.constant 0 : i32
    %c0_i32_0 = arith.constant 0 : i32
    return %arg0, %c0_i32, %arg1 : i32, i32, i32
  }
  func.func @transform_3(%arg0: i32, %arg1: i32) -> (i32, i32, i32) {
    %c0_i32 = arith.constant 0 : i32
    %c0_i32_0 = arith.constant 0 : i32
    return %arg0, %c0_i32, %arg1 : i32, i32, i32
  }
}

module attributes {stable_mosaic.version = 11 : i64} {
  func.func @_block_mlp_kernel(%arg0: i32, %arg1: i32, %arg2: memref<1x128x42xf32, #tpu.memory_space<vmem>>, %arg3: memref<1x1x64xf32, #tpu.memory_space<vmem>>, %arg4: memref<42x64xbf16, #tpu.memory_space<vmem>>, %arg5: memref<64x128xbf16, #tpu.memory_space<vmem>>, %arg6: memref<1x128xf32, #tpu.memory_space<vmem>>, %arg7: memref<128x64xbf16, #tpu.memory_space<vmem>>, %arg8: memref<1x64xf32, #tpu.memory_space<vmem>>, %arg9: memref<64x10xbf16, #tpu.memory_space<vmem>>, %arg10: memref<1x10xf32, #tpu.memory_space<vmem>>, %arg11: memref<64x21xbf16, #tpu.memory_space<vmem>>, %arg12: memref<1x21xf32, #tpu.memory_space<vmem>>, %arg13: memref<64x42xbf16, #tpu.memory_space<vmem>>, %arg14: memref<1x42xf32, #tpu.memory_space<vmem>>, %arg15: memref<1x128x10xf32, #tpu.memory_space<vmem>>, %arg16: memref<1x128x21xf32, #tpu.memory_space<vmem>>, %arg17: memref<1x128x42xf32, #tpu.memory_space<vmem>>) attributes {dimension_semantics = [#tpu.dimension_semantics<parallel>, #tpu.dimension_semantics<parallel>], iteration_bounds = array<i64: 2, 1>, scalar_prefetch = 0 : i64, scratch_operands = 0 : i64, tpu.core_type = #tpu.core_type<tc>, window_params = [{transform_indices = @transform_0, window_bounds = array<i64: 1, 128, 42>}, {transform_indices = @transform_1, window_bounds = array<i64: 1, 1, 64>}, {pipeline_mode = #tpu.pipeline_mode<synchronous>, transform_indices = @transform_2, window_bounds = array<i64: 42, 64>}, {pipeline_mode = #tpu.pipeline_mode<synchronous>, transform_indices = @transform_3, window_bounds = array<i64: 64, 128>}, {pipeline_mode = #tpu.pipeline_mode<synchronous>, transform_indices = @transform_4, window_bounds = array<i64: 1, 128>}, {pipeline_mode = #tpu.pipeline_mode<synchronous>, transform_indices = @transform_5, window_bounds = array<i64: 128, 64>}, {pipeline_mode = #tpu.pipeline_mode<synchronous>, transform_indices = @transform_6, window_bounds = array<i64: 1, 64>}, {pipeline_mode = #tpu.pipeline_mode<synchronous>, transform_indices = @transform_7, window_bounds = array<i64: 64, 10>}, {pipeline_mode = #tpu.pipeline_mode<synchronous>, transform_indices = @transform_8, window_bounds = array<i64: 1, 10>}, {pipeline_mode = #tpu.pipeline_mode<synchronous>, transform_indices = @transform_9, window_bounds = array<i64: 64, 21>}, {pipeline_mode = #tpu.pipeline_mode<synchronous>, transform_indices = @transform_10, window_bounds = array<i64: 1, 21>}, {pipeline_mode = #tpu.pipeline_mode<synchronous>, transform_indices = @transform_11, window_bounds = array<i64: 64, 42>}, {pipeline_mode = #tpu.pipeline_mode<synchronous>, transform_indices = @transform_12, window_bounds = array<i64: 1, 42>}, {transform_indices = @transform_13, window_bounds = array<i64: 1, 128, 10>}, {transform_indices = @transform_14, window_bounds = array<i64: 1, 128, 21>}, {transform_indices = @transform_15, window_bounds = array<i64: 1, 128, 42>}]} {
    %c0 = arith.constant 0 : index
    %c0_0 = arith.constant 0 : index
    %c0_1 = arith.constant 0 : index
    %0 = vector.load %arg2[%c0, %c0_0, %c0_1] : memref<1x128x42xf32, #tpu.memory_space<vmem>>, vector<1x128x42xf32>
    %1 = vector.shape_cast %0 : vector<1x128x42xf32> to vector<128x42xf32>
    %2 = arith.truncf %1 : vector<128x42xf32> to vector<128x42xbf16>
    %c0_2 = arith.constant 0 : index
    %c0_3 = arith.constant 0 : index
    %3 = vector.load %arg4[%c0_2, %c0_3] : memref<42x64xbf16, #tpu.memory_space<vmem>>, vector<42x64xbf16>
    %cst = arith.constant dense<0.000000e+00> : vector<128x64xf32>
    %4 = tpu.matmul %2, %3, %cst {dimension_numbers = #tpu.dot_dimension_numbers<[1], [0], [0], [1], [0, 0, 1, 1], [], []>} : vector<128x42xbf16>, vector<42x64xbf16>, vector<128x64xf32> -> vector<128x64xf32>
    %c0_4 = arith.constant 0 : index
    %c0_5 = arith.constant 0 : index
    %c0_6 = arith.constant 0 : index
    %5 = vector.load %arg3[%c0_4, %c0_5, %c0_6] : memref<1x1x64xf32, #tpu.memory_space<vmem>>, vector<1x1x64xf32>
    %6 = vector.shape_cast %5 : vector<1x1x64xf32> to vector<1x64xf32>
    %7 = vector.broadcast %6 : vector<1x64xf32> to vector<128x64xf32>
    %8 = arith.addf %4, %7 : vector<128x64xf32>
    %9 = math.tanh %8 : vector<128x64xf32>
    %10 = arith.truncf %9 : vector<128x64xf32> to vector<128x64xbf16>
    %c0_7 = arith.constant 0 : index
    %c0_8 = arith.constant 0 : index
    %11 = vector.load %arg5[%c0_7, %c0_8] : memref<64x128xbf16, #tpu.memory_space<vmem>>, vector<64x128xbf16>
    %cst_9 = arith.constant dense<0.000000e+00> : vector<128x128xf32>
    %12 = tpu.matmul %10, %11, %cst_9 {dimension_numbers = #tpu.dot_dimension_numbers<[1], [0], [0], [1], [0, 0, 1, 1], [], []>} : vector<128x64xbf16>, vector<64x128xbf16>, vector<128x128xf32> -> vector<128x128xf32>
    %c0_10 = arith.constant 0 : index
    %c0_11 = arith.constant 0 : index
    %13 = vector.load %arg6[%c0_10, %c0_11] : memref<1x128xf32, #tpu.memory_space<vmem>>, vector<1x128xf32>
    %14 = vector.broadcast %13 : vector<1x128xf32> to vector<128x128xf32>
    %15 = arith.addf %12, %14 : vector<128x128xf32>
    %16 = math.tanh %15 : vector<128x128xf32>
    %17 = arith.truncf %16 : vector<128x128xf32> to vector<128x128xbf16>
    %c0_12 = arith.constant 0 : index
    %c0_13 = arith.constant 0 : index
    %18 = vector.load %arg7[%c0_12, %c0_13] : memref<128x64xbf16, #tpu.memory_space<vmem>>, vector<128x64xbf16>
    %cst_14 = arith.constant dense<0.000000e+00> : vector<128x64xf32>
    %19 = tpu.matmul %17, %18, %cst_14 {dimension_numbers = #tpu.dot_dimension_numbers<[1], [0], [0], [1], [0, 0, 1, 1], [], []>} : vector<128x128xbf16>, vector<128x64xbf16>, vector<128x64xf32> -> vector<128x64xf32>
    %c0_15 = arith.constant 0 : index
    %c0_16 = arith.constant 0 : index
    %20 = vector.load %arg8[%c0_15, %c0_16] : memref<1x64xf32, #tpu.memory_space<vmem>>, vector<1x64xf32>
    %21 = vector.broadcast %20 : vector<1x64xf32> to vector<128x64xf32>
    %22 = arith.addf %19, %21 : vector<128x64xf32>
    %23 = math.tanh %22 : vector<128x64xf32>
    %24 = arith.truncf %23 : vector<128x64xf32> to vector<128x64xbf16>
    %c0_17 = arith.constant 0 : index
    %c0_18 = arith.constant 0 : index
    %25 = vector.load %arg9[%c0_17, %c0_18] : memref<64x10xbf16, #tpu.memory_space<vmem>>, vector<64x10xbf16>
    %cst_19 = arith.constant dense<0.000000e+00> : vector<128x10xf32>
    %26 = tpu.matmul %24, %25, %cst_19 {dimension_numbers = #tpu.dot_dimension_numbers<[1], [0], [0], [1], [0, 0, 1, 1], [], []>} : vector<128x64xbf16>, vector<64x10xbf16>, vector<128x10xf32> -> vector<128x10xf32>
    %c0_20 = arith.constant 0 : index
    %c0_21 = arith.constant 0 : index
    %27 = vector.load %arg10[%c0_20, %c0_21] : memref<1x10xf32, #tpu.memory_space<vmem>>, vector<1x10xf32>
    %28 = vector.broadcast %27 : vector<1x10xf32> to vector<128x10xf32>
    %29 = arith.addf %26, %28 : vector<128x10xf32>
    %c0_22 = arith.constant 0 : index
    %c0_23 = arith.constant 0 : index
    %c0_24 = arith.constant 0 : index
    %30 = vector.load %arg15[%c0_22, %c0_23, %c0_24] : memref<1x128x10xf32, #tpu.memory_space<vmem>>, vector<1x128x10xf32>
    %31 = vector.shape_cast %30 : vector<1x128x10xf32> to vector<128x10xf32>
    %32 = vector.shape_cast %29 : vector<128x10xf32> to vector<1x128x10xf32>
    tpu.vector_store %arg15[%c0_22, %c0_23, %c0_24], %32 {strides = array<i32>} : memref<1x128x10xf32, #tpu.memory_space<vmem>>, vector<1x128x10xf32>,
    %c0_25 = arith.constant 0 : index
    %c0_26 = arith.constant 0 : index
    %33 = vector.load %arg11[%c0_25, %c0_26] : memref<64x21xbf16, #tpu.memory_space<vmem>>, vector<64x21xbf16>
    %cst_27 = arith.constant dense<0.000000e+00> : vector<128x21xf32>
    %34 = tpu.matmul %24, %33, %cst_27 {dimension_numbers = #tpu.dot_dimension_numbers<[1], [0], [0], [1], [0, 0, 1, 1], [], []>} : vector<128x64xbf16>, vector<64x21xbf16>, vector<128x21xf32> -> vector<128x21xf32>
    %c0_28 = arith.constant 0 : index
    %c0_29 = arith.constant 0 : index
    %35 = vector.load %arg12[%c0_28, %c0_29] : memref<1x21xf32, #tpu.memory_space<vmem>>, vector<1x21xf32>
    %36 = vector.broadcast %35 : vector<1x21xf32> to vector<128x21xf32>
    %37 = arith.addf %34, %36 : vector<128x21xf32>
    %c0_30 = arith.constant 0 : index
    %c0_31 = arith.constant 0 : index
    %c0_32 = arith.constant 0 : index
    %38 = vector.load %arg16[%c0_30, %c0_31, %c0_32] : memref<1x128x21xf32, #tpu.memory_space<vmem>>, vector<1x128x21xf32>
    %39 = vector.shape_cast %38 : vector<1x128x21xf32> to vector<128x21xf32>
    %40 = vector.shape_cast %37 : vector<128x21xf32> to vector<1x128x21xf32>
    tpu.vector_store %arg16[%c0_30, %c0_31, %c0_32], %40 {strides = array<i32>} : memref<1x128x21xf32, #tpu.memory_space<vmem>>, vector<1x128x21xf32>,
    %c0_33 = arith.constant 0 : index
    %c0_34 = arith.constant 0 : index
    %41 = vector.load %arg13[%c0_33, %c0_34] : memref<64x42xbf16, #tpu.memory_space<vmem>>, vector<64x42xbf16>
    %cst_35 = arith.constant dense<0.000000e+00> : vector<128x42xf32>
    %42 = tpu.matmul %24, %41, %cst_35 {dimension_numbers = #tpu.dot_dimension_numbers<[1], [0], [0], [1], [0, 0, 1, 1], [], []>} : vector<128x64xbf16>, vector<64x42xbf16>, vector<128x42xf32> -> vector<128x42xf32>
    %c0_36 = arith.constant 0 : index
    %c0_37 = arith.constant 0 : index
    %43 = vector.load %arg14[%c0_36, %c0_37] : memref<1x42xf32, #tpu.memory_space<vmem>>, vector<1x42xf32>
    %44 = vector.broadcast %43 : vector<1x42xf32> to vector<128x42xf32>
    %45 = arith.addf %42, %44 : vector<128x42xf32>
    %c0_38 = arith.constant 0 : index
    %c0_39 = arith.constant 0 : index
    %c0_40 = arith.constant 0 : index
    %46 = vector.load %arg17[%c0_38, %c0_39, %c0_40] : memref<1x128x42xf32, #tpu.memory_space<vmem>>, vector<1x128x42xf32>
    %47 = vector.shape_cast %46 : vector<1x128x42xf32> to vector<128x42xf32>
    %48 = vector.shape_cast %45 : vector<128x42xf32> to vector<1x128x42xf32>
    tpu.vector_store %arg17[%c0_38, %c0_39, %c0_40], %48 {strides = array<i32>} : memref<1x128x42xf32, #tpu.memory_space<vmem>>, vector<1x128x42xf32>,
    return
  }
  func.func @transform_0(%arg0: i32, %arg1: i32) -> (i32, i32, i32) {
    %c0_i32 = arith.constant 0 : i32
    %c0_i32_0 = arith.constant 0 : i32
    return %arg0, %arg1, %c0_i32 : i32, i32, i32
  }
  func.func @transform_1(%arg0: i32, %arg1: i32) -> (i32, i32, i32) {
    %c0_i32 = arith.constant 0 : i32
    %c0_i32_0 = arith.constant 0 : i32
    %c0_i32_1 = arith.constant 0 : i32
    return %arg0, %c0_i32, %c0_i32_0 : i32, i32, i32
  }
  func.func @transform_2(%arg0: i32, %arg1: i32) -> (i32, i32) {
    %c0_i32 = arith.constant 0 : i32
    %c0_i32_0 = arith.constant 0 : i32
    %c0_i32_1 = arith.constant 0 : i32
    return %c0_i32, %c0_i32_0 : i32, i32
  }
  func.func @transform_3(%arg0: i32, %arg1: i32) -> (i32, i32) {
    %c0_i32 = arith.constant 0 : i32
    %c0_i32_0 = arith.constant 0 : i32
    %c0_i32_1 = arith.constant 0 : i32
    return %c0_i32, %c0_i32_0 : i32, i32
  }
  func.func @transform_4(%arg0: i32, %arg1: i32) -> (i32, i32) {
    %c0_i32 = arith.constant 0 : i32
    %c0_i32_0 = arith.constant 0 : i32
    %c0_i32_1 = arith.constant 0 : i32
    return %c0_i32, %c0_i32_0 : i32, i32
  }
  func.func @transform_5(%arg0: i32, %arg1: i32) -> (i32, i32) {
    %c0_i32 = arith.constant 0 : i32
    %c0_i32_0 = arith.constant 0 : i32
    %c0_i32_1 = arith.constant 0 : i32
    return %c0_i32, %c0_i32_0 : i32, i32
  }
  func.func @transform_6(%arg0: i32, %arg1: i32) -> (i32, i32) {
    %c0_i32 = arith.constant 0 : i32
    %c0_i32_0 = arith.constant 0 : i32
    %c0_i32_1 = arith.constant 0 : i32
    return %c0_i32, %c0_i32_0 : i32, i32
  }
  func.func @transform_7(%arg0: i32, %arg1: i32) -> (i32, i32) {
    %c0_i32 = arith.constant 0 : i32
    %c0_i32_0 = arith.constant 0 : i32
    %c0_i32_1 = arith.constant 0 : i32
    return %c0_i32, %c0_i32_0 : i32, i32
  }
  func.func @transform_8(%arg0: i32, %arg1: i32) -> (i32, i32) {
    %c0_i32 = arith.constant 0 : i32
    %c0_i32_0 = arith.constant 0 : i32
    %c0_i32_1 = arith.constant 0 : i32
    return %c0_i32, %c0_i32_0 : i32, i32
  }
  func.func @transform_9(%arg0: i32, %arg1: i32) -> (i32, i32) {
    %c0_i32 = arith.constant 0 : i32
    %c0_i32_0 = arith.constant 0 : i32
    %c0_i32_1 = arith.constant 0 : i32
    return %c0_i32, %c0_i32_0 : i32, i32
  }
  func.func @transform_10(%arg0: i32, %arg1: i32) -> (i32, i32) {
    %c0_i32 = arith.constant 0 : i32
    %c0_i32_0 = arith.constant 0 : i32
    %c0_i32_1 = arith.constant 0 : i32
    return %c0_i32, %c0_i32_0 : i32, i32
  }
  func.func @transform_11(%arg0: i32, %arg1: i32) -> (i32, i32) {
    %c0_i32 = arith.constant 0 : i32
    %c0_i32_0 = arith.constant 0 : i32
    %c0_i32_1 = arith.constant 0 : i32
    return %c0_i32, %c0_i32_0 : i32, i32
  }
  func.func @transform_12(%arg0: i32, %arg1: i32) -> (i32, i32) {
    %c0_i32 = arith.constant 0 : i32
    %c0_i32_0 = arith.constant 0 : i32
    %c0_i32_1 = arith.constant 0 : i32
    return %c0_i32, %c0_i32_0 : i32, i32
  }
  func.func @transform_13(%arg0: i32, %arg1: i32) -> (i32, i32, i32) {
    %c0_i32 = arith.constant 0 : i32
    %c0_i32_0 = arith.constant 0 : i32
    return %arg0, %arg1, %c0_i32 : i32, i32, i32
  }
  func.func @transform_14(%arg0: i32, %arg1: i32) -> (i32, i32, i32) {
    %c0_i32 = arith.constant 0 : i32
    %c0_i32_0 = arith.constant 0 : i32
    return %arg0, %arg1, %c0_i32 : i32, i32, i32
  }
  func.func @transform_15(%arg0: i32, %arg1: i32) -> (i32, i32, i32) {
    %c0_i32 = arith.constant 0 : i32
    %c0_i32_0 = arith.constant 0 : i32
    return %arg0, %arg1, %c0_i32 : i32, i32, i32
  }
}

module attributes {stable_mosaic.version = 11 : i64} {
  func.func @_aggregate_out_kernel(%arg0: i32, %arg1: i32, %arg2: i32, %arg3: memref<1x128x10xf32, #tpu.memory_space<vmem>>, %arg4: memref<1x1x128xf32, #tpu.memory_space<vmem>>, %arg5: memref<1x1x128xf32, #tpu.memory_space<vmem>>, %arg6: memref<1x128x10xf32, #tpu.memory_space<vmem>>, %arg7: memref<1x128x21xf32, #tpu.memory_space<vmem>>, %arg8: memref<1x128x42xf32, #tpu.memory_space<vmem>>, %arg9: memref<21x42xbf16, #tpu.memory_space<vmem>>, %arg10: memref<21x42xbf16, #tpu.memory_space<vmem>>, %arg11: memref<1x128x42xf32, #tpu.memory_space<vmem>>, %arg12: memref<128x21xf32, #tpu.memory_space<vmem>>, %arg13: memref<128x1xf32, #tpu.memory_space<vmem>>, %arg14: memref<21x128xf32, #tpu.memory_space<vmem>>) attributes {dimension_semantics = [#tpu.dimension_semantics<parallel>, #tpu.dimension_semantics<parallel>, #tpu.dimension_semantics<arbitrary>], iteration_bounds = array<i64: 2, 1, 1>, scalar_prefetch = 0 : i64, scratch_operands = 3 : i64, tpu.core_type = #tpu.core_type<tc>, window_params = [{transform_indices = @transform_0, window_bounds = array<i64: 1, 128, 10>}, {transform_indices = @transform_1, window_bounds = array<i64: 1, 1, 128>}, {transform_indices = @transform_2, window_bounds = array<i64: 1, 1, 128>}, {transform_indices = @transform_3, window_bounds = array<i64: 1, 128, 10>}, {transform_indices = @transform_4, window_bounds = array<i64: 1, 128, 21>}, {transform_indices = @transform_5, window_bounds = array<i64: 1, 128, 42>}, {pipeline_mode = #tpu.pipeline_mode<synchronous>, transform_indices = @transform_6, window_bounds = array<i64: 21, 42>}, {pipeline_mode = #tpu.pipeline_mode<synchronous>, transform_indices = @transform_7, window_bounds = array<i64: 21, 42>}, {transform_indices = @transform_8, window_bounds = array<i64: 1, 128, 42>}]} {
    %c0_i32 = arith.constant 0 : i32
    %0 = arith.cmpi eq, %arg2, %c0_i32 : i32
    %1 = arith.extui %0 : i1 to i32
    %c0_i32_0 = arith.constant 0 : i32
    %2 = arith.cmpi ne, %1, %c0_i32_0 : i32
    scf.if %2 {
      %cst_119 = arith.constant 0.000000e+00 : f32
      %240 = vector.broadcast %cst_119 : f32 to vector<128x21xf32>
      %c0_120 = arith.constant 0 : index
      %c0_121 = arith.constant 0 : index
      %241 = vector.load %arg12[%c0_120, %c0_121] : memref<128x21xf32, #tpu.memory_space<vmem>>, vector<128x21xf32>
      tpu.vector_store %arg12[%c0_120, %c0_121], %240 {strides = array<i32>} : memref<128x21xf32, #tpu.memory_space<vmem>>, vector<128x21xf32>,
      %cst_122 = arith.constant 0.000000e+00 : f32
      %242 = vector.broadcast %cst_122 : f32 to vector<128x1xf32>
      %c0_123 = arith.constant 0 : index
      %c0_124 = arith.constant 0 : index
      %243 = vector.load %arg13[%c0_123, %c0_124] : memref<128x1xf32, #tpu.memory_space<vmem>>, vector<128x1xf32>
      tpu.vector_store %arg13[%c0_123, %c0_124], %242 {strides = array<i32>} : memref<128x1xf32, #tpu.memory_space<vmem>>, vector<128x1xf32>,
      %cst_125 = arith.constant -1.000000e+30 : f32
      %244 = vector.broadcast %cst_125 : f32 to vector<21x128xf32>
      %c0_126 = arith.constant 0 : index
      %c0_127 = arith.constant 0 : index
      %245 = vector.load %arg14[%c0_126, %c0_127] : memref<21x128xf32, #tpu.memory_space<vmem>>, vector<21x128xf32>
      tpu.vector_store %arg14[%c0_126, %c0_127], %244 {strides = array<i32>} : memref<21x128xf32, #tpu.memory_space<vmem>>, vector<21x128xf32>,
    } else {
    }
    %c0 = arith.constant 0 : index
    %c0_1 = arith.constant 0 : index
    %c0_2 = arith.constant 0 : index
    %3 = vector.load %arg3[%c0, %c0_1, %c0_2] : memref<1x128x10xf32, #tpu.memory_space<vmem>>, vector<1x128x10xf32>
    %4 = vector.shape_cast %3 : vector<1x128x10xf32> to vector<128x10xf32>
    %c0_3 = arith.constant 0 : index
    %c0_4 = arith.constant 0 : index
    %c0_5 = arith.constant 0 : index
    %5 = vector.load %arg6[%c0_3, %c0_4, %c0_5] : memref<1x128x10xf32, #tpu.memory_space<vmem>>, vector<1x128x10xf32>
    %6 = vector.shape_cast %5 : vector<1x128x10xf32> to vector<128x10xf32>
    %c0_6 = arith.constant 0 : index
    %c0_7 = arith.constant 0 : index
    %c0_8 = arith.constant 0 : index
    %7 = vector.load %arg7[%c0_6, %c0_7, %c0_8] : memref<1x128x21xf32, #tpu.memory_space<vmem>>, vector<1x128x21xf32>
    %8 = vector.shape_cast %7 : vector<1x128x21xf32> to vector<128x21xf32>
    %9 = arith.mulf %6, %6 : vector<128x10xf32>
    %cst = arith.constant dense<0.000000e+00> : vector<128xf32>
    %10 = vector.multi_reduction <add>, %9, %cst [1] : vector<128x10xf32> to vector<128xf32>
    %11 = vector.shape_cast %10 : vector<128xf32> to vector<128x1xf32>
    %cst_9 = arith.constant dense<0.000000e+00> : vector<128x128xf32>
    %12 = tpu.matmul %6, %4, %cst_9 {dimension_numbers = #tpu.dot_dimension_numbers<[1], [1], [0], [0], [0, 0, 1, 0], [], []>} : vector<128x10xf32>, vector<128x10xf32>, vector<128x128xf32> -> vector<128x128xf32>
    %c0_10 = arith.constant 0 : index
    %c0_11 = arith.constant 0 : index
    %c0_12 = arith.constant 0 : index
    %13 = vector.load %arg4[%c0_10, %c0_11, %c0_12] : memref<1x1x128xf32, #tpu.memory_space<vmem>>, vector<1x1x128xf32>
    %14 = vector.shape_cast %13 : vector<1x1x128xf32> to vector<1x128xf32>
    %15 = vector.broadcast %11 : vector<128x1xf32> to vector<128x128xf32>
    %16 = vector.broadcast %14 : vector<1x128xf32> to vector<128x128xf32>
    %17 = arith.addf %15, %16 : vector<128x128xf32>
    %cst_13 = arith.constant 2.000000e+00 : f32
    %18 = vector.broadcast %cst_13 : f32 to vector<128x128xf32>
    %19 = arith.mulf %18, %12 : vector<128x128xf32>
    %20 = arith.subf %17, %19 : vector<128x128xf32>
    %cst_14 = arith.constant 0.000000e+00 : f32
    %21 = vector.broadcast %cst_14 : f32 to vector<128x128xf32>
    %22 = arith.maximumf %20, %21 : vector<128x128xf32>
    %c0_15 = arith.constant 0 : index
    %c0_16 = arith.constant 0 : index
    %c0_17 = arith.constant 0 : index
    %23 = vector.load %arg5[%c0_15, %c0_16, %c0_17] : memref<1x1x128xf32, #tpu.memory_space<vmem>>, vector<1x1x128xf32>
    %24 = vector.shape_cast %23 : vector<1x1x128xf32> to vector<1x128xf32>
    %25 = vector.broadcast %24 : vector<1x128xf32> to vector<128x128xf32>
    %26 = arith.cmpf ole, %22, %25 : vector<128x128xf32>
    %27 = arith.extui %26 : vector<128x128xi1> to vector<128x128xi32>
    %28 = arith.sitofp %27 : vector<128x128xi32> to vector<128x128xf32>
    %cst_18 = arith.constant -1.000000e+01 : f32
    %29 = vector.broadcast %cst_18 : f32 to vector<128x128xf32>
    %30 = arith.mulf %29, %22 : vector<128x128xf32>
    %31 = math.exp %30 : vector<128x128xf32>
    %32 = arith.mulf %31, %28 : vector<128x128xf32>
    %cst_19 = arith.constant 1.000000e+00 : f32
    %33 = vector.broadcast %cst_19 : f32 to vector<128x128xf32>
    %34 = arith.subf %28, %33 : vector<128x128xf32>
    %cst_20 = arith.constant 1.000000e+30 : f32
    %35 = vector.broadcast %cst_20 : f32 to vector<128x128xf32>
    %36 = arith.mulf %34, %35 : vector<128x128xf32>
    %c0_21 = arith.constant 0 : index
    %c0_22 = arith.constant 0 : index
    %37 = vector.load %arg12[%c0_21, %c0_22] : memref<128x21xf32, #tpu.memory_space<vmem>>, vector<128x21xf32>
    %38 = arith.truncf %32 : vector<128x128xf32> to vector<128x128xbf16>
    %39 = arith.truncf %8 : vector<128x21xf32> to vector<128x21xbf16>
    %cst_23 = arith.constant dense<0.000000e+00> : vector<128x21xf32>
    %40 = tpu.matmul %38, %39, %cst_23 {dimension_numbers = #tpu.dot_dimension_numbers<[0], [0], [1], [1], [0, 1, 1, 1], [], []>} : vector<128x128xbf16>, vector<128x21xbf16>, vector<128x21xf32> -> vector<128x21xf32>
    %41 = arith.addf %37, %40 : vector<128x21xf32>
    %c0_24 = arith.constant 0 : index
    %c0_25 = arith.constant 0 : index
    %42 = vector.load %arg12[%c0_24, %c0_25] : memref<128x21xf32, #tpu.memory_space<vmem>>, vector<128x21xf32>
    tpu.vector_store %arg12[%c0_24, %c0_25], %41 {strides = array<i32>} : memref<128x21xf32, #tpu.memory_space<vmem>>, vector<128x21xf32>,
    %cst_26 = arith.constant 1.000000e+00 : f32
    %43 = vector.broadcast %cst_26 : f32 to vector<128x1xf32>
    %c0_27 = arith.constant 0 : index
    %c0_28 = arith.constant 0 : index
    %44 = vector.load %arg13[%c0_27, %c0_28] : memref<128x1xf32, #tpu.memory_space<vmem>>, vector<128x1xf32>
    %cst_29 = arith.constant dense<0.000000e+00> : vector<128x1xf32>
    %45 = tpu.matmul %28, %43, %cst_29 {dimension_numbers = #tpu.dot_dimension_numbers<[0], [0], [1], [1], [0, 1, 1, 1], [], []>} : vector<128x128xf32>, vector<128x1xf32>, vector<128x1xf32> -> vector<128x1xf32>
    %46 = arith.addf %44, %45 : vector<128x1xf32>
    %c0_30 = arith.constant 0 : index
    %c0_31 = arith.constant 0 : index
    %47 = vector.load %arg13[%c0_30, %c0_31] : memref<128x1xf32, #tpu.memory_space<vmem>>, vector<128x1xf32>
    tpu.vector_store %arg13[%c0_30, %c0_31], %46 {strides = array<i32>} : memref<128x1xf32, #tpu.memory_space<vmem>>, vector<128x1xf32>,
    %48 = vector.extract_strided_slice %8 {offsets = [0, 0], sizes = [128, 1], strides = [1, 1]} : vector<128x21xf32> to vector<128x1xf32>
    %49 = vector.broadcast %48 : vector<128x1xf32> to vector<128x128xf32>
    %50 = arith.mulf %32, %49 : vector<128x128xf32>
    %51 = arith.addf %50, %36 : vector<128x128xf32>
    %cst_32 = arith.constant dense<0xFF800000> : vector<128xf32>
    %52 = vector.multi_reduction <maximumf>, %51, %cst_32 [0] : vector<128x128xf32> to vector<128xf32>
    %53 = vector.shape_cast %52 : vector<128xf32> to vector<1x128xf32>
    %c0_33 = arith.constant 0 : index
    %c0_34 = arith.constant 0 : index
    %54 = vector.load %arg14[%c0_33, %c0_34] : memref<21x128xf32, #tpu.memory_space<vmem>>, vector<1x128xf32>
    %55 = arith.maximumf %54, %53 : vector<1x128xf32>
    %c0_35 = arith.constant 0 : index
    %c0_36 = arith.constant 0 : index
    %56 = vector.load %arg14[%c0_35, %c0_36] : memref<21x128xf32, #tpu.memory_space<vmem>>, vector<1x128xf32>
    tpu.vector_store %arg14[%c0_35, %c0_36], %55 {strides = array<i32>} : memref<21x128xf32, #tpu.memory_space<vmem>>, vector<1x128xf32>,
    %57 = vector.extract_strided_slice %8 {offsets = [0, 1], sizes = [128, 1], strides = [1, 1]} : vector<128x21xf32> to vector<128x1xf32>
    %58 = vector.broadcast %57 : vector<128x1xf32> to vector<128x128xf32>
    %59 = arith.mulf %32, %58 : vector<128x128xf32>
    %60 = arith.addf %59, %36 : vector<128x128xf32>
    %cst_37 = arith.constant dense<0xFF800000> : vector<128xf32>
    %61 = vector.multi_reduction <maximumf>, %60, %cst_37 [0] : vector<128x128xf32> to vector<128xf32>
    %62 = vector.shape_cast %61 : vector<128xf32> to vector<1x128xf32>
    %c1 = arith.constant 1 : index
    %c0_38 = arith.constant 0 : index
    %63 = vector.load %arg14[%c1, %c0_38] : memref<21x128xf32, #tpu.memory_space<vmem>>, vector<1x128xf32>
    %64 = arith.maximumf %63, %62 : vector<1x128xf32>
    %c1_39 = arith.constant 1 : index
    %c0_40 = arith.constant 0 : index
    %65 = vector.load %arg14[%c1_39, %c0_40] : memref<21x128xf32, #tpu.memory_space<vmem>>, vector<1x128xf32>
    tpu.vector_store %arg14[%c1_39, %c0_40], %64 {strides = array<i32>} : memref<21x128xf32, #tpu.memory_space<vmem>>, vector<1x128xf32>,
    %66 = vector.extract_strided_slice %8 {offsets = [0, 2], sizes = [128, 1], strides = [1, 1]} : vector<128x21xf32> to vector<128x1xf32>
    %67 = vector.broadcast %66 : vector<128x1xf32> to vector<128x128xf32>
    %68 = arith.mulf %32, %67 : vector<128x128xf32>
    %69 = arith.addf %68, %36 : vector<128x128xf32>
    %cst_41 = arith.constant dense<0xFF800000> : vector<128xf32>
    %70 = vector.multi_reduction <maximumf>, %69, %cst_41 [0] : vector<128x128xf32> to vector<128xf32>
    %71 = vector.shape_cast %70 : vector<128xf32> to vector<1x128xf32>
    %c2 = arith.constant 2 : index
    %c0_42 = arith.constant 0 : index
    %72 = vector.load %arg14[%c2, %c0_42] : memref<21x128xf32, #tpu.memory_space<vmem>>, vector<1x128xf32>
    %73 = arith.maximumf %72, %71 : vector<1x128xf32>
    %c2_43 = arith.constant 2 : index
    %c0_44 = arith.constant 0 : index
    %74 = vector.load %arg14[%c2_43, %c0_44] : memref<21x128xf32, #tpu.memory_space<vmem>>, vector<1x128xf32>
    tpu.vector_store %arg14[%c2_43, %c0_44], %73 {strides = array<i32>} : memref<21x128xf32, #tpu.memory_space<vmem>>, vector<1x128xf32>,
    %75 = vector.extract_strided_slice %8 {offsets = [0, 3], sizes = [128, 1], strides = [1, 1]} : vector<128x21xf32> to vector<128x1xf32>
    %76 = vector.broadcast %75 : vector<128x1xf32> to vector<128x128xf32>
    %77 = arith.mulf %32, %76 : vector<128x128xf32>
    %78 = arith.addf %77, %36 : vector<128x128xf32>
    %cst_45 = arith.constant dense<0xFF800000> : vector<128xf32>
    %79 = vector.multi_reduction <maximumf>, %78, %cst_45 [0] : vector<128x128xf32> to vector<128xf32>
    %80 = vector.shape_cast %79 : vector<128xf32> to vector<1x128xf32>
    %c3 = arith.constant 3 : index
    %c0_46 = arith.constant 0 : index
    %81 = vector.load %arg14[%c3, %c0_46] : memref<21x128xf32, #tpu.memory_space<vmem>>, vector<1x128xf32>
    %82 = arith.maximumf %81, %80 : vector<1x128xf32>
    %c3_47 = arith.constant 3 : index
    %c0_48 = arith.constant 0 : index
    %83 = vector.load %arg14[%c3_47, %c0_48] : memref<21x128xf32, #tpu.memory_space<vmem>>, vector<1x128xf32>
    tpu.vector_store %arg14[%c3_47, %c0_48], %82 {strides = array<i32>} : memref<21x128xf32, #tpu.memory_space<vmem>>, vector<1x128xf32>,
    %84 = vector.extract_strided_slice %8 {offsets = [0, 4], sizes = [128, 1], strides = [1, 1]} : vector<128x21xf32> to vector<128x1xf32>
    %85 = vector.broadcast %84 : vector<128x1xf32> to vector<128x128xf32>
    %86 = arith.mulf %32, %85 : vector<128x128xf32>
    %87 = arith.addf %86, %36 : vector<128x128xf32>
    %cst_49 = arith.constant dense<0xFF800000> : vector<128xf32>
    %88 = vector.multi_reduction <maximumf>, %87, %cst_49 [0] : vector<128x128xf32> to vector<128xf32>
    %89 = vector.shape_cast %88 : vector<128xf32> to vector<1x128xf32>
    %c4 = arith.constant 4 : index
    %c0_50 = arith.constant 0 : index
    %90 = vector.load %arg14[%c4, %c0_50] : memref<21x128xf32, #tpu.memory_space<vmem>>, vector<1x128xf32>
    %91 = arith.maximumf %90, %89 : vector<1x128xf32>
    %c4_51 = arith.constant 4 : index
    %c0_52 = arith.constant 0 : index
    %92 = vector.load %arg14[%c4_51, %c0_52] : memref<21x128xf32, #tpu.memory_space<vmem>>, vector<1x128xf32>
    tpu.vector_store %arg14[%c4_51, %c0_52], %91 {strides = array<i32>} : memref<21x128xf32, #tpu.memory_space<vmem>>, vector<1x128xf32>,
    %93 = vector.extract_strided_slice %8 {offsets = [0, 5], sizes = [128, 1], strides = [1, 1]} : vector<128x21xf32> to vector<128x1xf32>
    %94 = vector.broadcast %93 : vector<128x1xf32> to vector<128x128xf32>
    %95 = arith.mulf %32, %94 : vector<128x128xf32>
    %96 = arith.addf %95, %36 : vector<128x128xf32>
    %cst_53 = arith.constant dense<0xFF800000> : vector<128xf32>
    %97 = vector.multi_reduction <maximumf>, %96, %cst_53 [0] : vector<128x128xf32> to vector<128xf32>
    %98 = vector.shape_cast %97 : vector<128xf32> to vector<1x128xf32>
    %c5 = arith.constant 5 : index
    %c0_54 = arith.constant 0 : index
    %99 = vector.load %arg14[%c5, %c0_54] : memref<21x128xf32, #tpu.memory_space<vmem>>, vector<1x128xf32>
    %100 = arith.maximumf %99, %98 : vector<1x128xf32>
    %c5_55 = arith.constant 5 : index
    %c0_56 = arith.constant 0 : index
    %101 = vector.load %arg14[%c5_55, %c0_56] : memref<21x128xf32, #tpu.memory_space<vmem>>, vector<1x128xf32>
    tpu.vector_store %arg14[%c5_55, %c0_56], %100 {strides = array<i32>} : memref<21x128xf32, #tpu.memory_space<vmem>>, vector<1x128xf32>,
    %102 = vector.extract_strided_slice %8 {offsets = [0, 6], sizes = [128, 1], strides = [1, 1]} : vector<128x21xf32> to vector<128x1xf32>
    %103 = vector.broadcast %102 : vector<128x1xf32> to vector<128x128xf32>
    %104 = arith.mulf %32, %103 : vector<128x128xf32>
    %105 = arith.addf %104, %36 : vector<128x128xf32>
    %cst_57 = arith.constant dense<0xFF800000> : vector<128xf32>
    %106 = vector.multi_reduction <maximumf>, %105, %cst_57 [0] : vector<128x128xf32> to vector<128xf32>
    %107 = vector.shape_cast %106 : vector<128xf32> to vector<1x128xf32>
    %c6 = arith.constant 6 : index
    %c0_58 = arith.constant 0 : index
    %108 = vector.load %arg14[%c6, %c0_58] : memref<21x128xf32, #tpu.memory_space<vmem>>, vector<1x128xf32>
    %109 = arith.maximumf %108, %107 : vector<1x128xf32>
    %c6_59 = arith.constant 6 : index
    %c0_60 = arith.constant 0 : index
    %110 = vector.load %arg14[%c6_59, %c0_60] : memref<21x128xf32, #tpu.memory_space<vmem>>, vector<1x128xf32>
    tpu.vector_store %arg14[%c6_59, %c0_60], %109 {strides = array<i32>} : memref<21x128xf32, #tpu.memory_space<vmem>>, vector<1x128xf32>,
    %111 = vector.extract_strided_slice %8 {offsets = [0, 7], sizes = [128, 1], strides = [1, 1]} : vector<128x21xf32> to vector<128x1xf32>
    %112 = vector.broadcast %111 : vector<128x1xf32> to vector<128x128xf32>
    %113 = arith.mulf %32, %112 : vector<128x128xf32>
    %114 = arith.addf %113, %36 : vector<128x128xf32>
    %cst_61 = arith.constant dense<0xFF800000> : vector<128xf32>
    %115 = vector.multi_reduction <maximumf>, %114, %cst_61 [0] : vector<128x128xf32> to vector<128xf32>
    %116 = vector.shape_cast %115 : vector<128xf32> to vector<1x128xf32>
    %c7 = arith.constant 7 : index
    %c0_62 = arith.constant 0 : index
    %117 = vector.load %arg14[%c7, %c0_62] : memref<21x128xf32, #tpu.memory_space<vmem>>, vector<1x128xf32>
    %118 = arith.maximumf %117, %116 : vector<1x128xf32>
    %c7_63 = arith.constant 7 : index
    %c0_64 = arith.constant 0 : index
    %119 = vector.load %arg14[%c7_63, %c0_64] : memref<21x128xf32, #tpu.memory_space<vmem>>, vector<1x128xf32>
    tpu.vector_store %arg14[%c7_63, %c0_64], %118 {strides = array<i32>} : memref<21x128xf32, #tpu.memory_space<vmem>>, vector<1x128xf32>,
    %120 = vector.extract_strided_slice %8 {offsets = [0, 8], sizes = [128, 1], strides = [1, 1]} : vector<128x21xf32> to vector<128x1xf32>
    %121 = vector.broadcast %120 : vector<128x1xf32> to vector<128x128xf32>
    %122 = arith.mulf %32, %121 : vector<128x128xf32>
    %123 = arith.addf %122, %36 : vector<128x128xf32>
    %cst_65 = arith.constant dense<0xFF800000> : vector<128xf32>
    %124 = vector.multi_reduction <maximumf>, %123, %cst_65 [0] : vector<128x128xf32> to vector<128xf32>
    %125 = vector.shape_cast %124 : vector<128xf32> to vector<1x128xf32>
    %c8 = arith.constant 8 : index
    %c0_66 = arith.constant 0 : index
    %126 = vector.load %arg14[%c8, %c0_66] : memref<21x128xf32, #tpu.memory_space<vmem>>, vector<1x128xf32>
    %127 = arith.maximumf %126, %125 : vector<1x128xf32>
    %c8_67 = arith.constant 8 : index
    %c0_68 = arith.constant 0 : index
    %128 = vector.load %arg14[%c8_67, %c0_68] : memref<21x128xf32, #tpu.memory_space<vmem>>, vector<1x128xf32>
    tpu.vector_store %arg14[%c8_67, %c0_68], %127 {strides = array<i32>} : memref<21x128xf32, #tpu.memory_space<vmem>>, vector<1x128xf32>,
    %129 = vector.extract_strided_slice %8 {offsets = [0, 9], sizes = [128, 1], strides = [1, 1]} : vector<128x21xf32> to vector<128x1xf32>
    %130 = vector.broadcast %129 : vector<128x1xf32> to vector<128x128xf32>
    %131 = arith.mulf %32, %130 : vector<128x128xf32>
    %132 = arith.addf %131, %36 : vector<128x128xf32>
    %cst_69 = arith.constant dense<0xFF800000> : vector<128xf32>
    %133 = vector.multi_reduction <maximumf>, %132, %cst_69 [0] : vector<128x128xf32> to vector<128xf32>
    %134 = vector.shape_cast %133 : vector<128xf32> to vector<1x128xf32>
    %c9 = arith.constant 9 : index
    %c0_70 = arith.constant 0 : index
    %135 = vector.load %arg14[%c9, %c0_70] : memref<21x128xf32, #tpu.memory_space<vmem>>, vector<1x128xf32>
    %136 = arith.maximumf %135, %134 : vector<1x128xf32>
    %c9_71 = arith.constant 9 : index
    %c0_72 = arith.constant 0 : index
    %137 = vector.load %arg14[%c9_71, %c0_72] : memref<21x128xf32, #tpu.memory_space<vmem>>, vector<1x128xf32>
    tpu.vector_store %arg14[%c9_71, %c0_72], %136 {strides = array<i32>} : memref<21x128xf32, #tpu.memory_space<vmem>>, vector<1x128xf32>,
    %138 = vector.extract_strided_slice %8 {offsets = [0, 10], sizes = [128, 1], strides = [1, 1]} : vector<128x21xf32> to vector<128x1xf32>
    %139 = vector.broadcast %138 : vector<128x1xf32> to vector<128x128xf32>
    %140 = arith.mulf %32, %139 : vector<128x128xf32>
    %141 = arith.addf %140, %36 : vector<128x128xf32>
    %cst_73 = arith.constant dense<0xFF800000> : vector<128xf32>
    %142 = vector.multi_reduction <maximumf>, %141, %cst_73 [0] : vector<128x128xf32> to vector<128xf32>
    %143 = vector.shape_cast %142 : vector<128xf32> to vector<1x128xf32>
    %c10 = arith.constant 10 : index
    %c0_74 = arith.constant 0 : index
    %144 = vector.load %arg14[%c10, %c0_74] : memref<21x128xf32, #tpu.memory_space<vmem>>, vector<1x128xf32>
    %145 = arith.maximumf %144, %143 : vector<1x128xf32>
    %c10_75 = arith.constant 10 : index
    %c0_76 = arith.constant 0 : index
    %146 = vector.load %arg14[%c10_75, %c0_76] : memref<21x128xf32, #tpu.memory_space<vmem>>, vector<1x128xf32>
    tpu.vector_store %arg14[%c10_75, %c0_76], %145 {strides = array<i32>} : memref<21x128xf32, #tpu.memory_space<vmem>>, vector<1x128xf32>,
    %147 = vector.extract_strided_slice %8 {offsets = [0, 11], sizes = [128, 1], strides = [1, 1]} : vector<128x21xf32> to vector<128x1xf32>
    %148 = vector.broadcast %147 : vector<128x1xf32> to vector<128x128xf32>
    %149 = arith.mulf %32, %148 : vector<128x128xf32>
    %150 = arith.addf %149, %36 : vector<128x128xf32>
    %cst_77 = arith.constant dense<0xFF800000> : vector<128xf32>
    %151 = vector.multi_reduction <maximumf>, %150, %cst_77 [0] : vector<128x128xf32> to vector<128xf32>
    %152 = vector.shape_cast %151 : vector<128xf32> to vector<1x128xf32>
    %c11 = arith.constant 11 : index
    %c0_78 = arith.constant 0 : index
    %153 = vector.load %arg14[%c11, %c0_78] : memref<21x128xf32, #tpu.memory_space<vmem>>, vector<1x128xf32>
    %154 = arith.maximumf %153, %152 : vector<1x128xf32>
    %c11_79 = arith.constant 11 : index
    %c0_80 = arith.constant 0 : index
    %155 = vector.load %arg14[%c11_79, %c0_80] : memref<21x128xf32, #tpu.memory_space<vmem>>, vector<1x128xf32>
    tpu.vector_store %arg14[%c11_79, %c0_80], %154 {strides = array<i32>} : memref<21x128xf32, #tpu.memory_space<vmem>>, vector<1x128xf32>,
    %156 = vector.extract_strided_slice %8 {offsets = [0, 12], sizes = [128, 1], strides = [1, 1]} : vector<128x21xf32> to vector<128x1xf32>
    %157 = vector.broadcast %156 : vector<128x1xf32> to vector<128x128xf32>
    %158 = arith.mulf %32, %157 : vector<128x128xf32>
    %159 = arith.addf %158, %36 : vector<128x128xf32>
    %cst_81 = arith.constant dense<0xFF800000> : vector<128xf32>
    %160 = vector.multi_reduction <maximumf>, %159, %cst_81 [0] : vector<128x128xf32> to vector<128xf32>
    %161 = vector.shape_cast %160 : vector<128xf32> to vector<1x128xf32>
    %c12 = arith.constant 12 : index
    %c0_82 = arith.constant 0 : index
    %162 = vector.load %arg14[%c12, %c0_82] : memref<21x128xf32, #tpu.memory_space<vmem>>, vector<1x128xf32>
    %163 = arith.maximumf %162, %161 : vector<1x128xf32>
    %c12_83 = arith.constant 12 : index
    %c0_84 = arith.constant 0 : index
    %164 = vector.load %arg14[%c12_83, %c0_84] : memref<21x128xf32, #tpu.memory_space<vmem>>, vector<1x128xf32>
    tpu.vector_store %arg14[%c12_83, %c0_84], %163 {strides = array<i32>} : memref<21x128xf32, #tpu.memory_space<vmem>>, vector<1x128xf32>,
    %165 = vector.extract_strided_slice %8 {offsets = [0, 13], sizes = [128, 1], strides = [1, 1]} : vector<128x21xf32> to vector<128x1xf32>
    %166 = vector.broadcast %165 : vector<128x1xf32> to vector<128x128xf32>
    %167 = arith.mulf %32, %166 : vector<128x128xf32>
    %168 = arith.addf %167, %36 : vector<128x128xf32>
    %cst_85 = arith.constant dense<0xFF800000> : vector<128xf32>
    %169 = vector.multi_reduction <maximumf>, %168, %cst_85 [0] : vector<128x128xf32> to vector<128xf32>
    %170 = vector.shape_cast %169 : vector<128xf32> to vector<1x128xf32>
    %c13 = arith.constant 13 : index
    %c0_86 = arith.constant 0 : index
    %171 = vector.load %arg14[%c13, %c0_86] : memref<21x128xf32, #tpu.memory_space<vmem>>, vector<1x128xf32>
    %172 = arith.maximumf %171, %170 : vector<1x128xf32>
    %c13_87 = arith.constant 13 : index
    %c0_88 = arith.constant 0 : index
    %173 = vector.load %arg14[%c13_87, %c0_88] : memref<21x128xf32, #tpu.memory_space<vmem>>, vector<1x128xf32>
    tpu.vector_store %arg14[%c13_87, %c0_88], %172 {strides = array<i32>} : memref<21x128xf32, #tpu.memory_space<vmem>>, vector<1x128xf32>,
    %174 = vector.extract_strided_slice %8 {offsets = [0, 14], sizes = [128, 1], strides = [1, 1]} : vector<128x21xf32> to vector<128x1xf32>
    %175 = vector.broadcast %174 : vector<128x1xf32> to vector<128x128xf32>
    %176 = arith.mulf %32, %175 : vector<128x128xf32>
    %177 = arith.addf %176, %36 : vector<128x128xf32>
    %cst_89 = arith.constant dense<0xFF800000> : vector<128xf32>
    %178 = vector.multi_reduction <maximumf>, %177, %cst_89 [0] : vector<128x128xf32> to vector<128xf32>
    %179 = vector.shape_cast %178 : vector<128xf32> to vector<1x128xf32>
    %c14 = arith.constant 14 : index
    %c0_90 = arith.constant 0 : index
    %180 = vector.load %arg14[%c14, %c0_90] : memref<21x128xf32, #tpu.memory_space<vmem>>, vector<1x128xf32>
    %181 = arith.maximumf %180, %179 : vector<1x128xf32>
    %c14_91 = arith.constant 14 : index
    %c0_92 = arith.constant 0 : index
    %182 = vector.load %arg14[%c14_91, %c0_92] : memref<21x128xf32, #tpu.memory_space<vmem>>, vector<1x128xf32>
    tpu.vector_store %arg14[%c14_91, %c0_92], %181 {strides = array<i32>} : memref<21x128xf32, #tpu.memory_space<vmem>>, vector<1x128xf32>,
    %183 = vector.extract_strided_slice %8 {offsets = [0, 15], sizes = [128, 1], strides = [1, 1]} : vector<128x21xf32> to vector<128x1xf32>
    %184 = vector.broadcast %183 : vector<128x1xf32> to vector<128x128xf32>
    %185 = arith.mulf %32, %184 : vector<128x128xf32>
    %186 = arith.addf %185, %36 : vector<128x128xf32>
    %cst_93 = arith.constant dense<0xFF800000> : vector<128xf32>
    %187 = vector.multi_reduction <maximumf>, %186, %cst_93 [0] : vector<128x128xf32> to vector<128xf32>
    %188 = vector.shape_cast %187 : vector<128xf32> to vector<1x128xf32>
    %c15 = arith.constant 15 : index
    %c0_94 = arith.constant 0 : index
    %189 = vector.load %arg14[%c15, %c0_94] : memref<21x128xf32, #tpu.memory_space<vmem>>, vector<1x128xf32>
    %190 = arith.maximumf %189, %188 : vector<1x128xf32>
    %c15_95 = arith.constant 15 : index
    %c0_96 = arith.constant 0 : index
    %191 = vector.load %arg14[%c15_95, %c0_96] : memref<21x128xf32, #tpu.memory_space<vmem>>, vector<1x128xf32>
    tpu.vector_store %arg14[%c15_95, %c0_96], %190 {strides = array<i32>} : memref<21x128xf32, #tpu.memory_space<vmem>>, vector<1x128xf32>,
    %192 = vector.extract_strided_slice %8 {offsets = [0, 16], sizes = [128, 1], strides = [1, 1]} : vector<128x21xf32> to vector<128x1xf32>
    %193 = vector.broadcast %192 : vector<128x1xf32> to vector<128x128xf32>
    %194 = arith.mulf %32, %193 : vector<128x128xf32>
    %195 = arith.addf %194, %36 : vector<128x128xf32>
    %cst_97 = arith.constant dense<0xFF800000> : vector<128xf32>
    %196 = vector.multi_reduction <maximumf>, %195, %cst_97 [0] : vector<128x128xf32> to vector<128xf32>
    %197 = vector.shape_cast %196 : vector<128xf32> to vector<1x128xf32>
    %c16 = arith.constant 16 : index
    %c0_98 = arith.constant 0 : index
    %198 = vector.load %arg14[%c16, %c0_98] : memref<21x128xf32, #tpu.memory_space<vmem>>, vector<1x128xf32>
    %199 = arith.maximumf %198, %197 : vector<1x128xf32>
    %c16_99 = arith.constant 16 : index
    %c0_100 = arith.constant 0 : index
    %200 = vector.load %arg14[%c16_99, %c0_100] : memref<21x128xf32, #tpu.memory_space<vmem>>, vector<1x128xf32>
    tpu.vector_store %arg14[%c16_99, %c0_100], %199 {strides = array<i32>} : memref<21x128xf32, #tpu.memory_space<vmem>>, vector<1x128xf32>,
    %201 = vector.extract_strided_slice %8 {offsets = [0, 17], sizes = [128, 1], strides = [1, 1]} : vector<128x21xf32> to vector<128x1xf32>
    %202 = vector.broadcast %201 : vector<128x1xf32> to vector<128x128xf32>
    %203 = arith.mulf %32, %202 : vector<128x128xf32>
    %204 = arith.addf %203, %36 : vector<128x128xf32>
    %cst_101 = arith.constant dense<0xFF800000> : vector<128xf32>
    %205 = vector.multi_reduction <maximumf>, %204, %cst_101 [0] : vector<128x128xf32> to vector<128xf32>
    %206 = vector.shape_cast %205 : vector<128xf32> to vector<1x128xf32>
    %c17 = arith.constant 17 : index
    %c0_102 = arith.constant 0 : index
    %207 = vector.load %arg14[%c17, %c0_102] : memref<21x128xf32, #tpu.memory_space<vmem>>, vector<1x128xf32>
    %208 = arith.maximumf %207, %206 : vector<1x128xf32>
    %c17_103 = arith.constant 17 : index
    %c0_104 = arith.constant 0 : index
    %209 = vector.load %arg14[%c17_103, %c0_104] : memref<21x128xf32, #tpu.memory_space<vmem>>, vector<1x128xf32>
    tpu.vector_store %arg14[%c17_103, %c0_104], %208 {strides = array<i32>} : memref<21x128xf32, #tpu.memory_space<vmem>>, vector<1x128xf32>,
    %210 = vector.extract_strided_slice %8 {offsets = [0, 18], sizes = [128, 1], strides = [1, 1]} : vector<128x21xf32> to vector<128x1xf32>
    %211 = vector.broadcast %210 : vector<128x1xf32> to vector<128x128xf32>
    %212 = arith.mulf %32, %211 : vector<128x128xf32>
    %213 = arith.addf %212, %36 : vector<128x128xf32>
    %cst_105 = arith.constant dense<0xFF800000> : vector<128xf32>
    %214 = vector.multi_reduction <maximumf>, %213, %cst_105 [0] : vector<128x128xf32> to vector<128xf32>
    %215 = vector.shape_cast %214 : vector<128xf32> to vector<1x128xf32>
    %c18 = arith.constant 18 : index
    %c0_106 = arith.constant 0 : index
    %216 = vector.load %arg14[%c18, %c0_106] : memref<21x128xf32, #tpu.memory_space<vmem>>, vector<1x128xf32>
    %217 = arith.maximumf %216, %215 : vector<1x128xf32>
    %c18_107 = arith.constant 18 : index
    %c0_108 = arith.constant 0 : index
    %218 = vector.load %arg14[%c18_107, %c0_108] : memref<21x128xf32, #tpu.memory_space<vmem>>, vector<1x128xf32>
    tpu.vector_store %arg14[%c18_107, %c0_108], %217 {strides = array<i32>} : memref<21x128xf32, #tpu.memory_space<vmem>>, vector<1x128xf32>,
    %219 = vector.extract_strided_slice %8 {offsets = [0, 19], sizes = [128, 1], strides = [1, 1]} : vector<128x21xf32> to vector<128x1xf32>
    %220 = vector.broadcast %219 : vector<128x1xf32> to vector<128x128xf32>
    %221 = arith.mulf %32, %220 : vector<128x128xf32>
    %222 = arith.addf %221, %36 : vector<128x128xf32>
    %cst_109 = arith.constant dense<0xFF800000> : vector<128xf32>
    %223 = vector.multi_reduction <maximumf>, %222, %cst_109 [0] : vector<128x128xf32> to vector<128xf32>
    %224 = vector.shape_cast %223 : vector<128xf32> to vector<1x128xf32>
    %c19 = arith.constant 19 : index
    %c0_110 = arith.constant 0 : index
    %225 = vector.load %arg14[%c19, %c0_110] : memref<21x128xf32, #tpu.memory_space<vmem>>, vector<1x128xf32>
    %226 = arith.maximumf %225, %224 : vector<1x128xf32>
    %c19_111 = arith.constant 19 : index
    %c0_112 = arith.constant 0 : index
    %227 = vector.load %arg14[%c19_111, %c0_112] : memref<21x128xf32, #tpu.memory_space<vmem>>, vector<1x128xf32>
    tpu.vector_store %arg14[%c19_111, %c0_112], %226 {strides = array<i32>} : memref<21x128xf32, #tpu.memory_space<vmem>>, vector<1x128xf32>,
    %228 = vector.extract_strided_slice %8 {offsets = [0, 20], sizes = [128, 1], strides = [1, 1]} : vector<128x21xf32> to vector<128x1xf32>
    %229 = vector.broadcast %228 : vector<128x1xf32> to vector<128x128xf32>
    %230 = arith.mulf %32, %229 : vector<128x128xf32>
    %231 = arith.addf %230, %36 : vector<128x128xf32>
    %cst_113 = arith.constant dense<0xFF800000> : vector<128xf32>
    %232 = vector.multi_reduction <maximumf>, %231, %cst_113 [0] : vector<128x128xf32> to vector<128xf32>
    %233 = vector.shape_cast %232 : vector<128xf32> to vector<1x128xf32>
    %c20 = arith.constant 20 : index
    %c0_114 = arith.constant 0 : index
    %234 = vector.load %arg14[%c20, %c0_114] : memref<21x128xf32, #tpu.memory_space<vmem>>, vector<1x128xf32>
    %235 = arith.maximumf %234, %233 : vector<1x128xf32>
    %c20_115 = arith.constant 20 : index
    %c0_116 = arith.constant 0 : index
    %236 = vector.load %arg14[%c20_115, %c0_116] : memref<21x128xf32, #tpu.memory_space<vmem>>, vector<1x128xf32>
    tpu.vector_store %arg14[%c20_115, %c0_116], %235 {strides = array<i32>} : memref<21x128xf32, #tpu.memory_space<vmem>>, vector<1x128xf32>,
    %c0_i32_117 = arith.constant 0 : i32
    %237 = arith.cmpi eq, %arg2, %c0_i32_117 : i32
    %238 = arith.extui %237 : i1 to i32
    %c0_i32_118 = arith.constant 0 : i32
    %239 = arith.cmpi ne, %238, %c0_i32_118 : i32
    scf.if %239 {
      %c0_119 = arith.constant 0 : index
      %c0_120 = arith.constant 0 : index
      %240 = vector.load %arg13[%c0_119, %c0_120] : memref<128x1xf32, #tpu.memory_space<vmem>>, vector<128x1xf32>
      %cst_121 = arith.constant 1.000000e+00 : f32
      %241 = vector.broadcast %cst_121 : f32 to vector<128x1xf32>
      %242 = arith.maximumf %240, %241 : vector<128x1xf32>
      %243 = tpu.reciprocal %242 {approx = true} : vector<128x1xf32> -> vector<128x1xf32>
      %c0_122 = arith.constant 0 : index
      %c0_123 = arith.constant 0 : index
      %244 = vector.load %arg12[%c0_122, %c0_123] : memref<128x21xf32, #tpu.memory_space<vmem>>, vector<128x21xf32>
      %245 = vector.broadcast %243 : vector<128x1xf32> to vector<128x21xf32>
      %246 = arith.mulf %244, %245 : vector<128x21xf32>
      %247 = arith.truncf %246 : vector<128x21xf32> to vector<128x21xbf16>
      %c0_124 = arith.constant 0 : index
      %c0_125 = arith.constant 0 : index
      %248 = vector.load %arg9[%c0_124, %c0_125] : memref<21x42xbf16, #tpu.memory_space<vmem>>, vector<21x42xbf16>
      %cst_126 = arith.constant dense<0.000000e+00> : vector<128x42xf32>
      %249 = tpu.matmul %247, %248, %cst_126 {dimension_numbers = #tpu.dot_dimension_numbers<[1], [0], [0], [1], [0, 0, 1, 1], [], []>} : vector<128x21xbf16>, vector<21x42xbf16>, vector<128x42xf32> -> vector<128x42xf32>
      %c0_127 = arith.constant 0 : index
      %c0_128 = arith.constant 0 : index
      %250 = vector.load %arg14[%c0_127, %c0_128] : memref<21x128xf32, #tpu.memory_space<vmem>>, vector<21x128xf32>
      %251 = arith.truncf %250 : vector<21x128xf32> to vector<21x128xbf16>
      %c0_129 = arith.constant 0 : index
      %c0_130 = arith.constant 0 : index
      %252 = vector.load %arg10[%c0_129, %c0_130] : memref<21x42xbf16, #tpu.memory_space<vmem>>, vector<21x42xbf16>
      %cst_131 = arith.constant dense<0.000000e+00> : vector<128x42xf32>
      %253 = tpu.matmul %251, %252, %cst_131 {dimension_numbers = #tpu.dot_dimension_numbers<[0], [0], [1], [1], [0, 1, 1, 1], [], []>} : vector<21x128xbf16>, vector<21x42xbf16>, vector<128x42xf32> -> vector<128x42xf32>
      %c0_132 = arith.constant 0 : index
      %c0_133 = arith.constant 0 : index
      %c0_134 = arith.constant 0 : index
      %254 = vector.load %arg8[%c0_132, %c0_133, %c0_134] : memref<1x128x42xf32, #tpu.memory_space<vmem>>, vector<1x128x42xf32>
      %255 = vector.shape_cast %254 : vector<1x128x42xf32> to vector<128x42xf32>
      %256 = arith.addf %255, %249 : vector<128x42xf32>
      %257 = arith.addf %256, %253 : vector<128x42xf32>
      %c0_135 = arith.constant 0 : index
      %c0_136 = arith.constant 0 : index
      %c0_137 = arith.constant 0 : index
      %258 = vector.load %arg11[%c0_135, %c0_136, %c0_137] : memref<1x128x42xf32, #tpu.memory_space<vmem>>, vector<1x128x42xf32>
      %259 = vector.shape_cast %258 : vector<1x128x42xf32> to vector<128x42xf32>
      %260 = vector.shape_cast %257 : vector<128x42xf32> to vector<1x128x42xf32>
      tpu.vector_store %arg11[%c0_135, %c0_136, %c0_137], %260 {strides = array<i32>} : memref<1x128x42xf32, #tpu.memory_space<vmem>>, vector<1x128x42xf32>,
    } else {
    }
    return
  }
  func.func @transform_0(%arg0: i32, %arg1: i32, %arg2: i32) -> (i32, i32, i32) {
    %c0_i32 = arith.constant 0 : i32
    %c0_i32_0 = arith.constant 0 : i32
    return %arg0, %arg1, %c0_i32 : i32, i32, i32
  }
  func.func @transform_1(%arg0: i32, %arg1: i32, %arg2: i32) -> (i32, i32, i32) {
    %c0_i32 = arith.constant 0 : i32
    %c0_i32_0 = arith.constant 0 : i32
    return %arg0, %c0_i32, %arg1 : i32, i32, i32
  }
  func.func @transform_2(%arg0: i32, %arg1: i32, %arg2: i32) -> (i32, i32, i32) {
    %c0_i32 = arith.constant 0 : i32
    %c0_i32_0 = arith.constant 0 : i32
    return %arg0, %c0_i32, %arg1 : i32, i32, i32
  }
  func.func @transform_3(%arg0: i32, %arg1: i32, %arg2: i32) -> (i32, i32, i32) {
    %c0_i32 = arith.constant 0 : i32
    %c0_i32_0 = arith.constant 0 : i32
    return %arg0, %arg2, %c0_i32 : i32, i32, i32
  }
  func.func @transform_4(%arg0: i32, %arg1: i32, %arg2: i32) -> (i32, i32, i32) {
    %c0_i32 = arith.constant 0 : i32
    %c0_i32_0 = arith.constant 0 : i32
    return %arg0, %arg2, %c0_i32 : i32, i32, i32
  }
  func.func @transform_5(%arg0: i32, %arg1: i32, %arg2: i32) -> (i32, i32, i32) {
    %c0_i32 = arith.constant 0 : i32
    %c0_i32_0 = arith.constant 0 : i32
    return %arg0, %arg1, %c0_i32 : i32, i32, i32
  }
  func.func @transform_6(%arg0: i32, %arg1: i32, %arg2: i32) -> (i32, i32) {
    %c0_i32 = arith.constant 0 : i32
    %c0_i32_0 = arith.constant 0 : i32
    %c0_i32_1 = arith.constant 0 : i32
    return %c0_i32, %c0_i32_0 : i32, i32
  }
  func.func @transform_7(%arg0: i32, %arg1: i32, %arg2: i32) -> (i32, i32) {
    %c0_i32 = arith.constant 0 : i32
    %c0_i32_0 = arith.constant 0 : i32
    %c0_i32_1 = arith.constant 0 : i32
    return %c0_i32, %c0_i32_0 : i32, i32
  }
  func.func @transform_8(%arg0: i32, %arg1: i32, %arg2: i32) -> (i32, i32, i32) {
    %c0_i32 = arith.constant 0 : i32
    %c0_i32_0 = arith.constant 0 : i32
    return %arg0, %arg1, %c0_i32 : i32, i32, i32
  }
}

module attributes {stable_mosaic.version = 11 : i64} {
  func.func @kernel(%arg0: i32, %arg1: i32, %arg2: memref<1x128x10xf32, #tpu.memory_space<vmem>>, %arg3: memref<1x128x10xf32, #tpu.memory_space<vmem>>, %arg4: memref<1x1x128xf32, #tpu.memory_space<vmem>>, %arg5: memref<1x1x128xf32, #tpu.memory_space<vmem>>) attributes {dimension_semantics = [#tpu.dimension_semantics<parallel>, #tpu.dimension_semantics<parallel>], iteration_bounds = array<i64: 2, 1>, scalar_prefetch = 0 : i64, scratch_operands = 0 : i64, tpu.core_type = #tpu.core_type<tc>, window_params = [{transform_indices = @transform_0, window_bounds = array<i64: 1, 128, 10>}, {transform_indices = @transform_1, window_bounds = array<i64: 1, 128, 10>}, {transform_indices = @transform_2, window_bounds = array<i64: 1, 1, 128>}, {transform_indices = @transform_3, window_bounds = array<i64: 1, 1, 128>}]} {
    %c0 = arith.constant 0 : index
    %c0_0 = arith.constant 0 : index
    %c0_1 = arith.constant 0 : index
    %0 = vector.load %arg2[%c0, %c0_0, %c0_1] : memref<1x128x10xf32, #tpu.memory_space<vmem>>, vector<1x128x10xf32>
    %1 = vector.shape_cast %0 : vector<1x128x10xf32> to vector<128x10xf32>
    %c0_2 = arith.constant 0 : index
    %c0_3 = arith.constant 0 : index
    %c0_4 = arith.constant 0 : index
    %2 = vector.load %arg3[%c0_2, %c0_3, %c0_4] : memref<1x128x10xf32, #tpu.memory_space<vmem>>, vector<1x128x10xf32>
    %3 = vector.shape_cast %2 : vector<1x128x10xf32> to vector<128x10xf32>
    %4 = arith.mulf %3, %3 : vector<128x10xf32>
    %cst = arith.constant dense<0.000000e+00> : vector<128xf32>
    %5 = vector.multi_reduction <add>, %4, %cst [1] : vector<128x10xf32> to vector<128xf32>
    %6 = vector.shape_cast %5 : vector<128xf32> to vector<128x1xf32>
    %cst_5 = arith.constant dense<0.000000e+00> : vector<128x128xf32>
    %7 = tpu.matmul %3, %1, %cst_5 {dimension_numbers = #tpu.dot_dimension_numbers<[1], [1], [0], [0], [0, 0, 1, 0], [], []>} : vector<128x10xf32>, vector<128x10xf32>, vector<128x128xf32> -> vector<128x128xf32>
    %c0_6 = arith.constant 0 : index
    %c0_7 = arith.constant 0 : index
    %c0_8 = arith.constant 0 : index
    %8 = vector.load %arg4[%c0_6, %c0_7, %c0_8] : memref<1x1x128xf32, #tpu.memory_space<vmem>>, vector<1x1x128xf32>
    %9 = vector.shape_cast %8 : vector<1x1x128xf32> to vector<1x128xf32>
    %10 = vector.broadcast %6 : vector<128x1xf32> to vector<128x128xf32>
    %11 = vector.broadcast %9 : vector<1x128xf32> to vector<128x128xf32>
    %12 = arith.addf %10, %11 : vector<128x128xf32>
    %cst_9 = arith.constant 2.000000e+00 : f32
    %13 = vector.broadcast %cst_9 : f32 to vector<128x128xf32>
    %14 = arith.mulf %13, %7 : vector<128x128xf32>
    %15 = arith.subf %12, %14 : vector<128x128xf32>
    %cst_10 = arith.constant 0.000000e+00 : f32
    %16 = vector.broadcast %cst_10 : f32 to vector<128x128xf32>
    %17 = arith.maximumf %15, %16 : vector<128x128xf32>
    %cst_11 = arith.constant dense<0xFF800000> : vector<128xf32>
    %18 = vector.multi_reduction <maximumf>, %17, %cst_11 [0] : vector<128x128xf32> to vector<128xf32>
    %19 = vector.shape_cast %18 : vector<128xf32> to vector<1x128xf32>
    %cst_12 = arith.constant 0.000000e+00 : f32
    %20 = vector.broadcast %cst_12 : f32 to vector<1x128xf32>
    %c0_i32 = arith.constant 0 : i32
    %c26_i32 = arith.constant 26 : i32
    %21 = arith.addi %c0_i32, %c26_i32 : i32
    %c1_i32 = arith.constant 1 : i32
    %22:2 = scf.for %arg6 = %c0_i32 to %21 step %c1_i32 iter_args(%arg7 = %20, %arg8 = %19) -> (vector<1x128xf32>, vector<1x128xf32>)  : i32 {
      %26 = arith.addf %arg7, %arg8 : vector<1x128xf32>
      %cst_16 = arith.constant 5.000000e-01 : f32
      %27 = vector.broadcast %cst_16 : f32 to vector<1x128xf32>
      %28 = arith.mulf %27, %26 : vector<1x128xf32>
      %29 = vector.broadcast %28 : vector<1x128xf32> to vector<128x128xf32>
      %30 = arith.cmpf ole, %17, %29 : vector<128x128xf32>
      %31 = arith.extui %30 : vector<128x128xi1> to vector<128x128xi32>
      %32 = arith.sitofp %31 : vector<128x128xi32> to vector<128x128xf32>
      %cst_17 = arith.constant dense<0.000000e+00> : vector<128xf32>
      %33 = vector.multi_reduction <add>, %32, %cst_17 [0] : vector<128x128xf32> to vector<128xf32>
      %34 = vector.shape_cast %33 : vector<128xf32> to vector<1x128xf32>
      %cst_18 = arith.constant 8.000000e+01 : f32
      %35 = vector.broadcast %cst_18 : f32 to vector<1x128xf32>
      %36 = arith.cmpf oge, %34, %35 : vector<1x128xf32>
      %37 = arith.select %36, %arg7, %28 : vector<1x128xi1>, vector<1x128xf32>
      %38 = arith.select %36, %28, %arg8 : vector<1x128xi1>, vector<1x128xf32>
      scf.yield %37, %38 : vector<1x128xf32>, vector<1x128xf32>
    }
    %c0_13 = arith.constant 0 : index
    %c0_14 = arith.constant 0 : index
    %c0_15 = arith.constant 0 : index
    %23 = vector.load %arg5[%c0_13, %c0_14, %c0_15] : memref<1x1x128xf32, #tpu.memory_space<vmem>>, vector<1x1x128xf32>
    %24 = vector.shape_cast %23 : vector<1x1x128xf32> to vector<1x128xf32>
    %25 = vector.shape_cast %22#1 : vector<1x128xf32> to vector<1x1x128xf32>
    tpu.vector_store %arg5[%c0_13, %c0_14, %c0_15], %25 {strides = array<i32>} : memref<1x1x128xf32, #tpu.memory_space<vmem>>, vector<1x1x128xf32>,
    return
  }
  func.func @transform_0(%arg0: i32, %arg1: i32) -> (i32, i32, i32) {
    %c0_i32 = arith.constant 0 : i32
    %c0_i32_0 = arith.constant 0 : i32
    return %arg0, %arg1, %c0_i32 : i32, i32, i32
  }
  func.func @transform_1(%arg0: i32, %arg1: i32) -> (i32, i32, i32) {
    %c0_i32 = arith.constant 0 : i32
    %c0_i32_0 = arith.constant 0 : i32
    %c0_i32_1 = arith.constant 0 : i32
    return %arg0, %c0_i32, %c0_i32_0 : i32, i32, i32
  }
  func.func @transform_2(%arg0: i32, %arg1: i32) -> (i32, i32, i32) {
    %c0_i32 = arith.constant 0 : i32
    %c0_i32_0 = arith.constant 0 : i32
    return %arg0, %c0_i32, %arg1 : i32, i32, i32
  }
  func.func @transform_3(%arg0: i32, %arg1: i32) -> (i32, i32, i32) {
    %c0_i32 = arith.constant 0 : i32
    %c0_i32_0 = arith.constant 0 : i32
    return %arg0, %c0_i32, %arg1 : i32, i32, i32
  }
}

module attributes {stable_mosaic.version = 11 : i64} {
  func.func @_head_kernel(%arg0: i32, %arg1: memref<256x42xf32, #tpu.memory_space<vmem>>, %arg2: memref<256x42xf32, #tpu.memory_space<vmem>>, %arg3: memref<256x42xf32, #tpu.memory_space<vmem>>, %arg4: memref<256x42xf32, #tpu.memory_space<vmem>>, %arg5: memref<42x64xbf16, #tpu.memory_space<vmem>>, %arg6: memref<42x64xbf16, #tpu.memory_space<vmem>>, %arg7: memref<42x64xbf16, #tpu.memory_space<vmem>>, %arg8: memref<42x64xbf16, #tpu.memory_space<vmem>>, %arg9: memref<1x64xf32, #tpu.memory_space<vmem>>, %arg10: memref<64x100xbf16, #tpu.memory_space<vmem>>, %arg11: memref<1x100xf32, #tpu.memory_space<vmem>>, %arg12: memref<256x100xf32, #tpu.memory_space<vmem>>) attributes {dimension_semantics = [#tpu.dimension_semantics<parallel>], iteration_bounds = array<i64: 1>, scalar_prefetch = 0 : i64, scratch_operands = 0 : i64, tpu.core_type = #tpu.core_type<tc>, window_params = [{transform_indices = @transform_0, window_bounds = array<i64: 256, 42>}, {transform_indices = @transform_1, window_bounds = array<i64: 256, 42>}, {transform_indices = @transform_2, window_bounds = array<i64: 256, 42>}, {transform_indices = @transform_3, window_bounds = array<i64: 256, 42>}, {pipeline_mode = #tpu.pipeline_mode<synchronous>, transform_indices = @transform_4, window_bounds = array<i64: 42, 64>}, {pipeline_mode = #tpu.pipeline_mode<synchronous>, transform_indices = @transform_5, window_bounds = array<i64: 42, 64>}, {pipeline_mode = #tpu.pipeline_mode<synchronous>, transform_indices = @transform_6, window_bounds = array<i64: 42, 64>}, {pipeline_mode = #tpu.pipeline_mode<synchronous>, transform_indices = @transform_7, window_bounds = array<i64: 42, 64>}, {pipeline_mode = #tpu.pipeline_mode<synchronous>, transform_indices = @transform_8, window_bounds = array<i64: 1, 64>}, {pipeline_mode = #tpu.pipeline_mode<synchronous>, transform_indices = @transform_9, window_bounds = array<i64: 64, 100>}, {pipeline_mode = #tpu.pipeline_mode<synchronous>, transform_indices = @transform_10, window_bounds = array<i64: 1, 100>}, {transform_indices = @transform_11, window_bounds = array<i64: 256, 100>}]} {
    %c0 = arith.constant 0 : index
    %c0_0 = arith.constant 0 : index
    %0 = vector.load %arg1[%c0, %c0_0] : memref<256x42xf32, #tpu.memory_space<vmem>>, vector<256x42xf32>
    %1 = arith.truncf %0 : vector<256x42xf32> to vector<256x42xbf16>
    %c0_1 = arith.constant 0 : index
    %c0_2 = arith.constant 0 : index
    %2 = vector.load %arg5[%c0_1, %c0_2] : memref<42x64xbf16, #tpu.memory_space<vmem>>, vector<42x64xbf16>
    %cst = arith.constant dense<0.000000e+00> : vector<256x64xf32>
    %3 = tpu.matmul %1, %2, %cst {dimension_numbers = #tpu.dot_dimension_numbers<[1], [0], [0], [1], [0, 0, 1, 1], [], []>} : vector<256x42xbf16>, vector<42x64xbf16>, vector<256x64xf32> -> vector<256x64xf32>
    %c0_3 = arith.constant 0 : index
    %c0_4 = arith.constant 0 : index
    %4 = vector.load %arg2[%c0_3, %c0_4] : memref<256x42xf32, #tpu.memory_space<vmem>>, vector<256x42xf32>
    %5 = arith.truncf %4 : vector<256x42xf32> to vector<256x42xbf16>
    %c0_5 = arith.constant 0 : index
    %c0_6 = arith.constant 0 : index
    %6 = vector.load %arg6[%c0_5, %c0_6] : memref<42x64xbf16, #tpu.memory_space<vmem>>, vector<42x64xbf16>
    %cst_7 = arith.constant dense<0.000000e+00> : vector<256x64xf32>
    %7 = tpu.matmul %5, %6, %cst_7 {dimension_numbers = #tpu.dot_dimension_numbers<[1], [0], [0], [1], [0, 0, 1, 1], [], []>} : vector<256x42xbf16>, vector<42x64xbf16>, vector<256x64xf32> -> vector<256x64xf32>
    %8 = arith.addf %3, %7 : vector<256x64xf32>
    %c0_8 = arith.constant 0 : index
    %c0_9 = arith.constant 0 : index
    %9 = vector.load %arg3[%c0_8, %c0_9] : memref<256x42xf32, #tpu.memory_space<vmem>>, vector<256x42xf32>
    %10 = arith.truncf %9 : vector<256x42xf32> to vector<256x42xbf16>
    %c0_10 = arith.constant 0 : index
    %c0_11 = arith.constant 0 : index
    %11 = vector.load %arg7[%c0_10, %c0_11] : memref<42x64xbf16, #tpu.memory_space<vmem>>, vector<42x64xbf16>
    %cst_12 = arith.constant dense<0.000000e+00> : vector<256x64xf32>
    %12 = tpu.matmul %10, %11, %cst_12 {dimension_numbers = #tpu.dot_dimension_numbers<[1], [0], [0], [1], [0, 0, 1, 1], [], []>} : vector<256x42xbf16>, vector<42x64xbf16>, vector<256x64xf32> -> vector<256x64xf32>
    %13 = arith.addf %8, %12 : vector<256x64xf32>
    %c0_13 = arith.constant 0 : index
    %c0_14 = arith.constant 0 : index
    %14 = vector.load %arg4[%c0_13, %c0_14] : memref<256x42xf32, #tpu.memory_space<vmem>>, vector<256x42xf32>
    %15 = arith.truncf %14 : vector<256x42xf32> to vector<256x42xbf16>
    %c0_15 = arith.constant 0 : index
    %c0_16 = arith.constant 0 : index
    %16 = vector.load %arg8[%c0_15, %c0_16] : memref<42x64xbf16, #tpu.memory_space<vmem>>, vector<42x64xbf16>
    %cst_17 = arith.constant dense<0.000000e+00> : vector<256x64xf32>
    %17 = tpu.matmul %15, %16, %cst_17 {dimension_numbers = #tpu.dot_dimension_numbers<[1], [0], [0], [1], [0, 0, 1, 1], [], []>} : vector<256x42xbf16>, vector<42x64xbf16>, vector<256x64xf32> -> vector<256x64xf32>
    %18 = arith.addf %13, %17 : vector<256x64xf32>
    %c0_18 = arith.constant 0 : index
    %c0_19 = arith.constant 0 : index
    %19 = vector.load %arg9[%c0_18, %c0_19] : memref<1x64xf32, #tpu.memory_space<vmem>>, vector<1x64xf32>
    %20 = vector.broadcast %19 : vector<1x64xf32> to vector<256x64xf32>
    %21 = arith.addf %18, %20 : vector<256x64xf32>
    %cst_20 = arith.constant 0.000000e+00 : f32
    %22 = vector.broadcast %cst_20 : f32 to vector<256x64xf32>
    %23 = arith.cmpf oge, %21, %22 : vector<256x64xf32>
    %cst_21 = arith.constant 0.00999999977 : f32
    %24 = vector.broadcast %cst_21 : f32 to vector<256x64xf32>
    %25 = arith.mulf %24, %21 : vector<256x64xf32>
    %26 = arith.select %23, %21, %25 : vector<256x64xi1>, vector<256x64xf32>
    %27 = arith.truncf %26 : vector<256x64xf32> to vector<256x64xbf16>
    %c0_22 = arith.constant 0 : index
    %c0_23 = arith.constant 0 : index
    %28 = vector.load %arg10[%c0_22, %c0_23] : memref<64x100xbf16, #tpu.memory_space<vmem>>, vector<64x100xbf16>
    %cst_24 = arith.constant dense<0.000000e+00> : vector<256x100xf32>
    %29 = tpu.matmul %27, %28, %cst_24 {dimension_numbers = #tpu.dot_dimension_numbers<[1], [0], [0], [1], [0, 0, 1, 1], [], []>} : vector<256x64xbf16>, vector<64x100xbf16>, vector<256x100xf32> -> vector<256x100xf32>
    %c0_25 = arith.constant 0 : index
    %c0_26 = arith.constant 0 : index
    %30 = vector.load %arg11[%c0_25, %c0_26] : memref<1x100xf32, #tpu.memory_space<vmem>>, vector<1x100xf32>
    %31 = vector.broadcast %30 : vector<1x100xf32> to vector<256x100xf32>
    %32 = arith.addf %29, %31 : vector<256x100xf32>
    %cst_27 = arith.constant 0.000000e+00 : f32
    %33 = vector.broadcast %cst_27 : f32 to vector<256x100xf32>
    %34 = arith.cmpf oge, %32, %33 : vector<256x100xf32>
    %cst_28 = arith.constant 0.00999999977 : f32
    %35 = vector.broadcast %cst_28 : f32 to vector<256x100xf32>
    %36 = arith.mulf %35, %32 : vector<256x100xf32>
    %37 = arith.select %34, %32, %36 : vector<256x100xi1>, vector<256x100xf32>
    %c0_29 = arith.constant 0 : index
    %c0_30 = arith.constant 0 : index
    %38 = vector.load %arg12[%c0_29, %c0_30] : memref<256x100xf32, #tpu.memory_space<vmem>>, vector<256x100xf32>
    tpu.vector_store %arg12[%c0_29, %c0_30], %37 {strides = array<i32>} : memref<256x100xf32, #tpu.memory_space<vmem>>, vector<256x100xf32>,
    return
  }
  func.func @transform_0(%arg0: i32) -> (i32, i32) {
    %c0_i32 = arith.constant 0 : i32
    %c0_i32_0 = arith.constant 0 : i32
    return %arg0, %c0_i32 : i32, i32
  }
  func.func @transform_1(%arg0: i32) -> (i32, i32) {
    %c0_i32 = arith.constant 0 : i32
    %c0_i32_0 = arith.constant 0 : i32
    return %arg0, %c0_i32 : i32, i32
  }
  func.func @transform_2(%arg0: i32) -> (i32, i32) {
    %c0_i32 = arith.constant 0 : i32
    %c0_i32_0 = arith.constant 0 : i32
    return %arg0, %c0_i32 : i32, i32
  }
  func.func @transform_3(%arg0: i32) -> (i32, i32) {
    %c0_i32 = arith.constant 0 : i32
    %c0_i32_0 = arith.constant 0 : i32
    return %arg0, %c0_i32 : i32, i32
  }
  func.func @transform_4(%arg0: i32) -> (i32, i32) {
    %c0_i32 = arith.constant 0 : i32
    %c0_i32_0 = arith.constant 0 : i32
    %c0_i32_1 = arith.constant 0 : i32
    return %c0_i32, %c0_i32_0 : i32, i32
  }
  func.func @transform_5(%arg0: i32) -> (i32, i32) {
    %c0_i32 = arith.constant 0 : i32
    %c0_i32_0 = arith.constant 0 : i32
    %c0_i32_1 = arith.constant 0 : i32
    return %c0_i32, %c0_i32_0 : i32, i32
  }
  func.func @transform_6(%arg0: i32) -> (i32, i32) {
    %c0_i32 = arith.constant 0 : i32
    %c0_i32_0 = arith.constant 0 : i32
    %c0_i32_1 = arith.constant 0 : i32
    return %c0_i32, %c0_i32_0 : i32, i32
  }
  func.func @transform_7(%arg0: i32) -> (i32, i32) {
    %c0_i32 = arith.constant 0 : i32
    %c0_i32_0 = arith.constant 0 : i32
    %c0_i32_1 = arith.constant 0 : i32
    return %c0_i32, %c0_i32_0 : i32, i32
  }
  func.func @transform_8(%arg0: i32) -> (i32, i32) {
    %c0_i32 = arith.constant 0 : i32
    %c0_i32_0 = arith.constant 0 : i32
    %c0_i32_1 = arith.constant 0 : i32
    return %c0_i32, %c0_i32_0 : i32, i32
  }
  func.func @transform_9(%arg0: i32) -> (i32, i32) {
    %c0_i32 = arith.constant 0 : i32
    %c0_i32_0 = arith.constant 0 : i32
    %c0_i32_1 = arith.constant 0 : i32
    return %c0_i32, %c0_i32_0 : i32, i32
  }
  func.func @transform_10(%arg0: i32) -> (i32, i32) {
    %c0_i32 = arith.constant 0 : i32
    %c0_i32_0 = arith.constant 0 : i32
    %c0_i32_1 = arith.constant 0 : i32
    return %c0_i32, %c0_i32_0 : i32, i32
  }
  func.func @transform_11(%arg0: i32) -> (i32, i32) {
    %c0_i32 = arith.constant 0 : i32
    %c0_i32_0 = arith.constant 0 : i32
    return %arg0, %c0_i32 : i32, i32
  }
}

</mosaic_0001>

<bundles_post_ra>
// kernel: forward.14
= control target key start
LH: loop header
LB: loop body
LE: loop exit
PB: predicated region body
PF: predicated region fallthrough
CT: control target
= control target key end

     0   :  { %s1167_s12 = smov 0   ;;  %s1169_s13 = smov 0   ;;  %s1501_s0 = inlined_call_operand.vmem [shape: f32[2,128,10], index: 0, kind: input, shape index: {}, may-alias: {0,1}]   ;;  %s1502_s1 = inlined_call_operand.vmem [shape: f32[2,128,10], index: 1, kind: input, shape index: {}, may-alias: {0,1}]   ;;  %s1503_s2 = inlined_call_operand.vmem [shape: f32[2,1,128], index: 2, kind: input, shape index: {}]   ;;  %s1504_s3 = inlined_call_operand.vmem [shape: f32[2,1,128], index: 3, kind: output, shape index: {}]  }
   0x1   :  { %s1171_s14 = smov 0  }
   0x2 LB: > { %s25_s15 = sadd.s32 1, %s1128_s13  ;;  %p871_p0 = scmp.ge.s32.totalorder %s1132_s14, 1  ;;  %s1132_s14 = sphi %s1171_s14, %s13_s14   ;;  %s1128_s13 = sphi %s1169_s13, %s1507_s13   ;;  %s1124_s12 = sphi %s1167_s12, %s1506_s12  }
   0x3   : > { %p27_p1 = scmp.ge.s32.totalorder %s25_s15, 2  ;;  %p181_p2 = scmp.lt.s32.totalorder %s1132_s14, 3 }
   0x5   : > { %s1509_s15 = smov (%p27_p1, %s25_s15), 0  ;;  %p182_p3 = pnand %p871_p0, %p181_p2 }
   0x6   : > { %p222_p4 = scmp.lt.s32.totalorder (!%p182_p3), %s1124_s12, 1  ;;  %s1457_s29 = smov (!%p182_p3), 0  }
   0x7   : > { %185 = sbr.rel (%p182_p3) target bundleno = 365 (0x16d), region = 32 }
   0xc   : > { %s1511_s12 = smov (!%p222_p4, %s1124_s12), 1  ;;  %vm296_vm0 = vcmask 80896  }
   0xd   : > { %s927_s16 = sshll.u32 %s1511_s12, 7  ;;  %s247_s19 = scalar_lea.vmem %s1504_s3, %s1511_s12 }
   0xe   : > { %s1195_s22 = scalar_lea.vmem %s1501_s0, %s927_s16  ;;  %s1206_s25 = scalar_lea.vmem %s1502_s1, %s927_s16 }
   0xf   : > { %v263_v0 = vld [vmem:[%s1195_s22 + $0x78] sm:$0xff]  ;;  %v262_v1 = vld [vmem:[%s1195_s22 + $0x70] sm:$0xff]  ;;  %v261_v2 = vld [vmem:[%s1195_s22 + $0x68] sm:$0xff]  ;;  %s241_s28 = scalar_lea.vmem %s1503_s2, %s1511_s12 }
  0x10   : > { %961 = vmatprep.subr.msk.mxu0 %vm296_vm0, %v263_v0  ;;  %1017 = vmatprep.subr.msk.mxu1 %vm296_vm0, %v263_v0  ;;  %v264_v3 = vld [vmem:[%s1206_s25] sm:$0xff]  ;;  %v1213_v4 = vld [vmem:[%s1206_s25 + $0x8] sm:$0xff]  ;;  %v1219_v7 = vld [vmem:[%s1206_s25 + $0x10] sm:$0xff] }
  0x11   : > { %962 = vmatpush3.xpose.msk.msra.mxu0 %vm296_vm0, %v263_v0  ;;  %1033 = vmatpush3.xpose.msk.msra.mxu1 %vm296_vm0, %v263_v0  ;;  %v280_v5 = vmul.f32 %v264_v3, %v264_v3  ;;  %v272_v6 = vld [vmem:[%s1206_s25 + $0x40] sm:$0xff]  ;;  %v281_v8 = vmul.f32 %v1213_v4, %v1213_v4  ;;  %v282_v9 = vmul.f32 %v1219_v7, %v1219_v7  ;;  %v1231_v11 = vld [vmem:[%s1206_s25 + $0x18] sm:$0xff]  ;;  %v1249_v19 = vld [vmem:[%s1206_s25 + $0x28] sm:$0xff] }
  0x12   : > { %963 = vmatprep.subr.msk.mxu0 %vm296_vm0, %v262_v1  ;;  %1018 = vmatprep.subr.msk.mxu1 %vm296_vm0, %v262_v1  ;;  %v260_v10 = vld [vmem:[%s1195_s22 + $0x60] sm:$0xff]  ;;  %v283_v15 = vmul.f32 %v1231_v11, %v1231_v11  ;;  %v259_v18 = vld [vmem:[%s1195_s22 + $0x58] sm:$0xff]  ;;  %v1252_v20 = vld [vmem:[%s1206_s25 + $0x30] sm:$0xff]  ;;  %v285_v22 = vmul.f32 %v1249_v19, %v1249_v19  ;;  %v288_v29 = vmul.f32 %v272_v6, %v272_v6 }
  0x13   : > { %993 = vmatprep.mubr.msk.f32.mxu0 %vm296_vm0, %v264_v3  ;;  %1005 = vmatprep.mubr.msk.f32.mxu1 %vm296_vm0, %v272_v6  ;;  %v297_v12 = vsel %vm296_vm0, %v280_v5, 0.0  ;;  %v1235_v13 = vld [vmem:[%s1206_s25 + $0x20] sm:$0xff]  ;;  %v303_v14 = vsel %vm296_vm0, %v282_v9, 0.0  ;;  %v300_v16 = vsel %vm296_vm0, %v281_v8, 0.0  ;;  %v286_v24 = vmul.f32 %v1252_v20, %v1252_v20  ;;  %v258_v25 = vld [vmem:[%s1195_s22 + $0x50] sm:$0xff]  ;;  %v1266_v26 = vld [vmem:[%s1206_s25 + $0x38] sm:$0xff] }
  0x14   : > { %298 = vadd.xlane.f32.xlu0 %v297_v12  ;;  %v284_v17 = vmul.f32 %v1235_v13, %v1235_v13  ;;  %304 = vadd.xlane.f32.xlu1 %v303_v14  ;;  %v306_v21 = vsel %vm296_vm0, %v283_v15, 0.0  ;;  %v312_v27 = vsel %vm296_vm0, %v285_v22, 0.0  ;;  %v287_v28 = vmul.f32 %v1266_v26, %v1266_v26  ;;  %v257_v31 = vld [vmem:[%s1195_s22 + $0x48] sm:$0xff]  ;;  %v1281_v33 = vld [vmem:[%s1206_s25 + $0x50] sm:$0xff]  ;;  %v256_v38 = vld [vmem:[%s1195_s22 + $0x40] sm:$0xff] }
  0x15   : > { %964 = vmatpush3.xpose.msk.msra.mxu0 %vm296_vm0, %v262_v1  ;;  %1034 = vmatpush3.xpose.msk.msra.mxu1 %vm296_vm0, %v262_v1  ;;  %v315_v30 = vsel %vm296_vm0, %v286_v24, 0.0  ;;  %v1278_v32 = vld [vmem:[%s1206_s25 + $0x48] sm:$0xff]  ;;  %v321_v36 = vsel %vm296_vm0, %v288_v29, 0.0  ;;  %v290_v37 = vmul.f32 %v1281_v33, %v1281_v33  ;;  %v1295_v39 = vld [vmem:[%s1206_s25 + $0x58] sm:$0xff]  ;;  %v1298_v40 = vld [vmem:[%s1206_s25 + $0x60] sm:$0xff] }
  0x16   : > { %965 = vmatprep.subr.msk.mxu0 %vm296_vm0, %v261_v2  ;;  %1019 = vmatprep.subr.msk.mxu1 %vm296_vm0, %v261_v2  ;;  %v309_v23 = vsel %vm296_vm0, %v284_v17, 0.0  ;;  %v318_v34 = vsel %vm296_vm0, %v287_v28, 0.0  ;;  %v289_v35 = vmul.f32 %v1278_v32, %v1278_v32  ;;  %v291_v42 = vmul.f32 %v1295_v39, %v1295_v39  ;;  %v255_v45 = vld [vmem:[%s1195_s22 + $0x38] sm:$0xff]  ;;  %v1312_v46 = vld [vmem:[%s1206_s25 + $0x68] sm:$0xff]  ;;  %v1315_v47 = vld [vmem:[%s1206_s25 + $0x70] sm:$0xff] }
  0x17   : > { %v327_v43 = vsel %vm296_vm0, %v290_v37, 0.0  ;;  %v292_v44 = vmul.f32 %v1298_v40, %v1298_v40  ;;  %v293_v49 = vmul.f32 %v1312_v46, %v1312_v46  ;;  %v294_v51 = vmul.f32 %v1315_v47, %v1315_v47  ;;  %v254_v52 = vld [vmem:[%s1195_s22 + $0x30] sm:$0xff]  ;;  %v279_v53 = vld [vmem:[%s1206_s25 + $0x78] sm:$0xff]  ;;  %v253_v57 = vld [vmem:[%s1195_s22 + $0x28] sm:$0xff] }
  0x18   : > { %301 = vadd.xlane.f32.xlu0 %v300_v16  ;;  %307 = vadd.xlane.f32.xlu1 %v306_v21  ;;  %v324_v41 = vsel %vm296_vm0, %v289_v35, 0.0  ;;  %v330_v48 = vsel %vm296_vm0, %v291_v42, 0.0  ;;  %v295_v55 = vmul.f32 %v279_v53, %v279_v53  ;;  %v252_v59 = vld [vmem:[%s1195_s22 + $0x20] sm:$0xff]  ;;  %v251_v60 = vld [vmem:[%s1195_s22 + $0x18] sm:$0xff]  ;;  %v250_v61 = vld [vmem:[%s1195_s22 + $0x10] sm:$0xff] }
  0x19   : > { %966 = vmatpush3.xpose.msk.msra.mxu0 %vm296_vm0, %v261_v2  ;;  %1035 = vmatpush3.xpose.msk.msra.mxu1 %vm296_vm0, %v261_v2  ;;  %v333_v50 = vsel %vm296_vm0, %v292_v44, 0.0  ;;  %v336_v54 = vsel %vm296_vm0, %v293_v49, 0.0  ;;  %v339_v56 = vsel %vm296_vm0, %v294_v51, 0.0  ;;  %v249_v62 = vld [vmem:[%s1195_s22 + $0x8] sm:$0xff]  ;;  %v248_v63 = vld [vmem:[%s1195_s22] sm:$0xff] }
  0x1a   : > { %967 = vmatprep.subr.msk.mxu0 %vm296_vm0, %v260_v10  ;;  %1020 = vmatprep.subr.msk.mxu1 %vm296_vm0, %v260_v10  ;;  %v342_v58 = vsel %vm296_vm0, %v295_v55, 0.0  ;;  %v908_v16 = vld [vmem:[%s241_s28] ss:$0 sm:$0xff] }
  0x1c   : > { %310 = vadd.xlane.f32.xlu0 %v309_v23  ;;  %313 = vadd.xlane.f32.xlu1 %v312_v27 }
  0x1d   : > { %968 = vmatpush3.xpose.msk.msra.mxu0 %vm296_vm0, %v260_v10  ;;  %1036 = vmatpush3.xpose.msk.msra.mxu1 %vm296_vm0, %v260_v10 }
  0x1e   : > { %969 = vmatprep.subr.msk.mxu0 %vm296_vm0, %v259_v18  ;;  %1021 = vmatprep.subr.msk.mxu1 %vm296_vm0, %v259_v18 }
  0x20   : > { %316 = vadd.xlane.f32.xlu0 %v315_v30  ;;  %319 = vadd.xlane.f32.xlu1 %v318_v34 }
  0x21   : > { %970 = vmatpush3.xpose.msk.msra.mxu0 %vm296_vm0, %v259_v18  ;;  %1037 = vmatpush3.xpose.msk.msra.mxu1 %vm296_vm0, %v259_v18 }
  0x22   : > { %971 = vmatprep.subr.msk.mxu0 %vm296_vm0, %v258_v25  ;;  %1022 = vmatprep.subr.msk.mxu1 %vm296_vm0, %v258_v25 }
  0x24   : > { %322 = vadd.xlane.f32.xlu0 %v321_v36  ;;  %325 = vadd.xlane.f32.xlu1 %v324_v41 }
  0x25   : > { %972 = vmatpush3.xpose.msk.msra.mxu0 %vm296_vm0, %v258_v25  ;;  %1038 = vmatpush3.xpose.msk.msra.mxu1 %vm296_vm0, %v258_v25 }
  0x26   : > { %973 = vmatprep.subr.msk.mxu0 %vm296_vm0, %v257_v31  ;;  %1023 = vmatprep.subr.msk.mxu1 %vm296_vm0, %v257_v31 }
  0x28   : > { %328 = vadd.xlane.f32.xlu0 %v327_v43  ;;  %331 = vadd.xlane.f32.xlu1 %v330_v48 }
  0x29   : > { %974 = vmatpush3.xpose.msk.msra.mxu0 %vm296_vm0, %v257_v31  ;;  %1039 = vmatpush3.xpose.msk.msra.mxu1 %vm296_vm0, %v257_v31 }
  0x2a   : > { %975 = vmatprep.subr.msk.mxu0 %vm296_vm0, %v256_v38  ;;  %1024 = vmatprep.subr.msk.mxu1 %vm296_vm0, %v256_v38 }
  0x2c   : > { %334 = vadd.xlane.f32.xlu0 %v333_v50  ;;  %337 = vadd.xlane.f32.xlu1 %v336_v54 }
  0x2d   : > { %976 = vmatpush3.xpose.msk.msra.mxu0 %vm296_vm0, %v256_v38  ;;  %1040 = vmatpush3.xpose.msk.msra.mxu1 %vm296_vm0, %v256_v38 }
  0x2e   : > { %977 = vmatprep.subr.msk.mxu0 %vm296_vm0, %v255_v45  ;;  %1025 = vmatprep.subr.msk.mxu1 %vm296_vm0, %v255_v45 }
  0x30   : > { %340 = vadd.xlane.f32.xlu0 %v339_v56  ;;  %343 = vadd.xlane.f32.xlu1 %v342_v58 }
  0x31   : > { %978 = vmatpush3.xpose.msk.msra.mxu0 %vm296_vm0, %v255_v45  ;;  %1041 = vmatpush3.xpose.msk.msra.mxu1 %vm296_vm0, %v255_v45 }
  0x32   : > { %979 = vmatprep.subr.msk.mxu0 %vm296_vm0, %v254_v52  ;;  %1026 = vmatprep.subr.msk.mxu1 %vm296_vm0, %v254_v52 }
  0x35   : > { %980 = vmatpush3.xpose.msk.msra.mxu0 %vm296_vm0, %v254_v52  ;;  %1042 = vmatpush3.xpose.msk.msra.mxu1 %vm296_vm0, %v254_v52 }
  0x36   : > { %981 = vmatprep.subr.msk.mxu0 %vm296_vm0, %v253_v57  ;;  %1027 = vmatprep.subr.msk.mxu1 %vm296_vm0, %v253_v57 }
  0x39   : > { %982 = vmatpush3.xpose.msk.msra.mxu0 %vm296_vm0, %v253_v57  ;;  %1043 = vmatpush3.xpose.msk.msra.mxu1 %vm296_vm0, %v253_v57 }
  0x3a   : > { %983 = vmatprep.subr.msk.mxu0 %vm296_vm0, %v252_v59  ;;  %1028 = vmatprep.subr.msk.mxu1 %vm296_vm0, %v252_v59 }
  0x3d   : > { %984 = vmatpush3.xpose.msk.msra.mxu0 %vm296_vm0, %v252_v59  ;;  %1044 = vmatpush3.xpose.msk.msra.mxu1 %vm296_vm0, %v252_v59 }
  0x3e   : > { %985 = vmatprep.subr.msk.mxu0 %vm296_vm0, %v251_v60  ;;  %1029 = vmatprep.subr.msk.mxu1 %vm296_vm0, %v251_v60 }
  0x41   : > { %986 = vmatpush3.xpose.msk.msra.mxu0 %vm296_vm0, %v251_v60  ;;  %1045 = vmatpush3.xpose.msk.msra.mxu1 %vm296_vm0, %v251_v60 }
  0x42   : > { %987 = vmatprep.subr.msk.mxu0 %vm296_vm0, %v250_v61  ;;  %1030 = vmatprep.subr.msk.mxu1 %vm296_vm0, %v250_v61 }
  0x45   : > { %988 = vmatpush3.xpose.msk.msra.mxu0 %vm296_vm0, %v250_v61  ;;  %1046 = vmatpush3.xpose.msk.msra.mxu1 %vm296_vm0, %v250_v61 }
  0x46   : > { %989 = vmatprep.subr.msk.mxu0 %vm296_vm0, %v249_v62  ;;  %1031 = vmatprep.subr.msk.mxu1 %vm296_vm0, %v249_v62 }
  0x49   : > { %990 = vmatpush3.xpose.msk.msra.mxu0 %vm296_vm0, %v249_v62  ;;  %1047 = vmatpush3.xpose.msk.msra.mxu1 %vm296_vm0, %v249_v62 }
  0x4a   : > { %991 = vmatprep.subr.msk.mxu0 %vm296_vm0, %v248_v63  ;;  %1032 = vmatprep.subr.msk.mxu1 %vm296_vm0, %v248_v63 }
  0x4d   : > { %992 = vmatpush3.xpose.msk.msra.mxu0 %vm296_vm0, %v248_v63  ;;  %1048 = vmatpush3.xpose.msk.msra.mxu1 %vm296_vm0, %v248_v63 }
  0x50   : > { %994 = vmatmul.mubr.msk.f32.vlgmr.msra.gmra.mxu0 %vm296_vm0, %v1213_v4  ;;  %1006 = vmatmul.mubr.msk.f32.vlgmr.msra.gmra.mxu1 %vm296_vm0, %v1278_v32 }
  0x51   : > { %996 = vmatprep.mubr.msk.f32.mxu0 %vm296_vm0, %v1219_v7  ;;  %1008 = vmatprep.mubr.msk.f32.mxu1 %vm296_vm0, %v1281_v33 }
  0x54   : > { %997 = vmatmul.mubr.msk.f32.gmra.mxu0 %vm296_vm0, %v1231_v11  ;;  %1009 = vmatmul.mubr.msk.f32.gmra.mxu1 %vm296_vm0, %v1295_v39 }
  0x55   : > { %999 = vmatprep.mubr.msk.f32.mxu0 %vm296_vm0, %v1235_v13  ;;  %1011 = vmatprep.mubr.msk.f32.mxu1 %vm296_vm0, %v1298_v40 }
  0x58   : > { %1000 = vmatmul.mubr.msk.f32.gmra.mxu0 %vm296_vm0, %v1249_v19  ;;  %1012 = vmatmul.mubr.msk.f32.gmra.mxu1 %vm296_vm0, %v1312_v46 }
  0x59   : > { %1002 = vmatprep.mubr.msk.f32.mxu0 %vm296_vm0, %v1252_v20  ;;  %1014 = vmatprep.mubr.msk.f32.mxu1 %vm296_vm0, %v1315_v47 }
  0x5c   : > { %1003 = vmatmul.mubr.msk.f32.gmra.mxu0 %vm296_vm0, %v1266_v26  ;;  %1015 = vmatmul.mubr.msk.f32.gmra.mxu1 %vm296_vm0, %v279_v53 }
  0x9d   : > { %v305_v0 = vpop.xlane.xlu1 %304  ;;  %v299_v1 = vpop.xlane.xlu0 %298 }
  0x9e   : > { %v1399_v19 = vadd.f32 %v908_v16, %v305_v0  ;;  %v593_v20 = vadd.f32 %v908_v16, %v299_v1 }
  0xa1   : > { %v308_v2 = vpop.xlane.xlu1 %307  ;;  %v302_v3 = vpop.xlane.xlu0 %301 }
  0xa2   : > { %v596_v25 = vadd.f32 %v908_v16, %v308_v2  ;;  %v594_v26 = vadd.f32 %v908_v16, %v302_v3 }
  0xa5   : > { %v314_v4 = vpop.xlane.xlu1 %313  ;;  %v311_v5 = vpop.xlane.xlu0 %310 }
  0xa6   : > { %v598_v27 = vadd.f32 %v908_v16, %v314_v4  ;;  %v597_v28 = vadd.f32 %v908_v16, %v311_v5 }
  0xa9   : > { %v320_v6 = vpop.xlane.xlu1 %319  ;;  %v317_v7 = vpop.xlane.xlu0 %316 }
  0xaa   : > { %v1401_v31 = vadd.f32 %v908_v16, %v317_v7  ;;  %v600_v37 = vadd.f32 %v908_v16, %v320_v6 }
  0xad   : > { %v326_v8 = vpop.xlane.xlu1 %325  ;;  %v323_v9 = vpop.xlane.xlu0 %322 }
  0xae   : > { %v601_v32 = vadd.f32 %v908_v16, %v323_v9  ;;  %v602_v39 = vadd.f32 %v908_v16, %v326_v8 }
  0xb1   : > { %v332_v10 = vpop.xlane.xlu1 %331  ;;  %v329_v11 = vpop.xlane.xlu0 %328 }
  0xb2   : > { %v603_v40 = vadd.f32 %v908_v16, %v329_v11  ;;  %v604_v43 = vadd.f32 %v908_v16, %v332_v10 }
  0xb5   : > { %v338_v12 = vpop.xlane.xlu1 %337  ;;  %v335_v13 = vpop.xlane.xlu0 %334 }
  0xb6   : > { %v605_v46 = vadd.f32 %v908_v16, %v335_v13  ;;  %v606_v48 = vadd.f32 %v908_v16, %v338_v12 }
  0xb9   : > { %v344_v29 = vpop.xlane.xlu1 %343  ;;  %v341_v30 = vpop.xlane.xlu0 %340 }
  0xba   : > { %v608_v49 = vadd.f32 %v908_v16, %v344_v29  ;;  %v607_v50 = vadd.f32 %v908_v16, %v341_v30 }
 0x110   : > { %v995_v14 = vpop.f32.mrf.mxu0  ;;  %v1007_v15 = vpop.f32.mrf.mxu1 }
 0x111   : > { %v610_v21 = vmul.f32 2.0, %v995_v14  ;;  %v618_v38 = vmul.f32 2.0, %v1007_v15 }
 0x112   : > { %v507_v17 = vpop.f32.mrf.mxu0  ;;  %v547_v18 = vpop.f32.mrf.mxu1 }
 0x113   : > { %v609_v22 = vmul.f32 2.0, %v507_v17  ;;  %v617_v34 = vmul.f32 2.0, %v547_v18  ;;  %v626_v41 = vsub.f32 %v594_v26, %v610_v21  ;;  %v634_v57 = vsub.f32 %v602_v39, %v618_v38 }
 0x114   : > { %v998_v23 = vpop.f32.mrf.mxu0  ;;  %v1010_v24 = vpop.f32.mrf.mxu1 }
 0x115   : > { %v612_v33 = vmul.f32 2.0, %v998_v23  ;;  %v625_v42 = vsub.f32 %v593_v20, %v609_v22  ;;  %v633_v52 = vsub.f32 %v601_v32, %v617_v34  ;;  %v620_v54 = vmul.f32 2.0, %v1010_v24 }
 0x116   : > { %v517_v35 = vpop.f32.mrf.mxu0  ;;  %v557_v36 = vpop.f32.mrf.mxu1  ;;  %v1403_v61 = vmax.f32 %v626_v41, 0.0 }
 0x117   : > { %v628_v51 = vsub.f32 %v596_v25, %v612_v33  ;;  %v611_v53 = vmul.f32 2.0, %v517_v35  ;;  %v619_v59 = vmul.f32 2.0, %v557_v36  ;;  %v1405_v62 = vmax.f32 %v625_v42, 0.0 }
 0x118   : > { %v1001_v44 = vpop.f32.mrf.mxu0  ;;  %v1013_v45 = vpop.f32.mrf.mxu1  ;;  %v1411_v8 = vmax.f32 %v633_v52, 0.0  ;;  %v636_v10 = vsub.f32 %v604_v43, %v620_v54  ;;  %v1423_v25 = vmax.f32 %v634_v57, 0.0  ;;  %v1455_v54 = vmov 0.0  }
 0x119   : > { %v614_v47 = vmul.f32 2.0, %v1001_v44  ;;  %v622_v63 = vmul.f32 2.0, %v1013_v45  ;;  %v1409_v7 = vmax.f32 %v628_v51, 0.0  ;;  %v627_v9 = vsub.f32 %v1399_v19, %v611_v53 }
 0x11a   : > { %v527_v55 = vpop.f32.mrf.mxu0  ;;  %v567_v56 = vpop.f32.mrf.mxu1  ;;  %v635_v13 = vsub.f32 %v603_v40, %v619_v59 }
 0x11b   : > { %v630_v58 = vsub.f32 %v598_v27, %v614_v47  ;;  %v613_v60 = vmul.f32 2.0, %v527_v55  ;;  %v621_v1 = vmul.f32 2.0, %v567_v56  ;;  %v638_v18 = vsub.f32 %v606_v48, %v622_v63 }
 0x11c   : > { %v1004_v0 = vpop.f32.mrf.mxu0  ;;  %v1016_v2 = vpop.f32.mrf.mxu1  ;;  %v1425_v26 = vmax.f32 %v627_v9, 0.0  ;;  %v1427_v27 = vmax.f32 %v636_v10, 0.0  ;;  %v1434_v33 = vmax.f32 %v635_v13, 0.0 }
 0x11d   : > { %v1407_v3 = vmax.f32 %v630_v58, 0.0  ;;  %v629_v4 = vsub.f32 %v597_v28, %v613_v60  ;;  %v616_v5 = vmul.f32 2.0, %v1004_v0  ;;  %v624_v6 = vmul.f32 2.0, %v1016_v2 }
 0x11e   : > { %v537_v11 = vpop.f32.mrf.mxu0  ;;  %v577_v12 = vpop.f32.mrf.mxu1  ;;  %v637_v20 = vsub.f32 %v605_v46, %v621_v1  ;;  %v1436_v34 = vmax.f32 %v638_v18, 0.0 }
 0x11f   : > { %v1414_v14 = vmax.f32 %v629_v4, 0.0  ;;  %v632_v15 = vsub.f32 %v600_v37, %v616_v5  ;;  %v615_v16 = vmul.f32 2.0, %v537_v11  ;;  %v658_v17 = vmax.f32 %v1403_v61, %v1407_v3 }
 0x120   : > { %v623_v21 = vmul.f32 2.0, %v577_v12  ;;  %v640_v24 = vsub.f32 %v608_v49, %v624_v6 }
 0x121   : > { %v657_v22 = vmax.f32 %v1405_v62, %v1414_v14  ;;  %v1420_v23 = vmax.f32 %v632_v15, 0.0  ;;  %v631_v19 = vsub.f32 %v1401_v31, %v615_v16  ;;  %v1438_v31 = vmax.f32 %v637_v20, 0.0 }
 0x122   : > { %v639_v32 = vsub.f32 %v607_v50, %v623_v21  ;;  %v662_v35 = vmax.f32 %v658_v17, %v1423_v25  ;;  %v1443_v37 = vmax.f32 %v640_v24, 0.0 }
 0x123   : > { %v660_v28 = vmax.f32 %v1409_v7, %v1420_v23  ;;  %v661_v29 = vmax.f32 %v657_v22, %v1411_v8  ;;  %v1432_v30 = vmax.f32 %v631_v19, 0.0 }
 0x124   : > { %v1447_v40 = vmax.f32 %v639_v32, 0.0  ;;  %v666_v42 = vmax.f32 %v662_v35, %v1436_v34 }
 0x125   : > { %v659_v36 = vmax.f32 %v1425_v26, %v1432_v30  ;;  %v664_v38 = vmax.f32 %v660_v28, %v1427_v27  ;;  %v665_v39 = vmax.f32 %v661_v29, %v1438_v31 }
 0x127   : > { %v663_v41 = vmax.f32 %v659_v36, %v1434_v33  ;;  %v668_v43 = vmax.f32 %v664_v38, %v1443_v37  ;;  %v669_v45 = vmax.f32 %v665_v39, %v666_v42 }
 0x129   : > { %v667_v44 = vmax.f32 %v663_v41, %v1447_v40 }
 0x12b   : > { %v670_v46 = vmax.f32 %v667_v44, %v668_v43 }
 0x12d   : > { %v671_v47 = vmax.f32 %v669_v45, %v670_v46 }
 0x12f   : > { %v672_v48 = vrot.slane %v671_v47, 4 }
 0x131   : > { %v673_v49 = vmax.f32 %v671_v47, %v672_v48 }
 0x133   : > { %v674_v50 = vrot.slane %v673_v49, 2 }
 0x135   : > { %v675_v51 = vmax.f32 %v673_v49, %v674_v50 }
 0x137   : > { %v676_v52 = vrot.slane %v675_v51, 1 }
 0x139   : > { %v677_v53 = vmax.f32 %v675_v51, %v676_v52  }
 0x13a LB: >> { %v686_v55 = vadd.f32 %v1136_v53, %v1140_v54  ;;  %v1146_v57 = vmov 0.0   ;;  %s683_s29 = sadd.s32 1, %s1144_s29   ;;  %s1144_s29 = sphi %s1457_s29, %s683_s29   ;;  %v1140_v54 = vphi %v1455_v54, %v758_v54   ;;  %v1136_v53 = vphi %v677_v53, %v1505_v53  }
 0x13b   : >> { %p680_p5 = scmp.ge.s32.totalorder %s683_s29, 26  }
 0x13c   : >> { %v687_v56 = vmul.f32 0.5, %v686_v55 }
 0x13e   : >> { %vm688_vm1 = vcmp.le.f32.partialorder %v1405_v62, %v687_v56  ;;  %vm689_vm2 = vcmp.le.f32.partialorder %v1403_v61, %v687_v56  ;;  %vm690_vm3 = vcmp.le.f32.partialorder %v1425_v26, %v687_v56  ;;  %vm691_vm4 = vcmp.le.f32.partialorder %v1409_v7, %v687_v56 }
 0x13f   : >> { %v909_v58 = vsel %vm688_vm1, 1.0, %v1146_v57  ;;  %v910_v59 = vsel %vm689_vm2, 1.0, %v1146_v57  ;;  %v911_v60 = vsel %vm690_vm3, 1.0, %v1146_v57  ;;  %vm692_vm5 = vcmp.le.f32.partialorder %v1414_v14, %v687_v56 }
 0x140   : >> { %v736_v63 = vadd.f32 %v910_v59, %v909_v58  ;;  %v912_v0 = vsel %vm691_vm4, 1.0, %v1146_v57  ;;  %vm693_vm6 = vcmp.le.f32.partialorder %v1407_v3, %v687_v56  ;;  %v913_v2 = vsel %vm692_vm5, 1.0, %v1146_v57 }
 0x141   : >> { %vm694_vm7 = vcmp.le.f32.partialorder %v1432_v30, %v687_v56  ;;  %v914_v5 = vsel %vm693_vm6, 1.0, %v1146_v57  ;;  %vm695_vm8 = vcmp.le.f32.partialorder %v1420_v23, %v687_v56  ;;  %vm696_vm9 = vcmp.le.f32.partialorder %v1411_v8, %v687_v56 }
 0x142   : >> { %v737_v1 = vadd.f32 %v911_v60, %v736_v63  ;;  %v915_v9 = vsel %vm694_vm7, 1.0, %v1146_v57  ;;  %v916_v11 = vsel %vm695_vm8, 1.0, %v1146_v57  ;;  %vm697_vm10 = vcmp.le.f32.partialorder %v1423_v25, %v687_v56 }
 0x143   : >> { %v917_v13 = vsel %vm696_vm9, 1.0, %v1146_v57  ;;  %vm698_vm11 = vcmp.le.f32.partialorder %v1434_v33, %v687_v56  ;;  %v918_v16 = vsel %vm697_vm10, 1.0, %v1146_v57  ;;  %vm699_vm12 = vcmp.le.f32.partialorder %v1427_v27, %v687_v56 }
 0x144   : >> { %v738_v4 = vadd.f32 %v912_v0, %v737_v1  ;;  %v919_v18 = vsel %vm698_vm11, 1.0, %v1146_v57  ;;  %vm700_vm13 = vcmp.le.f32.partialorder %v1438_v31, %v687_v56  ;;  %v920_v21 = vsel %vm699_vm12, 1.0, %v1146_v57 }
 0x145   : >> { %vm701_vm14 = vcmp.le.f32.partialorder %v1436_v34, %v687_v56  ;;  %v921_v19 = vsel %vm700_vm13, 1.0, %v1146_v57  ;;  %vm702_vm15 = vcmp.le.f32.partialorder %v1447_v40, %v687_v56  ;;  %vm703_vm0 = vcmp.le.f32.partialorder %v1443_v37, %v687_v56 }
 0x146   : >> { %v739_v6 = vadd.f32 %v913_v2, %v738_v4  ;;  %v922_v28 = vsel %vm701_vm14, 1.0, %v1146_v57  ;;  %v923_v32 = vsel %vm702_vm15, 1.0, %v1146_v57  ;;  %v924_v36 = vsel %vm703_vm0, 1.0, %v1146_v57 }
 0x148   : >> { %v740_v10 = vadd.f32 %v914_v5, %v739_v6 }
 0x14a   : >> { %v741_v12 = vadd.f32 %v915_v9, %v740_v10 }
 0x14c   : >> { %v742_v15 = vadd.f32 %v916_v11, %v741_v12 }
 0x14e   : >> { %v743_v17 = vadd.f32 %v917_v13, %v742_v15 }
 0x150   : >> { %v744_v20 = vadd.f32 %v918_v16, %v743_v17 }
 0x152   : >> { %v745_v22 = vadd.f32 %v919_v18, %v744_v20 }
 0x154   : >> { %v746_v24 = vadd.f32 %v920_v21, %v745_v22 }
 0x156   : >> { %v747_v29 = vadd.f32 %v921_v19, %v746_v24 }
 0x158   : >> { %v748_v35 = vadd.f32 %v922_v28, %v747_v29 }
 0x15a   : >> { %v749_v38 = vadd.f32 %v923_v32, %v748_v35 }
 0x15c   : >> { %v750_v39 = vadd.f32 %v924_v36, %v749_v38 }
 0x15e   : >> { %v751_v41 = vrot.slane %v750_v39, 4 }
 0x160   : >> { %v752_v42 = vadd.f32 %v751_v41, %v750_v39 }
 0x162   : >> { %v753_v43 = vrot.slane %v752_v42, 2 }
 0x164   : >> { %v754_v44 = vadd.f32 %v753_v43, %v752_v42 }
 0x166   : >> { %v755_v45 = vrot.slane %v754_v44, 1 }
 0x168   : >> { %v756_v46 = vadd.f32 %v755_v45, %v754_v44  ;;  %682 = sbr.rel (!%p680_p5) target bundleno = 314 (0x13a), region = 75 }
 0x16a   : >> { %vm757_vm1 = vcmp.ge.f32.partialorder %v756_v46, 40.0 }
 0x16b   : >> { %v758_v54 = vsel %vm757_vm1, %v1140_v54, %v687_v56   ;;  %v759_v47 = vsel %vm757_vm1, %v687_v56, %v1136_v53  }
 0x16c   : >> { %v1505_v53 = vmov %v759_v47  ;;  %760 = vst [vmem:[%s247_s19] sm:$0x1] (%p680_p5), %v759_v47 }
 0x16d PF: > { %s13_s14 = sadd.s32 1, %s1132_s14   ;;  %s1506_s12 = smov %s1128_s13 }
 0x16e   : > { %p10_p6 = scmp.ge.s32.totalorder %s13_s14, 4   ;;  %s1507_s13 = smov %s1509_s15 }
 0x170   :  { %12 = sbr.rel (!%p10_p6) target bundleno = 2 (0x2), region = 86 }

// kernel: forward.16
= control target key start
LH: loop header
LB: loop body
LE: loop exit
PB: predicated region body
PF: predicated region fallthrough
CT: control target
= control target key end

     0   :  { %s2424_s18 = smov 0   ;;  %s2426_s19 = smov 0   ;;  %s2768_s0 = inlined_call_operand.vmem [shape: f32[2,128,42], index: 0, kind: input, shape index: {}]   ;;  %s2769_s1 = inlined_call_operand.vmem [shape: f32[2,1,64], index: 1, kind: input, shape index: {}]   ;;  %s2770_s2 = inlined_call_operand.vmem [shape: bf16[42,64], index: 2, kind: input, shape index: {}]   ;;  %s2771_s3 = inlined_call_operand.vmem [shape: bf16[64,128], index: 3, kind: input, shape index: {}]   ;;  %s2772_s4 = inlined_call_operand.vmem [shape: f32[1,128], index: 4, kind: input, shape index: {}]   ;;  %s2773_s5 = inlined_call_operand.vmem [shape: bf16[128,64], index: 5, kind: input, shape index: {}]   ;;  %s2774_s6 = inlined_call_operand.vmem [shape: f32[1,64], index: 6, kind: input, shape index: {}]   ;;  %s2775_s7 = inlined_call_operand.vmem [shape: bf16[64,10], index: 7, kind: input, shape index: {}]   ;;  %s2776_s8 = inlined_call_operand.vmem [shape: f32[1,10], index: 8, kind: input, shape index: {}]   ;;  %s2777_s9 = inlined_call_operand.vmem [shape: bf16[64,21], index: 9, kind: input, shape index: {}]   ;;  %s2778_s10 = inlined_call_operand.vmem [shape: f32[1,21], index: 10, kind: input, shape index: {}]   ;;  %s2779_s11 = inlined_call_operand.vmem [shape: bf16[64,42], index: 11, kind: input, shape index: {}]   ;;  %s2780_s12 = inlined_call_operand.vmem [shape: f32[1,42], index: 12, kind: input, shape index: {}]   ;;  %s2781_s13 = inlined_call_operand.vmem [shape: f32[2,128,10], index: 13, kind: output, shape index: {0}]   ;;  %s2782_s14 = inlined_call_operand.vmem [shape: f32[2,128,21], index: 14, kind: output, shape index: {1}]   ;;  %s2783_s15 = inlined_call_operand.vmem [shape: f32[2,128,42], index: 15, kind: output, shape index: {2}]  }
   0x1   :  { %s2428_s20 = smov 0  }
   0x2 LB: > { %s38_s21 = sadd.s32 1, %s2338_s19  ;;  %p1859_p0 = scmp.ge.s32.totalorder %s2342_s20, 1  ;;  %s2342_s20 = sphi %s2428_s20, %s26_s20   ;;  %s2338_s19 = sphi %s2426_s19, %s2785_s19   ;;  %s2334_s18 = sphi %s2424_s18, %s2784_s18  }
   0x3   : > { %p40_p1 = scmp.ge.s32.totalorder %s38_s21, 2  ;;  %p475_p2 = scmp.lt.s32.totalorder %s2342_s20, 3 }
   0x5   : > { %s2787_s21 = smov (%p40_p1, %s38_s21), 0  ;;  %p476_p3 = pnand %p1859_p0, %p475_p2 }
   0x6   : > { %p553_p4 = scmp.lt.s32.totalorder (!%p476_p3), %s2334_s18, 1 }
   0x7   : > { %479 = sbr.rel (%p476_p3) target bundleno = 937 (0x3a9), region = 72 }
   0xc   : > { %v2197_v0 = vld [vmem:[%s2770_s2 + $0x10] sm:$0x1f]   ;;  %vm675_vm0 = vcmask 1044480   ;;  %v2198_v1 = vld [vmem:[%s2770_s2 + $0x8] sm:$0xff]   ;;  %v2199_v3 = vld [vmem:[%s2770_s2] sm:$0xff]   ;;  %s2789_s18 = smov (!%p553_p4, %s2334_s18), 1 }
   0xd   : > { %2172 = vmatprep.subr.msk.bf16.mxu0 %vm675_vm0, %v2197_v0  ;;  %v677_v2 = vsel %vm675_vm0, %v2197_v0, 0  ;;  %s2454_s28 = sshll.u32 %s2789_s18, 7  ;;  %vm650_vm1 = vcmask 343040   ;;  %v2200_v28 = vld [vmem:[%s2771_s3 + $0x18] sm:$0xff]   ;;  %v2201_v29 = vld [vmem:[%s2771_s3 + $0x10] sm:$0xff]   ;;  %v2202_v30 = vld [vmem:[%s2771_s3 + $0x8] sm:$0xff]   ;;  %s564_s25 = scalar_lea.vmem %s2769_s1, %s2789_s18 }
   0xe   : > { %2023 = vmatpush3.bf16.msra.mxu0 %v677_v2  ;;  %s2460_s16 = scalar_lea.vmem %s2768_s0, %s2454_s28  ;;  %2044 = vmatprep.subr.bf16.mxu1 %v2200_v28  ;;  %v2203_v31 = vld [vmem:[%s2771_s3] sm:$0xff]   ;;  %v2204_v32 = vld [vmem:[%s2773_s5 + $0x38] sm:$0xff]   ;;  %v2205_v33 = vld [vmem:[%s2773_s5 + $0x30] sm:$0xff]   ;;  %vm839_vm2 = vcmask 523264   ;;  %s2614_s27 = scalar_lea.vmem %s2781_s13, %s2454_s28  ;;  %vm1337_vm3 = vcmask 80896   ;;  %vm1490_vm4 = vcmask 171008  }
   0xf   : > { %2024 = vmatprep.subr.bf16.mxu0 %v2198_v1  ;;  %v596_v4 = vld [vmem:[%s2460_s16] sm:$0xff]  ;;  %v597_v5 = vld [vmem:[%s2460_s16 + $0x8] sm:$0xff]  ;;  %v598_v6 = vld [vmem:[%s2460_s16 + $0x10] sm:$0xff]  ;;  %2045 = vmatpush3.bf16.msra.mxu1 %v2200_v28 }
  0x10   : > { %v612_v7 = vpack.c.bf16 %v597_v5, %v596_v4  ;;  %v599_v8 = vld [vmem:[%s2460_s16 + $0x18] sm:$0xff]  ;;  %v600_v9 = vld [vmem:[%s2460_s16 + $0x20] sm:$0xff]  ;;  %v601_v10 = vld [vmem:[%s2460_s16 + $0x28] sm:$0xff]  ;;  %2046 = vmatprep.subr.bf16.mxu1 %v2201_v29 }
  0x11   : > { %v613_v11 = vpack.c.bf16 %v599_v8, %v598_v6  ;;  %v614_v12 = vpack.c.bf16 %v601_v10, %v600_v9  ;;  %v602_v13 = vld [vmem:[%s2460_s16 + $0x30] sm:$0xff]  ;;  %v603_v14 = vld [vmem:[%s2460_s16 + $0x38] sm:$0xff]  ;;  %v604_v15 = vld [vmem:[%s2460_s16 + $0x40] sm:$0xff] }
  0x12   : > { %2025 = vmatpush3.bf16.msra.mxu0 %v2198_v1  ;;  %2028 = vmatprep.mubr.msk.bf16.mxu0 %vm650_vm1, %v612_v7  ;;  %v605_v16 = vld [vmem:[%s2460_s16 + $0x48] sm:$0xff]  ;;  %v615_v17 = vpack.c.bf16 %v603_v14, %v602_v13  ;;  %v606_v19 = vld [vmem:[%s2460_s16 + $0x50] sm:$0xff]  ;;  %v607_v20 = vld [vmem:[%s2460_s16 + $0x58] sm:$0xff] }
  0x13   : > { %2026 = vmatprep.subr.bf16.mxu0 %v2199_v3  ;;  %v616_v18 = vpack.c.bf16 %v605_v16, %v604_v15  ;;  %v608_v21 = vld [vmem:[%s2460_s16 + $0x60] sm:$0xff]  ;;  %v609_v22 = vld [vmem:[%s2460_s16 + $0x68] sm:$0xff]  ;;  %v617_v23 = vpack.c.bf16 %v607_v20, %v606_v19  ;;  %v610_v25 = vld [vmem:[%s2460_s16 + $0x70] sm:$0xff]  ;;  %2047 = vmatpush3.bf16.msra.mxu1 %v2201_v29 }
  0x14   : > { %v618_v24 = vpack.c.bf16 %v609_v22, %v608_v21  ;;  %v611_v26 = vld [vmem:[%s2460_s16 + $0x78] sm:$0xff]  ;;  %2048 = vmatprep.subr.bf16.mxu1 %v2202_v30  ;;  %v1868_v35 = vld [vmem:[%s564_s25] ss:$0 sm:$0xff]  ;;  %s2620_s16 = scalar_lea.vmem %s2782_s14, %s2454_s28  ;;  %s2721_s25 = scalar_lea.vmem %s2783_s15, %s2454_s28 }
  0x15   : > { %v619_v27 = vpack.c.bf16 %v611_v26, %v610_v25  ;;  %v2207_v28 = vld [vmem:[%s2773_s5 + $0x20] sm:$0xff]   ;;  %v2208_v29 = vld [vmem:[%s2773_s5 + $0x18] sm:$0xff]  }
  0x16   : > { %2027 = vmatpush3.bf16.msra.mxu0 %v2199_v3 }
  0x17   : > { %2049 = vmatpush3.bf16.msra.mxu1 %v2202_v30  ;;  %2068 = vmatprep.subr.bf16.mxu0 %v2204_v32  ;;  %v2209_v30 = vld [vmem:[%s2773_s5 + $0x10] sm:$0xff]  }
  0x18   : > { %2050 = vmatprep.subr.bf16.mxu1 %v2203_v31 }
  0x19   : > { %2029 = vmatmul.mubr.msk.bf16.vlgmr.msra.gmra.mxu0 %vm650_vm1, %v613_v11 }
  0x1a   : > { %2032 = vmatprep.mubr.msk.bf16.mxu0 %vm650_vm1, %v614_v12  ;;  %2069 = vmatpush3.bf16.msra.mxu0 %v2204_v32  ;;  %v2211_v32 = vld [vmem:[%s2773_s5] sm:$0xff]  }
  0x1b   : > { %2051 = vmatpush3.bf16.msra.mxu1 %v2203_v31  ;;  %2070 = vmatprep.subr.bf16.mxu0 %v2205_v33  ;;  %v2210_v31 = vld [vmem:[%s2773_s5 + $0x8] sm:$0xff]  }
  0x1e   : > { %2071 = vmatpush3.bf16.msra.mxu0 %v2205_v33  ;;  %v2212_v33 = vld [vmem:[%s2775_s7 + $0x18] sm:$0xff]  }
  0x1f   : > { %2100 = vmatprep.subr.bf16.mxu1 %v2212_v33 }
  0x21   : > { %2033 = vmatmul.mubr.msk.bf16.gmra.mxu0 %vm650_vm1, %v615_v17 }
  0x22   : > { %2036 = vmatprep.mubr.msk.bf16.mxu0 %vm650_vm1, %v616_v18 }
  0x29   : > { %2037 = vmatmul.mubr.msk.bf16.gmra.mxu0 %vm650_vm1, %v617_v23 }
  0x2a   : > { %2040 = vmatprep.mubr.msk.bf16.mxu0 %vm650_vm1, %v618_v24 }
  0x31   : > { %2041 = vmatmul.mubr.msk.bf16.gmra.mxu0 %vm650_vm1, %v619_v27  ;;  %v2206_v27 = vld [vmem:[%s2773_s5 + $0x28] sm:$0xff]  }
  0x32   : > { %2072 = vmatprep.subr.bf16.mxu0 %v2206_v27 }
  0x33   : > { %2073 = vmatpush3.bf16.msra.mxu0 %v2206_v27  ;;  %v2213_v27 = vld [vmem:[%s2775_s7 + $0x10] sm:$0xff]  }
  0x34   : > { %2074 = vmatprep.subr.bf16.mxu0 %v2207_v28 }
  0x37   : > { %2075 = vmatpush3.bf16.msra.mxu0 %v2207_v28  ;;  %v2215_v28 = vld [vmem:[%s2777_s9 + $0x18] sm:$0xff]  }
  0x38   : > { %2076 = vmatprep.subr.bf16.mxu0 %v2208_v29 }
  0x3b   : > { %2077 = vmatpush3.bf16.msra.mxu0 %v2208_v29  ;;  %v2216_v29 = vld [vmem:[%s2777_s9 + $0x10] sm:$0xff]  }
  0x3c   : > { %2078 = vmatprep.subr.bf16.mxu0 %v2209_v30 }
  0x3f   : > { %2079 = vmatpush3.bf16.msra.mxu0 %v2209_v30  ;;  %v2214_v30 = vld [vmem:[%s2775_s7 + $0x8] sm:$0xff]  }
  0x40   : > { %2080 = vmatprep.subr.bf16.mxu0 %v2210_v31 }
  0x43   : > { %2081 = vmatpush3.bf16.msra.mxu0 %v2210_v31  ;;  %v2218_v31 = vld [vmem:[%s2777_s9 + $0x8] sm:$0xff]  }
  0x44   : > { %2082 = vmatprep.subr.bf16.mxu0 %v2211_v32 }
  0x47   : > { %2083 = vmatpush3.bf16.msra.mxu0 %v2211_v32  ;;  %v2217_v32 = vld [vmem:[%s2775_s7] sm:$0xff]  }
  0x48   : > { %2124 = vmatprep.subr.bf16.mxu0 %v2215_v28 }
  0xd9   : > { %v2030_v34 = vpop.f32.mrf.mxu0 }
  0xda   : > { %v722_v40 = vadd.f32 %v2030_v34, %v1868_v35 }
  0xdb   : > { %v713_v36 = vpop.f32.mrf.mxu0 }
  0xdc   : > { %v714_v37 = vadd.f32 %v1868_v35, %v713_v36 }
  0xdd   : > { %v2031_v38 = vpop.f32.mrf.mxu0 }
  0xde   : > { %v725_v39 = vadd.f32 %v2031_v38, %v1868_v35  ;;  %2224 = vtanh.f32 %v714_v37 }
  0xdf   : > { %v716_v41 = vpop.f32.mrf.mxu0 }
  0xe0   : > { %v717_v42 = vadd.f32 %v1868_v35, %v716_v41  ;;  %2226 = vtanh.f32 %v725_v39 }
  0xe1   : > { %v2034_v43 = vpop.f32.mrf.mxu0 }
  0xe2   : > { %2228 = vtanh.f32 %v717_v42  ;;  %v738_v48 = vadd.f32 %v2034_v43, %v1868_v35 }
  0xe3   : > { %2230 = vtanh.f32 %v722_v40  ;;  %v729_v44 = vpop.f32.mrf.mxu0 }
  0xe4   : > { %v730_v45 = vadd.f32 %v1868_v35, %v729_v44 }
  0xe5   : > { %v2035_v46 = vpop.f32.mrf.mxu0 }
  0xe6   : > { %v741_v47 = vadd.f32 %v2035_v46, %v1868_v35  ;;  %2232 = vtanh.f32 %v730_v45 }
  0xe7   : > { %v732_v49 = vpop.f32.mrf.mxu0 }
  0xe8   : > { %v733_v50 = vadd.f32 %v1868_v35, %v732_v49  ;;  %2234 = vtanh.f32 %v741_v47 }
  0xe9   : > { %v2038_v51 = vpop.f32.mrf.mxu0 }
  0xea   : > { %2236 = vtanh.f32 %v733_v50  ;;  %v754_v59 = vadd.f32 %v2038_v51, %v1868_v35 }
  0xeb   : > { %2238 = vtanh.f32 %v738_v48  ;;  %v745_v52 = vpop.f32.mrf.mxu0  ;;  %v2225_v54 = vpop.eup %2224 }
  0xec   : > { %v746_v53 = vadd.f32 %v1868_v35, %v745_v52 }
  0xed   : > { %v2039_v55 = vpop.f32.mrf.mxu0  ;;  %v2227_v56 = vpop.eup %2226 }
  0xee   : > { %v757_v57 = vadd.f32 %v2039_v55, %v1868_v35  ;;  %2240 = vtanh.f32 %v746_v53 }
  0xef   : > { %v2229_v58 = vpop.eup %2228  ;;  %v748_v60 = vpop.f32.mrf.mxu0 }
  0xf0   : > { %v2231_v61 = vpop.eup %2230  ;;  %v749_v62 = vadd.f32 %v1868_v35, %v748_v60  ;;  %v792_v63 = vpack.c.bf16 %v2229_v58, %v2225_v54  ;;  %2242 = vtanh.f32 %v757_v57 }
  0xf1   : > { %v2042_v0 = vpop.f32.mrf.mxu0  ;;  %v793_v1 = vpack.c.bf16 %v2227_v56, %v2231_v61 }
  0xf2   : > { %2244 = vtanh.f32 %v749_v62  ;;  %2052 = vmatprep.mubr.msk.bf16.mxu1 %vm839_vm2, %v792_v63  ;;  %v770_v9 = vadd.f32 %v2042_v0, %v1868_v35 }
  0xf3   : > { %2246 = vtanh.f32 %v754_v59  ;;  %v761_v2 = vpop.f32.mrf.mxu0  ;;  %2053 = vmatmul.mubr.msk.bf16.vlgmr.msra.gmra.mxu1 %vm839_vm2, %v793_v1  ;;  %v2233_v4 = vpop.eup %2232 }
  0xf4   : > { %v762_v3 = vadd.f32 %v1868_v35, %v761_v2  ;;  %2101 = vmatpush3.bf16.msra.mxu1 %v2212_v33  ;;  %v2219_v33 = vld [vmem:[%s2777_s9] sm:$0xff]  }
  0xf5   : > { %v2043_v5 = vpop.f32.mrf.mxu0  ;;  %v2235_v6 = vpop.eup %2234  ;;  %2102 = vmatprep.subr.bf16.mxu1 %v2213_v27 }
  0xf6   : > { %v773_v7 = vadd.f32 %v2043_v5, %v1868_v35  ;;  %2248 = vtanh.f32 %v762_v3 }
  0xf7   : > { %v2237_v8 = vpop.eup %2236  ;;  %v764_v10 = vpop.f32.mrf.mxu0 }
  0xf8   : > { %v2239_v11 = vpop.eup %2238  ;;  %v765_v12 = vadd.f32 %v1868_v35, %v764_v10  ;;  %v794_v13 = vpack.c.bf16 %v2237_v8, %v2233_v4  ;;  %2250 = vtanh.f32 %v773_v7  ;;  %v1880_v35 = vld [vmem:[%s2772_s4] ss:$0 sm:$0xff]  ;;  %2103 = vmatpush3.bf16.msra.mxu1 %v2213_v27 }
  0xf9   : > { %v795_v14 = vpack.c.bf16 %v2235_v6, %v2239_v11  ;;  %2104 = vmatprep.subr.bf16.mxu1 %v2214_v30 }
  0xfa   : > { %2252 = vtanh.f32 %v765_v12  ;;  %2056 = vmatprep.mubr.msk.bf16.mxu1 %vm839_vm2, %v794_v13 }
  0xfb   : > { %2254 = vtanh.f32 %v770_v9  ;;  %2057 = vmatmul.mubr.msk.bf16.gmra.mxu1 %vm839_vm2, %v795_v14  ;;  %v2241_v15 = vpop.eup %2240 }
  0xfc   : > { %2105 = vmatpush3.bf16.msra.mxu1 %v2214_v30 }
  0xfd   : > { %v2243_v16 = vpop.eup %2242  ;;  %2106 = vmatprep.subr.bf16.mxu1 %v2217_v32 }
  0xff   : > { %v2245_v17 = vpop.eup %2244 }
 0x100   : > { %v2247_v18 = vpop.eup %2246  ;;  %v796_v19 = vpack.c.bf16 %v2245_v17, %v2241_v15  ;;  %2107 = vmatpush3.bf16.msra.mxu1 %v2217_v32  ;;  %v2608_v32 = vld [vmem:[%s2778_s10] ss:$0 sm:$0xff] }
 0x101   : > { %v797_v20 = vpack.c.bf16 %v2243_v16, %v2247_v18 }
 0x102   : > { %2060 = vmatprep.mubr.msk.bf16.mxu1 %vm839_vm2, %v796_v19 }
 0x103   : > { %2061 = vmatmul.mubr.msk.bf16.gmra.mxu1 %vm839_vm2, %v797_v20  ;;  %v2249_v21 = vpop.eup %2248 }
 0x105   : > { %v2251_v22 = vpop.eup %2250 }
 0x107   : > { %v2253_v23 = vpop.eup %2252 }
 0x108   : > { %v2255_v24 = vpop.eup %2254  ;;  %v798_v25 = vpack.c.bf16 %v2253_v23, %v2249_v21 }
 0x109   : > { %v799_v26 = vpack.c.bf16 %v2251_v22, %v2255_v24 }
 0x10a   : > { %2064 = vmatprep.mubr.msk.bf16.mxu1 %vm839_vm2, %v798_v25 }
 0x10b   : > { %2065 = vmatmul.mubr.msk.bf16.gmra.mxu1 %vm839_vm2, %v799_v26 }
 0x1b3   : > { %v2054_v34 = vpop.f32.mrf.mxu1 }
 0x1b4   : > { %v907_v40 = vadd.f32 %v2054_v34, %v1880_v35  ;;  %v2220_v34 = vld [vmem:[%s2779_s11 + $0x18] sm:$0xff]  }
 0x1b5   : > { %v898_v36 = vpop.f32.mrf.mxu1  ;;  %2148 = vmatprep.subr.bf16.mxu1 %v2220_v34 }
 0x1b6   : > { %v899_v37 = vadd.f32 %v1880_v35, %v898_v36  ;;  %v1893_v36 = vld [vmem:[%s2774_s6] ss:$0 sm:$0xff] }
 0x1b7   : > { %v2055_v38 = vpop.f32.mrf.mxu1 }
 0x1b8   : > { %v910_v39 = vadd.f32 %v2055_v38, %v1880_v35  ;;  %2256 = vtanh.f32 %v899_v37 }
 0x1b9   : > { %v901_v41 = vpop.f32.mrf.mxu1 }
 0x1ba   : > { %v902_v42 = vadd.f32 %v1880_v35, %v901_v41  ;;  %2258 = vtanh.f32 %v910_v39 }
 0x1bb   : > { %v2058_v43 = vpop.f32.mrf.mxu1 }
 0x1bc   : > { %2260 = vtanh.f32 %v902_v42  ;;  %v923_v48 = vadd.f32 %v2058_v43, %v1880_v35 }
 0x1bd   : > { %2262 = vtanh.f32 %v907_v40  ;;  %v914_v44 = vpop.f32.mrf.mxu1 }
 0x1be   : > { %v915_v45 = vadd.f32 %v1880_v35, %v914_v44 }
 0x1bf   : > { %v2059_v46 = vpop.f32.mrf.mxu1 }
 0x1c0   : > { %v926_v47 = vadd.f32 %v2059_v46, %v1880_v35  ;;  %2264 = vtanh.f32 %v915_v45 }
 0x1c1   : > { %v917_v49 = vpop.f32.mrf.mxu1 }
 0x1c2   : > { %v918_v50 = vadd.f32 %v1880_v35, %v917_v49  ;;  %2266 = vtanh.f32 %v926_v47 }
 0x1c3   : > { %v2062_v51 = vpop.f32.mrf.mxu1 }
 0x1c4   : > { %2268 = vtanh.f32 %v918_v50  ;;  %v939_v59 = vadd.f32 %v2062_v51, %v1880_v35 }
 0x1c5   : > { %2270 = vtanh.f32 %v923_v48  ;;  %v930_v52 = vpop.f32.mrf.mxu1  ;;  %v2257_v54 = vpop.eup %2256 }
 0x1c6   : > { %v931_v53 = vadd.f32 %v1880_v35, %v930_v52 }
 0x1c7   : > { %v2063_v55 = vpop.f32.mrf.mxu1  ;;  %v2259_v56 = vpop.eup %2258 }
 0x1c8   : > { %v942_v57 = vadd.f32 %v2063_v55, %v1880_v35  ;;  %2272 = vtanh.f32 %v931_v53 }
 0x1c9   : > { %v2261_v58 = vpop.eup %2260  ;;  %v933_v60 = vpop.f32.mrf.mxu1 }
 0x1ca   : > { %v2263_v61 = vpop.eup %2262  ;;  %v934_v62 = vadd.f32 %v1880_v35, %v933_v60  ;;  %v977_v63 = vpack.c.bf16 %v2261_v58, %v2257_v54  ;;  %2274 = vtanh.f32 %v942_v57 }
 0x1cb   : > { %v2066_v0 = vpop.f32.mrf.mxu1  ;;  %v978_v1 = vpack.c.bf16 %v2259_v56, %v2263_v61 }
 0x1cc   : > { %2276 = vtanh.f32 %v934_v62  ;;  %2084 = vmatprep.mubr.bf16.mxu0 %v977_v63  ;;  %v955_v9 = vadd.f32 %v2066_v0, %v1880_v35 }
 0x1cd   : > { %2278 = vtanh.f32 %v939_v59  ;;  %v946_v2 = vpop.f32.mrf.mxu1  ;;  %2085 = vmatmul.mubr.bf16.vlgmr.msra.gmra.mxu0 %v978_v1  ;;  %v2265_v4 = vpop.eup %2264 }
 0x1ce   : > { %v947_v3 = vadd.f32 %v1880_v35, %v946_v2  ;;  %2125 = vmatpush3.bf16.msra.mxu0 %v2215_v28 }
 0x1cf   : > { %v2067_v5 = vpop.f32.mrf.mxu1  ;;  %v2267_v6 = vpop.eup %2266  ;;  %2126 = vmatprep.subr.bf16.mxu0 %v2216_v29 }
 0x1d0   : > { %v958_v7 = vadd.f32 %v2067_v5, %v1880_v35  ;;  %2280 = vtanh.f32 %v947_v3  ;;  %v2221_v3 = vld [vmem:[%s2779_s11 + $0x10] sm:$0xff]  }
 0x1d1   : > { %v2269_v8 = vpop.eup %2268  ;;  %v949_v10 = vpop.f32.mrf.mxu1 }
 0x1d2   : > { %v2271_v11 = vpop.eup %2270  ;;  %v950_v12 = vadd.f32 %v1880_v35, %v949_v10  ;;  %v979_v13 = vpack.c.bf16 %v2269_v8, %v2265_v4  ;;  %2282 = vtanh.f32 %v958_v7  ;;  %2127 = vmatpush3.bf16.msra.mxu0 %v2216_v29  ;;  %v2222_v8 = vld [vmem:[%s2779_s11 + $0x8] sm:$0xff]  }
 0x1d3   : > { %v980_v14 = vpack.c.bf16 %v2267_v6, %v2271_v11  ;;  %2128 = vmatprep.subr.bf16.mxu0 %v2218_v31 }
 0x1d4   : > { %2284 = vtanh.f32 %v950_v12  ;;  %2088 = vmatprep.mubr.bf16.mxu0 %v979_v13 }
 0x1d5   : > { %2286 = vtanh.f32 %v955_v9  ;;  %2089 = vmatmul.mubr.bf16.gmra.mxu0 %v980_v14  ;;  %v2273_v15 = vpop.eup %2272 }
 0x1d6   : > { %2129 = vmatpush3.bf16.msra.mxu0 %v2218_v31  ;;  %v2603_v31 = vld [vmem:[%s2776_s8] ss:$0 sm:$0xff] }
 0x1d7   : > { %v2275_v16 = vpop.eup %2274  ;;  %2130 = vmatprep.subr.bf16.mxu0 %v2219_v33 }
 0x1d9   : > { %v2277_v17 = vpop.eup %2276 }
 0x1da   : > { %v2279_v18 = vpop.eup %2278  ;;  %v981_v19 = vpack.c.bf16 %v2277_v17, %v2273_v15  ;;  %2131 = vmatpush3.bf16.msra.mxu0 %v2219_v33 }
 0x1db   : > { %v982_v20 = vpack.c.bf16 %v2275_v16, %v2279_v18  ;;  %v2223_v18 = vld [vmem:[%s2779_s11] sm:$0xff]  }
 0x1dc   : > { %2092 = vmatprep.mubr.bf16.mxu0 %v981_v19 }
 0x1dd   : > { %2093 = vmatmul.mubr.bf16.gmra.mxu0 %v982_v20  ;;  %v2281_v21 = vpop.eup %2280 }
 0x1df   : > { %v2283_v22 = vpop.eup %2282 }
 0x1e1   : > { %v2285_v23 = vpop.eup %2284 }
 0x1e2   : > { %v2287_v24 = vpop.eup %2286  ;;  %v983_v25 = vpack.c.bf16 %v2285_v23, %v2281_v21 }
 0x1e3   : > { %v984_v26 = vpack.c.bf16 %v2283_v22, %v2287_v24 }
 0x1e4   : > { %2096 = vmatprep.mubr.bf16.mxu0 %v983_v25 }
 0x1e5   : > { %2097 = vmatmul.mubr.bf16.gmra.mxu0 %v984_v26 }
 0x28d   : > { %v2086_v35 = vpop.f32.mrf.mxu0 }
 0x28e   : > { %v1099_v41 = vadd.f32 %v2086_v35, %v1893_v36 }
 0x28f   : > { %v1090_v37 = vpop.f32.mrf.mxu0 }
 0x290   : > { %v1091_v38 = vadd.f32 %v1893_v36, %v1090_v37 }
 0x291   : > { %v2087_v39 = vpop.f32.mrf.mxu0 }
 0x292   : > { %v1102_v40 = vadd.f32 %v2087_v39, %v1893_v36  ;;  %2288 = vtanh.f32 %v1091_v38 }
 0x293   : > { %v1093_v42 = vpop.f32.mrf.mxu0 }
 0x294   : > { %v1094_v43 = vadd.f32 %v1893_v36, %v1093_v42  ;;  %2290 = vtanh.f32 %v1102_v40 }
 0x295   : > { %v2090_v44 = vpop.f32.mrf.mxu0 }
 0x296   : > { %2292 = vtanh.f32 %v1094_v43  ;;  %v1115_v49 = vadd.f32 %v2090_v44, %v1893_v36 }
 0x297   : > { %2294 = vtanh.f32 %v1099_v41  ;;  %v1106_v45 = vpop.f32.mrf.mxu0 }
 0x298   : > { %v1107_v46 = vadd.f32 %v1893_v36, %v1106_v45 }
 0x299   : > { %v2091_v47 = vpop.f32.mrf.mxu0 }
 0x29a   : > { %v1118_v48 = vadd.f32 %v2091_v47, %v1893_v36  ;;  %2296 = vtanh.f32 %v1107_v46 }
 0x29b   : > { %v1109_v50 = vpop.f32.mrf.mxu0 }
 0x29c   : > { %v1110_v51 = vadd.f32 %v1893_v36, %v1109_v50  ;;  %2298 = vtanh.f32 %v1118_v48 }
 0x29d   : > { %v2094_v52 = vpop.f32.mrf.mxu0 }
 0x29e   : > { %2300 = vtanh.f32 %v1110_v51  ;;  %v1131_v60 = vadd.f32 %v2094_v52, %v1893_v36 }
 0x29f   : > { %2302 = vtanh.f32 %v1115_v49  ;;  %v1122_v53 = vpop.f32.mrf.mxu0  ;;  %v2289_v55 = vpop.eup %2288 }
 0x2a0   : > { %v1123_v54 = vadd.f32 %v1893_v36, %v1122_v53 }
 0x2a1   : > { %v2095_v56 = vpop.f32.mrf.mxu0  ;;  %v2291_v57 = vpop.eup %2290 }
 0x2a2   : > { %v1134_v58 = vadd.f32 %v2095_v56, %v1893_v36  ;;  %2304 = vtanh.f32 %v1123_v54 }
 0x2a3   : > { %v2293_v59 = vpop.eup %2292  ;;  %v1125_v61 = vpop.f32.mrf.mxu0 }
 0x2a4   : > { %v2295_v62 = vpop.eup %2294  ;;  %v1126_v63 = vadd.f32 %v1893_v36, %v1125_v61  ;;  %v1169_v0 = vpack.c.bf16 %v2293_v59, %v2289_v55  ;;  %2306 = vtanh.f32 %v1134_v58 }
 0x2a5   : > { %v1170_v1 = vpack.c.bf16 %v2291_v57, %v2295_v62  ;;  %v2098_v2 = vpop.f32.mrf.mxu0 }
 0x2a6   : > { %2308 = vtanh.f32 %v1126_v63  ;;  %2108 = vmatprep.mubr.msk.bf16.mxu1 %vm839_vm2, %v1169_v0  ;;  %2132 = vmatprep.mubr.msk.bf16.mxu0 %vm839_vm2, %v1169_v0  ;;  %v1147_v12 = vadd.f32 %v2098_v2, %v1893_v36 }
 0x2a7   : > { %2310 = vtanh.f32 %v1131_v60  ;;  %v1138_v4 = vpop.f32.mrf.mxu0  ;;  %2109 = vmatmul.mubr.msk.bf16.vlgmr.msra.gmra.mxu1 %vm839_vm2, %v1170_v1  ;;  %2133 = vmatmul.mubr.msk.bf16.vlgmr.msra.gmra.mxu0 %vm839_vm2, %v1170_v1  ;;  %v2297_v6 = vpop.eup %2296 }
 0x2a8   : > { %v1139_v5 = vadd.f32 %v1893_v36, %v1138_v4  ;;  %2149 = vmatpush3.bf16.msra.mxu1 %v2220_v34 }
 0x2a9   : > { %v2099_v7 = vpop.f32.mrf.mxu0  ;;  %2150 = vmatprep.subr.bf16.mxu1 %v2221_v3  ;;  %v2299_v9 = vpop.eup %2298 }
 0x2aa   : > { %v1150_v10 = vadd.f32 %v2099_v7, %v1893_v36  ;;  %2312 = vtanh.f32 %v1139_v5 }
 0x2ab   : > { %v2301_v11 = vpop.eup %2300  ;;  %v1141_v13 = vpop.f32.mrf.mxu0 }
 0x2ac   : > { %v2303_v14 = vpop.eup %2302  ;;  %v1142_v15 = vadd.f32 %v1893_v36, %v1141_v13  ;;  %v1171_v16 = vpack.c.bf16 %v2301_v11, %v2297_v6  ;;  %2151 = vmatpush3.bf16.msra.mxu1 %v2221_v3  ;;  %2314 = vtanh.f32 %v1150_v10 }
 0x2ad   : > { %v1172_v17 = vpack.c.bf16 %v2299_v9, %v2303_v14  ;;  %2152 = vmatprep.subr.bf16.mxu1 %v2222_v8 }
 0x2ae   : > { %2316 = vtanh.f32 %v1142_v15  ;;  %2112 = vmatprep.mubr.msk.bf16.mxu1 %vm839_vm2, %v1171_v16  ;;  %2136 = vmatprep.mubr.msk.bf16.mxu0 %vm839_vm2, %v1171_v16 }
 0x2af   : > { %2318 = vtanh.f32 %v1147_v12  ;;  %2113 = vmatmul.mubr.msk.bf16.gmra.mxu1 %vm839_vm2, %v1172_v17  ;;  %2137 = vmatmul.mubr.msk.bf16.gmra.mxu0 %vm839_vm2, %v1172_v17  ;;  %v2305_v19 = vpop.eup %2304 }
 0x2b0   : > { %2153 = vmatpush3.bf16.msra.mxu1 %v2222_v8 }
 0x2b1   : > { %2154 = vmatprep.subr.bf16.mxu1 %v2223_v18  ;;  %v2307_v20 = vpop.eup %2306 }
 0x2b3   : > { %v2309_v21 = vpop.eup %2308 }
 0x2b4   : > { %v2311_v22 = vpop.eup %2310  ;;  %v1173_v23 = vpack.c.bf16 %v2309_v21, %v2305_v19  ;;  %2155 = vmatpush3.bf16.msra.mxu1 %v2223_v18 }
 0x2b5   : > { %v1174_v24 = vpack.c.bf16 %v2307_v20, %v2311_v22 }
 0x2b6   : > { %2116 = vmatprep.mubr.msk.bf16.mxu1 %vm839_vm2, %v1173_v23  ;;  %2140 = vmatprep.mubr.msk.bf16.mxu0 %vm839_vm2, %v1173_v23 }
 0x2b7   : > { %2117 = vmatmul.mubr.msk.bf16.gmra.mxu1 %vm839_vm2, %v1174_v24  ;;  %2141 = vmatmul.mubr.msk.bf16.gmra.mxu0 %vm839_vm2, %v1174_v24  ;;  %v2313_v25 = vpop.eup %2312 }
 0x2b9   : > { %v2315_v26 = vpop.eup %2314 }
 0x2bb   : > { %v2317_v27 = vpop.eup %2316 }
 0x2bc   : > { %v2319_v28 = vpop.eup %2318  ;;  %v1175_v29 = vpack.c.bf16 %v2317_v27, %v2313_v25 }
 0x2bd   : > { %v1176_v30 = vpack.c.bf16 %v2315_v26, %v2319_v28 }
 0x2be   : > { %2120 = vmatprep.mubr.msk.bf16.mxu1 %vm839_vm2, %v1175_v29  ;;  %2144 = vmatprep.mubr.msk.bf16.mxu0 %vm839_vm2, %v1175_v29 }
 0x2bf   : > { %2121 = vmatmul.mubr.msk.bf16.gmra.mxu1 %vm839_vm2, %v1176_v30  ;;  %2145 = vmatmul.mubr.msk.bf16.gmra.mxu0 %vm839_vm2, %v1176_v30 }
 0x2c0   : > { %2156 = vmatprep.mubr.msk.bf16.mxu1 %vm839_vm2, %v1169_v0 }
 0x2c7   : > { %2157 = vmatmul.mubr.msk.bf16.vlgmr.msra.gmra.mxu1 %vm839_vm2, %v1170_v1 }
 0x2c8   : > { %2160 = vmatprep.mubr.msk.bf16.mxu1 %vm839_vm2, %v1171_v16 }
 0x2cf   : > { %2161 = vmatmul.mubr.msk.bf16.gmra.mxu1 %vm839_vm2, %v1172_v17 }
 0x2d0   : > { %2164 = vmatprep.mubr.msk.bf16.mxu1 %vm839_vm2, %v1173_v23 }
 0x2d7   : > { %2165 = vmatmul.mubr.msk.bf16.gmra.mxu1 %vm839_vm2, %v1174_v24 }
 0x2d8   : > { %2168 = vmatprep.mubr.msk.bf16.mxu1 %vm839_vm2, %v1175_v29 }
 0x2df   : > { %2169 = vmatmul.mubr.msk.bf16.gmra.mxu1 %vm839_vm2, %v1176_v30 }
 0x367   : > { %v2110_v33 = vpop.f32.mrf.mxu1  ;;  %v2134_v34 = vpop.f32.mrf.mxu0 }
 0x368   : > { %v1283_v35 = vadd.f32 %v2110_v33, %v2603_v31  ;;  %v1436_v36 = vadd.f32 %v2134_v34, %v2608_v32  ;;  %v1928_v33 = vld [vmem:[%s2780_s12] ss:$0 sm:$0xff] }
 0x369   : > { %v1274_v37 = vpop.f32.mrf.mxu1  ;;  %v1427_v38 = vpop.f32.mrf.mxu0 }
 0x36a   : > { %1340 = vst.msk [vmem:[%s2614_s27 + $0x10] sm:$0xff] %vm1337_vm3, %v1283_v35  ;;  %v1275_v39 = vadd.f32 %v2603_v31, %v1274_v37  ;;  %v1428_v40 = vadd.f32 %v2608_v32, %v1427_v38 }
 0x36b   : > { %1493 = vst.msk [vmem:[%s2620_s16 + $0x10] sm:$0xff] %vm1490_vm4, %v1436_v36  ;;  %v2111_v41 = vpop.f32.mrf.mxu1  ;;  %v2135_v42 = vpop.f32.mrf.mxu0 }
 0x36c   : > { %1338 = vst.msk [vmem:[%s2614_s27] sm:$0xff] %vm1337_vm3, %v1275_v39  ;;  %v1286_v43 = vadd.f32 %v2111_v41, %v2603_v31  ;;  %v1439_v44 = vadd.f32 %v2135_v42, %v2608_v32 }
 0x36d   : > { %1491 = vst.msk [vmem:[%s2620_s16] sm:$0xff] %vm1490_vm4, %v1428_v40  ;;  %v1277_v45 = vpop.f32.mrf.mxu1  ;;  %v1430_v46 = vpop.f32.mrf.mxu0 }
 0x36e   : > { %1341 = vst.msk [vmem:[%s2614_s27 + $0x18] sm:$0xff] %vm1337_vm3, %v1286_v43  ;;  %v1278_v47 = vadd.f32 %v2603_v31, %v1277_v45  ;;  %v1431_v48 = vadd.f32 %v2608_v32, %v1430_v46 }
 0x36f   : > { %1494 = vst.msk [vmem:[%s2620_s16 + $0x18] sm:$0xff] %vm1490_vm4, %v1439_v44  ;;  %v2114_v49 = vpop.f32.mrf.mxu1  ;;  %v2138_v50 = vpop.f32.mrf.mxu0 }
 0x370   : > { %1339 = vst.msk [vmem:[%s2614_s27 + $0x8] sm:$0xff] %vm1337_vm3, %v1278_v47  ;;  %v1299_v51 = vadd.f32 %v2114_v49, %v2603_v31  ;;  %v1452_v52 = vadd.f32 %v2138_v50, %v2608_v32 }
 0x371   : > { %1492 = vst.msk [vmem:[%s2620_s16 + $0x8] sm:$0xff] %vm1490_vm4, %v1431_v48  ;;  %v1290_v53 = vpop.f32.mrf.mxu1  ;;  %v1443_v54 = vpop.f32.mrf.mxu0 }
 0x372   : > { %1344 = vst.msk [vmem:[%s2614_s27 + $0x30] sm:$0xff] %vm1337_vm3, %v1299_v51  ;;  %v1291_v55 = vadd.f32 %v2603_v31, %v1290_v53  ;;  %v1444_v56 = vadd.f32 %v2608_v32, %v1443_v54 }
 0x373   : > { %1497 = vst.msk [vmem:[%s2620_s16 + $0x30] sm:$0xff] %vm1490_vm4, %v1452_v52  ;;  %v2115_v57 = vpop.f32.mrf.mxu1  ;;  %v2139_v58 = vpop.f32.mrf.mxu0 }
 0x374   : > { %1342 = vst.msk [vmem:[%s2614_s27 + $0x20] sm:$0xff] %vm1337_vm3, %v1291_v55  ;;  %v1302_v59 = vadd.f32 %v2115_v57, %v2603_v31  ;;  %v1455_v60 = vadd.f32 %v2139_v58, %v2608_v32 }
 0x375   : > { %1495 = vst.msk [vmem:[%s2620_s16 + $0x20] sm:$0xff] %vm1490_vm4, %v1444_v56  ;;  %v1293_v61 = vpop.f32.mrf.mxu1  ;;  %v1446_v62 = vpop.f32.mrf.mxu0 }
 0x376   : > { %1345 = vst.msk [vmem:[%s2614_s27 + $0x38] sm:$0xff] %vm1337_vm3, %v1302_v59  ;;  %v1294_v63 = vadd.f32 %v2603_v31, %v1293_v61  ;;  %v1447_v0 = vadd.f32 %v2608_v32, %v1446_v62 }
 0x377   : > { %1498 = vst.msk [vmem:[%s2620_s16 + $0x38] sm:$0xff] %vm1490_vm4, %v1455_v60  ;;  %v2118_v1 = vpop.f32.mrf.mxu1  ;;  %v2142_v2 = vpop.f32.mrf.mxu0 }
 0x378   : > { %1343 = vst.msk [vmem:[%s2614_s27 + $0x28] sm:$0xff] %vm1337_vm3, %v1294_v63  ;;  %v1315_v3 = vadd.f32 %v2118_v1, %v2603_v31  ;;  %v1468_v4 = vadd.f32 %v2142_v2, %v2608_v32 }
 0x379   : > { %1496 = vst.msk [vmem:[%s2620_s16 + $0x28] sm:$0xff] %vm1490_vm4, %v1447_v0  ;;  %v1306_v5 = vpop.f32.mrf.mxu1  ;;  %v1459_v6 = vpop.f32.mrf.mxu0 }
 0x37a   : > { %1348 = vst.msk [vmem:[%s2614_s27 + $0x50] sm:$0xff] %vm1337_vm3, %v1315_v3  ;;  %v1307_v7 = vadd.f32 %v2603_v31, %v1306_v5  ;;  %v1460_v8 = vadd.f32 %v2608_v32, %v1459_v6 }
 0x37b   : > { %1501 = vst.msk [vmem:[%s2620_s16 + $0x50] sm:$0xff] %vm1490_vm4, %v1468_v4  ;;  %v2119_v9 = vpop.f32.mrf.mxu1  ;;  %v2143_v10 = vpop.f32.mrf.mxu0 }
 0x37c   : > { %1346 = vst.msk [vmem:[%s2614_s27 + $0x40] sm:$0xff] %vm1337_vm3, %v1307_v7  ;;  %v1318_v11 = vadd.f32 %v2119_v9, %v2603_v31  ;;  %v1471_v12 = vadd.f32 %v2143_v10, %v2608_v32 }
 0x37d   : > { %1499 = vst.msk [vmem:[%s2620_s16 + $0x40] sm:$0xff] %vm1490_vm4, %v1460_v8  ;;  %v1309_v13 = vpop.f32.mrf.mxu1  ;;  %v1462_v14 = vpop.f32.mrf.mxu0 }
 0x37e   : > { %1349 = vst.msk [vmem:[%s2614_s27 + $0x58] sm:$0xff] %vm1337_vm3, %v1318_v11  ;;  %v1310_v15 = vadd.f32 %v2603_v31, %v1309_v13  ;;  %v1463_v16 = vadd.f32 %v2608_v32, %v1462_v14 }
 0x37f   : > { %1502 = vst.msk [vmem:[%s2620_s16 + $0x58] sm:$0xff] %vm1490_vm4, %v1471_v12  ;;  %v2122_v17 = vpop.f32.mrf.mxu1  ;;  %v2146_v18 = vpop.f32.mrf.mxu0 }
 0x380   : > { %1347 = vst.msk [vmem:[%s2614_s27 + $0x48] sm:$0xff] %vm1337_vm3, %v1310_v15  ;;  %v1331_v19 = vadd.f32 %v2122_v17, %v2603_v31  ;;  %v1484_v20 = vadd.f32 %v2146_v18, %v2608_v32 }
 0x381   : > { %1500 = vst.msk [vmem:[%s2620_s16 + $0x48] sm:$0xff] %vm1490_vm4, %v1463_v16  ;;  %v1322_v21 = vpop.f32.mrf.mxu1  ;;  %v1475_v22 = vpop.f32.mrf.mxu0 }
 0x382   : > { %1352 = vst.msk [vmem:[%s2614_s27 + $0x70] sm:$0xff] %vm1337_vm3, %v1331_v19  ;;  %v1323_v23 = vadd.f32 %v2603_v31, %v1322_v21  ;;  %v1476_v24 = vadd.f32 %v2608_v32, %v1475_v22 }
 0x383   : > { %1505 = vst.msk [vmem:[%s2620_s16 + $0x70] sm:$0xff] %vm1490_vm4, %v1484_v20  ;;  %v2123_v25 = vpop.f32.mrf.mxu1  ;;  %v2147_v26 = vpop.f32.mrf.mxu0 }
 0x384   : > { %1350 = vst.msk [vmem:[%s2614_s27 + $0x60] sm:$0xff] %vm1337_vm3, %v1323_v23  ;;  %v1334_v27 = vadd.f32 %v2123_v25, %v2603_v31  ;;  %v1487_v28 = vadd.f32 %v2147_v26, %v2608_v32 }
 0x385   : > { %1503 = vst.msk [vmem:[%s2620_s16 + $0x60] sm:$0xff] %vm1490_vm4, %v1476_v24  ;;  %v1325_v29 = vpop.f32.mrf.mxu1  ;;  %v1478_v30 = vpop.f32.mrf.mxu0 }
 0x386   : > { %1353 = vst.msk [vmem:[%s2614_s27 + $0x78] sm:$0xff] %vm1337_vm3, %v1334_v27  ;;  %v1326_v34 = vadd.f32 %v2603_v31, %v1325_v29  ;;  %v1479_v35 = vadd.f32 %v2608_v32, %v1478_v30 }
 0x387   : > { %1506 = vst.msk [vmem:[%s2620_s16 + $0x78] sm:$0xff] %vm1490_vm4, %v1487_v28  ;;  %v2158_v36 = vpop.f32.mrf.mxu1 }
 0x388   : > { %1351 = vst.msk [vmem:[%s2614_s27 + $0x68] sm:$0xff] %vm1337_vm3, %v1326_v34  ;;  %v1589_v37 = vadd.f32 %v2158_v36, %v1928_v33 }
 0x389   : > { %1504 = vst.msk [vmem:[%s2620_s16 + $0x68] sm:$0xff] %vm1490_vm4, %v1479_v35  ;;  %v1580_v38 = vpop.f32.mrf.mxu1 }
 0x38a   : > { %1645 = vst.msk [vmem:[%s2721_s25 + $0x10] sm:$0xff] %vm650_vm1, %v1589_v37  ;;  %v1581_v31 = vadd.f32 %v1928_v33, %v1580_v38 }
 0x38b   : > { %v2159_v32 = vpop.f32.mrf.mxu1 }
 0x38c   : > { %1643 = vst.msk [vmem:[%s2721_s25] sm:$0xff] %vm650_vm1, %v1581_v31  ;;  %v1592_v39 = vadd.f32 %v2159_v32, %v1928_v33 }
 0x38d   : > { %v1583_v40 = vpop.f32.mrf.mxu1 }
 0x38e   : > { %1646 = vst.msk [vmem:[%s2721_s25 + $0x18] sm:$0xff] %vm650_vm1, %v1592_v39  ;;  %v1584_v41 = vadd.f32 %v1928_v33, %v1583_v40 }
 0x38f   : > { %v2162_v42 = vpop.f32.mrf.mxu1 }
 0x390   : > { %1644 = vst.msk [vmem:[%s2721_s25 + $0x8] sm:$0xff] %vm650_vm1, %v1584_v41  ;;  %v1605_v43 = vadd.f32 %v2162_v42, %v1928_v33 }
 0x391   : > { %v1596_v44 = vpop.f32.mrf.mxu1 }
 0x392   : > { %1649 = vst.msk [vmem:[%s2721_s25 + $0x30] sm:$0xff] %vm650_vm1, %v1605_v43  ;;  %v1597_v45 = vadd.f32 %v1928_v33, %v1596_v44 }
 0x393   : > { %v2163_v46 = vpop.f32.mrf.mxu1 }
 0x394   : > { %1647 = vst.msk [vmem:[%s2721_s25 + $0x20] sm:$0xff] %vm650_vm1, %v1597_v45  ;;  %v1608_v47 = vadd.f32 %v2163_v46, %v1928_v33 }
 0x395   : > { %v1599_v48 = vpop.f32.mrf.mxu1 }
 0x396   : > { %1650 = vst.msk [vmem:[%s2721_s25 + $0x38] sm:$0xff] %vm650_vm1, %v1608_v47  ;;  %v1600_v49 = vadd.f32 %v1928_v33, %v1599_v48 }
 0x397   : > { %v2166_v50 = vpop.f32.mrf.mxu1 }
 0x398   : > { %1648 = vst.msk [vmem:[%s2721_s25 + $0x28] sm:$0xff] %vm650_vm1, %v1600_v49  ;;  %v1621_v51 = vadd.f32 %v2166_v50, %v1928_v33 }
 0x399   : > { %v1612_v52 = vpop.f32.mrf.mxu1 }
 0x39a   : > { %1653 = vst.msk [vmem:[%s2721_s25 + $0x50] sm:$0xff] %vm650_vm1, %v1621_v51  ;;  %v1613_v53 = vadd.f32 %v1928_v33, %v1612_v52 }
 0x39b   : > { %v2167_v54 = vpop.f32.mrf.mxu1 }
 0x39c   : > { %1651 = vst.msk [vmem:[%s2721_s25 + $0x40] sm:$0xff] %vm650_vm1, %v1613_v53  ;;  %v1624_v55 = vadd.f32 %v2167_v54, %v1928_v33 }
 0x39d   : > { %v1615_v56 = vpop.f32.mrf.mxu1 }
 0x39e   : > { %1654 = vst.msk [vmem:[%s2721_s25 + $0x58] sm:$0xff] %vm650_vm1, %v1624_v55  ;;  %v1616_v57 = vadd.f32 %v1928_v33, %v1615_v56 }
 0x39f   : > { %v2170_v58 = vpop.f32.mrf.mxu1 }
 0x3a0   : > { %1652 = vst.msk [vmem:[%s2721_s25 + $0x48] sm:$0xff] %vm650_vm1, %v1616_v57  ;;  %v1637_v59 = vadd.f32 %v2170_v58, %v1928_v33 }
 0x3a1   : > { %v1628_v60 = vpop.f32.mrf.mxu1 }
 0x3a2   : > { %1657 = vst.msk [vmem:[%s2721_s25 + $0x70] sm:$0xff] %vm650_vm1, %v1637_v59  ;;  %v1629_v61 = vadd.f32 %v1928_v33, %v1628_v60 }
 0x3a3   : > { %v2171_v62 = vpop.f32.mrf.mxu1 }
 0x3a4   : > { %1655 = vst.msk [vmem:[%s2721_s25 + $0x60] sm:$0xff] %vm650_vm1, %v1629_v61  ;;  %v1640_v63 = vadd.f32 %v2171_v62, %v1928_v33 }
 0x3a5   : > { %v1631_v0 = vpop.f32.mrf.mxu1 }
 0x3a6   : > { %1658 = vst.msk [vmem:[%s2721_s25 + $0x78] sm:$0xff] %vm650_vm1, %v1640_v63  ;;  %v1632_v1 = vadd.f32 %v1928_v33, %v1631_v0 }
 0x3a8   : > { %1656 = vst.msk [vmem:[%s2721_s25 + $0x68] sm:$0xff] %vm650_vm1, %v1632_v1 }
 0x3a9 PF: > { %s26_s20 = sadd.s32 1, %s2342_s20   ;;  %s2784_s18 = smov %s2338_s19 }
 0x3aa   : > { %p23_p5 = scmp.ge.s32.totalorder %s26_s20, 4   ;;  %s2785_s19 = smov %s2787_s21 }
 0x3ac   :  { %25 = sbr.rel (!%p23_p5) target bundleno = 2 (0x2), region = 129 }

// kernel: forward.13
= control target key start
LH: loop header
LB: loop body
LE: loop exit
PB: predicated region body
PF: predicated region fallthrough
CT: control target
= control target key end

     0   :  { %s2395_s18 = smov 0   ;;  %s2397_s19 = smov 0   ;;  %s2733_s0 = inlined_call_operand.vmem [shape: f32[2,128,7], index: 0, kind: input, shape index: {}]   ;;  %s2734_s1 = inlined_call_operand.vmem [shape: f32[2,1,64], index: 1, kind: input, shape index: {}]   ;;  %s2735_s2 = inlined_call_operand.vmem [shape: bf16[7,64], index: 2, kind: input, shape index: {}]   ;;  %s2736_s3 = inlined_call_operand.vmem [shape: bf16[64,128], index: 3, kind: input, shape index: {}]   ;;  %s2737_s4 = inlined_call_operand.vmem [shape: f32[1,128], index: 4, kind: input, shape index: {}]   ;;  %s2738_s5 = inlined_call_operand.vmem [shape: bf16[128,64], index: 5, kind: input, shape index: {}]   ;;  %s2739_s6 = inlined_call_operand.vmem [shape: f32[1,64], index: 6, kind: input, shape index: {}]   ;;  %s2740_s7 = inlined_call_operand.vmem [shape: bf16[64,10], index: 7, kind: input, shape index: {}]   ;;  %s2741_s8 = inlined_call_operand.vmem [shape: f32[1,10], index: 8, kind: input, shape index: {}]   ;;  %s2742_s9 = inlined_call_operand.vmem [shape: bf16[64,21], index: 9, kind: input, shape index: {}]   ;;  %s2743_s10 = inlined_call_operand.vmem [shape: f32[1,21], index: 10, kind: input, shape index: {}]   ;;  %s2744_s11 = inlined_call_operand.vmem [shape: bf16[64,42], index: 11, kind: input, shape index: {}]   ;;  %s2745_s12 = inlined_call_operand.vmem [shape: f32[1,42], index: 12, kind: input, shape index: {}]   ;;  %s2746_s13 = inlined_call_operand.vmem [shape: f32[2,128,10], index: 13, kind: output, shape index: {0}]   ;;  %s2747_s14 = inlined_call_operand.vmem [shape: f32[2,128,21], index: 14, kind: output, shape index: {1}]   ;;  %s2748_s15 = inlined_call_operand.vmem [shape: f32[2,128,42], index: 15, kind: output, shape index: {2}]  }
   0x1   :  { %s2399_s20 = smov 0  }
   0x2 LB: > { %s38_s21 = sadd.s32 1, %s2308_s19  ;;  %p1841_p0 = scmp.ge.s32.totalorder %s2312_s20, 1  ;;  %s2312_s20 = sphi %s2399_s20, %s26_s20   ;;  %s2308_s19 = sphi %s2397_s19, %s2750_s19   ;;  %s2304_s18 = sphi %s2395_s18, %s2749_s18  }
   0x3   : > { %p40_p1 = scmp.ge.s32.totalorder %s38_s21, 2  ;;  %p475_p2 = scmp.lt.s32.totalorder %s2312_s20, 3 }
   0x5   : > { %s2752_s21 = smov (%p40_p1, %s38_s21), 0  ;;  %p476_p3 = pnand %p1841_p0, %p475_p2 }
   0x6   : > { %p553_p4 = scmp.lt.s32.totalorder (!%p476_p3), %s2304_s18, 1 }
   0x7   : > { %479 = sbr.rel (%p476_p3) target bundleno = 933 (0x3a5), region = 72 }
   0xc   : > { %v620_v0 = vld [vmem:[%s2735_s2] sm:$0xf]  ;;  %vm653_vm0 = vcmask 1042432   ;;  %vm654_vm1 = vcmask 1043456   ;;  %v2314_v1 = vmov 65535   ;;  %s2754_s18 = smov (!%p553_p4, %s2304_s18), 1 }
   0xd   : > { %v655_v2 = vsel %vm653_vm0, 4294967295, %v2314_v1  ;;  %s2419_s24 = sshll.u32 %s2754_s18, 7  ;;  %vm628_vm2 = vcmask 56320   ;;  %v2170_v29 = vld [vmem:[%s2736_s3 + $0x18] sm:$0xff]   ;;  %v2171_v30 = vld [vmem:[%s2736_s3 + $0x10] sm:$0xff]   ;;  %v2172_v31 = vld [vmem:[%s2736_s3 + $0x8] sm:$0xff]   ;;  %s564_s17 = scalar_lea.vmem %s2734_s1, %s2754_s18 }
   0xe   : > { %v656_v3 = vsel %vm654_vm1, %v655_v2, 0  ;;  %s2425_s27 = scalar_lea.vmem %s2733_s0, %s2419_s24  ;;  %2017 = vmatprep.subr.bf16.mxu1 %v2170_v29  ;;  %v2173_v32 = vld [vmem:[%s2736_s3] sm:$0xff]   ;;  %v2174_v33 = vld [vmem:[%s2738_s5 + $0x38] sm:$0xff]   ;;  %v2175_v34 = vld [vmem:[%s2738_s5 + $0x30] sm:$0xff]   ;;  %vm820_vm3 = vcmask 523264   ;;  %s2579_s23 = scalar_lea.vmem %s2746_s13, %s2419_s24  ;;  %vm1318_vm4 = vcmask 80896  }
   0xf   : > { %v658_v4 = vand.u32 %v656_v3, %v620_v0  ;;  %v596_v5 = vld [vmem:[%s2425_s27] sm:$0xff]  ;;  %v597_v6 = vld [vmem:[%s2425_s27 + $0x8] sm:$0xff]  ;;  %v598_v7 = vld [vmem:[%s2425_s27 + $0x10] sm:$0xff]  ;;  %2018 = vmatpush3.bf16.msra.mxu1 %v2170_v29  ;;  %vm1471_vm5 = vcmask 171008   ;;  %vm1624_vm6 = vcmask 343040  }
  0x10   : > { %v612_v8 = vpack.c.bf16 %v597_v6, %v596_v5  ;;  %v599_v9 = vld [vmem:[%s2425_s27 + $0x18] sm:$0xff]  ;;  %v600_v10 = vld [vmem:[%s2425_s27 + $0x20] sm:$0xff]  ;;  %v601_v11 = vld [vmem:[%s2425_s27 + $0x28] sm:$0xff]  ;;  %2019 = vmatprep.subr.bf16.mxu1 %v2171_v30 }
  0x11   : > { %1999 = vmatprep.subr.bf16.mxu0 %v658_v4  ;;  %v613_v12 = vpack.c.bf16 %v599_v9, %v598_v7  ;;  %v614_v13 = vpack.c.bf16 %v601_v11, %v600_v10  ;;  %v602_v14 = vld [vmem:[%s2425_s27 + $0x30] sm:$0xff]  ;;  %v603_v15 = vld [vmem:[%s2425_s27 + $0x38] sm:$0xff]  ;;  %v604_v16 = vld [vmem:[%s2425_s27 + $0x40] sm:$0xff] }
  0x12   : > { %2000 = vmatpush3.bf16.msra.mxu0 %v658_v4  ;;  %2001 = vmatprep.mubr.msk.bf16.mxu0 %vm628_vm2, %v612_v8  ;;  %v605_v17 = vld [vmem:[%s2425_s27 + $0x48] sm:$0xff]  ;;  %v615_v18 = vpack.c.bf16 %v603_v15, %v602_v14  ;;  %v606_v20 = vld [vmem:[%s2425_s27 + $0x50] sm:$0xff]  ;;  %v607_v21 = vld [vmem:[%s2425_s27 + $0x58] sm:$0xff] }
  0x13   : > { %v616_v19 = vpack.c.bf16 %v605_v17, %v604_v16  ;;  %v608_v22 = vld [vmem:[%s2425_s27 + $0x60] sm:$0xff]  ;;  %v609_v23 = vld [vmem:[%s2425_s27 + $0x68] sm:$0xff]  ;;  %v617_v24 = vpack.c.bf16 %v607_v21, %v606_v20  ;;  %v610_v26 = vld [vmem:[%s2425_s27 + $0x70] sm:$0xff]  ;;  %2020 = vmatpush3.bf16.msra.mxu1 %v2171_v30  ;;  %2041 = vmatprep.subr.bf16.mxu0 %v2174_v33 }
  0x14   : > { %v618_v25 = vpack.c.bf16 %v609_v23, %v608_v22  ;;  %v611_v27 = vld [vmem:[%s2425_s27 + $0x78] sm:$0xff]  ;;  %2021 = vmatprep.subr.bf16.mxu1 %v2172_v31  ;;  %v1850_v36 = vld [vmem:[%s564_s17] ss:$0 sm:$0xff]  ;;  %s2585_s27 = scalar_lea.vmem %s2747_s14, %s2419_s24  ;;  %s2686_s17 = scalar_lea.vmem %s2748_s15, %s2419_s24 }
  0x15   : > { %2002 = vmatmul.mubr.msk.bf16.vlgmr.msra.gmra.mxu0 %vm628_vm2, %v613_v12  ;;  %v619_v28 = vpack.c.bf16 %v611_v27, %v610_v26  ;;  %v2177_v29 = vld [vmem:[%s2738_s5 + $0x20] sm:$0xff]   ;;  %v2178_v30 = vld [vmem:[%s2738_s5 + $0x18] sm:$0xff]  }
  0x16   : > { %2005 = vmatprep.mubr.msk.bf16.mxu0 %vm628_vm2, %v614_v13  ;;  %2042 = vmatpush3.bf16.msra.mxu0 %v2174_v33  ;;  %v2181_v33 = vld [vmem:[%s2738_s5] sm:$0xff]  }
  0x17   : > { %2022 = vmatpush3.bf16.msra.mxu1 %v2172_v31  ;;  %2043 = vmatprep.subr.bf16.mxu0 %v2175_v34  ;;  %v2179_v31 = vld [vmem:[%s2738_s5 + $0x10] sm:$0xff]  }
  0x18   : > { %2023 = vmatprep.subr.bf16.mxu1 %v2173_v32 }
  0x1a   : > { %2044 = vmatpush3.bf16.msra.mxu0 %v2175_v34  ;;  %v2182_v34 = vld [vmem:[%s2740_s7 + $0x18] sm:$0xff]  }
  0x1b   : > { %2024 = vmatpush3.bf16.msra.mxu1 %v2173_v32  ;;  %v2180_v32 = vld [vmem:[%s2738_s5 + $0x8] sm:$0xff]  }
  0x1c   : > { %2073 = vmatprep.subr.bf16.mxu1 %v2182_v34 }
  0x1d   : > { %2006 = vmatmul.mubr.msk.bf16.gmra.mxu0 %vm628_vm2, %v615_v18 }
  0x1e   : > { %2009 = vmatprep.mubr.msk.bf16.mxu0 %vm628_vm2, %v616_v19 }
  0x25   : > { %2010 = vmatmul.mubr.msk.bf16.gmra.mxu0 %vm628_vm2, %v617_v24 }
  0x26   : > { %2013 = vmatprep.mubr.msk.bf16.mxu0 %vm628_vm2, %v618_v25 }
  0x2d   : > { %2014 = vmatmul.mubr.msk.bf16.gmra.mxu0 %vm628_vm2, %v619_v28  ;;  %v2176_v28 = vld [vmem:[%s2738_s5 + $0x28] sm:$0xff]  }
  0x2e   : > { %2045 = vmatprep.subr.bf16.mxu0 %v2176_v28 }
  0x2f   : > { %2046 = vmatpush3.bf16.msra.mxu0 %v2176_v28  ;;  %v2183_v28 = vld [vmem:[%s2740_s7 + $0x10] sm:$0xff]  }
  0x30   : > { %2047 = vmatprep.subr.bf16.mxu0 %v2177_v29 }
  0x33   : > { %2048 = vmatpush3.bf16.msra.mxu0 %v2177_v29  ;;  %v2185_v29 = vld [vmem:[%s2742_s9 + $0x18] sm:$0xff]  }
  0x34   : > { %2049 = vmatprep.subr.bf16.mxu0 %v2178_v30 }
  0x37   : > { %2050 = vmatpush3.bf16.msra.mxu0 %v2178_v30  ;;  %v2186_v30 = vld [vmem:[%s2742_s9 + $0x10] sm:$0xff]  }
  0x38   : > { %2051 = vmatprep.subr.bf16.mxu0 %v2179_v31 }
  0x3b   : > { %2052 = vmatpush3.bf16.msra.mxu0 %v2179_v31  ;;  %v2184_v31 = vld [vmem:[%s2740_s7 + $0x8] sm:$0xff]  }
  0x3c   : > { %2053 = vmatprep.subr.bf16.mxu0 %v2180_v32 }
  0x3f   : > { %2054 = vmatpush3.bf16.msra.mxu0 %v2180_v32  ;;  %v2188_v32 = vld [vmem:[%s2742_s9 + $0x8] sm:$0xff]  }
  0x40   : > { %2055 = vmatprep.subr.bf16.mxu0 %v2181_v33 }
  0x43   : > { %2056 = vmatpush3.bf16.msra.mxu0 %v2181_v33  ;;  %v2187_v33 = vld [vmem:[%s2740_s7] sm:$0xff]  }
  0x44   : > { %2097 = vmatprep.subr.bf16.mxu0 %v2185_v29 }
  0xd5   : > { %v2003_v35 = vpop.f32.mrf.mxu0 }
  0xd6   : > { %v703_v41 = vadd.f32 %v2003_v35, %v1850_v36 }
  0xd7   : > { %v694_v37 = vpop.f32.mrf.mxu0 }
  0xd8   : > { %v695_v38 = vadd.f32 %v1850_v36, %v694_v37 }
  0xd9   : > { %v2004_v39 = vpop.f32.mrf.mxu0 }
  0xda   : > { %v706_v40 = vadd.f32 %v2004_v39, %v1850_v36  ;;  %2194 = vtanh.f32 %v695_v38 }
  0xdb   : > { %v697_v42 = vpop.f32.mrf.mxu0 }
  0xdc   : > { %v698_v43 = vadd.f32 %v1850_v36, %v697_v42  ;;  %2196 = vtanh.f32 %v706_v40 }
  0xdd   : > { %v2007_v44 = vpop.f32.mrf.mxu0 }
  0xde   : > { %2198 = vtanh.f32 %v698_v43  ;;  %v719_v49 = vadd.f32 %v2007_v44, %v1850_v36 }
  0xdf   : > { %2200 = vtanh.f32 %v703_v41  ;;  %v710_v45 = vpop.f32.mrf.mxu0 }
  0xe0   : > { %v711_v46 = vadd.f32 %v1850_v36, %v710_v45 }
  0xe1   : > { %v2008_v47 = vpop.f32.mrf.mxu0 }
  0xe2   : > { %v722_v48 = vadd.f32 %v2008_v47, %v1850_v36  ;;  %2202 = vtanh.f32 %v711_v46 }
  0xe3   : > { %v713_v50 = vpop.f32.mrf.mxu0 }
  0xe4   : > { %v714_v51 = vadd.f32 %v1850_v36, %v713_v50  ;;  %2204 = vtanh.f32 %v722_v48 }
  0xe5   : > { %v2011_v52 = vpop.f32.mrf.mxu0 }
  0xe6   : > { %2206 = vtanh.f32 %v714_v51  ;;  %v735_v60 = vadd.f32 %v2011_v52, %v1850_v36 }
  0xe7   : > { %2208 = vtanh.f32 %v719_v49  ;;  %v726_v53 = vpop.f32.mrf.mxu0  ;;  %v2195_v55 = vpop.eup %2194 }
  0xe8   : > { %v727_v54 = vadd.f32 %v1850_v36, %v726_v53 }
  0xe9   : > { %v2012_v56 = vpop.f32.mrf.mxu0  ;;  %v2197_v57 = vpop.eup %2196 }
  0xea   : > { %v738_v58 = vadd.f32 %v2012_v56, %v1850_v36  ;;  %2210 = vtanh.f32 %v727_v54 }
  0xeb   : > { %v2199_v59 = vpop.eup %2198  ;;  %v729_v61 = vpop.f32.mrf.mxu0 }
  0xec   : > { %v2201_v62 = vpop.eup %2200  ;;  %v730_v63 = vadd.f32 %v1850_v36, %v729_v61  ;;  %v773_v0 = vpack.c.bf16 %v2199_v59, %v2195_v55  ;;  %2212 = vtanh.f32 %v738_v58 }
  0xed   : > { %v2015_v1 = vpop.f32.mrf.mxu0  ;;  %v774_v2 = vpack.c.bf16 %v2197_v57, %v2201_v62 }
  0xee   : > { %2214 = vtanh.f32 %v730_v63  ;;  %2025 = vmatprep.mubr.msk.bf16.mxu1 %vm820_vm3, %v773_v0  ;;  %v751_v10 = vadd.f32 %v2015_v1, %v1850_v36 }
  0xef   : > { %2216 = vtanh.f32 %v735_v60  ;;  %v742_v3 = vpop.f32.mrf.mxu0  ;;  %2026 = vmatmul.mubr.msk.bf16.vlgmr.msra.gmra.mxu1 %vm820_vm3, %v774_v2  ;;  %v2203_v5 = vpop.eup %2202 }
  0xf0   : > { %v743_v4 = vadd.f32 %v1850_v36, %v742_v3  ;;  %2074 = vmatpush3.bf16.msra.mxu1 %v2182_v34  ;;  %v2189_v34 = vld [vmem:[%s2742_s9] sm:$0xff]  }
  0xf1   : > { %v2016_v6 = vpop.f32.mrf.mxu0  ;;  %v2205_v7 = vpop.eup %2204  ;;  %2075 = vmatprep.subr.bf16.mxu1 %v2183_v28 }
  0xf2   : > { %v754_v8 = vadd.f32 %v2016_v6, %v1850_v36  ;;  %2218 = vtanh.f32 %v743_v4 }
  0xf3   : > { %v2207_v9 = vpop.eup %2206  ;;  %v745_v11 = vpop.f32.mrf.mxu0 }
  0xf4   : > { %v2209_v12 = vpop.eup %2208  ;;  %v746_v13 = vadd.f32 %v1850_v36, %v745_v11  ;;  %v775_v14 = vpack.c.bf16 %v2207_v9, %v2203_v5  ;;  %2220 = vtanh.f32 %v754_v8  ;;  %v1859_v36 = vld [vmem:[%s2737_s4] ss:$0 sm:$0xff]  ;;  %2076 = vmatpush3.bf16.msra.mxu1 %v2183_v28 }
  0xf5   : > { %v776_v15 = vpack.c.bf16 %v2205_v7, %v2209_v12  ;;  %2077 = vmatprep.subr.bf16.mxu1 %v2184_v31 }
  0xf6   : > { %2222 = vtanh.f32 %v746_v13  ;;  %2029 = vmatprep.mubr.msk.bf16.mxu1 %vm820_vm3, %v775_v14 }
  0xf7   : > { %2224 = vtanh.f32 %v751_v10  ;;  %2030 = vmatmul.mubr.msk.bf16.gmra.mxu1 %vm820_vm3, %v776_v15  ;;  %v2211_v16 = vpop.eup %2210 }
  0xf8   : > { %2078 = vmatpush3.bf16.msra.mxu1 %v2184_v31 }
  0xf9   : > { %v2213_v17 = vpop.eup %2212  ;;  %2079 = vmatprep.subr.bf16.mxu1 %v2187_v33 }
  0xfb   : > { %v2215_v18 = vpop.eup %2214 }
  0xfc   : > { %v2217_v19 = vpop.eup %2216  ;;  %v777_v20 = vpack.c.bf16 %v2215_v18, %v2211_v16  ;;  %2080 = vmatpush3.bf16.msra.mxu1 %v2187_v33  ;;  %v2573_v33 = vld [vmem:[%s2743_s10] ss:$0 sm:$0xff] }
  0xfd   : > { %v778_v21 = vpack.c.bf16 %v2213_v17, %v2217_v19 }
  0xfe   : > { %2033 = vmatprep.mubr.msk.bf16.mxu1 %vm820_vm3, %v777_v20 }
  0xff   : > { %2034 = vmatmul.mubr.msk.bf16.gmra.mxu1 %vm820_vm3, %v778_v21  ;;  %v2219_v22 = vpop.eup %2218 }
 0x101   : > { %v2221_v23 = vpop.eup %2220 }
 0x103   : > { %v2223_v24 = vpop.eup %2222 }
 0x104   : > { %v2225_v25 = vpop.eup %2224  ;;  %v779_v26 = vpack.c.bf16 %v2223_v24, %v2219_v22 }
 0x105   : > { %v780_v27 = vpack.c.bf16 %v2221_v23, %v2225_v25 }
 0x106   : > { %2037 = vmatprep.mubr.msk.bf16.mxu1 %vm820_vm3, %v779_v26 }
 0x107   : > { %2038 = vmatmul.mubr.msk.bf16.gmra.mxu1 %vm820_vm3, %v780_v27 }
 0x1af   : > { %v2027_v35 = vpop.f32.mrf.mxu1 }
 0x1b0   : > { %v888_v41 = vadd.f32 %v2027_v35, %v1859_v36  ;;  %v2190_v35 = vld [vmem:[%s2744_s11 + $0x18] sm:$0xff]  }
 0x1b1   : > { %v879_v37 = vpop.f32.mrf.mxu1  ;;  %2121 = vmatprep.subr.bf16.mxu1 %v2190_v35 }
 0x1b2   : > { %v880_v38 = vadd.f32 %v1859_v36, %v879_v37  ;;  %v1872_v37 = vld [vmem:[%s2739_s6] ss:$0 sm:$0xff] }
 0x1b3   : > { %v2028_v39 = vpop.f32.mrf.mxu1 }
 0x1b4   : > { %v891_v40 = vadd.f32 %v2028_v39, %v1859_v36  ;;  %2226 = vtanh.f32 %v880_v38 }
 0x1b5   : > { %v882_v42 = vpop.f32.mrf.mxu1 }
 0x1b6   : > { %v883_v43 = vadd.f32 %v1859_v36, %v882_v42  ;;  %2228 = vtanh.f32 %v891_v40 }
 0x1b7   : > { %v2031_v44 = vpop.f32.mrf.mxu1 }
 0x1b8   : > { %2230 = vtanh.f32 %v883_v43  ;;  %v904_v49 = vadd.f32 %v2031_v44, %v1859_v36 }
 0x1b9   : > { %2232 = vtanh.f32 %v888_v41  ;;  %v895_v45 = vpop.f32.mrf.mxu1 }
 0x1ba   : > { %v896_v46 = vadd.f32 %v1859_v36, %v895_v45 }
 0x1bb   : > { %v2032_v47 = vpop.f32.mrf.mxu1 }
 0x1bc   : > { %v907_v48 = vadd.f32 %v2032_v47, %v1859_v36  ;;  %2234 = vtanh.f32 %v896_v46 }
 0x1bd   : > { %v898_v50 = vpop.f32.mrf.mxu1 }
 0x1be   : > { %v899_v51 = vadd.f32 %v1859_v36, %v898_v50  ;;  %2236 = vtanh.f32 %v907_v48 }
 0x1bf   : > { %v2035_v52 = vpop.f32.mrf.mxu1 }
 0x1c0   : > { %2238 = vtanh.f32 %v899_v51  ;;  %v920_v60 = vadd.f32 %v2035_v52, %v1859_v36 }
 0x1c1   : > { %2240 = vtanh.f32 %v904_v49  ;;  %v911_v53 = vpop.f32.mrf.mxu1  ;;  %v2227_v55 = vpop.eup %2226 }
 0x1c2   : > { %v912_v54 = vadd.f32 %v1859_v36, %v911_v53 }
 0x1c3   : > { %v2036_v56 = vpop.f32.mrf.mxu1  ;;  %v2229_v57 = vpop.eup %2228 }
 0x1c4   : > { %v923_v58 = vadd.f32 %v2036_v56, %v1859_v36  ;;  %2242 = vtanh.f32 %v912_v54 }
 0x1c5   : > { %v2231_v59 = vpop.eup %2230  ;;  %v914_v61 = vpop.f32.mrf.mxu1 }
 0x1c6   : > { %v2233_v62 = vpop.eup %2232  ;;  %v915_v63 = vadd.f32 %v1859_v36, %v914_v61  ;;  %v958_v0 = vpack.c.bf16 %v2231_v59, %v2227_v55  ;;  %2244 = vtanh.f32 %v923_v58 }
 0x1c7   : > { %v2039_v1 = vpop.f32.mrf.mxu1  ;;  %v959_v2 = vpack.c.bf16 %v2229_v57, %v2233_v62 }
 0x1c8   : > { %2246 = vtanh.f32 %v915_v63  ;;  %2057 = vmatprep.mubr.bf16.mxu0 %v958_v0  ;;  %v936_v10 = vadd.f32 %v2039_v1, %v1859_v36 }
 0x1c9   : > { %2248 = vtanh.f32 %v920_v60  ;;  %v927_v3 = vpop.f32.mrf.mxu1  ;;  %2058 = vmatmul.mubr.bf16.vlgmr.msra.gmra.mxu0 %v959_v2  ;;  %v2235_v5 = vpop.eup %2234 }
 0x1ca   : > { %v928_v4 = vadd.f32 %v1859_v36, %v927_v3  ;;  %2098 = vmatpush3.bf16.msra.mxu0 %v2185_v29 }
 0x1cb   : > { %v2040_v6 = vpop.f32.mrf.mxu1  ;;  %v2237_v7 = vpop.eup %2236  ;;  %2099 = vmatprep.subr.bf16.mxu0 %v2186_v30 }
 0x1cc   : > { %v939_v8 = vadd.f32 %v2040_v6, %v1859_v36  ;;  %2250 = vtanh.f32 %v928_v4  ;;  %v2191_v4 = vld [vmem:[%s2744_s11 + $0x10] sm:$0xff]  }
 0x1cd   : > { %v2239_v9 = vpop.eup %2238  ;;  %v930_v11 = vpop.f32.mrf.mxu1 }
 0x1ce   : > { %v2241_v12 = vpop.eup %2240  ;;  %v931_v13 = vadd.f32 %v1859_v36, %v930_v11  ;;  %v960_v14 = vpack.c.bf16 %v2239_v9, %v2235_v5  ;;  %2252 = vtanh.f32 %v939_v8  ;;  %2100 = vmatpush3.bf16.msra.mxu0 %v2186_v30  ;;  %v2192_v9 = vld [vmem:[%s2744_s11 + $0x8] sm:$0xff]  }
 0x1cf   : > { %v961_v15 = vpack.c.bf16 %v2237_v7, %v2241_v12  ;;  %2101 = vmatprep.subr.bf16.mxu0 %v2188_v32 }
 0x1d0   : > { %2254 = vtanh.f32 %v931_v13  ;;  %2061 = vmatprep.mubr.bf16.mxu0 %v960_v14 }
 0x1d1   : > { %2256 = vtanh.f32 %v936_v10  ;;  %2062 = vmatmul.mubr.bf16.gmra.mxu0 %v961_v15  ;;  %v2243_v16 = vpop.eup %2242 }
 0x1d2   : > { %2102 = vmatpush3.bf16.msra.mxu0 %v2188_v32  ;;  %v2568_v32 = vld [vmem:[%s2741_s8] ss:$0 sm:$0xff] }
 0x1d3   : > { %v2245_v17 = vpop.eup %2244  ;;  %2103 = vmatprep.subr.bf16.mxu0 %v2189_v34 }
 0x1d5   : > { %v2247_v18 = vpop.eup %2246 }
 0x1d6   : > { %v2249_v19 = vpop.eup %2248  ;;  %v962_v20 = vpack.c.bf16 %v2247_v18, %v2243_v16  ;;  %2104 = vmatpush3.bf16.msra.mxu0 %v2189_v34 }
 0x1d7   : > { %v963_v21 = vpack.c.bf16 %v2245_v17, %v2249_v19  ;;  %v2193_v19 = vld [vmem:[%s2744_s11] sm:$0xff]  }
 0x1d8   : > { %2065 = vmatprep.mubr.bf16.mxu0 %v962_v20 }
 0x1d9   : > { %2066 = vmatmul.mubr.bf16.gmra.mxu0 %v963_v21  ;;  %v2251_v22 = vpop.eup %2250 }
 0x1db   : > { %v2253_v23 = vpop.eup %2252 }
 0x1dd   : > { %v2255_v24 = vpop.eup %2254 }
 0x1de   : > { %v2257_v25 = vpop.eup %2256  ;;  %v964_v26 = vpack.c.bf16 %v2255_v24, %v2251_v22 }
 0x1df   : > { %v965_v27 = vpack.c.bf16 %v2253_v23, %v2257_v25 }
 0x1e0   : > { %2069 = vmatprep.mubr.bf16.mxu0 %v964_v26 }
 0x1e1   : > { %2070 = vmatmul.mubr.bf16.gmra.mxu0 %v965_v27 }
 0x289   : > { %v2059_v36 = vpop.f32.mrf.mxu0 }
 0x28a   : > { %v1080_v42 = vadd.f32 %v2059_v36, %v1872_v37 }
 0x28b   : > { %v1071_v38 = vpop.f32.mrf.mxu0 }
 0x28c   : > { %v1072_v39 = vadd.f32 %v1872_v37, %v1071_v38 }
 0x28d   : > { %v2060_v40 = vpop.f32.mrf.mxu0 }
 0x28e   : > { %v1083_v41 = vadd.f32 %v2060_v40, %v1872_v37  ;;  %2258 = vtanh.f32 %v1072_v39 }
 0x28f   : > { %v1074_v43 = vpop.f32.mrf.mxu0 }
 0x290   : > { %v1075_v44 = vadd.f32 %v1872_v37, %v1074_v43  ;;  %2260 = vtanh.f32 %v1083_v41 }
 0x291   : > { %v2063_v45 = vpop.f32.mrf.mxu0 }
 0x292   : > { %2262 = vtanh.f32 %v1075_v44  ;;  %v1096_v50 = vadd.f32 %v2063_v45, %v1872_v37 }
 0x293   : > { %2264 = vtanh.f32 %v1080_v42  ;;  %v1087_v46 = vpop.f32.mrf.mxu0 }
 0x294   : > { %v1088_v47 = vadd.f32 %v1872_v37, %v1087_v46 }
 0x295   : > { %v2064_v48 = vpop.f32.mrf.mxu0 }
 0x296   : > { %v1099_v49 = vadd.f32 %v2064_v48, %v1872_v37  ;;  %2266 = vtanh.f32 %v1088_v47 }
 0x297   : > { %v1090_v51 = vpop.f32.mrf.mxu0 }
 0x298   : > { %v1091_v52 = vadd.f32 %v1872_v37, %v1090_v51  ;;  %2268 = vtanh.f32 %v1099_v49 }
 0x299   : > { %v2067_v53 = vpop.f32.mrf.mxu0 }
 0x29a   : > { %2270 = vtanh.f32 %v1091_v52  ;;  %v1112_v61 = vadd.f32 %v2067_v53, %v1872_v37 }
 0x29b   : > { %2272 = vtanh.f32 %v1096_v50  ;;  %v1103_v54 = vpop.f32.mrf.mxu0  ;;  %v2259_v56 = vpop.eup %2258 }
 0x29c   : > { %v1104_v55 = vadd.f32 %v1872_v37, %v1103_v54 }
 0x29d   : > { %v2068_v57 = vpop.f32.mrf.mxu0  ;;  %v2261_v58 = vpop.eup %2260 }
 0x29e   : > { %v1115_v59 = vadd.f32 %v2068_v57, %v1872_v37  ;;  %2274 = vtanh.f32 %v1104_v55 }
 0x29f   : > { %v2263_v60 = vpop.eup %2262  ;;  %v1106_v62 = vpop.f32.mrf.mxu0 }
 0x2a0   : > { %v2265_v63 = vpop.eup %2264  ;;  %v1107_v0 = vadd.f32 %v1872_v37, %v1106_v62  ;;  %v1150_v1 = vpack.c.bf16 %v2263_v60, %v2259_v56  ;;  %2276 = vtanh.f32 %v1115_v59 }
 0x2a1   : > { %v1151_v2 = vpack.c.bf16 %v2261_v58, %v2265_v63  ;;  %v2071_v3 = vpop.f32.mrf.mxu0 }
 0x2a2   : > { %2278 = vtanh.f32 %v1107_v0  ;;  %2081 = vmatprep.mubr.msk.bf16.mxu1 %vm820_vm3, %v1150_v1  ;;  %2105 = vmatprep.mubr.msk.bf16.mxu0 %vm820_vm3, %v1150_v1  ;;  %v1128_v13 = vadd.f32 %v2071_v3, %v1872_v37 }
 0x2a3   : > { %2280 = vtanh.f32 %v1112_v61  ;;  %v1119_v5 = vpop.f32.mrf.mxu0  ;;  %2082 = vmatmul.mubr.msk.bf16.vlgmr.msra.gmra.mxu1 %vm820_vm3, %v1151_v2  ;;  %2106 = vmatmul.mubr.msk.bf16.vlgmr.msra.gmra.mxu0 %vm820_vm3, %v1151_v2  ;;  %v2267_v7 = vpop.eup %2266 }
 0x2a4   : > { %v1120_v6 = vadd.f32 %v1872_v37, %v1119_v5  ;;  %2122 = vmatpush3.bf16.msra.mxu1 %v2190_v35 }
 0x2a5   : > { %v2072_v8 = vpop.f32.mrf.mxu0  ;;  %2123 = vmatprep.subr.bf16.mxu1 %v2191_v4  ;;  %v2269_v10 = vpop.eup %2268 }
 0x2a6   : > { %v1131_v11 = vadd.f32 %v2072_v8, %v1872_v37  ;;  %2282 = vtanh.f32 %v1120_v6 }
 0x2a7   : > { %v2271_v12 = vpop.eup %2270  ;;  %v1122_v14 = vpop.f32.mrf.mxu0 }
 0x2a8   : > { %v2273_v15 = vpop.eup %2272  ;;  %v1123_v16 = vadd.f32 %v1872_v37, %v1122_v14  ;;  %v1152_v17 = vpack.c.bf16 %v2271_v12, %v2267_v7  ;;  %2124 = vmatpush3.bf16.msra.mxu1 %v2191_v4  ;;  %2284 = vtanh.f32 %v1131_v11 }
 0x2a9   : > { %v1153_v18 = vpack.c.bf16 %v2269_v10, %v2273_v15  ;;  %2125 = vmatprep.subr.bf16.mxu1 %v2192_v9 }
 0x2aa   : > { %2286 = vtanh.f32 %v1123_v16  ;;  %2085 = vmatprep.mubr.msk.bf16.mxu1 %vm820_vm3, %v1152_v17  ;;  %2109 = vmatprep.mubr.msk.bf16.mxu0 %vm820_vm3, %v1152_v17 }
 0x2ab   : > { %2288 = vtanh.f32 %v1128_v13  ;;  %2086 = vmatmul.mubr.msk.bf16.gmra.mxu1 %vm820_vm3, %v1153_v18  ;;  %2110 = vmatmul.mubr.msk.bf16.gmra.mxu0 %vm820_vm3, %v1153_v18  ;;  %v2275_v20 = vpop.eup %2274 }
 0x2ac   : > { %2126 = vmatpush3.bf16.msra.mxu1 %v2192_v9 }
 0x2ad   : > { %2127 = vmatprep.subr.bf16.mxu1 %v2193_v19  ;;  %v2277_v21 = vpop.eup %2276 }
 0x2af   : > { %v2279_v22 = vpop.eup %2278 }
 0x2b0   : > { %v2281_v23 = vpop.eup %2280  ;;  %v1154_v24 = vpack.c.bf16 %v2279_v22, %v2275_v20  ;;  %2128 = vmatpush3.bf16.msra.mxu1 %v2193_v19 }
 0x2b1   : > { %v1155_v25 = vpack.c.bf16 %v2277_v21, %v2281_v23 }
 0x2b2   : > { %2089 = vmatprep.mubr.msk.bf16.mxu1 %vm820_vm3, %v1154_v24  ;;  %2113 = vmatprep.mubr.msk.bf16.mxu0 %vm820_vm3, %v1154_v24 }
 0x2b3   : > { %2090 = vmatmul.mubr.msk.bf16.gmra.mxu1 %vm820_vm3, %v1155_v25  ;;  %2114 = vmatmul.mubr.msk.bf16.gmra.mxu0 %vm820_vm3, %v1155_v25  ;;  %v2283_v26 = vpop.eup %2282 }
 0x2b5   : > { %v2285_v27 = vpop.eup %2284 }
 0x2b7   : > { %v2287_v28 = vpop.eup %2286 }
 0x2b8   : > { %v2289_v29 = vpop.eup %2288  ;;  %v1156_v30 = vpack.c.bf16 %v2287_v28, %v2283_v26 }
 0x2b9   : > { %v1157_v31 = vpack.c.bf16 %v2285_v27, %v2289_v29 }
 0x2ba   : > { %2093 = vmatprep.mubr.msk.bf16.mxu1 %vm820_vm3, %v1156_v30  ;;  %2117 = vmatprep.mubr.msk.bf16.mxu0 %vm820_vm3, %v1156_v30 }
 0x2bb   : > { %2094 = vmatmul.mubr.msk.bf16.gmra.mxu1 %vm820_vm3, %v1157_v31  ;;  %2118 = vmatmul.mubr.msk.bf16.gmra.mxu0 %vm820_vm3, %v1157_v31 }
 0x2bc   : > { %2129 = vmatprep.mubr.msk.bf16.mxu1 %vm820_vm3, %v1150_v1 }
 0x2c3   : > { %2130 = vmatmul.mubr.msk.bf16.vlgmr.msra.gmra.mxu1 %vm820_vm3, %v1151_v2 }
 0x2c4   : > { %2133 = vmatprep.mubr.msk.bf16.mxu1 %vm820_vm3, %v1152_v17 }
 0x2cb   : > { %2134 = vmatmul.mubr.msk.bf16.gmra.mxu1 %vm820_vm3, %v1153_v18 }
 0x2cc   : > { %2137 = vmatprep.mubr.msk.bf16.mxu1 %vm820_vm3, %v1154_v24 }
 0x2d3   : > { %2138 = vmatmul.mubr.msk.bf16.gmra.mxu1 %vm820_vm3, %v1155_v25 }
 0x2d4   : > { %2141 = vmatprep.mubr.msk.bf16.mxu1 %vm820_vm3, %v1156_v30 }
 0x2db   : > { %2142 = vmatmul.mubr.msk.bf16.gmra.mxu1 %vm820_vm3, %v1157_v31 }
 0x363   : > { %v2083_v34 = vpop.f32.mrf.mxu1  ;;  %v2107_v35 = vpop.f32.mrf.mxu0 }
 0x364   : > { %v1264_v36 = vadd.f32 %v2083_v34, %v2568_v32  ;;  %v1417_v37 = vadd.f32 %v2107_v35, %v2573_v33  ;;  %v1907_v34 = vld [vmem:[%s2745_s12] ss:$0 sm:$0xff] }
 0x365   : > { %v1255_v38 = vpop.f32.mrf.mxu1  ;;  %v1408_v39 = vpop.f32.mrf.mxu0 }
 0x366   : > { %1321 = vst.msk [vmem:[%s2579_s23 + $0x10] sm:$0xff] %vm1318_vm4, %v1264_v36  ;;  %v1256_v40 = vadd.f32 %v2568_v32, %v1255_v38  ;;  %v1409_v41 = vadd.f32 %v2573_v33, %v1408_v39 }
 0x367   : > { %1474 = vst.msk [vmem:[%s2585_s27 + $0x10] sm:$0xff] %vm1471_vm5, %v1417_v37  ;;  %v2084_v42 = vpop.f32.mrf.mxu1  ;;  %v2108_v43 = vpop.f32.mrf.mxu0 }
 0x368   : > { %1319 = vst.msk [vmem:[%s2579_s23] sm:$0xff] %vm1318_vm4, %v1256_v40  ;;  %v1267_v44 = vadd.f32 %v2084_v42, %v2568_v32  ;;  %v1420_v45 = vadd.f32 %v2108_v43, %v2573_v33 }
 0x369   : > { %1472 = vst.msk [vmem:[%s2585_s27] sm:$0xff] %vm1471_vm5, %v1409_v41  ;;  %v1258_v46 = vpop.f32.mrf.mxu1  ;;  %v1411_v47 = vpop.f32.mrf.mxu0 }
 0x36a   : > { %1322 = vst.msk [vmem:[%s2579_s23 + $0x18] sm:$0xff] %vm1318_vm4, %v1267_v44  ;;  %v1259_v48 = vadd.f32 %v2568_v32, %v1258_v46  ;;  %v1412_v49 = vadd.f32 %v2573_v33, %v1411_v47 }
 0x36b   : > { %1475 = vst.msk [vmem:[%s2585_s27 + $0x18] sm:$0xff] %vm1471_vm5, %v1420_v45  ;;  %v2087_v50 = vpop.f32.mrf.mxu1  ;;  %v2111_v51 = vpop.f32.mrf.mxu0 }
 0x36c   : > { %1320 = vst.msk [vmem:[%s2579_s23 + $0x8] sm:$0xff] %vm1318_vm4, %v1259_v48  ;;  %v1280_v52 = vadd.f32 %v2087_v50, %v2568_v32  ;;  %v1433_v53 = vadd.f32 %v2111_v51, %v2573_v33 }
 0x36d   : > { %1473 = vst.msk [vmem:[%s2585_s27 + $0x8] sm:$0xff] %vm1471_vm5, %v1412_v49  ;;  %v1271_v54 = vpop.f32.mrf.mxu1  ;;  %v1424_v55 = vpop.f32.mrf.mxu0 }
 0x36e   : > { %1325 = vst.msk [vmem:[%s2579_s23 + $0x30] sm:$0xff] %vm1318_vm4, %v1280_v52  ;;  %v1272_v56 = vadd.f32 %v2568_v32, %v1271_v54  ;;  %v1425_v57 = vadd.f32 %v2573_v33, %v1424_v55 }
 0x36f   : > { %1478 = vst.msk [vmem:[%s2585_s27 + $0x30] sm:$0xff] %vm1471_vm5, %v1433_v53  ;;  %v2088_v58 = vpop.f32.mrf.mxu1  ;;  %v2112_v59 = vpop.f32.mrf.mxu0 }
 0x370   : > { %1323 = vst.msk [vmem:[%s2579_s23 + $0x20] sm:$0xff] %vm1318_vm4, %v1272_v56  ;;  %v1283_v60 = vadd.f32 %v2088_v58, %v2568_v32  ;;  %v1436_v61 = vadd.f32 %v2112_v59, %v2573_v33 }
 0x371   : > { %1476 = vst.msk [vmem:[%s2585_s27 + $0x20] sm:$0xff] %vm1471_vm5, %v1425_v57  ;;  %v1274_v62 = vpop.f32.mrf.mxu1  ;;  %v1427_v63 = vpop.f32.mrf.mxu0 }
 0x372   : > { %1326 = vst.msk [vmem:[%s2579_s23 + $0x38] sm:$0xff] %vm1318_vm4, %v1283_v60  ;;  %v1275_v0 = vadd.f32 %v2568_v32, %v1274_v62  ;;  %v1428_v1 = vadd.f32 %v2573_v33, %v1427_v63 }
 0x373   : > { %1479 = vst.msk [vmem:[%s2585_s27 + $0x38] sm:$0xff] %vm1471_vm5, %v1436_v61  ;;  %v2091_v2 = vpop.f32.mrf.mxu1  ;;  %v2115_v3 = vpop.f32.mrf.mxu0 }
 0x374   : > { %1324 = vst.msk [vmem:[%s2579_s23 + $0x28] sm:$0xff] %vm1318_vm4, %v1275_v0  ;;  %v1296_v4 = vadd.f32 %v2091_v2, %v2568_v32  ;;  %v1449_v5 = vadd.f32 %v2115_v3, %v2573_v33 }
 0x375   : > { %1477 = vst.msk [vmem:[%s2585_s27 + $0x28] sm:$0xff] %vm1471_vm5, %v1428_v1  ;;  %v1287_v6 = vpop.f32.mrf.mxu1  ;;  %v1440_v7 = vpop.f32.mrf.mxu0 }
 0x376   : > { %1329 = vst.msk [vmem:[%s2579_s23 + $0x50] sm:$0xff] %vm1318_vm4, %v1296_v4  ;;  %v1288_v8 = vadd.f32 %v2568_v32, %v1287_v6  ;;  %v1441_v9 = vadd.f32 %v2573_v33, %v1440_v7 }
 0x377   : > { %1482 = vst.msk [vmem:[%s2585_s27 + $0x50] sm:$0xff] %vm1471_vm5, %v1449_v5  ;;  %v2092_v10 = vpop.f32.mrf.mxu1  ;;  %v2116_v11 = vpop.f32.mrf.mxu0 }
 0x378   : > { %1327 = vst.msk [vmem:[%s2579_s23 + $0x40] sm:$0xff] %vm1318_vm4, %v1288_v8  ;;  %v1299_v12 = vadd.f32 %v2092_v10, %v2568_v32  ;;  %v1452_v13 = vadd.f32 %v2116_v11, %v2573_v33 }
 0x379   : > { %1480 = vst.msk [vmem:[%s2585_s27 + $0x40] sm:$0xff] %vm1471_vm5, %v1441_v9  ;;  %v1290_v14 = vpop.f32.mrf.mxu1  ;;  %v1443_v15 = vpop.f32.mrf.mxu0 }
 0x37a   : > { %1330 = vst.msk [vmem:[%s2579_s23 + $0x58] sm:$0xff] %vm1318_vm4, %v1299_v12  ;;  %v1291_v16 = vadd.f32 %v2568_v32, %v1290_v14  ;;  %v1444_v17 = vadd.f32 %v2573_v33, %v1443_v15 }
 0x37b   : > { %1483 = vst.msk [vmem:[%s2585_s27 + $0x58] sm:$0xff] %vm1471_vm5, %v1452_v13  ;;  %v2095_v18 = vpop.f32.mrf.mxu1  ;;  %v2119_v19 = vpop.f32.mrf.mxu0 }
 0x37c   : > { %1328 = vst.msk [vmem:[%s2579_s23 + $0x48] sm:$0xff] %vm1318_vm4, %v1291_v16  ;;  %v1312_v20 = vadd.f32 %v2095_v18, %v2568_v32  ;;  %v1465_v21 = vadd.f32 %v2119_v19, %v2573_v33 }
 0x37d   : > { %1481 = vst.msk [vmem:[%s2585_s27 + $0x48] sm:$0xff] %vm1471_vm5, %v1444_v17  ;;  %v1303_v22 = vpop.f32.mrf.mxu1  ;;  %v1456_v23 = vpop.f32.mrf.mxu0 }
 0x37e   : > { %1333 = vst.msk [vmem:[%s2579_s23 + $0x70] sm:$0xff] %vm1318_vm4, %v1312_v20  ;;  %v1304_v24 = vadd.f32 %v2568_v32, %v1303_v22  ;;  %v1457_v25 = vadd.f32 %v2573_v33, %v1456_v23 }
 0x37f   : > { %1486 = vst.msk [vmem:[%s2585_s27 + $0x70] sm:$0xff] %vm1471_vm5, %v1465_v21  ;;  %v2096_v26 = vpop.f32.mrf.mxu1  ;;  %v2120_v27 = vpop.f32.mrf.mxu0 }
 0x380   : > { %1331 = vst.msk [vmem:[%s2579_s23 + $0x60] sm:$0xff] %vm1318_vm4, %v1304_v24  ;;  %v1315_v28 = vadd.f32 %v2096_v26, %v2568_v32  ;;  %v1468_v29 = vadd.f32 %v2120_v27, %v2573_v33 }
 0x381   : > { %1484 = vst.msk [vmem:[%s2585_s27 + $0x60] sm:$0xff] %vm1471_vm5, %v1457_v25  ;;  %v1306_v30 = vpop.f32.mrf.mxu1  ;;  %v1459_v31 = vpop.f32.mrf.mxu0 }
 0x382   : > { %1334 = vst.msk [vmem:[%s2579_s23 + $0x78] sm:$0xff] %vm1318_vm4, %v1315_v28  ;;  %v1307_v35 = vadd.f32 %v2568_v32, %v1306_v30  ;;  %v1460_v36 = vadd.f32 %v2573_v33, %v1459_v31 }
 0x383   : > { %1487 = vst.msk [vmem:[%s2585_s27 + $0x78] sm:$0xff] %vm1471_vm5, %v1468_v29  ;;  %v2131_v37 = vpop.f32.mrf.mxu1 }
 0x384   : > { %1332 = vst.msk [vmem:[%s2579_s23 + $0x68] sm:$0xff] %vm1318_vm4, %v1307_v35  ;;  %v1570_v38 = vadd.f32 %v2131_v37, %v1907_v34 }
 0x385   : > { %1485 = vst.msk [vmem:[%s2585_s27 + $0x68] sm:$0xff] %vm1471_vm5, %v1460_v36  ;;  %v1561_v32 = vpop.f32.mrf.mxu1 }
 0x386   : > { %1627 = vst.msk [vmem:[%s2686_s17 + $0x10] sm:$0xff] %vm1624_vm6, %v1570_v38  ;;  %v1562_v33 = vadd.f32 %v1907_v34, %v1561_v32 }
 0x387   : > { %v2132_v39 = vpop.f32.mrf.mxu1 }
 0x388   : > { %1625 = vst.msk [vmem:[%s2686_s17] sm:$0xff] %vm1624_vm6, %v1562_v33  ;;  %v1573_v40 = vadd.f32 %v2132_v39, %v1907_v34 }
 0x389   : > { %v1564_v41 = vpop.f32.mrf.mxu1 }
 0x38a   : > { %1628 = vst.msk [vmem:[%s2686_s17 + $0x18] sm:$0xff] %vm1624_vm6, %v1573_v40  ;;  %v1565_v42 = vadd.f32 %v1907_v34, %v1564_v41 }
 0x38b   : > { %v2135_v43 = vpop.f32.mrf.mxu1 }
 0x38c   : > { %1626 = vst.msk [vmem:[%s2686_s17 + $0x8] sm:$0xff] %vm1624_vm6, %v1565_v42  ;;  %v1586_v44 = vadd.f32 %v2135_v43, %v1907_v34 }
 0x38d   : > { %v1577_v45 = vpop.f32.mrf.mxu1 }
 0x38e   : > { %1631 = vst.msk [vmem:[%s2686_s17 + $0x30] sm:$0xff] %vm1624_vm6, %v1586_v44  ;;  %v1578_v46 = vadd.f32 %v1907_v34, %v1577_v45 }
 0x38f   : > { %v2136_v47 = vpop.f32.mrf.mxu1 }
 0x390   : > { %1629 = vst.msk [vmem:[%s2686_s17 + $0x20] sm:$0xff] %vm1624_vm6, %v1578_v46  ;;  %v1589_v48 = vadd.f32 %v2136_v47, %v1907_v34 }
 0x391   : > { %v1580_v49 = vpop.f32.mrf.mxu1 }
 0x392   : > { %1632 = vst.msk [vmem:[%s2686_s17 + $0x38] sm:$0xff] %vm1624_vm6, %v1589_v48  ;;  %v1581_v50 = vadd.f32 %v1907_v34, %v1580_v49 }
 0x393   : > { %v2139_v51 = vpop.f32.mrf.mxu1 }
 0x394   : > { %1630 = vst.msk [vmem:[%s2686_s17 + $0x28] sm:$0xff] %vm1624_vm6, %v1581_v50  ;;  %v1602_v52 = vadd.f32 %v2139_v51, %v1907_v34 }
 0x395   : > { %v1593_v53 = vpop.f32.mrf.mxu1 }
 0x396   : > { %1635 = vst.msk [vmem:[%s2686_s17 + $0x50] sm:$0xff] %vm1624_vm6, %v1602_v52  ;;  %v1594_v54 = vadd.f32 %v1907_v34, %v1593_v53 }
 0x397   : > { %v2140_v55 = vpop.f32.mrf.mxu1 }
 0x398   : > { %1633 = vst.msk [vmem:[%s2686_s17 + $0x40] sm:$0xff] %vm1624_vm6, %v1594_v54  ;;  %v1605_v56 = vadd.f32 %v2140_v55, %v1907_v34 }
 0x399   : > { %v1596_v57 = vpop.f32.mrf.mxu1 }
 0x39a   : > { %1636 = vst.msk [vmem:[%s2686_s17 + $0x58] sm:$0xff] %vm1624_vm6, %v1605_v56  ;;  %v1597_v58 = vadd.f32 %v1907_v34, %v1596_v57 }
 0x39b   : > { %v2143_v59 = vpop.f32.mrf.mxu1 }
 0x39c   : > { %1634 = vst.msk [vmem:[%s2686_s17 + $0x48] sm:$0xff] %vm1624_vm6, %v1597_v58  ;;  %v1618_v60 = vadd.f32 %v2143_v59, %v1907_v34 }
 0x39d   : > { %v1609_v61 = vpop.f32.mrf.mxu1 }
 0x39e   : > { %1639 = vst.msk [vmem:[%s2686_s17 + $0x70] sm:$0xff] %vm1624_vm6, %v1618_v60  ;;  %v1610_v62 = vadd.f32 %v1907_v34, %v1609_v61 }
 0x39f   : > { %v2144_v63 = vpop.f32.mrf.mxu1 }
 0x3a0   : > { %1637 = vst.msk [vmem:[%s2686_s17 + $0x60] sm:$0xff] %vm1624_vm6, %v1610_v62  ;;  %v1621_v0 = vadd.f32 %v2144_v63, %v1907_v34 }
 0x3a1   : > { %v1612_v1 = vpop.f32.mrf.mxu1 }
 0x3a2   : > { %1640 = vst.msk [vmem:[%s2686_s17 + $0x78] sm:$0xff] %vm1624_vm6, %v1621_v0  ;;  %v1613_v2 = vadd.f32 %v1907_v34, %v1612_v1 }
 0x3a4   : > { %1638 = vst.msk [vmem:[%s2686_s17 + $0x68] sm:$0xff] %vm1624_vm6, %v1613_v2 }
 0x3a5 PF: > { %s26_s20 = sadd.s32 1, %s2312_s20   ;;  %s2749_s18 = smov %s2308_s19 }
 0x3a6   : > { %p23_p5 = scmp.ge.s32.totalorder %s26_s20, 4   ;;  %s2750_s19 = smov %s2752_s21 }
 0x3a8   :  { %25 = sbr.rel (!%p23_p5) target bundleno = 2 (0x2), region = 129 }

// kernel: forward.17
= control target key start
LH: loop header
LB: loop body
LE: loop exit
PB: predicated region body
PF: predicated region fallthrough
CT: control target
= control target key end

     0   :  { %s1167_s12 = smov 0   ;;  %s1169_s13 = smov 0   ;;  %s1501_s0 = inlined_call_operand.vmem [shape: f32[2,128,10], index: 0, kind: input, shape index: {}, may-alias: {0,1}]   ;;  %s1502_s1 = inlined_call_operand.vmem [shape: f32[2,128,10], index: 1, kind: input, shape index: {}, may-alias: {0,1}]   ;;  %s1503_s2 = inlined_call_operand.vmem [shape: f32[2,1,128], index: 2, kind: input, shape index: {}]   ;;  %s1504_s3 = inlined_call_operand.vmem [shape: f32[2,1,128], index: 3, kind: output, shape index: {}]  }
   0x1   :  { %s1171_s14 = smov 0  }
   0x2 LB: > { %s25_s15 = sadd.s32 1, %s1128_s13  ;;  %p871_p0 = scmp.ge.s32.totalorder %s1132_s14, 1  ;;  %s1132_s14 = sphi %s1171_s14, %s13_s14   ;;  %s1128_s13 = sphi %s1169_s13, %s1507_s13   ;;  %s1124_s12 = sphi %s1167_s12, %s1506_s12  }
   0x3   : > { %p27_p1 = scmp.ge.s32.totalorder %s25_s15, 2  ;;  %p181_p2 = scmp.lt.s32.totalorder %s1132_s14, 3 }
   0x5   : > { %s1509_s15 = smov (%p27_p1, %s25_s15), 0  ;;  %p182_p3 = pnand %p871_p0, %p181_p2 }
   0x6   : > { %p222_p4 = scmp.lt.s32.totalorder (!%p182_p3), %s1124_s12, 1  ;;  %s1457_s29 = smov (!%p182_p3), 0  }
   0x7   : > { %185 = sbr.rel (%p182_p3) target bundleno = 365 (0x16d), region = 32 }
   0xc   : > { %s1511_s12 = smov (!%p222_p4, %s1124_s12), 1  ;;  %vm296_vm0 = vcmask 80896  }
   0xd   : > { %s927_s16 = sshll.u32 %s1511_s12, 7  ;;  %s247_s19 = scalar_lea.vmem %s1504_s3, %s1511_s12 }
   0xe   : > { %s1195_s22 = scalar_lea.vmem %s1501_s0, %s927_s16  ;;  %s1206_s25 = scalar_lea.vmem %s1502_s1, %s927_s16 }
   0xf   : > { %v263_v0 = vld [vmem:[%s1195_s22 + $0x78] sm:$0xff]  ;;  %v262_v1 = vld [vmem:[%s1195_s22 + $0x70] sm:$0xff]  ;;  %v261_v2 = vld [vmem:[%s1195_s22 + $0x68] sm:$0xff]  ;;  %s241_s28 = scalar_lea.vmem %s1503_s2, %s1511_s12 }
  0x10   : > { %961 = vmatprep.subr.msk.mxu0 %vm296_vm0, %v263_v0  ;;  %1017 = vmatprep.subr.msk.mxu1 %vm296_vm0, %v263_v0  ;;  %v264_v3 = vld [vmem:[%s1206_s25] sm:$0xff]  ;;  %v1213_v4 = vld [vmem:[%s1206_s25 + $0x8] sm:$0xff]  ;;  %v1219_v7 = vld [vmem:[%s1206_s25 + $0x10] sm:$0xff] }
  0x11   : > { %962 = vmatpush3.xpose.msk.msra.mxu0 %vm296_vm0, %v263_v0  ;;  %1033 = vmatpush3.xpose.msk.msra.mxu1 %vm296_vm0, %v263_v0  ;;  %v280_v5 = vmul.f32 %v264_v3, %v264_v3  ;;  %v272_v6 = vld [vmem:[%s1206_s25 + $0x40] sm:$0xff]  ;;  %v281_v8 = vmul.f32 %v1213_v4, %v1213_v4  ;;  %v282_v9 = vmul.f32 %v1219_v7, %v1219_v7  ;;  %v1231_v11 = vld [vmem:[%s1206_s25 + $0x18] sm:$0xff]  ;;  %v1249_v19 = vld [vmem:[%s1206_s25 + $0x28] sm:$0xff] }
  0x12   : > { %963 = vmatprep.subr.msk.mxu0 %vm296_vm0, %v262_v1  ;;  %1018 = vmatprep.subr.msk.mxu1 %vm296_vm0, %v262_v1  ;;  %v260_v10 = vld [vmem:[%s1195_s22 + $0x60] sm:$0xff]  ;;  %v283_v15 = vmul.f32 %v1231_v11, %v1231_v11  ;;  %v259_v18 = vld [vmem:[%s1195_s22 + $0x58] sm:$0xff]  ;;  %v1252_v20 = vld [vmem:[%s1206_s25 + $0x30] sm:$0xff]  ;;  %v285_v22 = vmul.f32 %v1249_v19, %v1249_v19  ;;  %v288_v29 = vmul.f32 %v272_v6, %v272_v6 }
  0x13   : > { %993 = vmatprep.mubr.msk.f32.mxu0 %vm296_vm0, %v264_v3  ;;  %1005 = vmatprep.mubr.msk.f32.mxu1 %vm296_vm0, %v272_v6  ;;  %v297_v12 = vsel %vm296_vm0, %v280_v5, 0.0  ;;  %v1235_v13 = vld [vmem:[%s1206_s25 + $0x20] sm:$0xff]  ;;  %v303_v14 = vsel %vm296_vm0, %v282_v9, 0.0  ;;  %v300_v16 = vsel %vm296_vm0, %v281_v8, 0.0  ;;  %v286_v24 = vmul.f32 %v1252_v20, %v1252_v20  ;;  %v258_v25 = vld [vmem:[%s1195_s22 + $0x50] sm:$0xff]  ;;  %v1266_v26 = vld [vmem:[%s1206_s25 + $0x38] sm:$0xff] }
  0x14   : > { %298 = vadd.xlane.f32.xlu0 %v297_v12  ;;  %v284_v17 = vmul.f32 %v1235_v13, %v1235_v13  ;;  %304 = vadd.xlane.f32.xlu1 %v303_v14  ;;  %v306_v21 = vsel %vm296_vm0, %v283_v15, 0.0  ;;  %v312_v27 = vsel %vm296_vm0, %v285_v22, 0.0  ;;  %v287_v28 = vmul.f32 %v1266_v26, %v1266_v26  ;;  %v257_v31 = vld [vmem:[%s1195_s22 + $0x48] sm:$0xff]  ;;  %v1281_v33 = vld [vmem:[%s1206_s25 + $0x50] sm:$0xff]  ;;  %v256_v38 = vld [vmem:[%s1195_s22 + $0x40] sm:$0xff] }
  0x15   : > { %964 = vmatpush3.xpose.msk.msra.mxu0 %vm296_vm0, %v262_v1  ;;  %1034 = vmatpush3.xpose.msk.msra.mxu1 %vm296_vm0, %v262_v1  ;;  %v315_v30 = vsel %vm296_vm0, %v286_v24, 0.0  ;;  %v1278_v32 = vld [vmem:[%s1206_s25 + $0x48] sm:$0xff]  ;;  %v321_v36 = vsel %vm296_vm0, %v288_v29, 0.0  ;;  %v290_v37 = vmul.f32 %v1281_v33, %v1281_v33  ;;  %v1295_v39 = vld [vmem:[%s1206_s25 + $0x58] sm:$0xff]  ;;  %v1298_v40 = vld [vmem:[%s1206_s25 + $0x60] sm:$0xff] }
  0x16   : > { %965 = vmatprep.subr.msk.mxu0 %vm296_vm0, %v261_v2  ;;  %1019 = vmatprep.subr.msk.mxu1 %vm296_vm0, %v261_v2  ;;  %v309_v23 = vsel %vm296_vm0, %v284_v17, 0.0  ;;  %v318_v34 = vsel %vm296_vm0, %v287_v28, 0.0  ;;  %v289_v35 = vmul.f32 %v1278_v32, %v1278_v32  ;;  %v291_v42 = vmul.f32 %v1295_v39, %v1295_v39  ;;  %v255_v45 = vld [vmem:[%s1195_s22 + $0x38] sm:$0xff]  ;;  %v1312_v46 = vld [vmem:[%s1206_s25 + $0x68] sm:$0xff]  ;;  %v1315_v47 = vld [vmem:[%s1206_s25 + $0x70] sm:$0xff] }
  0x17   : > { %v327_v43 = vsel %vm296_vm0, %v290_v37, 0.0  ;;  %v292_v44 = vmul.f32 %v1298_v40, %v1298_v40  ;;  %v293_v49 = vmul.f32 %v1312_v46, %v1312_v46  ;;  %v294_v51 = vmul.f32 %v1315_v47, %v1315_v47  ;;  %v254_v52 = vld [vmem:[%s1195_s22 + $0x30] sm:$0xff]  ;;  %v279_v53 = vld [vmem:[%s1206_s25 + $0x78] sm:$0xff]  ;;  %v253_v57 = vld [vmem:[%s1195_s22 + $0x28] sm:$0xff] }
  0x18   : > { %301 = vadd.xlane.f32.xlu0 %v300_v16  ;;  %307 = vadd.xlane.f32.xlu1 %v306_v21  ;;  %v324_v41 = vsel %vm296_vm0, %v289_v35, 0.0  ;;  %v330_v48 = vsel %vm296_vm0, %v291_v42, 0.0  ;;  %v295_v55 = vmul.f32 %v279_v53, %v279_v53  ;;  %v252_v59 = vld [vmem:[%s1195_s22 + $0x20] sm:$0xff]  ;;  %v251_v60 = vld [vmem:[%s1195_s22 + $0x18] sm:$0xff]  ;;  %v250_v61 = vld [vmem:[%s1195_s22 + $0x10] sm:$0xff] }
  0x19   : > { %966 = vmatpush3.xpose.msk.msra.mxu0 %vm296_vm0, %v261_v2  ;;  %1035 = vmatpush3.xpose.msk.msra.mxu1 %vm296_vm0, %v261_v2  ;;  %v333_v50 = vsel %vm296_vm0, %v292_v44, 0.0  ;;  %v336_v54 = vsel %vm296_vm0, %v293_v49, 0.0  ;;  %v339_v56 = vsel %vm296_vm0, %v294_v51, 0.0  ;;  %v249_v62 = vld [vmem:[%s1195_s22 + $0x8] sm:$0xff]  ;;  %v248_v63 = vld [vmem:[%s1195_s22] sm:$0xff] }
  0x1a   : > { %967 = vmatprep.subr.msk.mxu0 %vm296_vm0, %v260_v10  ;;  %1020 = vmatprep.subr.msk.mxu1 %vm296_vm0, %v260_v10  ;;  %v342_v58 = vsel %vm296_vm0, %v295_v55, 0.0  ;;  %v908_v16 = vld [vmem:[%s241_s28] ss:$0 sm:$0xff] }
  0x1c   : > { %310 = vadd.xlane.f32.xlu0 %v309_v23  ;;  %313 = vadd.xlane.f32.xlu1 %v312_v27 }
  0x1d   : > { %968 = vmatpush3.xpose.msk.msra.mxu0 %vm296_vm0, %v260_v10  ;;  %1036 = vmatpush3.xpose.msk.msra.mxu1 %vm296_vm0, %v260_v10 }
  0x1e   : > { %969 = vmatprep.subr.msk.mxu0 %vm296_vm0, %v259_v18  ;;  %1021 = vmatprep.subr.msk.mxu1 %vm296_vm0, %v259_v18 }
  0x20   : > { %316 = vadd.xlane.f32.xlu0 %v315_v30  ;;  %319 = vadd.xlane.f32.xlu1 %v318_v34 }
  0x21   : > { %970 = vmatpush3.xpose.msk.msra.mxu0 %vm296_vm0, %v259_v18  ;;  %1037 = vmatpush3.xpose.msk.msra.mxu1 %vm296_vm0, %v259_v18 }
  0x22   : > { %971 = vmatprep.subr.msk.mxu0 %vm296_vm0, %v258_v25  ;;  %1022 = vmatprep.subr.msk.mxu1 %vm296_vm0, %v258_v25 }
  0x24   : > { %322 = vadd.xlane.f32.xlu0 %v321_v36  ;;  %325 = vadd.xlane.f32.xlu1 %v324_v41 }
  0x25   : > { %972 = vmatpush3.xpose.msk.msra.mxu0 %vm296_vm0, %v258_v25  ;;  %1038 = vmatpush3.xpose.msk.msra.mxu1 %vm296_vm0, %v258_v25 }
  0x26   : > { %973 = vmatprep.subr.msk.mxu0 %vm296_vm0, %v257_v31  ;;  %1023 = vmatprep.subr.msk.mxu1 %vm296_vm0, %v257_v31 }
  0x28   : > { %328 = vadd.xlane.f32.xlu0 %v327_v43  ;;  %331 = vadd.xlane.f32.xlu1 %v330_v48 }
  0x29   : > { %974 = vmatpush3.xpose.msk.msra.mxu0 %vm296_vm0, %v257_v31  ;;  %1039 = vmatpush3.xpose.msk.msra.mxu1 %vm296_vm0, %v257_v31 }
  0x2a   : > { %975 = vmatprep.subr.msk.mxu0 %vm296_vm0, %v256_v38  ;;  %1024 = vmatprep.subr.msk.mxu1 %vm296_vm0, %v256_v38 }
  0x2c   : > { %334 = vadd.xlane.f32.xlu0 %v333_v50  ;;  %337 = vadd.xlane.f32.xlu1 %v336_v54 }
  0x2d   : > { %976 = vmatpush3.xpose.msk.msra.mxu0 %vm296_vm0, %v256_v38  ;;  %1040 = vmatpush3.xpose.msk.msra.mxu1 %vm296_vm0, %v256_v38 }
  0x2e   : > { %977 = vmatprep.subr.msk.mxu0 %vm296_vm0, %v255_v45  ;;  %1025 = vmatprep.subr.msk.mxu1 %vm296_vm0, %v255_v45 }
  0x30   : > { %340 = vadd.xlane.f32.xlu0 %v339_v56  ;;  %343 = vadd.xlane.f32.xlu1 %v342_v58 }
  0x31   : > { %978 = vmatpush3.xpose.msk.msra.mxu0 %vm296_vm0, %v255_v45  ;;  %1041 = vmatpush3.xpose.msk.msra.mxu1 %vm296_vm0, %v255_v45 }
  0x32   : > { %979 = vmatprep.subr.msk.mxu0 %vm296_vm0, %v254_v52  ;;  %1026 = vmatprep.subr.msk.mxu1 %vm296_vm0, %v254_v52 }
  0x35   : > { %980 = vmatpush3.xpose.msk.msra.mxu0 %vm296_vm0, %v254_v52  ;;  %1042 = vmatpush3.xpose.msk.msra.mxu1 %vm296_vm0, %v254_v52 }
  0x36   : > { %981 = vmatprep.subr.msk.mxu0 %vm296_vm0, %v253_v57  ;;  %1027 = vmatprep.subr.msk.mxu1 %vm296_vm0, %v253_v57 }
  0x39   : > { %982 = vmatpush3.xpose.msk.msra.mxu0 %vm296_vm0, %v253_v57  ;;  %1043 = vmatpush3.xpose.msk.msra.mxu1 %vm296_vm0, %v253_v57 }
  0x3a   : > { %983 = vmatprep.subr.msk.mxu0 %vm296_vm0, %v252_v59  ;;  %1028 = vmatprep.subr.msk.mxu1 %vm296_vm0, %v252_v59 }
  0x3d   : > { %984 = vmatpush3.xpose.msk.msra.mxu0 %vm296_vm0, %v252_v59  ;;  %1044 = vmatpush3.xpose.msk.msra.mxu1 %vm296_vm0, %v252_v59 }
  0x3e   : > { %985 = vmatprep.subr.msk.mxu0 %vm296_vm0, %v251_v60  ;;  %1029 = vmatprep.subr.msk.mxu1 %vm296_vm0, %v251_v60 }
  0x41   : > { %986 = vmatpush3.xpose.msk.msra.mxu0 %vm296_vm0, %v251_v60  ;;  %1045 = vmatpush3.xpose.msk.msra.mxu1 %vm296_vm0, %v251_v60 }
  0x42   : > { %987 = vmatprep.subr.msk.mxu0 %vm296_vm0, %v250_v61  ;;  %1030 = vmatprep.subr.msk.mxu1 %vm296_vm0, %v250_v61 }
  0x45   : > { %988 = vmatpush3.xpose.msk.msra.mxu0 %vm296_vm0, %v250_v61  ;;  %1046 = vmatpush3.xpose.msk.msra.mxu1 %vm296_vm0, %v250_v61 }
  0x46   : > { %989 = vmatprep.subr.msk.mxu0 %vm296_vm0, %v249_v62  ;;  %1031 = vmatprep.subr.msk.mxu1 %vm296_vm0, %v249_v62 }
  0x49   : > { %990 = vmatpush3.xpose.msk.msra.mxu0 %vm296_vm0, %v249_v62  ;;  %1047 = vmatpush3.xpose.msk.msra.mxu1 %vm296_vm0, %v249_v62 }
  0x4a   : > { %991 = vmatprep.subr.msk.mxu0 %vm296_vm0, %v248_v63  ;;  %1032 = vmatprep.subr.msk.mxu1 %vm296_vm0, %v248_v63 }
  0x4d   : > { %992 = vmatpush3.xpose.msk.msra.mxu0 %vm296_vm0, %v248_v63  ;;  %1048 = vmatpush3.xpose.msk.msra.mxu1 %vm296_vm0, %v248_v63 }
  0x50   : > { %994 = vmatmul.mubr.msk.f32.vlgmr.msra.gmra.mxu0 %vm296_vm0, %v1213_v4  ;;  %1006 = vmatmul.mubr.msk.f32.vlgmr.msra.gmra.mxu1 %vm296_vm0, %v1278_v32 }
  0x51   : > { %996 = vmatprep.mubr.msk.f32.mxu0 %vm296_vm0, %v1219_v7  ;;  %1008 = vmatprep.mubr.msk.f32.mxu1 %vm296_vm0, %v1281_v33 }
  0x54   : > { %997 = vmatmul.mubr.msk.f32.gmra.mxu0 %vm296_vm0, %v1231_v11  ;;  %1009 = vmatmul.mubr.msk.f32.gmra.mxu1 %vm296_vm0, %v1295_v39 }
  0x55   : > { %999 = vmatprep.mubr.msk.f32.mxu0 %vm296_vm0, %v1235_v13  ;;  %1011 = vmatprep.mubr.msk.f32.mxu1 %vm296_vm0, %v1298_v40 }
  0x58   : > { %1000 = vmatmul.mubr.msk.f32.gmra.mxu0 %vm296_vm0, %v1249_v19  ;;  %1012 = vmatmul.mubr.msk.f32.gmra.mxu1 %vm296_vm0, %v1312_v46 }
  0x59   : > { %1002 = vmatprep.mubr.msk.f32.mxu0 %vm296_vm0, %v1252_v20  ;;  %1014 = vmatprep.mubr.msk.f32.mxu1 %vm296_vm0, %v1315_v47 }
  0x5c   : > { %1003 = vmatmul.mubr.msk.f32.gmra.mxu0 %vm296_vm0, %v1266_v26  ;;  %1015 = vmatmul.mubr.msk.f32.gmra.mxu1 %vm296_vm0, %v279_v53 }
  0x9d   : > { %v305_v0 = vpop.xlane.xlu1 %304  ;;  %v299_v1 = vpop.xlane.xlu0 %298 }
  0x9e   : > { %v1399_v19 = vadd.f32 %v908_v16, %v305_v0  ;;  %v593_v20 = vadd.f32 %v908_v16, %v299_v1 }
  0xa1   : > { %v308_v2 = vpop.xlane.xlu1 %307  ;;  %v302_v3 = vpop.xlane.xlu0 %301 }
  0xa2   : > { %v596_v25 = vadd.f32 %v908_v16, %v308_v2  ;;  %v594_v26 = vadd.f32 %v908_v16, %v302_v3 }
  0xa5   : > { %v314_v4 = vpop.xlane.xlu1 %313  ;;  %v311_v5 = vpop.xlane.xlu0 %310 }
  0xa6   : > { %v598_v27 = vadd.f32 %v908_v16, %v314_v4  ;;  %v597_v28 = vadd.f32 %v908_v16, %v311_v5 }
  0xa9   : > { %v320_v6 = vpop.xlane.xlu1 %319  ;;  %v317_v7 = vpop.xlane.xlu0 %316 }
  0xaa   : > { %v1401_v31 = vadd.f32 %v908_v16, %v317_v7  ;;  %v600_v37 = vadd.f32 %v908_v16, %v320_v6 }
  0xad   : > { %v326_v8 = vpop.xlane.xlu1 %325  ;;  %v323_v9 = vpop.xlane.xlu0 %322 }
  0xae   : > { %v601_v32 = vadd.f32 %v908_v16, %v323_v9  ;;  %v602_v39 = vadd.f32 %v908_v16, %v326_v8 }
  0xb1   : > { %v332_v10 = vpop.xlane.xlu1 %331  ;;  %v329_v11 = vpop.xlane.xlu0 %328 }
  0xb2   : > { %v603_v40 = vadd.f32 %v908_v16, %v329_v11  ;;  %v604_v43 = vadd.f32 %v908_v16, %v332_v10 }
  0xb5   : > { %v338_v12 = vpop.xlane.xlu1 %337  ;;  %v335_v13 = vpop.xlane.xlu0 %334 }
  0xb6   : > { %v605_v46 = vadd.f32 %v908_v16, %v335_v13  ;;  %v606_v48 = vadd.f32 %v908_v16, %v338_v12 }
  0xb9   : > { %v344_v29 = vpop.xlane.xlu1 %343  ;;  %v341_v30 = vpop.xlane.xlu0 %340 }
  0xba   : > { %v608_v49 = vadd.f32 %v908_v16, %v344_v29  ;;  %v607_v50 = vadd.f32 %v908_v16, %v341_v30 }
 0x110   : > { %v995_v14 = vpop.f32.mrf.mxu0  ;;  %v1007_v15 = vpop.f32.mrf.mxu1 }
 0x111   : > { %v610_v21 = vmul.f32 2.0, %v995_v14  ;;  %v618_v38 = vmul.f32 2.0, %v1007_v15 }
 0x112   : > { %v507_v17 = vpop.f32.mrf.mxu0  ;;  %v547_v18 = vpop.f32.mrf.mxu1 }
 0x113   : > { %v609_v22 = vmul.f32 2.0, %v507_v17  ;;  %v617_v34 = vmul.f32 2.0, %v547_v18  ;;  %v626_v41 = vsub.f32 %v594_v26, %v610_v21  ;;  %v634_v57 = vsub.f32 %v602_v39, %v618_v38 }
 0x114   : > { %v998_v23 = vpop.f32.mrf.mxu0  ;;  %v1010_v24 = vpop.f32.mrf.mxu1 }
 0x115   : > { %v612_v33 = vmul.f32 2.0, %v998_v23  ;;  %v625_v42 = vsub.f32 %v593_v20, %v609_v22  ;;  %v633_v52 = vsub.f32 %v601_v32, %v617_v34  ;;  %v620_v54 = vmul.f32 2.0, %v1010_v24 }
 0x116   : > { %v517_v35 = vpop.f32.mrf.mxu0  ;;  %v557_v36 = vpop.f32.mrf.mxu1  ;;  %v1403_v61 = vmax.f32 %v626_v41, 0.0 }
 0x117   : > { %v628_v51 = vsub.f32 %v596_v25, %v612_v33  ;;  %v611_v53 = vmul.f32 2.0, %v517_v35  ;;  %v619_v59 = vmul.f32 2.0, %v557_v36  ;;  %v1405_v62 = vmax.f32 %v625_v42, 0.0 }
 0x118   : > { %v1001_v44 = vpop.f32.mrf.mxu0  ;;  %v1013_v45 = vpop.f32.mrf.mxu1  ;;  %v1411_v8 = vmax.f32 %v633_v52, 0.0  ;;  %v636_v10 = vsub.f32 %v604_v43, %v620_v54  ;;  %v1423_v25 = vmax.f32 %v634_v57, 0.0  ;;  %v1455_v54 = vmov 0.0  }
 0x119   : > { %v614_v47 = vmul.f32 2.0, %v1001_v44  ;;  %v622_v63 = vmul.f32 2.0, %v1013_v45  ;;  %v1409_v7 = vmax.f32 %v628_v51, 0.0  ;;  %v627_v9 = vsub.f32 %v1399_v19, %v611_v53 }
 0x11a   : > { %v527_v55 = vpop.f32.mrf.mxu0  ;;  %v567_v56 = vpop.f32.mrf.mxu1  ;;  %v635_v13 = vsub.f32 %v603_v40, %v619_v59 }
 0x11b   : > { %v630_v58 = vsub.f32 %v598_v27, %v614_v47  ;;  %v613_v60 = vmul.f32 2.0, %v527_v55  ;;  %v621_v1 = vmul.f32 2.0, %v567_v56  ;;  %v638_v18 = vsub.f32 %v606_v48, %v622_v63 }
 0x11c   : > { %v1004_v0 = vpop.f32.mrf.mxu0  ;;  %v1016_v2 = vpop.f32.mrf.mxu1  ;;  %v1425_v26 = vmax.f32 %v627_v9, 0.0  ;;  %v1427_v27 = vmax.f32 %v636_v10, 0.0  ;;  %v1434_v33 = vmax.f32 %v635_v13, 0.0 }
 0x11d   : > { %v1407_v3 = vmax.f32 %v630_v58, 0.0  ;;  %v629_v4 = vsub.f32 %v597_v28, %v613_v60  ;;  %v616_v5 = vmul.f32 2.0, %v1004_v0  ;;  %v624_v6 = vmul.f32 2.0, %v1016_v2 }
 0x11e   : > { %v537_v11 = vpop.f32.mrf.mxu0  ;;  %v577_v12 = vpop.f32.mrf.mxu1  ;;  %v637_v20 = vsub.f32 %v605_v46, %v621_v1  ;;  %v1436_v34 = vmax.f32 %v638_v18, 0.0 }
 0x11f   : > { %v1414_v14 = vmax.f32 %v629_v4, 0.0  ;;  %v632_v15 = vsub.f32 %v600_v37, %v616_v5  ;;  %v615_v16 = vmul.f32 2.0, %v537_v11  ;;  %v658_v17 = vmax.f32 %v1403_v61, %v1407_v3 }
 0x120   : > { %v623_v21 = vmul.f32 2.0, %v577_v12  ;;  %v640_v24 = vsub.f32 %v608_v49, %v624_v6 }
 0x121   : > { %v657_v22 = vmax.f32 %v1405_v62, %v1414_v14  ;;  %v1420_v23 = vmax.f32 %v632_v15, 0.0  ;;  %v631_v19 = vsub.f32 %v1401_v31, %v615_v16  ;;  %v1438_v31 = vmax.f32 %v637_v20, 0.0 }
 0x122   : > { %v639_v32 = vsub.f32 %v607_v50, %v623_v21  ;;  %v662_v35 = vmax.f32 %v658_v17, %v1423_v25  ;;  %v1443_v37 = vmax.f32 %v640_v24, 0.0 }
 0x123   : > { %v660_v28 = vmax.f32 %v1409_v7, %v1420_v23  ;;  %v661_v29 = vmax.f32 %v657_v22, %v1411_v8  ;;  %v1432_v30 = vmax.f32 %v631_v19, 0.0 }
 0x124   : > { %v1447_v40 = vmax.f32 %v639_v32, 0.0  ;;  %v666_v42 = vmax.f32 %v662_v35, %v1436_v34 }
 0x125   : > { %v659_v36 = vmax.f32 %v1425_v26, %v1432_v30  ;;  %v664_v38 = vmax.f32 %v660_v28, %v1427_v27  ;;  %v665_v39 = vmax.f32 %v661_v29, %v1438_v31 }
 0x127   : > { %v663_v41 = vmax.f32 %v659_v36, %v1434_v33  ;;  %v668_v43 = vmax.f32 %v664_v38, %v1443_v37  ;;  %v669_v45 = vmax.f32 %v665_v39, %v666_v42 }
 0x129   : > { %v667_v44 = vmax.f32 %v663_v41, %v1447_v40 }
 0x12b   : > { %v670_v46 = vmax.f32 %v667_v44, %v668_v43 }
 0x12d   : > { %v671_v47 = vmax.f32 %v669_v45, %v670_v46 }
 0x12f   : > { %v672_v48 = vrot.slane %v671_v47, 4 }
 0x131   : > { %v673_v49 = vmax.f32 %v671_v47, %v672_v48 }
 0x133   : > { %v674_v50 = vrot.slane %v673_v49, 2 }
 0x135   : > { %v675_v51 = vmax.f32 %v673_v49, %v674_v50 }
 0x137   : > { %v676_v52 = vrot.slane %v675_v51, 1 }
 0x139   : > { %v677_v53 = vmax.f32 %v675_v51, %v676_v52  }
 0x13a LB: >> { %v686_v55 = vadd.f32 %v1136_v53, %v1140_v54  ;;  %v1146_v57 = vmov 0.0   ;;  %s683_s29 = sadd.s32 1, %s1144_s29   ;;  %s1144_s29 = sphi %s1457_s29, %s683_s29   ;;  %v1140_v54 = vphi %v1455_v54, %v758_v54   ;;  %v1136_v53 = vphi %v677_v53, %v1505_v53  }
 0x13b   : >> { %p680_p5 = scmp.ge.s32.totalorder %s683_s29, 26  }
 0x13c   : >> { %v687_v56 = vmul.f32 0.5, %v686_v55 }
 0x13e   : >> { %vm688_vm1 = vcmp.le.f32.partialorder %v1405_v62, %v687_v56  ;;  %vm689_vm2 = vcmp.le.f32.partialorder %v1403_v61, %v687_v56  ;;  %vm690_vm3 = vcmp.le.f32.partialorder %v1425_v26, %v687_v56  ;;  %vm691_vm4 = vcmp.le.f32.partialorder %v1409_v7, %v687_v56 }
 0x13f   : >> { %v909_v58 = vsel %vm688_vm1, 1.0, %v1146_v57  ;;  %v910_v59 = vsel %vm689_vm2, 1.0, %v1146_v57  ;;  %v911_v60 = vsel %vm690_vm3, 1.0, %v1146_v57  ;;  %vm692_vm5 = vcmp.le.f32.partialorder %v1414_v14, %v687_v56 }
 0x140   : >> { %v736_v63 = vadd.f32 %v910_v59, %v909_v58  ;;  %v912_v0 = vsel %vm691_vm4, 1.0, %v1146_v57  ;;  %vm693_vm6 = vcmp.le.f32.partialorder %v1407_v3, %v687_v56  ;;  %v913_v2 = vsel %vm692_vm5, 1.0, %v1146_v57 }
 0x141   : >> { %vm694_vm7 = vcmp.le.f32.partialorder %v1432_v30, %v687_v56  ;;  %v914_v5 = vsel %vm693_vm6, 1.0, %v1146_v57  ;;  %vm695_vm8 = vcmp.le.f32.partialorder %v1420_v23, %v687_v56  ;;  %vm696_vm9 = vcmp.le.f32.partialorder %v1411_v8, %v687_v56 }
 0x142   : >> { %v737_v1 = vadd.f32 %v911_v60, %v736_v63  ;;  %v915_v9 = vsel %vm694_vm7, 1.0, %v1146_v57  ;;  %v916_v11 = vsel %vm695_vm8, 1.0, %v1146_v57  ;;  %vm697_vm10 = vcmp.le.f32.partialorder %v1423_v25, %v687_v56 }
 0x143   : >> { %v917_v13 = vsel %vm696_vm9, 1.0, %v1146_v57  ;;  %vm698_vm11 = vcmp.le.f32.partialorder %v1434_v33, %v687_v56  ;;  %v918_v16 = vsel %vm697_vm10, 1.0, %v1146_v57  ;;  %vm699_vm12 = vcmp.le.f32.partialorder %v1427_v27, %v687_v56 }
 0x144   : >> { %v738_v4 = vadd.f32 %v912_v0, %v737_v1  ;;  %v919_v18 = vsel %vm698_vm11, 1.0, %v1146_v57  ;;  %vm700_vm13 = vcmp.le.f32.partialorder %v1438_v31, %v687_v56  ;;  %v920_v21 = vsel %vm699_vm12, 1.0, %v1146_v57 }
 0x145   : >> { %vm701_vm14 = vcmp.le.f32.partialorder %v1436_v34, %v687_v56  ;;  %v921_v19 = vsel %vm700_vm13, 1.0, %v1146_v57  ;;  %vm702_vm15 = vcmp.le.f32.partialorder %v1447_v40, %v687_v56  ;;  %vm703_vm0 = vcmp.le.f32.partialorder %v1443_v37, %v687_v56 }
 0x146   : >> { %v739_v6 = vadd.f32 %v913_v2, %v738_v4  ;;  %v922_v28 = vsel %vm701_vm14, 1.0, %v1146_v57  ;;  %v923_v32 = vsel %vm702_vm15, 1.0, %v1146_v57  ;;  %v924_v36 = vsel %vm703_vm0, 1.0, %v1146_v57 }
 0x148   : >> { %v740_v10 = vadd.f32 %v914_v5, %v739_v6 }
 0x14a   : >> { %v741_v12 = vadd.f32 %v915_v9, %v740_v10 }
 0x14c   : >> { %v742_v15 = vadd.f32 %v916_v11, %v741_v12 }
 0x14e   : >> { %v743_v17 = vadd.f32 %v917_v13, %v742_v15 }
 0x150   : >> { %v744_v20 = vadd.f32 %v918_v16, %v743_v17 }
 0x152   : >> { %v745_v22 = vadd.f32 %v919_v18, %v744_v20 }
 0x154   : >> { %v746_v24 = vadd.f32 %v920_v21, %v745_v22 }
 0x156   : >> { %v747_v29 = vadd.f32 %v921_v19, %v746_v24 }
 0x158   : >> { %v748_v35 = vadd.f32 %v922_v28, %v747_v29 }
 0x15a   : >> { %v749_v38 = vadd.f32 %v923_v32, %v748_v35 }
 0x15c   : >> { %v750_v39 = vadd.f32 %v924_v36, %v749_v38 }
 0x15e   : >> { %v751_v41 = vrot.slane %v750_v39, 4 }
 0x160   : >> { %v752_v42 = vadd.f32 %v751_v41, %v750_v39 }
 0x162   : >> { %v753_v43 = vrot.slane %v752_v42, 2 }
 0x164   : >> { %v754_v44 = vadd.f32 %v753_v43, %v752_v42 }
 0x166   : >> { %v755_v45 = vrot.slane %v754_v44, 1 }
 0x168   : >> { %v756_v46 = vadd.f32 %v755_v45, %v754_v44  ;;  %682 = sbr.rel (!%p680_p5) target bundleno = 314 (0x13a), region = 75 }
 0x16a   : >> { %vm757_vm1 = vcmp.ge.f32.partialorder %v756_v46, 80.0 }
 0x16b   : >> { %v758_v54 = vsel %vm757_vm1, %v1140_v54, %v687_v56   ;;  %v759_v47 = vsel %vm757_vm1, %v687_v56, %v1136_v53  }
 0x16c   : >> { %v1505_v53 = vmov %v759_v47  ;;  %760 = vst [vmem:[%s247_s19] sm:$0x1] (%p680_p5), %v759_v47 }
 0x16d PF: > { %s13_s14 = sadd.s32 1, %s1132_s14   ;;  %s1506_s12 = smov %s1128_s13 }
 0x16e   : > { %p10_p6 = scmp.ge.s32.totalorder %s13_s14, 4   ;;  %s1507_s13 = smov %s1509_s15 }
 0x170   :  { %12 = sbr.rel (!%p10_p6) target bundleno = 2 (0x2), region = 86 }

// kernel: forward.15
= control target key start
LH: loop header
LB: loop body
LE: loop exit
PB: predicated region body
PF: predicated region fallthrough
CT: control target
= control target key end

     0   :  { %s5477_s27 = smov 0   ;;  %s5479_s28 = smov 0   ;;  %s8157_s0 = inlined_call_operand.vmem [shape: f32[2,128,10], index: 0, kind: input, shape index: {}, may-alias: {0,3}]   ;;  %s8158_s1 = inlined_call_operand.vmem [shape: f32[2,1,128], index: 1, kind: input, shape index: {}]   ;;  %s8159_s2 = inlined_call_operand.vmem [shape: f32[2,1,128], index: 2, kind: input, shape index: {}]   ;;  %s8160_s3 = inlined_call_operand.vmem [shape: f32[2,128,10], index: 3, kind: input, shape index: {}, may-alias: {0,3}]   ;;  %s8161_s4 = inlined_call_operand.vmem [shape: f32[2,128,21], index: 4, kind: input, shape index: {}]   ;;  %s8162_s5 = inlined_call_operand.vmem [shape: f32[2,128,42], index: 5, kind: input, shape index: {}]   ;;  %s8163_s6 = inlined_call_operand.vmem [shape: bf16[21,42], index: 6, kind: input, shape index: {}]   ;;  %s8164_s7 = inlined_call_operand.vmem [shape: bf16[21,42], index: 7, kind: input, shape index: {}]   ;;  %s8165_s8 = inlined_call_operand.vmem [shape: f32[2,128,42], index: 8, kind: output, shape index: {}]  }
   0x1   :  { %s5481_s29 = smov 0  }
   0x2 LB: > { %s37_s30 = sadd.s32 1, %s5401_s28  ;;  %p4773_p0 = scmp.ge.s32.totalorder %s5405_s29, 1  ;;  %s5405_s29 = sphi %s5481_s29, %s18_s29   ;;  %s5401_s28 = sphi %s5479_s28, %s8806_s28   ;;  %s5397_s27 = sphi %s5477_s27, %s8805_s27  }
   0x3   : > { %p39_p1 = scmp.ge.s32.totalorder %s37_s30, 2  ;;  %p367_p2 = scmp.lt.s32.totalorder %s5405_s29, 3 }
   0x5   : > { %s8808_s30 = smov (%p39_p1, %s37_s30), 0  ;;  %p368_p3 = pnand %p4773_p0, %p367_p2 }
   0x7   : > { %371 = sbr.rel (%p368_p3) target bundleno = 1432 (0x598), region = 52 }
   0xc   : > { %p449_p4 = scmp.lt.s32.totalorder %s5397_s27, 1  ;;  %v8166_v0 = vmov 0   ;;  %vm616_vm0 = vcmask 80896  }
   0xd   : > { %5211 = vset.pattern.permute.xlu1 %v8166_v0  ;;  %5210 = vset.pattern.permute.xlu0 %v8166_v0 }
   0xe   : > { %s8810_s27 = smov (!%p449_p4, %s5397_s27), 1 }
   0xf   : > { %s5500_s9 = sshll.u32 %s8810_s27, 7  ;;  %s463_s21 = scalar_lea.vmem %s8158_s1, %s8810_s27 }
  0x10   : > { %s5506_s12 = scalar_lea.vmem %s8157_s0, %s5500_s9  ;;  %s5513_s15 = scalar_lea.vmem %s8160_s3, %s5500_s9 }
  0x11   : > { %v567_v1 = vld [vmem:[%s5506_s12 + $0x78] sm:$0xff]  ;;  %v566_v2 = vld [vmem:[%s5506_s12 + $0x70] sm:$0xff]  ;;  %v568_v4 = vld [vmem:[%s5513_s15] sm:$0xff]  ;;  %s5646_s18 = scalar_lea.vmem %s8161_s4, %s5500_s9  ;;  %s469_s24 = scalar_lea.vmem %s8159_s2, %s8810_s27 }
  0x12   : > { %4977 = vmatprep.subr.msk.mxu0 %vm616_vm0, %v567_v1  ;;  %v5518_v3 = vld [vmem:[%s5513_s15 + $0x10] sm:$0xff]  ;;  %v5522_v5 = vld [vmem:[%s5513_s15 + $0x18] sm:$0xff]  ;;  %v600_v7 = vmul.f32 %v568_v4, %v568_v4  ;;  %v5530_v9 = vld [vmem:[%s5513_s15 + $0x8] sm:$0xff]  ;;  %5009 = vmatprep.mubr.msk.f32.mxu0 %vm616_vm0, %v568_v4  ;;  %s8092_s17 = scalar_lea.vmem %s8162_s5, %s5500_s9  ;;  %s8101_s20 = scalar_lea.vmem %s8165_s8, %s5500_s9 }
  0x13   : > { %4978 = vmatpush3.xpose.msk.msra.mxu0 %vm616_vm0, %v567_v1  ;;  %v602_v6 = vmul.f32 %v5518_v3, %v5518_v3  ;;  %v603_v8 = vmul.f32 %v5522_v5, %v5522_v5  ;;  %v601_v10 = vmul.f32 %v5530_v9, %v5530_v9  ;;  %v5537_v11 = vld [vmem:[%s5513_s15 + $0x28] sm:$0xff]  ;;  %v5540_v12 = vld [vmem:[%s5513_s15 + $0x20] sm:$0xff]  ;;  %v5554_v20 = vld [vmem:[%s5513_s15 + $0x38] sm:$0xff] }
  0x14   : > { %4979 = vmatprep.subr.msk.mxu0 %vm616_vm0, %v566_v2  ;;  %v617_v14 = vsel %vm616_vm0, %v600_v7, 0.0  ;;  %v565_v15 = vld [vmem:[%s5506_s12 + $0x68] sm:$0xff]  ;;  %v605_v18 = vmul.f32 %v5537_v11, %v5537_v11  ;;  %v604_v19 = vmul.f32 %v5540_v12, %v5540_v12  ;;  %v5557_v21 = vld [vmem:[%s5513_s15 + $0x30] sm:$0xff]  ;;  %v564_v22 = vld [vmem:[%s5506_s12 + $0x60] sm:$0xff]  ;;  %v607_v25 = vmul.f32 %v5554_v20, %v5554_v20 }
  0x15   : > { %v623_v13 = vsel %vm616_vm0, %v602_v6, 0.0  ;;  %618 = vadd.xlane.f32.xlu0 %v617_v14  ;;  %v626_v16 = vsel %vm616_vm0, %v603_v8, 0.0  ;;  %v620_v17 = vsel %vm616_vm0, %v601_v10, 0.0  ;;  %v606_v26 = vmul.f32 %v5557_v21, %v5557_v21  ;;  %v5569_v27 = vld [vmem:[%s5513_s15 + $0x48] sm:$0xff]  ;;  %v5572_v28 = vld [vmem:[%s5513_s15 + $0x40] sm:$0xff]  ;;  %v563_v29 = vld [vmem:[%s5506_s12 + $0x58] sm:$0xff] }
  0x16   : > { %624 = vadd.xlane.f32.xlu1 %v623_v13  ;;  %v632_v23 = vsel %vm616_vm0, %v605_v18, 0.0  ;;  %v629_v24 = vsel %vm616_vm0, %v604_v19, 0.0  ;;  %v638_v30 = vsel %vm616_vm0, %v607_v25, 0.0  ;;  %v609_v32 = vmul.f32 %v5569_v27, %v5569_v27  ;;  %v5584_v34 = vld [vmem:[%s5513_s15 + $0x58] sm:$0xff]  ;;  %v5587_v35 = vld [vmem:[%s5513_s15 + $0x50] sm:$0xff]  ;;  %v5599_v41 = vld [vmem:[%s5513_s15 + $0x68] sm:$0xff] }
  0x17   : > { %4980 = vmatpush3.xpose.msk.msra.mxu0 %vm616_vm0, %v566_v2  ;;  %v635_v31 = vsel %vm616_vm0, %v606_v26, 0.0  ;;  %v608_v33 = vmul.f32 %v5572_v28, %v5572_v28  ;;  %v562_v36 = vld [vmem:[%s5506_s12 + $0x50] sm:$0xff]  ;;  %v611_v39 = vmul.f32 %v5584_v34, %v5584_v34  ;;  %v610_v40 = vmul.f32 %v5587_v35, %v5587_v35  ;;  %v5602_v42 = vld [vmem:[%s5513_s15 + $0x60] sm:$0xff]  ;;  %v561_v43 = vld [vmem:[%s5506_s12 + $0x48] sm:$0xff] }
  0x18   : > { %4981 = vmatprep.subr.msk.mxu0 %vm616_vm0, %v565_v15  ;;  %v644_v37 = vsel %vm616_vm0, %v609_v32, 0.0  ;;  %v613_v46 = vmul.f32 %v5599_v41, %v5599_v41  ;;  %v612_v47 = vmul.f32 %v5602_v42, %v5602_v42  ;;  %v5614_v48 = vld [vmem:[%s5513_s15 + $0x78] sm:$0xff]  ;;  %v5617_v49 = vld [vmem:[%s5513_s15 + $0x70] sm:$0xff]  ;;  %v560_v50 = vld [vmem:[%s5506_s12 + $0x40] sm:$0xff]  ;;  %v5408_v6 = vmov 1  }
  0x19   : > { %621 = vadd.xlane.f32.xlu0 %v620_v17  ;;  %v641_v38 = vsel %vm616_vm0, %v608_v33, 0.0  ;;  %v650_v44 = vsel %vm616_vm0, %v611_v39, 0.0  ;;  %v647_v45 = vsel %vm616_vm0, %v610_v40, 0.0  ;;  %v615_v53 = vmul.f32 %v5614_v48, %v5614_v48  ;;  %v559_v55 = vld [vmem:[%s5506_s12 + $0x38] sm:$0xff]  ;;  %v558_v58 = vld [vmem:[%s5506_s12 + $0x30] sm:$0xff]  ;;  %v557_v59 = vld [vmem:[%s5506_s12 + $0x28] sm:$0xff] }
  0x1a   : > { %627 = vadd.xlane.f32.xlu1 %v626_v16  ;;  %v656_v51 = vsel %vm616_vm0, %v613_v46, 0.0  ;;  %v653_v52 = vsel %vm616_vm0, %v612_v47, 0.0  ;;  %v614_v54 = vmul.f32 %v5617_v49, %v5617_v49  ;;  %v556_v60 = vld [vmem:[%s5506_s12 + $0x20] sm:$0xff]  ;;  %v555_v61 = vld [vmem:[%s5506_s12 + $0x18] sm:$0xff]  ;;  %v5651_v62 = vld [vmem:[%s5646_s18 + $0x48] sm:$0xff]  ;;  %v5409_v16 = vmov 2  }
  0x1b   : > { %4982 = vmatpush3.xpose.msk.msra.mxu0 %vm616_vm0, %v565_v15  ;;  %v662_v56 = vsel %vm616_vm0, %v615_v53, 0.0  ;;  %v554_v63 = vld [vmem:[%s5506_s12 + $0x10] sm:$0xff]  ;;  %v5659_v1 = vld [vmem:[%s5646_s18 + $0x8] sm:$0xff]  ;;  %v5662_v2 = vld [vmem:[%s5646_s18] sm:$0xff]  ;;  %v5412_v47 = vmov 5  }
  0x1c   : > { %4983 = vmatprep.subr.msk.mxu0 %vm616_vm0, %v564_v22  ;;  %v659_v57 = vsel %vm616_vm0, %v614_v54, 0.0  ;;  %v553_v4 = vld [vmem:[%s5506_s12 + $0x8] sm:$0xff]  ;;  %v5671_v7 = vld [vmem:[%s5646_s18 + $0x10] sm:$0xff]  ;;  %v552_v8 = vld [vmem:[%s5506_s12] sm:$0xff] }
  0x1d   : > { %630 = vadd.xlane.f32.xlu0 %v629_v24  ;;  %v5679_v10 = vld [vmem:[%s5646_s18 + $0x20] sm:$0xff]  ;;  %v5685_v13 = vld [vmem:[%s5646_s18 + $0x30] sm:$0xff]  ;;  %v5688_v14 = vld [vmem:[%s5646_s18 + $0x18] sm:$0xff] }
  0x1e   : > { %633 = vadd.xlane.f32.xlu1 %v632_v23  ;;  %v5697_v15 = vld [vmem:[%s5646_s18 + $0x40] sm:$0xff]  ;;  %v5751_v17 = vld [vmem:[%s5646_s18 + $0x58] sm:$0xff]  ;;  %v5760_v18 = vld [vmem:[%s5646_s18 + $0x68] sm:$0xff] }
  0x1f   : > { %4984 = vmatpush3.xpose.msk.msra.mxu0 %vm616_vm0, %v564_v22  ;;  %v5767_v19 = vld [vmem:[%s5646_s18 + $0x78] sm:$0xff] }
  0x20   : > { %4985 = vmatprep.subr.msk.mxu0 %vm616_vm0, %v563_v29 }
  0x21   : > { %636 = vadd.xlane.f32.xlu0 %v635_v31 }
  0x22   : > { %639 = vadd.xlane.f32.xlu1 %v638_v30 }
  0x23   : > { %4986 = vmatpush3.xpose.msk.msra.mxu0 %vm616_vm0, %v563_v29  ;;  %v5411_v29 = vmov 4  }
  0x24   : > { %4987 = vmatprep.subr.msk.mxu0 %vm616_vm0, %v562_v36 }
  0x25   : > { %642 = vadd.xlane.f32.xlu0 %v641_v38 }
  0x26   : > { %645 = vadd.xlane.f32.xlu1 %v644_v37 }
  0x27   : > { %4988 = vmatpush3.xpose.msk.msra.mxu0 %vm616_vm0, %v562_v36 }
  0x28   : > { %4989 = vmatprep.subr.msk.mxu0 %vm616_vm0, %v561_v43 }
  0x29   : > { %648 = vadd.xlane.f32.xlu0 %v647_v45 }
  0x2a   : > { %651 = vadd.xlane.f32.xlu1 %v650_v44 }
  0x2b   : > { %4990 = vmatpush3.xpose.msk.msra.mxu0 %vm616_vm0, %v561_v43 }
  0x2c   : > { %4991 = vmatprep.subr.msk.mxu0 %vm616_vm0, %v560_v50 }
  0x2d   : > { %654 = vadd.xlane.f32.xlu0 %v653_v52 }
  0x2e   : > { %657 = vadd.xlane.f32.xlu1 %v656_v51 }
  0x2f   : > { %4992 = vmatpush3.xpose.msk.msra.mxu0 %vm616_vm0, %v560_v50 }
  0x30   : > { %4993 = vmatprep.subr.msk.mxu0 %vm616_vm0, %v559_v55 }
  0x31   : > { %660 = vadd.xlane.f32.xlu0 %v659_v57 }
  0x32   : > { %663 = vadd.xlane.f32.xlu1 %v662_v56 }
  0x33   : > { %4994 = vmatpush3.xpose.msk.msra.mxu0 %vm616_vm0, %v559_v55 }
  0x34   : > { %4995 = vmatprep.subr.msk.mxu0 %vm616_vm0, %v558_v58 }
  0x37   : > { %4996 = vmatpush3.xpose.msk.msra.mxu0 %vm616_vm0, %v558_v58 }
  0x38   : > { %4997 = vmatprep.subr.msk.mxu0 %vm616_vm0, %v557_v59 }
  0x3b   : > { %4998 = vmatpush3.xpose.msk.msra.mxu0 %vm616_vm0, %v557_v59  ;;  %v5413_v59 = vmov -1e+30  }
  0x3c   : > { %4999 = vmatprep.subr.msk.mxu0 %vm616_vm0, %v556_v60  ;;  %549 = vst [vmem:[#allocation4] sm:$0xff] %v5413_v59  ;;  %550 = vst [vmem:[#allocation4 + $0x8] sm:$0xff] %v5413_v59 }
  0x3d   : > { %551 = vst [vmem:[#allocation4 + $0x10] sm:$0x1f] %v5413_v59 }
  0x3f   : > { %5000 = vmatpush3.xpose.msk.msra.mxu0 %vm616_vm0, %v556_v60 }
  0x40   : > { %5001 = vmatprep.subr.msk.mxu0 %vm616_vm0, %v555_v61 }
  0x43   : > { %1579 = vperm.xlu1 %5211, %v5651_v62   ;;  %5002 = vmatpush3.xpose.msk.msra.mxu0 %vm616_vm0, %v555_v61 }
  0x44   : > { %5003 = vmatprep.subr.msk.mxu0 %vm616_vm0, %v554_v63 }
  0x47   : > { %5213 = vset.pattern.permute.xlu1 %v5408_v6  ;;  %5004 = vmatpush3.xpose.msk.msra.mxu0 %vm616_vm0, %v554_v63 }
  0x48   : > { %1673 = vperm.xlu1 %5213, %v5659_v1   ;;  %1534 = vperm.xlu0 %5210, %v5662_v2  }
  0x49   : > { %5005 = vmatprep.subr.msk.mxu0 %vm616_vm0, %v553_v4 }
  0x4b   : > { %5006 = vmatpush3.xpose.msk.msra.mxu0 %vm616_vm0, %v553_v4 }
  0x4c   : > { %1677 = vperm.xlu1 %5213, %v5671_v7   ;;  %1539 = vperm.xlu0 %5210, %v5659_v1  }
  0x4d   : > { %5007 = vmatprep.subr.msk.mxu0 %vm616_vm0, %v552_v8 }
  0x4f   : > { %5008 = vmatpush3.xpose.msk.msra.mxu0 %vm616_vm0, %v552_v8 }
  0x50   : > { %1685 = vperm.xlu1 %5213, %v5679_v10   ;;  %1544 = vperm.xlu0 %5210, %v5671_v7  }
  0x52   : > { %5010 = vmatmul.mubr.msk.f32.vlgmr.msra.gmra.mxu0 %vm616_vm0, %v5530_v9  ;;  %v5706_v9 = vld [vmem:[%s5646_s18 + $0x50] sm:$0xff] }
  0x53   : > { %5012 = vmatprep.mubr.msk.f32.mxu0 %vm616_vm0, %v5518_v3  ;;  %v5709_v3 = vld [vmem:[%s5646_s18 + $0x28] sm:$0xff] }
  0x54   : > { %1693 = vperm.xlu1 %5213, %v5685_v13   ;;  %1549 = vperm.xlu0 %5210, %v5688_v14  }
  0x56   : > { %5013 = vmatmul.mubr.msk.f32.gmra.mxu0 %vm616_vm0, %v5522_v5  ;;  %v5718_v5 = vld [vmem:[%s5646_s18 + $0x60] sm:$0xff] }
  0x57   : > { %5015 = vmatprep.mubr.msk.f32.mxu0 %vm616_vm0, %v5540_v12  ;;  %v5730_v12 = vld [vmem:[%s5646_s18 + $0x38] sm:$0xff] }
  0x58   : > { %1701 = vperm.xlu1 %5213, %v5697_v15   ;;  %1554 = vperm.xlu0 %5210, %v5679_v10  }
  0x5a   : > { %5016 = vmatmul.mubr.msk.f32.gmra.mxu0 %vm616_vm0, %v5537_v11  ;;  %v5727_v11 = vld [vmem:[%s5646_s18 + $0x70] sm:$0xff] }
  0x5b   : > { %5018 = vmatprep.mubr.msk.f32.mxu0 %vm616_vm0, %v5557_v21 }
  0x5c   : > { %1709 = vperm.xlu1 %5213, %v5706_v9   ;;  %1559 = vperm.xlu0 %5210, %v5709_v3  }
  0x5e   : > { %5019 = vmatmul.mubr.msk.f32.gmra.mxu0 %vm616_vm0, %v5554_v20  ;;  %v5410_v20 = vmov 3  }
  0x5f   : > { %5021 = vmatprep.mubr.msk.f32.mxu0 %vm616_vm0, %v5572_v28 }
  0x60   : > { %1717 = vperm.xlu1 %5213, %v5718_v5   ;;  %1564 = vperm.xlu0 %5210, %v5685_v13  }
  0x62   : > { %5022 = vmatmul.mubr.msk.f32.gmra.mxu0 %vm616_vm0, %v5569_v27 }
  0x63   : > { %5024 = vmatprep.mubr.msk.f32.mxu0 %vm616_vm0, %v5587_v35 }
  0x64   : > { %1725 = vperm.xlu1 %5213, %v5727_v11   ;;  %1569 = vperm.xlu0 %5210, %v5730_v12  }
  0x66   : > { %5025 = vmatmul.mubr.msk.f32.gmra.mxu0 %vm616_vm0, %v5584_v34 }
  0x67   : > { %5027 = vmatprep.mubr.msk.f32.mxu0 %vm616_vm0, %v5602_v42 }
  0x68   : > { %5214 = vset.pattern.permute.xlu1 %v5409_v16  ;;  %1574 = vperm.xlu0 %5210, %v5697_v15  }
  0x69   : > { %1789 = vperm.xlu1 %5214, %v5662_v2  }
  0x6a   : > { %5028 = vmatmul.mubr.msk.f32.gmra.mxu0 %vm616_vm0, %v5599_v41 }
  0x6b   : > { %5030 = vmatprep.mubr.msk.f32.mxu0 %vm616_vm0, %v5617_v49 }
  0x6c   : > { %1584 = vperm.xlu0 %5210, %v5706_v9  }
  0x6d   : > { %1797 = vperm.xlu1 %5214, %v5671_v7  }
  0x6e   : > { %5031 = vmatmul.mubr.msk.f32.gmra.mxu0 %vm616_vm0, %v5614_v48 }
  0x70   : > { %1589 = vperm.xlu0 %5210, %v5751_v17  }
  0x71   : > { %1801 = vperm.xlu1 %5214, %v5688_v14  }
  0x74   : > { %1594 = vperm.xlu0 %5210, %v5718_v5  }
  0x75   : > { %1809 = vperm.xlu1 %5214, %v5709_v3  }
  0x78   : > { %1599 = vperm.xlu0 %5210, %v5760_v18  }
  0x79   : > { %1817 = vperm.xlu1 %5214, %v5730_v12  }
  0x7c   : > { %1604 = vperm.xlu0 %5210, %v5727_v11  }
  0x7d   : > { %1825 = vperm.xlu1 %5214, %v5651_v62  }
  0x80   : > { %1609 = vperm.xlu0 %5210, %v5767_v19  }
  0x81   : > { %1833 = vperm.xlu1 %5214, %v5751_v17  }
  0x84   : > { %5212 = vset.pattern.permute.xlu0 %v5408_v6 }
  0x85   : > { %1841 = vperm.xlu1 %5214, %v5760_v18   ;;  %1669 = vperm.xlu0 %5212, %v5662_v2  }
  0x89   : > { %1849 = vperm.xlu1 %5214, %v5767_v19   ;;  %1681 = vperm.xlu0 %5212, %v5688_v14  }
  0x8d   : > { %5217 = vset.pattern.permute.xlu1 %v5410_v20  ;;  %1689 = vperm.xlu0 %5212, %v5709_v3  }
  0x8e   : > { %1913 = vperm.xlu1 %5217, %v5659_v1  }
  0x91   : > { %1697 = vperm.xlu0 %5212, %v5730_v12  }
  0x92   : > { %1917 = vperm.xlu1 %5217, %v5671_v7  }
  0x95   : > { %1705 = vperm.xlu0 %5212, %v5651_v62  }
  0x96   : > { %1925 = vperm.xlu1 %5217, %v5679_v10  }
  0x99   : > { %1713 = vperm.xlu0 %5212, %v5751_v17  }
  0x9a   : > { %1933 = vperm.xlu1 %5217, %v5685_v13  }
  0x9d   : > { %1721 = vperm.xlu0 %5212, %v5760_v18  }
  0x9e   : > { %1941 = vperm.xlu1 %5217, %v5697_v15   ;;  %v5788_v22 = vpop.xlane.xlu0 %618 }
  0x9f   : > { %v5786_v21 = vpop.xlane.xlu1 %624 }
  0xa1   : > { %1729 = vperm.xlu0 %5212, %v5767_v19  }
  0xa2   : > { %1949 = vperm.xlu1 %5217, %v5706_v9   ;;  %v5794_v24 = vpop.xlane.xlu0 %621 }
  0xa3   : > { %v5792_v23 = vpop.xlane.xlu1 %627 }
  0xa5   : > { %5215 = vset.pattern.permute.xlu0 %v5409_v16 }
  0xa6   : > { %1957 = vperm.xlu1 %5217, %v5718_v5   ;;  %1793 = vperm.xlu0 %5215, %v5659_v1   ;;  %v5800_v26 = vpop.xlane.xlu0 %630 }
  0xa7   : > { %v5798_v25 = vpop.xlane.xlu1 %633 }
  0xaa   : > { %1965 = vperm.xlu1 %5217, %v5727_v11   ;;  %1805 = vperm.xlu0 %5215, %v5679_v10   ;;  %v5806_v28 = vpop.xlane.xlu0 %636 }
  0xab   : > { %v5804_v27 = vpop.xlane.xlu1 %639 }
  0xae   : > { %5218 = vset.pattern.permute.xlu1 %v5411_v29  ;;  %1813 = vperm.xlu0 %5215, %v5685_v13   ;;  %v5812_v31 = vpop.xlane.xlu0 %642 }
  0xaf   : > { %2029 = vperm.xlu1 %5218, %v5662_v2   ;;  %v5810_v30 = vpop.xlane.xlu1 %645 }
  0xb2   : > { %1821 = vperm.xlu0 %5215, %v5697_v15   ;;  %v5818_v33 = vpop.xlane.xlu0 %648 }
  0xb3   : > { %2037 = vperm.xlu1 %5218, %v5671_v7   ;;  %v5816_v32 = vpop.xlane.xlu1 %651 }
  0xb6   : > { %1829 = vperm.xlu0 %5215, %v5706_v9   ;;  %v5824_v35 = vpop.xlane.xlu0 %654 }
  0xb7   : > { %2041 = vperm.xlu1 %5218, %v5688_v14   ;;  %v5822_v34 = vpop.xlane.xlu1 %657 }
  0xba   : > { %1837 = vperm.xlu0 %5215, %v5718_v5   ;;  %v5830_v37 = vpop.xlane.xlu0 %660 }
  0xbb   : > { %2049 = vperm.xlu1 %5218, %v5709_v3   ;;  %v5828_v36 = vpop.xlane.xlu1 %663 }
  0xbe   : > { %1845 = vperm.xlu0 %5215, %v5727_v11  }
  0xbf   : > { %2057 = vperm.xlu1 %5218, %v5730_v12   ;;  %v5834_v38 = vpop.permute.xlu1 %1579 }
  0xc0   : > { %8370 = vst [vmem:[#allocation5_spill] sm:$0xff] %v5834_v38 }
  0xc2   : > { %5216 = vset.pattern.permute.xlu0 %v5410_v20 }
  0xc3   : > { %2065 = vperm.xlu1 %5218, %v5651_v62   ;;  %v5837_v39 = vpop.permute.xlu1 %1673  ;;  %1909 = vperm.xlu0 %5216, %v5662_v2   ;;  %v5840_v40 = vpop.permute.xlu0 %1534 }
  0xc4   : > { %8371 = vst [vmem:[#allocation6_spill] sm:$0xff] %v5837_v39  ;;  %8372 = vst [vmem:[#allocation7_spill] sm:$0xff] %v5840_v40 }
  0xc7   : > { %2073 = vperm.xlu1 %5218, %v5751_v17   ;;  %v5843_v41 = vpop.permute.xlu1 %1677  ;;  %1921 = vperm.xlu0 %5216, %v5688_v14   ;;  %v5846_v42 = vpop.permute.xlu0 %1539 }
  0xc8   : > { %8373 = vst [vmem:[#allocation8_spill] sm:$0xff] %v5843_v41  ;;  %8374 = vst [vmem:[#allocation9_spill] sm:$0xff] %v5846_v42  ;;  %v8412_v41 = vmov 0.0  }
  0xcb   : > { %2081 = vperm.xlu1 %5218, %v5760_v18   ;;  %v5849_v43 = vpop.permute.xlu1 %1685  ;;  %1929 = vperm.xlu0 %5216, %v5709_v3   ;;  %v5852_v44 = vpop.permute.xlu0 %1544 }
  0xcc   : > { %8375 = vst [vmem:[#allocation10_spill] sm:$0xff] %v5849_v43  ;;  %8376 = vst [vmem:[#allocation11_spill] sm:$0xff] %v5852_v44 }
  0xcf   : > { %2089 = vperm.xlu1 %5218, %v5767_v19   ;;  %v5855_v45 = vpop.permute.xlu1 %1693  ;;  %1937 = vperm.xlu0 %5216, %v5730_v12   ;;  %v5858_v46 = vpop.permute.xlu0 %1549 }
  0xd0   : > { %8377 = vst [vmem:[#allocation12_spill] sm:$0xff] %v5855_v45  ;;  %8378 = vst [vmem:[#allocation13_spill] sm:$0xff] %v5858_v46 }
  0xd3   : > { %5221 = vset.pattern.permute.xlu1 %v5412_v47  ;;  %v5860_v48 = vpop.permute.xlu1 %1701  ;;  %1945 = vperm.xlu0 %5216, %v5651_v62   ;;  %v5863_v49 = vpop.permute.xlu0 %1554 }
  0xd4   : > { %8379 = vst [vmem:[#allocation14_spill] sm:$0xff] %v5860_v48  ;;  %8380 = vst [vmem:[#allocation15_spill] sm:$0xff] %v5863_v49  ;;  %2153 = vperm.xlu1 %5221, %v5659_v1  }
  0xd7   : > { %v5866_v50 = vpop.permute.xlu1 %1709  ;;  %1953 = vperm.xlu0 %5216, %v5751_v17   ;;  %v5869_v51 = vpop.permute.xlu0 %1559 }
  0xd8   : > { %8381 = vst [vmem:[#allocation16_spill] sm:$0xff] %v5866_v50  ;;  %8382 = vst [vmem:[#allocation17_spill] sm:$0xff] %v5869_v51  ;;  %2157 = vperm.xlu1 %5221, %v5671_v7  }
  0xdb   : > { %v5872_v52 = vpop.permute.xlu1 %1717  ;;  %1961 = vperm.xlu0 %5216, %v5760_v18   ;;  %v5875_v53 = vpop.permute.xlu0 %1564 }
  0xdc   : > { %8383 = vst [vmem:[#allocation18_spill] sm:$0xff] %v5872_v52  ;;  %8384 = vst [vmem:[#allocation19_spill] sm:$0xff] %v5875_v53  ;;  %2165 = vperm.xlu1 %5221, %v5679_v10  }
  0xdf   : > { %v5878_v54 = vpop.permute.xlu1 %1725  ;;  %1969 = vperm.xlu0 %5216, %v5767_v19   ;;  %v5881_v55 = vpop.permute.xlu0 %1569 }
  0xe0   : > { %8385 = vst [vmem:[#allocation20_spill] sm:$0xff] %v5878_v54  ;;  %8386 = vst [vmem:[#allocation21_spill] sm:$0xff] %v5881_v55  ;;  %2173 = vperm.xlu1 %5221, %v5685_v13  }
  0xe3   : > { %5219 = vset.pattern.permute.xlu0 %v5411_v29  ;;  %v5884_v56 = vpop.permute.xlu0 %1574 }
  0xe4   : > { %8387 = vst [vmem:[#allocation22_spill] sm:$0xff] %v5884_v56  ;;  %2181 = vperm.xlu1 %5221, %v5697_v15   ;;  %v5887_v57 = vpop.permute.xlu1 %1789  ;;  %2033 = vperm.xlu0 %5219, %v5659_v1  }
  0xe5   : > { %8388 = vst [vmem:[#allocation23_spill] sm:$0xff] %v5887_v57 }
  0xe7   : > { %v5890_v58 = vpop.permute.xlu0 %1584 }
  0xe8   : > { %8389 = vst [vmem:[#allocation24_spill] sm:$0xff] %v5890_v58  ;;  %2189 = vperm.xlu1 %5221, %v5706_v9   ;;  %v5893_v60 = vpop.permute.xlu1 %1797  ;;  %2045 = vperm.xlu0 %5219, %v5679_v10  }
  0xe9   : > { %8390 = vst [vmem:[#allocation25_spill] sm:$0xff] %v5893_v60 }
  0xeb   : > { %v5896_v61 = vpop.permute.xlu0 %1589 }
  0xec   : > { %8391 = vst [vmem:[#allocation26_spill] sm:$0xff] %v5896_v61  ;;  %2197 = vperm.xlu1 %5221, %v5718_v5   ;;  %v5899_v62 = vpop.permute.xlu1 %1801  ;;  %2053 = vperm.xlu0 %5219, %v5685_v13  }
  0xed   : > { %8392 = vst [vmem:[#allocation27_spill] sm:$0xff] %v5899_v62 }
  0xef   : > { %v5902_v63 = vpop.permute.xlu0 %1594 }
  0xf0   : > { %8393 = vst [vmem:[#allocation28_spill] sm:$0xff] %v5902_v63  ;;  %v5904_v1 = vpop.permute.xlu1 %1809  ;;  %2061 = vperm.xlu0 %5219, %v5697_v15  }
  0xf1   : > { %8394 = vst [vmem:[#allocation29_spill] sm:$0xff] %v5904_v1 }
  0xf3   : > { %v5907_v4 = vpop.permute.xlu0 %1599 }
  0xf4   : > { %8395 = vst [vmem:[#allocation30_spill] sm:$0xff] %v5907_v4  ;;  %v5909_v6 = vpop.permute.xlu1 %1817  ;;  %2069 = vperm.xlu0 %5219, %v5706_v9  }
  0xf5   : > { %8396 = vst [vmem:[#allocation31_spill] sm:$0xff] %v5909_v6 }
  0xf7   : > { %v5912_v7 = vpop.permute.xlu0 %1604 }
  0xf8   : > { %8397 = vst [vmem:[#allocation32_spill] sm:$0xff] %v5912_v7  ;;  %v5914_v8 = vpop.permute.xlu1 %1825  ;;  %2077 = vperm.xlu0 %5219, %v5718_v5  }
  0xf9   : > { %8398 = vst [vmem:[#allocation33_spill] sm:$0xff] %v5914_v8 }
  0xfb   : > { %v5917_v10 = vpop.permute.xlu0 %1609 }
  0xfc   : > { %8399 = vst [vmem:[#allocation34_spill] sm:$0xff] %v5917_v10  ;;  %v5919_v13 = vpop.permute.xlu1 %1833  ;;  %2085 = vperm.xlu0 %5219, %v5727_v11  }
  0xfd   : > { %8400 = vst [vmem:[#allocation35_spill] sm:$0xff] %v5919_v13 }
 0x100   : > { %v5922_v15 = vpop.permute.xlu1 %1841  ;;  %5220 = vset.pattern.permute.xlu0 %v5412_v47  ;;  %v5924_v16 = vpop.permute.xlu0 %1669  ;;  %v5950_v47 = vld [vmem:[%s463_s21] ss:$0 sm:$0xff] }
 0x101   : > { %8401 = vst [vmem:[#allocation36_spill] sm:$0xff] %v5922_v15  ;;  %8402 = vst [vmem:[#allocation37_spill] sm:$0xff] %v5924_v16  ;;  %2149 = vperm.xlu0 %5220, %v5662_v2   ;;  %v914_v13 = vadd.f32 %v5950_v47, %v5794_v24 }
 0x104   : > { %v5927_v9 = vpop.permute.xlu1 %1849  ;;  %v5929_v20 = vpop.permute.xlu0 %1681 }
 0x105   : > { %8403 = vst [vmem:[#allocation38_spill] sm:$0xff] %v5927_v9  ;;  %8404 = vst [vmem:[#allocation39_spill] sm:$0xff] %v5929_v20  ;;  %2161 = vperm.xlu0 %5220, %v5688_v14  }
 0x108   : > { %v5932_v29 = vpop.permute.xlu0 %1689 }
 0x109   : > { %8405 = vst [vmem:[#allocation40_spill] sm:$0xff] %v5932_v29  ;;  %v5934_v59 = vpop.permute.xlu1 %1913  ;;  %2169 = vperm.xlu0 %5220, %v5709_v3   ;;  %v913_v3 = vadd.f32 %v5950_v47, %v5788_v22  ;;  %v915_v22 = vadd.f32 %v5950_v47, %v5786_v21 }
 0x10c   : > { %v5937_v0 = vpop.permute.xlu0 %1697 }
 0x10d   : > { %8406 = vst [vmem:[#allocation41_spill] sm:$0xff] %v5937_v0  ;;  %v5939_v15 = vpop.permute.xlu1 %1917  ;;  %2177 = vperm.xlu0 %5220, %v5730_v12  }
 0x110   : > { %v5946_v2 = vpop.permute.xlu0 %1705 }
 0x111   : > { %8407 = vst [vmem:[#allocation42_spill] sm:$0xff] %v5946_v2  ;;  %v5948_v14 = vpop.permute.xlu1 %1925 }
 0x112   : > { %v5011_v9 = vpop.f32.mrf.mxu0 }
 0x113   : > { %v930_v8 = vmul.f32 2.0, %v5011_v9 }
 0x114   : > { %v827_v12 = vpop.f32.mrf.mxu0  ;;  %v5956_v62 = vpop.permute.xlu0 %1713 }
 0x115   : > { %8408 = vst [vmem:[#allocation43_spill] sm:$0xff] %v5956_v62  ;;  %v5958_v60 = vpop.permute.xlu1 %1933  ;;  %v929_v6 = vmul.f32 2.0, %v827_v12  ;;  %v946_v57 = vsub.f32 %v914_v13, %v930_v8  ;;  %v916_v8 = vadd.f32 %v5950_v47, %v5792_v23  ;;  %v917_v12 = vadd.f32 %v5950_v47, %v5800_v26 }
 0x116   : > { %v5014_v1 = vpop.f32.mrf.mxu0  ;;  %v8168_v23 = vmov 0.0   ;;  %v918_v26 = vadd.f32 %v5950_v47, %v5798_v25  ;;  %v920_v25 = vadd.f32 %v5950_v47, %v5804_v27 }
 0x117   : > { %v945_v54 = vsub.f32 %v913_v3, %v929_v6  ;;  %v932_v9 = vmul.f32 2.0, %v5014_v1  ;;  %v962_v6 = vmax.f32 %v946_v57, 0.0  ;;  %v5972_v3 = vld [vmem:[%s469_s24] ss:$0 sm:$0xff] }
 0x118   : > { %v837_v52 = vpop.f32.mrf.mxu0  ;;  %v5960_v50 = vpop.permute.xlu0 %1721 }
 0x119   : > { %8409 = vst [vmem:[#allocation44_spill] sm:$0xff] %v5960_v50  ;;  %v961_v24 = vmax.f32 %v945_v54, 0.0  ;;  %v5968_v2 = vpop.permute.xlu1 %1941  ;;  %v931_v62 = vmul.f32 2.0, %v837_v52  ;;  %v948_v21 = vsub.f32 %v916_v8, %v932_v9  ;;  %vm985_vm2 = vcmp.le.f32.partialorder %v962_v6, %v5972_v3 }
 0x11a   : > { %v5017_v48 = vpop.f32.mrf.mxu0  ;;  %v1033_v8 = vmul.f32 -10.0, %v962_v6  ;;  %v5997_v39 = vsel %vm985_vm2, 1.0, %v8412_v41  ;;  %vm532_vm2 = vcmask 7168  }
 0x11b   : > { %v947_v13 = vsub.f32 %v915_v22, %v931_v62  ;;  %vm984_vm1 = vcmp.le.f32.partialorder %v961_v24, %v5972_v3  ;;  %v934_v54 = vmul.f32 2.0, %v5017_v48  ;;  %v1032_v52 = vmul.f32 -10.0, %v961_v24 }
 0x11c   : > { %v847_v50 = vpop.f32.mrf.mxu0  ;;  %v5976_v0 = vpop.permute.xlu0 %1729  ;;  %v5982_v57 = vsel %vm984_vm1, 1.0, %v8168_v23  ;;  %v919_v22 = vadd.f32 %v5950_v47, %v5806_v28  ;;  %vm515_vm1 = vcmask 171008  }
 0x11d   : > { %8410 = vst [vmem:[#allocation45_spill] sm:$0xff] %v5976_v0  ;;  %v5979_v1 = vpop.permute.xlu1 %1949  ;;  %v963_v29 = vmax.f32 %v947_v13, 0.0  ;;  %v933_v45 = vmul.f32 2.0, %v847_v50  ;;  %1322 = vxpose.xlu1.b32.start [1/16] %v5982_v57, 128  ;;  %v964_v50 = vmax.f32 %v948_v21, 0.0  ;;  %v950_v13 = vsub.f32 %v918_v26, %v934_v54 }
 0x11e   : > { %v5020_v62 = vpop.f32.mrf.mxu0  ;;  %v1048_v20 = vmul.f32 1.442695, %v1032_v52  ;;  %v922_v21 = vadd.f32 %v5950_v47, %v5810_v30 }
 0x11f   : > { %v949_v48 = vsub.f32 %v917_v12, %v933_v45  ;;  %v936_v9 = vmul.f32 2.0, %v5020_v62  ;;  %v1034_v28 = vmul.f32 -10.0, %v963_v29  ;;  %v921_v45 = vadd.f32 %v5950_v47, %v5812_v31 }
 0x120   : > { %v857_v24 = vpop.f32.mrf.mxu0  ;;  %vm986_vm3 = vcmp.le.f32.partialorder %v963_v29, %v5972_v3  ;;  %v1050_v62 = vmul.f32 1.442695, %v1033_v8  ;;  %v1035_v26 = vmul.f32 -10.0, %v964_v50  ;;  %5268 = vpow2.f32 %v1048_v20 }
 0x121   : > { %v5990_v0 = vpop.permute.xlu1 %1957  ;;  %v935_v23 = vmul.f32 2.0, %v857_v24  ;;  %v5992_v43 = vpop.permute.xlu0 %1793  ;;  %v6001_v6 = vmax.f32 %v949_v48, 0.0  ;;  %1323 = vxpose.xlu1.b32.cont [2/16] %v5997_v39, 128  ;;  %v952_v27 = vsub.f32 %v920_v25, %v936_v9  ;;  %v6007_v24 = vmax.f32 %v950_v13, 0.0 }
 0x122   : > { %8411 = vst [vmem:[#allocation46_spill] sm:$0xff] %v5992_v43  ;;  %v5023_v16 = vpop.f32.mrf.mxu0  ;;  %v1052_v29 = vmul.f32 1.442695, %v1034_v28  ;;  %v923_v25 = vadd.f32 %v5950_v47, %v5818_v33  ;;  %5270 = vpow2.f32 %v1050_v62  ;;  %v1054_v28 = vmul.f32 1.442695, %v1035_v26 }
 0x123   : > { %v951_v12 = vsub.f32 %v919_v22, %v935_v23  ;;  %v938_v54 = vmul.f32 2.0, %v5023_v16  ;;  %v924_v23 = vadd.f32 %v5950_v47, %v5816_v32  ;;  %v6016_v22 = vsel %vm986_vm3, 1.0, %v8412_v41 }
 0x124   : > { %v867_v52 = vpop.f32.mrf.mxu0  ;;  %v1036_v16 = vmul.f32 -10.0, %v6001_v6  ;;  %v1037_v7 = vmul.f32 -10.0, %v6007_v24  ;;  %5272 = vpow2.f32 %v1052_v29  ;;  %vm987_vm4 = vcmp.le.f32.partialorder %v964_v50, %v5972_v3 }
 0x125   : > { %v6009_v10 = vpop.permute.xlu1 %1965  ;;  %v937_v31 = vmul.f32 2.0, %v867_v52  ;;  %v6011_v48 = vpop.permute.xlu0 %1805  ;;  %v6019_v9 = vmax.f32 %v951_v12, 0.0  ;;  %1324 = vxpose.xlu1.b32.cont [3/16] %v6016_v22, 128  ;;  %v6024_v52 = vmax.f32 %v952_v27, 0.0  ;;  %v954_v32 = vsub.f32 %v922_v21, %v938_v54 }
 0x126   : > { %8413 = vst [vmem:[#allocation47_spill] sm:$0xff] %v6011_v48  ;;  %v5026_v30 = vpop.f32.mrf.mxu0  ;;  %v1056_v27 = vmul.f32 1.442695, %v1036_v16  ;;  %5274 = vpow2.f32 %v1054_v28  ;;  %vm988_vm5 = vcmp.le.f32.partialorder %v6001_v6, %v5972_v3  ;;  %v925_v28 = vadd.f32 %v5950_v47, %v5824_v35 }
 0x127   : > { %v953_v8 = vsub.f32 %v921_v45, %v937_v31  ;;  %v940_v13 = vmul.f32 2.0, %v5026_v30  ;;  %v1038_v21 = vmul.f32 -10.0, %v6019_v9  ;;  %v1039_v54 = vmul.f32 -10.0, %v6024_v52 }
 0x128   : > { %v877_v20 = vpop.f32.mrf.mxu0  ;;  %v6036_v62 = vmax.f32 %v954_v32, 0.0  ;;  %5276 = vpow2.f32 %v1056_v27  ;;  %v927_v27 = vadd.f32 %v5950_v47, %v5830_v37  ;;  %vm990_vm7 = vcmp.le.f32.partialorder %v6019_v9, %v5972_v3 }
 0x129   : > { %v956_v4 = vsub.f32 %v924_v23, %v940_v13  ;;  %v6027_v63 = vpop.permute.xlu0 %1813  ;;  %v6029_v12 = vmax.f32 %v953_v8, 0.0  ;;  %v939_v45 = vmul.f32 2.0, %v877_v20  ;;  %v6039_v23 = vsel %vm987_vm4, 1.0, %v8412_v41 }
 0x12a   : > { %8414 = vst [vmem:[#allocation48_spill] sm:$0xff] %v6027_v63  ;;  %v6031_v31 = vpop.permute.xlu1 %2029  ;;  %v5029_v33 = vpop.f32.mrf.mxu0  ;;  %1325 = vxpose.xlu1.b32.cont [4/16] %v6039_v23, 128  ;;  %v1058_v8 = vmul.f32 1.442695, %v1037_v7  ;;  %v926_v20 = vadd.f32 %v5950_v47, %v5822_v34  ;;  %v1062_v61 = vmul.f32 1.442695, %v1039_v54  ;;  %v6060_v7 = vsel %vm988_vm5, 1.0, %v8412_v41 }
 0x12b   : > { %v955_v26 = vsub.f32 %v923_v25, %v939_v45  ;;  %v972_v30 = vmax.f32 %v956_v4, 0.0  ;;  %v942_v50 = vmul.f32 2.0, %v5029_v33  ;;  %v1040_v13 = vmul.f32 -10.0, %v6029_v12 }
 0x12c   : > { %v887_v29 = vpop.f32.mrf.mxu0  ;;  %v1060_v45 = vmul.f32 1.442695, %v1038_v21  ;;  %v1041_v33 = vmul.f32 -10.0, %v6036_v62  ;;  %5278 = vpow2.f32 %v1058_v8  ;;  %vm992_vm9 = vcmp.le.f32.partialorder %v6029_v12, %v5972_v3 }
 0x12d   : > { %v6044_v16 = vpop.permute.xlu0 %1821  ;;  %v6047_v32 = vmax.f32 %v955_v26, 0.0  ;;  %v928_v26 = vadd.f32 %v5950_v47, %v5828_v36  ;;  %v1043_v58 = vmul.f32 -10.0, %v972_v30  ;;  %v958_v34 = vsub.f32 %v926_v20, %v942_v50  ;;  %v5269_v56 = vpop.eup %5268 }
 0x12e   : > { %8415 = vst [vmem:[#allocation49_spill] sm:$0xff] %v6044_v16  ;;  %v6049_v25 = vpop.permute.xlu1 %2037  ;;  %v5032_v4 = vpop.f32.mrf.mxu0  ;;  %v941_v38 = vmul.f32 2.0, %v887_v29  ;;  %1326 = vxpose.xlu1.b32.cont [5/16] %v6060_v7, 128  ;;  %v1064_v21 = vmul.f32 1.442695, %v1040_v13  ;;  %5280 = vpow2.f32 %v1060_v45  ;;  %v4835_v36 = vadd.f32 -1.0, %v5997_v39 }
 0x12f   : > { %v1042_v54 = vmul.f32 -10.0, %v6047_v32  ;;  %v6073_v55 = vmax.f32 %v958_v34, 0.0  ;;  %v4834_v20 = vadd.f32 -1.0, %v5982_v57  ;;  %5282 = vpow2.f32 %v1062_v61  ;;  %v5271_v45 = vpop.eup %5270 }
 0x130   : > { %v957_v29 = vsub.f32 %v925_v28, %v941_v38  ;;  %v897_v50 = vpop.f32.mrf.mxu0  ;;  %v944_v53 = vmul.f32 2.0, %v5032_v4  ;;  %vm995_vm6 = vcmp.le.f32.partialorder %v972_v30, %v5972_v3  ;;  %v1070_v37 = vmul.f32 1.442695, %v1043_v58 }
 0x131   : > { %v6065_v35 = vpop.permute.xlu0 %1829  ;;  %v1045_v47 = vmul.f32 -10.0, %v6073_v55  ;;  %5284 = vpow2.f32 %v1064_v21  ;;  %v1068_v34 = vmul.f32 1.442695, %v1042_v54  ;;  %v943_v38 = vmul.f32 2.0, %v897_v50  ;;  %v5273_v49 = vpop.eup %5272 }
 0x132   : > { %8416 = vst [vmem:[#allocation50_spill] sm:$0xff] %v6065_v35  ;;  %v6070_v6 = vpop.permute.xlu1 %2041  ;;  %v1066_v35 = vmul.f32 1.442695, %v1041_v33  ;;  %v6078_v8 = vmax.f32 %v957_v29, 0.0  ;;  %v960_v51 = vsub.f32 %v928_v26, %v944_v53  ;;  %v6085_v61 = vmul.f32 %v5269_v56, %v5982_v57 }
 0x133   : > { %v6087_v4 = vmul.f32 1e+30, %v4835_v36  ;;  %v1074_v58 = vmul.f32 1.442695, %v1045_v47  ;;  %v4836_v29 = vadd.f32 -1.0, %v6016_v22  ;;  %v6094_v21 = vsel %vm995_vm6, 1.0, %v8412_v41 }
 0x134   : > { %8418 = vst [vmem:[#allocation52_spill] sm:$0xff] %v6085_v61  ;;  %v1044_v33 = vmul.f32 -10.0, %v6078_v8  ;;  %5286 = vpow2.f32 %v1066_v35  ;;  %v6096_v53 = vmax.f32 %v960_v51, 0.0  ;;  %v6099_v26 = vmul.f32 %v5271_v45, %v5997_v39  ;;  %v5275_v35 = vpop.eup %5274 }
 0x135   : > { %v6080_v13 = vpop.permute.xlu0 %1837  ;;  %8419 = vst [vmem:[#allocation53_spill] sm:$0xff] %v6087_v4  ;;  %5288 = vpow2.f32 %v1070_v37  ;;  %v4837_v56 = vadd.f32 -1.0, %v6039_v23  ;;  %v6107_v54 = vmul.f32 %v5273_v49, %v6016_v22  ;;  %v959_v51 = vsub.f32 %v927_v27, %v943_v38  ;;  %v5277_v49 = vpop.eup %5276 }
 0x136   : > { %8417 = vst [vmem:[#allocation51_spill] sm:$0xff] %v6080_v13  ;;  %v6082_v28 = vpop.permute.xlu1 %2049  ;;  %8420 = vst [vmem:[#allocation54_spill] sm:$0xff] %v6099_v26  ;;  %5290 = vpow2.f32 %v1068_v34  ;;  %v1047_v30 = vmul.f32 -10.0, %v6096_v53  ;;  %v4845_v39 = vadd.f32 -1.0, %v6094_v21  ;;  %v2092_v50 = vmul.f32 %v6031_v31, %v6085_v61 }
 0x137   : > { %8422 = vst [vmem:[#allocation56_spill] sm:$0xff] %v6107_v54  ;;  %5292 = vpow2.f32 %v1074_v58  ;;  %v1072_v37 = vmul.f32 1.442695, %v1044_v33  ;;  %v6115_v47 = vmul.f32 1e+30, %v4834_v20  ;;  %v6123_v22 = vsel %vm990_vm7, 1.0, %v8412_v41 }
 0x138   : > { %v6117_v45 = vmul.f32 1e+30, %v4836_v29  ;;  %v6126_v27 = vmul.f32 %v5275_v35, %v6039_v23  ;;  %vm997_vm8 = vcmp.le.f32.partialorder %v6073_v55, %v5972_v3  ;;  %v1144_v31 = vpack.c.bf16 %v6099_v26, %v6085_v61 }
 0x139   : > { %v6104_v57 = vpop.permute.xlu0 %1845  ;;  %8424 = vst [vmem:[#allocation58_spill] sm:$0xff] %v6115_v47  ;;  %v6132_v20 = vmul.f32 1e+30, %v4837_v56  ;;  %v2094_v34 = vmul.f32 %v6049_v25, %v6107_v54  ;;  %v1078_v38 = vmul.f32 1.442695, %v1047_v30  ;;  %v5279_v9 = vpop.eup %5278  ;;  %v6139_v23 = vadd.f32 %v2092_v50, %v6115_v47 }
 0x13a   : > { %8421 = vst [vmem:[#allocation55_spill] sm:$0xff] %v6104_v57  ;;  %v6110_v36 = vpop.permute.xlu1 %2057  ;;  %8425 = vst [vmem:[#allocation59_spill] sm:$0xff] %v6117_v45  ;;  %v975_v57 = vmax.f32 %v959_v51, 0.0  ;;  %v6136_v29 = vmul.f32 1e+30, %v4845_v39  ;;  %5294 = vpow2.f32 %v1072_v37  ;;  %1160 = vxpose.xlu0.c.b16.start [1/8] %v1144_v31, 128  ;;  %v6144_v56 = vmul.f32 %v5277_v49, %v6060_v7 }
 0x13b   : > { %8423 = vst [vmem:[#allocation57_spill] sm:$0xff] %v6110_v36  ;;  %8426 = vst [vmem:[#allocation60_spill] sm:$0xff] %v6126_v27  ;;  %v5281_v55 = vpop.eup %5280  ;;  %v6147_v25 = vsel %vm997_vm8, 1.0, %v8412_v41  ;;  %vm989_vm10 = vcmp.le.f32.partialorder %v6007_v24, %v5972_v3  ;;  %v4838_v39 = vadd.f32 -1.0, %v6060_v7  ;;  %v1145_v37 = vpack.c.bf16 %v6126_v27, %v6107_v54 }
 0x13c   : > { %8427 = vst [vmem:[#allocation61_spill] sm:$0xff] %v6132_v20  ;;  %v1046_v58 = vmul.f32 -10.0, %v975_v57  ;;  %8428 = vst [vmem:[#allocation62_spill] sm:$0xff] %v6136_v29  ;;  %v5283_v51 = vpop.eup %5282  ;;  %v4823_v50 = vsel %vm989_vm10, 1.0, %v8412_v41  ;;  %vm991_vm11 = vcmp.le.f32.partialorder %v6024_v52, %v5972_v3  ;;  %vm996_vm12 = vcmp.le.f32.partialorder %v6078_v8, %v5972_v3 }
 0x13d   : > { %8429 = vst [vmem:[#allocation63_spill] sm:$0xff] %v6144_v56  ;;  %8430 = vst [vmem:[#allocation64_spill] sm:$0xff] %v6147_v25  ;;  %v2110_v49 = vadd.f32 %v2094_v34, %v6117_v45  ;;  %5296 = vpow2.f32 %v1078_v38  ;;  %v6162_v24 = vmul.f32 %v5279_v9, %v4823_v50  ;;  %1327 = vxpose.xlu1.b32.cont [6/16] %v4823_v50, 128  ;;  %v4826_v52 = vsel %vm992_vm9, 1.0, %v8412_v41 }
 0x13e   : > { %v1910_v33 = vpop.permute.xlu0 %1909  ;;  %v1076_v35 = vmul.f32 1.442695, %v1046_v58  ;;  %v6151_v30 = vpop.permute.xlu1 %2065  ;;  %v6167_v58 = vmul.f32 %v5281_v55, %v6123_v22  ;;  %1161 = vxpose.xlu0.c.b16.cont [2/8] %v1145_v37, 128  ;;  %vm998_vm13 = vcmp.le.f32.partialorder %v975_v57, %v5972_v3  ;;  %vm994_vm14 = vcmp.le.f32.partialorder %v6047_v32, %v5972_v3 }
 0x13f   : > { %8431 = vst [vmem:[#allocation65_spill] sm:$0xff] %v6151_v30  ;;  %8432 = vst [vmem:[#allocation66_spill] sm:$0xff] %v6162_v24  ;;  %v5285_v7 = vpop.eup %5284  ;;  %v4847_v30 = vadd.f32 -1.0, %v6147_v25  ;;  %v4825_v34 = vsel %vm991_vm11, 1.0, %v8412_v41  ;;  %v1146_v38 = vpack.c.bf16 %v6162_v24, %v6144_v56  ;;  %v6184_v55 = vsel %vm996_vm12, 1.0, %v8412_v41 }
 0x140   : > { %8433 = vst [vmem:[#allocation67_spill] sm:$0xff] %v6167_v58  ;;  %5298 = vpow2.f32 %v1076_v35  ;;  %8434 = vst [vmem:[#allocation68_spill] sm:$0xff] %v6184_v55  ;;  %vm999_vm15 = vcmp.le.f32.partialorder %v6096_v53, %v5972_v3  ;;  %v6188_v12 = vmul.f32 %v5283_v51, %v4825_v34  ;;  %vm993_vm0 = vcmp.le.f32.partialorder %v6036_v62, %v5972_v3 }
 0x141   : > { %v5287_v9 = vpop.eup %5286  ;;  %v2125_v37 = vmax.f32 %v2110_v49, %v6139_v23  ;;  %v6193_v13 = vmul.f32 %v5285_v7, %v4826_v52  ;;  %v6195_v36 = vmul.f32 1e+30, %v4838_v39  ;;  %v2095_v8 = vmul.f32 %v6070_v6, %v6126_v27  ;;  %1328 = vxpose.xlu1.b32.cont [7/16] %v6123_v22, 128 }
 0x142   : > { %v6164_v31 = vpop.permute.xlu0 %1921  ;;  %8435 = vst [vmem:[#allocation69_spill] sm:$0xff] %v6188_v12  ;;  %v5289_v35 = vpop.eup %5288  ;;  %v6203_v51 = vsel %vm998_vm13, 1.0, %v8412_v41  ;;  %v6209_v23 = vsel %vm994_vm14, 1.0, %v8412_v41  ;;  %v4839_v39 = vadd.f32 -1.0, %v4823_v50  ;;  %1162 = vxpose.xlu0.c.b16.cont [3/8] %v1146_v38, 128  ;;  %v1147_v6 = vpack.c.bf16 %v6188_v12, %v6167_v58 }
 0x143   : > { %8436 = vst [vmem:[#allocation70_spill] sm:$0xff] %v6193_v13  ;;  %8437 = vst [vmem:[#allocation71_spill] sm:$0xff] %v6195_v36  ;;  %v2074_v46 = vpop.permute.xlu1 %2073  ;;  %v5291_v42 = vpop.eup %5290  ;;  %v6213_v7 = vmul.f32 1e+30, %v4847_v30  ;;  %v4846_v40 = vadd.f32 -1.0, %v6184_v55  ;;  %v6220_v57 = vsel %vm999_vm15, 1.0, %v8412_v41  ;;  %v6227_v50 = vmul.f32 %v5289_v35, %v6094_v21 }
 0x144   : > { %v5293_v49 = vpop.eup %5292  ;;  %v4827_v32 = vsel %vm993_vm0, 1.0, %v8412_v41  ;;  %v2097_v30 = vmul.f32 %v6082_v28, %v6162_v24  ;;  %v1972_v16 = vmul.f32 %v1910_v33, %v6085_v61  ;;  %v4848_v63 = vadd.f32 -1.0, %v6203_v51 }
 0x145   : > { %8438 = vst [vmem:[#allocation72_spill] sm:$0xff] %v6213_v7  ;;  %8439 = vst [vmem:[#allocation73_spill] sm:$0xff] %v6227_v50  ;;  %v6231_v38 = vmul.f32 %v5287_v9, %v4827_v32  ;;  %v2111_v53 = vadd.f32 %v2095_v8, %v6132_v20  ;;  %v6237_v48 = vmul.f32 %v5291_v42, %v6209_v23  ;;  %v4840_v3 = vadd.f32 -1.0, %v6123_v22 }
 0x146   : > { %v1930_v44 = vpop.permute.xlu0 %1929  ;;  %1329 = vxpose.xlu1.b32.cont [8/16] %v4825_v34, 128  ;;  %v6241_v35 = vmul.f32 %v5293_v49, %v6147_v25  ;;  %v6243_v41 = vmul.f32 1e+30, %v4839_v39  ;;  %v1976_v28 = vmul.f32 %v5948_v14, %v6144_v56  ;;  %1163 = vxpose.xlu0.c.b16.cont [4/8] %v1147_v6, 128  ;;  %v6249_v8 = vmul.f32 1e+30, %v4846_v40 }
 0x147   : > { %8440 = vst [vmem:[#allocation74_spill] sm:$0xff] %v6231_v38  ;;  %8441 = vst [vmem:[#allocation75_spill] sm:$0xff] %v6237_v48  ;;  %v1148_v33 = vpack.c.bf16 %v6231_v38, %v6193_v13  ;;  %v5295_v9 = vpop.eup %5294  ;;  %v6252_v42 = vadd.f32 -1.0, %v6220_v57  ;;  %v6254_v22 = vmax.f32 %v2111_v53, %v2125_v37  ;;  %v4841_v61 = vadd.f32 -1.0, %v4825_v34  ;;  %v2082_v49 = vpop.permute.xlu1 %2081 }
 0x148   : > { %8442 = vst [vmem:[#allocation76_spill] sm:$0xff] %v6241_v35  ;;  %8443 = vst [vmem:[#allocation77_spill] sm:$0xff] %v6243_v41  ;;  %v6257_v39 = vadd.f32 %v2097_v30, %v6243_v41  ;;  %v6260_v25 = vadd.f32 %v1972_v16, %v6115_v47  ;;  %v4842_v14 = vadd.f32 -1.0, %v4826_v52  ;;  %v2103_v6 = vmul.f32 %v2074_v46, %v6227_v50 }
 0x149   : > { %8444 = vst [vmem:[#allocation78_spill] sm:$0xff] %v6249_v8  ;;  %v6263_v56 = vmul.f32 1e+30, %v4848_v63  ;;  %v6265_v40 = vmul.f32 1e+30, %v4840_v3  ;;  %v1975_v37 = vmul.f32 %v6164_v31, %v6126_v27  ;;  %v4843_v53 = vadd.f32 -1.0, %v4827_v32 }
 0x14a   : > { %v1938_v62 = vpop.permute.xlu0 %1937  ;;  %1330 = vxpose.xlu1.b32.cont [9/16] %v4826_v52, 128  ;;  %v5297_v43 = vpop.eup %5296  ;;  %v6270_v30 = vmul.f32 %v5295_v9, %v6184_v55  ;;  %v6273_v16 = vadd.f32 %v1976_v28, %v6195_v36  ;;  %1164 = vxpose.xlu0.c.b16.cont [5/8] %v1148_v33, 128  ;;  %v2105_v46 = vmul.f32 %v2082_v49, %v6241_v35  ;;  %v6278_v52 = vmul.f32 1e+30, %v4841_v61 }
 0x14b   : > { %8445 = vst [vmem:[#allocation79_spill] sm:$0xff] %v6263_v56  ;;  %8446 = vst [vmem:[#allocation80_spill] sm:$0xff] %v6265_v40  ;;  %v1149_v63 = vpack.c.bf16 %v6227_v50, %v6237_v48  ;;  %v1973_v31 = vmul.f32 %v5934_v59, %v6099_v26  ;;  %v1977_v47 = vmul.f32 %v1930_v44, %v6162_v24  ;;  %v4844_v9 = vadd.f32 -1.0, %v6209_v23 }
 0x14c   : > { %8447 = vst [vmem:[#allocation81_spill] sm:$0xff] %v6270_v30  ;;  %8448 = vst [vmem:[#allocation82_spill] sm:$0xff] %v6278_v52  ;;  %v2126_v28 = vmax.f32 %v6257_v39, %v6254_v22  ;;  %v2004_v33 = vmax.f32 %v6260_v25, %v6273_v16  ;;  %v6288_v49 = vmul.f32 1e+30, %v4842_v14  ;;  %v2119_v36 = vadd.f32 %v2103_v6, %v6136_v29  ;;  %v2090_v6 = vpop.permute.xlu1 %2089 }
 0x14d   : > { %v5299_v3 = vpop.eup %5298  ;;  %v1991_v61 = vadd.f32 %v1975_v37, %v6132_v20  ;;  %v6292_v27 = vmul.f32 1e+30, %v4843_v53  ;;  %v1979_v59 = vmul.f32 %v1938_v62, %v6188_v12  ;;  %v6297_v55 = vmul.f32 %v5297_v43, %v6220_v57 }
 0x14e   : > { %v1946_v34 = vpop.permute.xlu0 %1945  ;;  %8449 = vst [vmem:[#allocation83_spill] sm:$0xff] %v6288_v49  ;;  %1331 = vxpose.xlu1.b32.cont [10/16] %v4827_v32, 128  ;;  %v6300_v22 = vmul.f32 %v5299_v3, %v6203_v51  ;;  %v6303_v25 = vadd.f32 %v2105_v46, %v6213_v7  ;;  %1165 = vxpose.xlu0.c.b16.cont [6/8] %v1149_v63, 128  ;;  %v6309_v14 = vmul.f32 1e+30, %v4844_v9  ;;  %vm4275_vm3 = vcmask 1041408  }
 0x14f   : > { %8450 = vst [vmem:[#allocation84_spill] sm:$0xff] %v6292_v27  ;;  %v1981_v44 = vmul.f32 %v1946_v34, %v6231_v38  ;;  %8451 = vst [vmem:[#allocation85_spill] sm:$0xff] %v6297_v55  ;;  %v1150_v39 = vpack.c.bf16 %v6241_v35, %v6270_v30  ;;  %v1989_v32 = vadd.f32 %v1973_v31, %v6087_v4  ;;  %vm4276_vm4 = vcmask 1042432  }
 0x150   : > { %8452 = vst [vmem:[#allocation86_spill] sm:$0xff] %v6300_v22  ;;  %v1993_v62 = vadd.f32 %v1977_v47, %v6243_v41  ;;  %8453 = vst [vmem:[#allocation87_spill] sm:$0xff] %v6309_v14  ;;  %v1980_v43 = vmul.f32 %v5968_v2, %v6193_v13  ;;  %v1974_v53 = vmul.f32 %v5939_v15, %v6107_v54  ;;  %vm4584_vm5 = vcmask 343040  }
 0x151   : > { %v1978_v34 = vmul.f32 %v5958_v60, %v6167_v58  ;;  %v1982_v16 = vmul.f32 %v5979_v1, %v6237_v48  ;;  %v1995_v47 = vadd.f32 %v1979_v59, %v6278_v52  ;;  %v1997_v46 = vadd.f32 %v1981_v44, %v6292_v27 }
 0x152   : > { %v1954_v24 = vpop.permute.xlu0 %1953  ;;  %1332 = vxpose.xlu1.b32.cont [11/16] %v6209_v23, 128  ;;  %v1984_v2 = vmul.f32 %v5990_v0, %v6270_v30  ;;  %1166 = vxpose.xlu0.c.b16.cont [7/8] %v1150_v39, 128  ;;  %v1151_v60 = vpack.c.bf16 %v6297_v55, %v6300_v22  ;;  %v1986_v1 = vmul.f32 %v6009_v10, %v6300_v22  ;;  %v6342_v44 = vmul.f32 1e+30, %v6252_v42 }
 0x153   : > { %v1983_v37 = vmul.f32 %v1954_v24, %v6227_v50  ;;  %v1159_v24 = vpack.c.bf16 %v5767_v19, %v5727_v11  ;;  %v1994_v23 = vadd.f32 %v1978_v34, %v6265_v40  ;;  %v2005_v3 = vmax.f32 %v1989_v32, %v1993_v62 }
 0x154   : > { %v2107_v31 = vmul.f32 %v2090_v6, %v6297_v55  ;;  %v1996_v0 = vadd.f32 %v1980_v43, %v6288_v49  ;;  %v1158_v11 = vpack.c.bf16 %v5760_v18, %v5718_v5  ;;  %v1990_v59 = vadd.f32 %v1974_v53, %v6117_v45  ;;  %v6346_v43 = vld [vmem:[%s5646_s18 + $0x50] sm:$0xff] }
 0x155   : > { %5033 = vmatprep.subr.bf16.mxu1 %v1159_v24  ;;  %v1999_v19 = vadd.f32 %v1983_v37, %v6136_v29  ;;  %v1998_v10 = vadd.f32 %v1982_v16, %v6309_v14  ;;  %v2007_v39 = vmax.f32 %v1991_v61, %v1995_v47  ;;  %v2009_v32 = vmax.f32 %v2005_v3, %v1997_v46 }
 0x156   : > { %v1962_v63 = vpop.permute.xlu0 %1961  ;;  %5034 = vmatpush3.bf16.msra.mxu1 %v1159_v24  ;;  %1333 = vxpose.xlu1.b32.cont [12/16] %v6094_v21, 128  ;;  %8454 = vst [vmem:[#allocation88_spill] sm:$0xff] %v6346_v43  ;;  %v1157_v5 = vpack.c.bf16 %v5751_v17, %v6346_v43  ;;  %v2000_v18 = vadd.f32 %v1984_v2, %v6249_v8  ;;  %v8455_v21 = vld [vmem:[#allocation46_spill] sm:$0xff]  ;;  %v8457_v2 = vld [vmem:[#allocation63_spill] sm:$0xff] }
 0x157   : > { %v1985_v15 = vmul.f32 %v1962_v63, %v6241_v35  ;;  %5035 = vmatprep.subr.bf16.mxu1 %v1158_v11  ;;  %1167 = vxpose.xlu0.c.b16.end [8/8] %v1151_v60, 128  ;;  %v2002_v42 = vadd.f32 %v1986_v1, %v6263_v56  ;;  %v2006_v61 = vmax.f32 %v1990_v59, %v1994_v23  ;;  %v8458_v24 = vld [vmem:[#allocation47_spill] sm:$0xff]  ;;  %v8460_v1 = vld [vmem:[#allocation68_spill] sm:$0xff] }
 0x158   : > { %v6355_v37 = vmul.f32 %v8455_v21, %v6099_v26  ;;  %v2128_v53 = vmax.f32 %v2119_v36, %v2126_v28  ;;  %v2123_v34 = vadd.f32 %v2107_v31, %v6342_v44  ;;  %v2008_v16 = vmax.f32 %v2004_v33, %v1996_v0  ;;  %v6366_v36 = vld [vmem:[%s5646_s18 + $0x48] sm:$0xff]  ;;  %v6369_v28 = vld [vmem:[%s5646_s18 + $0x40] sm:$0xff]  ;;  %v8463_v23 = vld [vmem:[#allocation48_spill] sm:$0xff] }
 0x159   : > { %v2001_v9 = vadd.f32 %v1985_v15, %v6213_v7  ;;  %v2011_v47 = vmax.f32 %v2007_v39, %v1999_v19  ;;  %v2010_v63 = vmax.f32 %v2006_v61, %v1998_v10  ;;  %v6361_v60 = vmul.f32 %v8458_v24, %v8457_v2  ;;  %8461 = vst [vmem:[#allocation68_spill] sm:$0xff] %v6366_v36  ;;  %v8465_v19 = vld [vmem:[#allocation49_spill] sm:$0xff]  ;;  %v6385_v39 = vld [vmem:[%s5646_s18 + $0x30] sm:$0xff]  ;;  %v6396_v61 = vld [vmem:[%s5646_s18 + $0x28] sm:$0xff] }
 0x15a   : > { %v1970_v62 = vpop.permute.xlu0 %1969  ;;  %8456 = vst [vmem:[#allocation46_spill] sm:$0xff] %v6355_v37  ;;  %5036 = vmatpush3.bf16.msra.mxu1 %v1158_v11  ;;  %v2130_v15 = vmax.f32 %v6303_v25, %v2128_v53  ;;  %1334 = vxpose.xlu1.b32.cont [13/16] %v8460_v1, 128  ;;  %8462 = vst [vmem:[#allocation89_spill] sm:$0xff] %v6369_v28  ;;  %v1156_v33 = vpack.c.bf16 %v6366_v36, %v6369_v28  ;;  %v6403_v53 = vld [vmem:[%s5646_s18 + $0x10] sm:$0xff]  ;;  %v8477_v24 = vld [vmem:[#allocation7_spill] sm:$0xff] }
 0x15b   : > { %v1987_v6 = vmul.f32 %v1970_v62, %v6297_v55  ;;  %v2013_v17 = vmax.f32 %v2009_v32, %v2001_v9  ;;  %8459 = vst [vmem:[#allocation47_spill] sm:$0xff] %v6361_v60  ;;  %5037 = vmatprep.subr.bf16.mxu1 %v1157_v5  ;;  %v6375_v3 = vmul.f32 %v8463_v23, %v6167_v58  ;;  %8467 = vst [vmem:[#allocation90_spill] sm:$0xff] %v6385_v39  ;;  %v6388_v32 = vld [vmem:[%s5646_s18 + $0x38] sm:$0xff] }
 0x15c   : > { %v2012_v31 = vmax.f32 %v2008_v16, %v2000_v18  ;;  %v2014_v0 = vmax.f32 %v2010_v63, %v2002_v42  ;;  %v6379_v9 = vmul.f32 %v8465_v19, %v6193_v13  ;;  %v6381_v59 = vmax.f32 %v2123_v34, %v2130_v15  ;;  %8468 = vst [vmem:[#allocation91_spill] sm:$0xff] %v6388_v32  ;;  %v6393_v42 = vld [vmem:[%s5646_s18 + $0x20] sm:$0xff]  ;;  %v6406_v34 = vld [vmem:[%s5646_s18 + $0x18] sm:$0xff]  ;;  %v8476_v63 = vld [vmem:[#allocation52_spill] sm:$0xff] }
 0x15d   : > { %v2003_v46 = vadd.f32 %v1987_v6, %v6342_v44  ;;  %8464 = vst [vmem:[#allocation48_spill] sm:$0xff] %v6375_v3  ;;  %v1155_v62 = vpack.c.bf16 %v6388_v32, %v6385_v39  ;;  %8469 = vst [vmem:[#allocation92_spill] sm:$0xff] %v6393_v42  ;;  %v6400_v21 = vpack.c.bf16 %v6396_v61, %v6393_v42  ;;  %v8478_v1 = vld [vmem:[#allocation9_spill] sm:$0xff]  ;;  %v8492_v39 = vld [vmem:[#allocation30_spill] sm:$0xff] }
 0x15e   : > { %8466 = vst [vmem:[#allocation49_spill] sm:$0xff] %v6379_v9  ;;  %v2016_v18 = vmax.f32 %v2012_v31, %v2013_v17  ;;  %5038 = vmatpush3.bf16.msra.mxu1 %v1157_v5  ;;  %8470 = vst [vmem:[#allocation93_spill] sm:$0xff] %v6396_v61  ;;  %v6410_v16 = vpack.c.bf16 %v6406_v34, %v6403_v53  ;;  %v6414_v5 = vld [vmem:[%s5646_s18 + $0x8] sm:$0xff]  ;;  %v6417_v17 = vld [vmem:[%s5646_s18] sm:$0xff]  ;;  %v1612_v15 = vmul.f32 %v8477_v24, %v8476_v63 }
 0x15f   : > { %v2015_v25 = vmax.f32 %v2011_v47, %v2003_v46  ;;  %v2034_v11 = vpop.permute.xlu0 %2033  ;;  %8471 = vst [vmem:[#allocation94_spill] sm:$0xff] %v6403_v53  ;;  %8472 = vst [vmem:[#allocation95_spill] sm:$0xff] %v6406_v34  ;;  %v8473_v47 = vld [vmem:[#allocation64_spill] sm:$0xff]  ;;  %5039 = vmatprep.subr.bf16.mxu1 %v1156_v33  ;;  %v6421_v46 = vpack.c.bf16 %v6414_v5, %v6417_v17  ;;  %v1613_v23 = vmul.f32 %v8478_v1, %v6099_v26  ;;  %v8481_v32 = vld [vmem:[#allocation13_spill] sm:$0xff] }
 0x160   : > { %v2093_v10 = vmul.f32 %v2034_v11, %v6099_v26  ;;  %1335 = vxpose.xlu1.b32.cont [14/16] %v8473_v47, 128  ;;  %8474 = vst [vmem:[#allocation64_spill] sm:$0xff] %v6414_v5  ;;  %8475 = vst [vmem:[#allocation96_spill] sm:$0xff] %v6417_v17  ;;  %v8479_v11 = vld [vmem:[#allocation11_spill] sm:$0xff]  ;;  %v8480_v47 = vld [vmem:[#allocation60_spill] sm:$0xff]  ;;  %2185 = vperm.xlu0 %5220, %v6366_v36  }
 0x161   : > { %v2017_v6 = vmax.f32 %v2014_v0, %v2015_v25  ;;  %v1614_v19 = vmul.f32 %v8479_v11, %v6107_v54  ;;  %v1615_v61 = vmul.f32 %v8481_v32, %v8480_v47  ;;  %v8482_v24 = vld [vmem:[#allocation15_spill] sm:$0xff]  ;;  %v8483_v17 = vld [vmem:[#allocation66_spill] sm:$0xff]  ;;  %v8484_v1 = vld [vmem:[#allocation17_spill] sm:$0xff] }
 0x162   : > { %v6428_v0 = vadd.f32 %v2093_v10, %v6087_v4  ;;  %v1616_v53 = vmul.f32 %v8482_v24, %v8457_v2  ;;  %v8485_v10 = vld [vmem:[#allocation19_spill] sm:$0xff]  ;;  %5040 = vmatpush3.bf16.msra.mxu1 %v1156_v33  ;;  %v8486_v11 = vld [vmem:[#allocation21_spill] sm:$0xff]  ;;  %v8487_v32 = vld [vmem:[#allocation22_spill] sm:$0xff] }
 0x163   : > { %v2018_v31 = vmax.f32 %v2016_v18, %v2017_v6  ;;  %v2046_v25 = vpop.permute.xlu0 %2045  ;;  %v1617_v18 = vmul.f32 %v8484_v1, %v8483_v17  ;;  %v1618_v6 = vmul.f32 %v8485_v10, %v6167_v58  ;;  %v1619_v37 = vmul.f32 %v8486_v11, %v6188_v12  ;;  %5041 = vmatprep.subr.bf16.mxu1 %v1155_v62  ;;  %v8489_v24 = vld [vmem:[#allocation24_spill] sm:$0xff]  ;;  %v8490_v10 = vld [vmem:[#allocation26_spill] sm:$0xff]  ;;  %v6462_v17 = vld [vmem:[%s5646_s18 + $0x58] sm:$0xff] }
 0x164   : > { %v2096_v34 = vmul.f32 %v2046_v25, %v8457_v2  ;;  %v1620_v36 = vmul.f32 %v8487_v32, %v6193_v13  ;;  %v8488_v25 = vld [vmem:[#allocation5_spill] sm:$0xff]  ;;  %1336 = vxpose.xlu1.b32.cont [15/16] %v6203_v51, 128  ;;  %v1622_v1 = vmul.f32 %v8489_v24, %v6237_v48  ;;  %v1623_v60 = vmul.f32 %v8490_v10, %v6227_v50  ;;  %v8491_v33 = vld [vmem:[#allocation28_spill] sm:$0xff]  ;;  %v8495_v24 = vld [vmem:[#allocation71_spill] sm:$0xff] }
 0x165   : > { %v2019_v9 = vrot.slane %v2018_v31, 4  ;;  %v1621_v3 = vmul.f32 %v8488_v25, %v6231_v38  ;;  %v1624_v43 = vmul.f32 %v8491_v33, %v6270_v30  ;;  %v2134_v11 = vmax.f32 %v6428_v0, %v6381_v59  ;;  %v8493_v51 = vld [vmem:[#allocation32_spill] sm:$0xff]  ;;  %8494 = vst [vmem:[#allocation52_spill] sm:$0xff] %v6462_v17  ;;  %2193 = vperm.xlu0 %5220, %v6462_v17   ;;  %v8496_v50 = vld [vmem:[#allocation34_spill] sm:$0xff] }
 0x166   : > { %v1625_v25 = vmul.f32 %v8492_v39, %v6241_v35  ;;  %v1626_v42 = vmul.f32 %v8493_v51, %v6300_v22  ;;  %v2112_v10 = vadd.f32 %v2096_v34, %v8495_v24  ;;  %v1627_v33 = vmul.f32 %v8496_v50, %v6297_v55  ;;  %5042 = vmatpush3.bf16.msra.mxu1 %v1155_v62 }
 0x167   : > { %v2020_v28 = vmax.f32 %v2018_v31, %v2019_v9  ;;  %v2054_v32 = vpop.permute.xlu0 %2053  ;;  %v8497_v9 = vld [vmem:[#allocation58_spill] sm:$0xff]  ;;  %v1629_v59 = vadd.f32 %v1613_v23, %v6087_v4  ;;  %v1630_v39 = vadd.f32 %v1614_v19, %v6117_v45  ;;  %v1631_v51 = vadd.f32 %v1615_v61, %v6132_v20  ;;  %5043 = vmatprep.subr.bf16.mxu1 %v6400_v21  ;;  %v6482_v20 = vld [vmem:[%s5646_s18 + $0x68] sm:$0xff] }
 0x168   : > { %v1628_v31 = vadd.f32 %v1612_v15, %v8497_v9  ;;  %v1632_v22 = vadd.f32 %v1616_v53, %v8495_v24  ;;  %1337 = vxpose.xlu1.b32.end [16/16] %v6220_v57, 128  ;;  %v1633_v34 = vadd.f32 %v1617_v18, %v6243_v41  ;;  %v1634_v50 = vadd.f32 %v1618_v6, %v6265_v40 }
 0x169   : > { %v2021_v0 = vrot.slane %v2020_v28, 2  ;;  %v1635_v15 = vadd.f32 %v1619_v37, %v6278_v52  ;;  %v2098_v17 = vmul.f32 %v2054_v32, %v6167_v58  ;;  %v1636_v19 = vadd.f32 %v1620_v36, %v6288_v49  ;;  %8498 = vst [vmem:[#allocation7_spill] sm:$0xff] %v6482_v20  ;;  %2201 = vperm.xlu0 %5220, %v6482_v20   ;;  %v2025_v32 = vld [vmem:[#allocation4 + $0x3] sm:$0x1] }
 0x16a   : > { %v1637_v61 = vadd.f32 %v1621_v3, %v6292_v27  ;;  %v1638_v53 = vadd.f32 %v1622_v1, %v6309_v14  ;;  %v1639_v18 = vadd.f32 %v1623_v60, %v6136_v29  ;;  %v1640_v37 = vadd.f32 %v1624_v43, %v6249_v8  ;;  %5044 = vmatpush3.bf16.msra.mxu1 %v6400_v21  ;;  %v8499_v60 = vld [vmem:[#allocation50_spill] sm:$0xff] }
 0x16b   : > { %v2022_v23 = vmax.f32 %v2020_v28, %v2021_v0  ;;  %v2062_v62 = vpop.permute.xlu0 %2061  ;;  %v1641_v36 = vadd.f32 %v1625_v25, %v6213_v7  ;;  %v1642_v3 = vadd.f32 %v1626_v42, %v6263_v56  ;;  %v1644_v6 = vmax.f32 %v1628_v31, %v1632_v22  ;;  %5045 = vmatprep.subr.bf16.mxu1 %v6410_v16  ;;  %v6500_v42 = vld [vmem:[%s5646_s18 + $0x78] sm:$0xff] }
 0x16c   : > { %v2100_v57 = vmul.f32 %v2062_v62, %v6193_v13  ;;  %v1643_v0 = vadd.f32 %v1627_v33, %v6342_v44  ;;  %v1645_v62 = vmax.f32 %v1629_v59, %v1633_v34  ;;  %v1646_v1 = vmax.f32 %v1630_v39, %v1634_v50  ;;  %8500 = vst [vmem:[#allocation9_spill] sm:$0xff] %v6500_v42 }
 0x16d   : > { %v2023_v28 = vrot.slane %v2022_v23, 1  ;;  %v1647_v20 = vmax.f32 %v1631_v51, %v1635_v15  ;;  %v6496_v43 = vmul.f32 %v8499_v60, %v6237_v48  ;;  %v2114_v21 = vadd.f32 %v2098_v17, %v6265_v40  ;;  %2209 = vperm.xlu0 %5220, %v6500_v42   ;;  %v8501_v17 = vld [vmem:[#allocation57_spill] sm:$0xff] }
 0x16e   : > { %v1648_v25 = vmax.f32 %v1644_v6, %v1636_v19  ;;  %v2127_v7 = vmax.f32 %v2112_v10, %v2134_v11  ;;  %v1649_v22 = vmax.f32 %v1645_v62, %v1637_v61  ;;  %v1650_v31 = vmax.f32 %v1646_v1, %v1638_v53  ;;  %5046 = vmatpush3.bf16.msra.mxu1 %v6410_v16  ;;  %v8509_v1 = vld [vmem:[#allocation39_spill] sm:$0xff] }
 0x16f   : > { %v2024_v8 = vmax.f32 %v2022_v23, %v2023_v28  ;;  %v2070_v29 = vpop.permute.xlu0 %2069  ;;  %v1651_v33 = vmax.f32 %v1647_v20, %v1639_v18  ;;  %v2116_v39 = vadd.f32 %v2100_v57, %v6288_v49  ;;  %v6508_v50 = vmul.f32 %v8501_v17, %v6188_v12  ;;  %5047 = vmatprep.subr.bf16.mxu1 %v6421_v46  ;;  %v8503_v23 = vld [vmem:[#allocation51_spill] sm:$0xff]  ;;  %v8506_v18 = vld [vmem:[#allocation37_spill] sm:$0xff]  ;;  %v8507_v28 = vld [vmem:[#allocation6_spill] sm:$0xff] }
 0x170   : > { %v2102_v51 = vmul.f32 %v2070_v29, %v6237_v48  ;;  %v1652_v34 = vmax.f32 %v1648_v25, %v1640_v37  ;;  %v1653_v11 = vmax.f32 %v1649_v22, %v1641_v36  ;;  %v1654_v10 = vmax.f32 %v1650_v31, %v1642_v3  ;;  %v8511_v22 = vld [vmem:[#allocation12_spill] sm:$0xff] }
 0x171   : > { %v2026_v59 = vmax.f32 %v2025_v32, %v2024_v8  ;;  %8502 = vst [vmem:[#allocation11_spill] sm:$0xff] %v6508_v50  ;;  %v1655_v15 = vmax.f32 %v1651_v33, %v1643_v0  ;;  %v6513_v20 = vmul.f32 %v8503_v23, %v6270_v30  ;;  %v8504_v8 = vld [vmem:[#allocation65_spill] sm:$0xff]  ;;  %v2129_v29 = vmax.f32 %v2114_v21, %v2127_v7  ;;  %v8508_v7 = vld [vmem:[#allocation8_spill] sm:$0xff]  ;;  %v8510_v21 = vld [vmem:[#allocation10_spill] sm:$0xff] }
 0x172   : > { %v6517_v19 = vmul.f32 %v8504_v8, %v6231_v38  ;;  %v8223_v61 = vmov 6   ;;  %v1656_v57 = vmax.f32 %v1652_v34, %v1653_v11  ;;  %v1732_v37 = vmul.f32 %v8506_v18, %v8476_v63  ;;  %5048 = vmatpush3.bf16.msra.mxu1 %v6421_v46  ;;  %v8512_v46 = vld [vmem:[#allocation66_spill] sm:$0xff]  ;;  %v8514_v34 = vld [vmem:[#allocation41_spill] sm:$0xff]  ;;  %v8519_v18 = vld [vmem:[#allocation43_spill] sm:$0xff] }
 0x173   : > { %2027 = vst [vmem:[#allocation4 + $0x3] sm:$0x1] %v2026_v59  ;;  %v2078_v16 = vpop.permute.xlu0 %2077  ;;  %5223 = vset.pattern.permute.xlu0 %v8223_v61  ;;  %v1657_v53 = vmax.f32 %v1654_v10, %v1655_v15  ;;  %v1733_v36 = vmul.f32 %v8507_v28, %v6099_v26  ;;  %v6525_v3 = vmax.f32 %v2116_v39, %v2129_v29  ;;  %v8221_v0 = vmov 1.0   ;;  %v8513_v39 = vld [vmem:[#allocation40_spill] sm:$0xff]  ;;  %v8515_v11 = vld [vmem:[#allocation14_spill] sm:$0xff] }
 0x174   : > { %8505 = vst [vmem:[#allocation13_spill] sm:$0xff] %v6517_v19  ;;  %2273 = vperm.xlu0 %5223, %v6414_v5   ;;  %v6528_v6 = vadd.f32 %v2102_v51, %v6309_v14  ;;  %v1734_v32 = vmul.f32 %v8508_v7, %v6107_v54  ;;  %5065 = vmatprep.subr.mxu1 %v8221_v0  ;;  %v8516_v23 = vld [vmem:[#allocation42_spill] sm:$0xff]  ;;  %v8517_v29 = vld [vmem:[#allocation16_spill] sm:$0xff]  ;;  %v8525_v0 = vld [vmem:[#allocation45_spill] sm:$0xff] }
 0x175   : > { %v1658_v62 = vmax.f32 %v1656_v57, %v1657_v53  ;;  %v1735_v60 = vmul.f32 %v8509_v1, %v8480_v47  ;;  %v1736_v25 = vmul.f32 %v8510_v21, %v8457_v2  ;;  %v1738_v31 = vmul.f32 %v8511_v22, %v6167_v58  ;;  %v8518_v53 = vld [vmem:[#allocation73_spill] sm:$0xff]  ;;  %v8520_v28 = vld [vmem:[#allocation92_spill] sm:$0xff]  ;;  %v8521_v7 = vld [vmem:[#allocation18_spill] sm:$0xff] }
 0x176   : > { %v2104_v33 = vmul.f32 %v2078_v16, %v6270_v30  ;;  %v1737_v51 = vmul.f32 %v8513_v39, %v8512_v46  ;;  %v1739_v17 = vmul.f32 %v8514_v34, %v6188_v12  ;;  %v1740_v10 = vmul.f32 %v8515_v11, %v6193_v13  ;;  %v8522_v21 = vld [vmem:[#allocation44_spill] sm:$0xff]  ;;  %v8523_v39 = vld [vmem:[#allocation86_spill] sm:$0xff] }
 0x177   : > { %v2086_v59 = vpop.permute.xlu0 %2085  ;;  %v1659_v15 = vrot.slane %v1658_v62, 4  ;;  %v1741_v8 = vmul.f32 %v8516_v23, %v6231_v38  ;;  %v1742_v57 = vmul.f32 %v8517_v29, %v6237_v48  ;;  %v1743_v16 = vmul.f32 %v8519_v18, %v8518_v53  ;;  %v8524_v34 = vld [vmem:[#allocation20_spill] sm:$0xff] }
 0x178   : > { %2285 = vperm.xlu0 %5223, %v8520_v28   ;;  %v1744_v1 = vmul.f32 %v8521_v7, %v6270_v30  ;;  %v1745_v22 = vmul.f32 %v8522_v21, %v6241_v35  ;;  %v1746_v11 = vmul.f32 %v8524_v34, %v8523_v39  ;;  %v1747_v23 = vmul.f32 %v8525_v0, %v6297_v55 }
 0x179   : > { %v2106_v61 = vmul.f32 %v2086_v59, %v8523_v39  ;;  %v1660_v29 = vmax.f32 %v1658_v62, %v1659_v15  ;;  %v1752_v48 = vadd.f32 %v1736_v25, %v8495_v24  ;;  %v1754_v18 = vadd.f32 %v1738_v31, %v6265_v40  ;;  %v8526_v62 = vld [vmem:[#allocation90_spill] sm:$0xff]  ;;  %v8527_v25 = vld [vmem:[#allocation61_spill] sm:$0xff] }
 0x17a   : > { %v1748_v13 = vadd.f32 %v1732_v37, %v8497_v9  ;;  %v1749_v7 = vadd.f32 %v1733_v36, %v6087_v4  ;;  %v1753_v30 = vadd.f32 %v1737_v51, %v6243_v41  ;;  %v1755_v21 = vadd.f32 %v1739_v17, %v6278_v52  ;;  %v8528_v37 = vld [vmem:[#allocation62_spill] sm:$0xff] }
 0x17b   : > { %v1661_v26 = vrot.slane %v1660_v29, 2  ;;  %v1750_v34 = vadd.f32 %v1734_v32, %v6117_v45  ;;  %v1756_v0 = vadd.f32 %v1740_v10, %v6288_v49  ;;  %v1758_v59 = vadd.f32 %v1742_v57, %v6309_v14  ;;  %v8529_v36 = vld [vmem:[#allocation78_spill] sm:$0xff]  ;;  %v8530_v32 = vld [vmem:[#allocation72_spill] sm:$0xff] }
 0x17c   : > { %2293 = vperm.xlu0 %5223, %v8526_v62   ;;  %v1751_v15 = vadd.f32 %v1735_v60, %v8527_v25  ;;  %v1757_v31 = vadd.f32 %v1741_v8, %v6292_v27  ;;  %v1759_v58 = vadd.f32 %v1743_v16, %v8528_v37  ;;  %v1760_v2 = vadd.f32 %v1744_v1, %v8529_v36  ;;  %v8531_v16 = vld [vmem:[#allocation55_spill] sm:$0xff]  ;;  %v8532_v1 = vld [vmem:[#allocation89_spill] sm:$0xff] }
 0x17d   : > { %v1662_v51 = vmax.f32 %v1660_v29, %v1661_v26  ;;  %v1762_v17 = vadd.f32 %v1746_v11, %v6263_v56  ;;  %v1764_v28 = vmax.f32 %v1748_v13, %v1752_v48  ;;  %v1766_v5 = vmax.f32 %v1750_v34, %v1754_v18  ;;  %v1665_v48 = vld [vmem:[#allocation4] sm:$0x1]  ;;  %v6586_v11 = vpop.permute.xlu1 %2153 }
 0x17e   : > { %v1761_v42 = vadd.f32 %v1745_v22, %v8530_v32  ;;  %v1763_v10 = vadd.f32 %v1747_v23, %v6342_v44  ;;  %v1765_v57 = vmax.f32 %v1749_v7, %v1753_v30  ;;  %v1767_v19 = vmax.f32 %v1751_v15, %v1755_v21  ;;  %v8538_v15 = vld [vmem:[#allocation27_spill] sm:$0xff] }
 0x17f   : > { %v2120_v62 = vadd.f32 %v2104_v33, %v8529_v36  ;;  %v1663_v60 = vrot.slane %v1662_v51, 1  ;;  %v1768_v50 = vmax.f32 %v1764_v28, %v1756_v0  ;;  %v1770_v8 = vmax.f32 %v1766_v5, %v1758_v59  ;;  %v8537_v0 = vld [vmem:[#allocation25_spill] sm:$0xff] }
 0x180   : > { %v1866_v37 = vmul.f32 %v8531_v16, %v8523_v39  ;;  %v2133_v26 = vmax.f32 %v6528_v6, %v6525_v3  ;;  %2301 = vperm.xlu0 %5223, %v8532_v1   ;;  %v1769_v13 = vmax.f32 %v1765_v57, %v1757_v31  ;;  %v1771_v22 = vmax.f32 %v1767_v19, %v1759_v58  ;;  %v8533_v3 = vld [vmem:[#allocation23_spill] sm:$0xff]  ;;  %v8534_v58 = vld [vmem:[#allocation29_spill] sm:$0xff]  ;;  %v8542_v16 = vld [vmem:[#allocation38_spill] sm:$0xff] }
 0x181   : > { %v6589_v30 = vadd.f32 %v2106_v61, %v6263_v56  ;;  %v1664_v33 = vmax.f32 %v1662_v51, %v1663_v60  ;;  %v1772_v23 = vmax.f32 %v1768_v50, %v1760_v2  ;;  %v1774_v28 = vmax.f32 %v1770_v8, %v1762_v17  ;;  %v8535_v61 = vld [vmem:[#allocation31_spill] sm:$0xff]  ;;  %v8536_v50 = vld [vmem:[#allocation88_spill] sm:$0xff]  ;;  %v8539_v51 = vld [vmem:[#allocation33_spill] sm:$0xff] }
 0x182   : > { %v6593_v5 = vadd.f32 %v6513_v20, %v8529_v36  ;;  %v1773_v29 = vmax.f32 %v1769_v13, %v1761_v42  ;;  %v1775_v18 = vmax.f32 %v1771_v22, %v1763_v10  ;;  %v1852_v6 = vmul.f32 %v8533_v3, %v8476_v63  ;;  %v8541_v60 = vld [vmem:[#allocation36_spill] sm:$0xff]  ;;  %v6619_v13 = vpop.permute.xlu1 %2157  ;;  %v6632_v3 = vld [vmem:[%s5646_s18 + $0x60] sm:$0xff] }
 0x183   : > { %v2135_v7 = vmax.f32 %v2120_v62, %v2133_v26  ;;  %v1666_v21 = vmax.f32 %v1665_v48, %v1664_v33  ;;  %v1857_v19 = vmul.f32 %v8534_v58, %v8512_v46  ;;  %v1859_v34 = vmul.f32 %v8535_v61, %v6188_v12  ;;  %v6622_v22 = vld [vmem:[%s5646_s18 + $0x70] sm:$0xff]  ;;  %v8547_v61 = vld [vmem:[#allocation49_spill] sm:$0xff] }
 0x184   : > { %v6602_v2 = vadd.f32 %v1866_v37, %v6263_v56  ;;  %2309 = vperm.xlu0 %5223, %v8536_v50   ;;  %v1776_v20 = vmax.f32 %v1772_v23, %v1773_v29  ;;  %v1777_v42 = vmax.f32 %v1774_v28, %v1775_v18  ;;  %v1854_v59 = vmul.f32 %v8537_v0, %v6107_v54  ;;  %v8540_v37 = vld [vmem:[#allocation35_spill] sm:$0xff]  ;;  %v8545_v28 = vld [vmem:[#allocation48_spill] sm:$0xff]  ;;  %v8548_v0 = vld [vmem:[#allocation62_spill] sm:$0xff] }
 0x185   : > { %v2136_v62 = vmax.f32 %v6589_v30, %v2135_v7  ;;  %1667 = vst [vmem:[#allocation4] sm:$0x1] %v1666_v21  ;;  %v1855_v31 = vmul.f32 %v8538_v15, %v8480_v47  ;;  %v1861_v17 = vmul.f32 %v8539_v51, %v6231_v38  ;;  %v1863_v10 = vmul.f32 %v8540_v37, %v8518_v53  ;;  %v8544_v30 = vld [vmem:[#allocation47_spill] sm:$0xff]  ;;  %v8546_v7 = vld [vmem:[#allocation46_spill] sm:$0xff]  ;;  %v6645_v51 = vpop.permute.xlu0 %2149  ;;  %v8551_v56 = vld [vmem:[#allocation96_spill] sm:$0xff] }
 0x186   : > { %v1778_v57 = vmax.f32 %v1776_v20, %v1777_v42  ;;  %v1865_v8 = vmul.f32 %v8541_v60, %v6241_v35  ;;  %v1867_v26 = vmul.f32 %v8542_v16, %v6297_v55  ;;  %v1868_v48 = vadd.f32 %v1852_v6, %v8497_v9  ;;  %8543 = vst [vmem:[#allocation15_spill] sm:$0xff] %v6622_v22 }
 0x187   : > { %2205 = vperm.xlu1 %5221, %v6622_v22   ;;  %v1872_v33 = vadd.f32 %v8544_v30, %v8495_v24  ;;  %v1873_v23 = vadd.f32 %v1857_v19, %v6243_v41  ;;  %v1874_v29 = vadd.f32 %v8545_v28, %v6265_v40  ;;  %v1875_v18 = vadd.f32 %v1859_v34, %v6278_v52 }
 0x188   : > { %2317 = vperm.xlu0 %5223, %v6632_v3   ;;  %v1779_v6 = vrot.slane %v1778_v57, 4  ;;  %v1869_v21 = vadd.f32 %v8546_v7, %v6087_v4  ;;  %v1870_v58 = vadd.f32 %v1854_v59, %v6117_v45  ;;  %v1876_v20 = vadd.f32 %v8547_v61, %v6288_v49 }
 0x189   : > { %v1871_v19 = vadd.f32 %v1855_v31, %v8527_v25  ;;  %v1877_v42 = vadd.f32 %v1861_v17, %v6292_v27  ;;  %v1878_v34 = vadd.f32 %v6496_v43, %v6309_v14  ;;  %v1879_v15 = vadd.f32 %v1863_v10, %v8548_v0  ;;  %v8550_v17 = vld [vmem:[#allocation11_spill] sm:$0xff] }
 0x18a   : > { %v1780_v37 = vmax.f32 %v1778_v57, %v1779_v6  ;;  %v1881_v60 = vadd.f32 %v1865_v8, %v8530_v32  ;;  %v1883_v16 = vadd.f32 %v1867_v26, %v6342_v44  ;;  %v1884_v59 = vmax.f32 %v1868_v48, %v1872_v33  ;;  %v8552_v57 = vld [vmem:[#allocation13_spill] sm:$0xff]  ;;  %v6656_v6 = vpop.permute.xlu1 %2165 }
 0x18b   : > { %v8549_v30 = vmov 6   ;;  %v1885_v28 = vmax.f32 %v1869_v21, %v1873_v23  ;;  %v1886_v7 = vmax.f32 %v1870_v58, %v1874_v29  ;;  %v1887_v31 = vmax.f32 %v1871_v19, %v1875_v18 }
 0x18c   : > { %5222 = vset.pattern.permute.xlu1 %v8549_v30  ;;  %v2115_v61 = vadd.f32 %v8550_v17, %v6278_v52  ;;  %2325 = vperm.xlu0 %5223, %v6622_v22   ;;  %v1781_v43 = vrot.slane %v1780_v37, 2  ;;  %v1888_v10 = vmax.f32 %v1884_v59, %v1876_v20  ;;  %v2117_v8 = vadd.f32 %v8552_v57, %v6292_v27  ;;  %v6660_v17 = vpop.permute.xlu0 %2161  ;;  %v8553_v20 = vld [vmem:[#allocation94_spill] sm:$0xff] }
 0x18d   : > { %2269 = vperm.xlu1 %5222, %v8551_v56   ;;  %v1889_v26 = vmax.f32 %v1885_v28, %v1877_v42  ;;  %v1890_v48 = vmax.f32 %v1886_v7, %v1878_v34  ;;  %v1891_v33 = vmax.f32 %v1887_v31, %v1879_v15  ;;  %v5417_v59 = vmov 7   ;;  %v1785_v42 = vld [vmem:[#allocation4 + $0x1] sm:$0x1] }
 0x18e   : > { %v2137_v23 = vmax.f32 %v2115_v61, %v2136_v62  ;;  %v1782_v29 = vmax.f32 %v1780_v37, %v1781_v43  ;;  %v1892_v18 = vmax.f32 %v1888_v10, %v6593_v5  ;;  %v6665_v37 = vpop.permute.xlu1 %2173 }
 0x18f   : > { %v1893_v21 = vmax.f32 %v1889_v26, %v1881_v60  ;;  %v1894_v58 = vmax.f32 %v1890_v48, %v6602_v2  ;;  %v1895_v19 = vmax.f32 %v1891_v33, %v1883_v16  ;;  %v8554_v16 = vld [vmem:[#allocation95_spill] sm:$0xff] }
 0x190   : > { %v2138_v30 = vmax.f32 %v2117_v8, %v2137_v23  ;;  %5224 = vset.pattern.permute.xlu0 %v5417_v59  ;;  %v1783_v57 = vrot.slane %v1782_v29, 1  ;;  %v6669_v61 = vpop.permute.xlu0 %2169  ;;  %v8555_v8 = vld [vmem:[#allocation93_spill] sm:$0xff]  ;;  %v2145_v23 = vld [vmem:[#allocation4 + $0x4] sm:$0x1] }
 0x191   : > { %2277 = vperm.xlu1 %5222, %v8553_v20   ;;  %2389 = vperm.xlu0 %5224, %v8551_v56   ;;  %v1896_v62 = vmax.f32 %v1892_v18, %v1893_v21  ;;  %v1897_v34 = vmax.f32 %v1894_v58, %v1895_v19  ;;  %v8556_v58 = vld [vmem:[#allocation91_spill] sm:$0xff] }
 0x192   : > { %v2139_v15 = vrot.slane %v2138_v30, 4  ;;  %v1784_v5 = vmax.f32 %v1782_v29, %v1783_v57  ;;  %v6672_v26 = vpop.permute.xlu1 %2181  ;;  %v1905_v57 = vld [vmem:[#allocation4 + $0x2] sm:$0x1] }
 0x193   : > { %v1898_v2 = vmax.f32 %v1896_v62, %v1897_v34  ;;  %v8557_v34 = vld [vmem:[#allocation68_spill] sm:$0xff] }
 0x194   : > { %v2140_v60 = vmax.f32 %v2138_v30, %v2139_v15  ;;  %v1786_v28 = vmax.f32 %v1785_v42, %v1784_v5  ;;  %v6675_v21 = vpop.permute.xlu0 %2177 }
 0x195   : > { %2281 = vperm.xlu1 %5222, %v8554_v16   ;;  %2401 = vperm.xlu0 %5224, %v8554_v16   ;;  %v1899_v7 = vrot.slane %v1898_v2, 4 }
 0x196   : > { %v2141_v31 = vrot.slane %v2140_v60, 2  ;;  %1787 = vst [vmem:[#allocation4 + $0x1] sm:$0x1] %v1786_v28  ;;  %v6679_v42 = vpop.permute.xlu1 %2189 }
 0x197   : > { %v1900_v43 = vmax.f32 %v1898_v2, %v1899_v7  ;;  %v8558_v2 = vld [vmem:[#allocation52_spill] sm:$0xff]  ;;  %v8559_v7 = vmov 1.0  }
 0x198   : > { %v2142_v10 = vmax.f32 %v2140_v60, %v2141_v31  ;;  %v8560_v31 = vld [vmem:[#allocation7_spill] sm:$0xff] }
 0x199   : > { %2289 = vperm.xlu1 %5222, %v8555_v8   ;;  %2409 = vperm.xlu0 %5224, %v8555_v8   ;;  %v1901_v48 = vrot.slane %v1900_v43, 2 }
 0x19a   : > { %v2143_v33 = vrot.slane %v2142_v10, 1  ;;  %v6684_v28 = vpop.permute.xlu1 %2197 }
 0x19b   : > { %v1902_v29 = vmax.f32 %v1900_v43, %v1901_v48  ;;  %v8561_v48 = vld [vmem:[#allocation9_spill] sm:$0xff] }
 0x19c   : > { %v2144_v18 = vmax.f32 %v2142_v10, %v2143_v33 }
 0x19d   : > { %2297 = vperm.xlu1 %5222, %v8556_v58   ;;  %2417 = vperm.xlu0 %5224, %v8556_v58   ;;  %v1903_v19 = vrot.slane %v1902_v29, 1  ;;  %v1168_v15 = vpop.trf.xlu0 }
 0x19e   : > { %v2146_v30 = vmax.f32 %v2145_v23, %v2144_v18  ;;  %5049 = vmatprep.mubr.bf16.mxu1 %v1168_v15  ;;  %v8562_v18 = vld [vmem:[#allocation64_spill] sm:$0xff] }
 0x19f   : > { %v1904_v62 = vmax.f32 %v1902_v29, %v1903_v19  ;;  %v5418_v19 = vmov 8  }
 0x1a0   : > { %2147 = vst [vmem:[#allocation4 + $0x4] sm:$0x1] %v2146_v30 }
 0x1a1   : > { %2305 = vperm.xlu1 %5222, %v8557_v34   ;;  %2425 = vperm.xlu0 %5224, %v8557_v34   ;;  %v1906_v5 = vmax.f32 %v1905_v57, %v1904_v62  ;;  %v1169_v60 = vpop.trf.xlu0  ;;  %v8563_v62 = vld [vmem:[#allocation92_spill] sm:$0xff] }
 0x1a2   : > { %5050 = vmatmul.mubr.bf16.vlgmr.msra.gmra.mxu1 %v1169_v60  ;;  %v8564_v60 = vld [vmem:[#allocation90_spill] sm:$0xff] }
 0x1a3   : > { %1907 = vst [vmem:[#allocation4 + $0x2] sm:$0x1] %v1906_v5  ;;  %5066 = vmatpush3.msra.mxu1 %v8559_v7 }
 0x1a4   : > { %5067 = vmatprep.subr.mxu1 %v8559_v7 }
 0x1a5   : > { %2313 = vperm.xlu1 %5222, %v8558_v2   ;;  %2433 = vperm.xlu0 %5224, %v8558_v2   ;;  %v1170_v43 = vpop.trf.xlu0 }
 0x1a6   : > { %5068 = vmatpush3.msra.mxu1 %v8559_v7  ;;  %5053 = vmatprep.mubr.bf16.mxu1 %v1170_v43 }
 0x1a7   : > { %5069 = vmatprep.subr.mxu1 %v8559_v7 }
 0x1a8   : > { %v1338_v10 = vpop.trf.xlu1  ;;  %5070 = vmatpush3.msra.mxu1 %v8559_v7 }
 0x1a9   : > { %2321 = vperm.xlu1 %5222, %v8560_v31   ;;  %2441 = vperm.xlu0 %5224, %v8560_v31   ;;  %v1171_v33 = vpop.trf.xlu0 }
 0x1aa   : > { %5071 = vmatprep.subr.mxu1 %v8559_v7  ;;  %5054 = vmatmul.mubr.bf16.gmra.mxu1 %v1171_v33 }
 0x1ab   : > { %5072 = vmatpush3.msra.mxu1 %v8559_v7 }
 0x1ac   : > { %v1339_v23 = vpop.trf.xlu1  ;;  %5073 = vmatprep.subr.mxu1 %v8559_v7 }
 0x1ad   : > { %2329 = vperm.xlu1 %5222, %v8561_v48   ;;  %2449 = vperm.xlu0 %5224, %v8561_v48   ;;  %v1172_v29 = vpop.trf.xlu0 }
 0x1ae   : > { %5074 = vmatpush3.msra.mxu1 %v8559_v7  ;;  %5057 = vmatprep.mubr.bf16.mxu1 %v1172_v29 }
 0x1af   : > { %5075 = vmatprep.subr.mxu1 %v8559_v7 }
 0x1b0   : > { %v1340_v30 = vpop.trf.xlu1  ;;  %5076 = vmatpush3.msra.mxu1 %v8559_v7 }
 0x1b1   : > { %5225 = vset.pattern.permute.xlu1 %v5417_v59  ;;  %5227 = vset.pattern.permute.xlu0 %v5418_v19  ;;  %v1173_v57 = vpop.trf.xlu0 }
 0x1b2   : > { %2393 = vperm.xlu1 %5225, %v8562_v18   ;;  %2513 = vperm.xlu0 %5227, %v8562_v18  }
 0x1b3   : > { %5077 = vmatprep.subr.mxu1 %v8559_v7  ;;  %5058 = vmatmul.mubr.bf16.gmra.mxu1 %v1173_v57 }
 0x1b4   : > { %5078 = vmatpush3.msra.mxu1 %v8559_v7  ;;  %v1341_v59 = vpop.trf.xlu1 }
 0x1b5   : > { %5079 = vmatprep.subr.mxu1 %v8559_v7  ;;  %v1174_v15 = vpop.trf.xlu0 }
 0x1b6   : > { %2397 = vperm.xlu1 %5225, %v8553_v20   ;;  %2525 = vperm.xlu0 %5227, %v8563_v62  }
 0x1b7   : > { %5080 = vmatpush3.msra.mxu1 %v8559_v7  ;;  %5061 = vmatprep.mubr.bf16.mxu1 %v1174_v15 }
 0x1b8   : > { %5081 = vmatprep.subr.mxu1 %v8559_v7  ;;  %v1342_v5 = vpop.trf.xlu1 }
 0x1b9   : > { %5082 = vmatpush3.msra.mxu1 %v8559_v7  ;;  %v1175_v43 = vpop.trf.xlu0 }
 0x1ba   : > { %2405 = vperm.xlu1 %5225, %v8563_v62   ;;  %5083 = vmatprep.subr.mxu1 %v8559_v7 }
 0x1bb   : > { %2533 = vperm.xlu0 %5227, %v8564_v60   ;;  %5084 = vmatpush3.msra.mxu1 %v8559_v7 }
 0x1bc   : > { %5085 = vmatprep.subr.mxu1 %v8559_v7  ;;  %v1343_v33 = vpop.trf.xlu1  ;;  %5062 = vmatmul.mubr.bf16.gmra.mxu1 %v1175_v43  ;;  %v5419_v43 = vmov 9  }
 0x1bd   : > { %5086 = vmatpush3.msra.mxu1 %v8559_v7  ;;  %5097 = vmatprep.mubr.f32.mxu1 %v1338_v10 }
 0x1be   : > { %2413 = vperm.xlu1 %5225, %v8564_v60   ;;  %5087 = vmatprep.subr.mxu1 %v8559_v7 }
 0x1bf   : > { %2541 = vperm.xlu0 %5227, %v8532_v1   ;;  %5088 = vmatpush3.msra.mxu1 %v8559_v7 }
 0x1c0   : > { %5089 = vmatprep.subr.mxu1 %v8559_v7  ;;  %v1344_v29 = vpop.trf.xlu1 }
 0x1c1   : > { %5090 = vmatpush3.msra.mxu1 %v8559_v7 }
 0x1c2   : > { %2421 = vperm.xlu1 %5225, %v8532_v1   ;;  %5091 = vmatprep.subr.mxu1 %v8559_v7 }
 0x1c3   : > { %2549 = vperm.xlu0 %5227, %v8536_v50   ;;  %5092 = vmatpush3.msra.mxu1 %v8559_v7 }
 0x1c4   : > { %5093 = vmatprep.subr.mxu1 %v8559_v7  ;;  %v1345_v57 = vpop.trf.xlu1 }
 0x1c5   : > { %5094 = vmatpush3.msra.mxu1 %v8559_v7 }
 0x1c6   : > { %2429 = vperm.xlu1 %5225, %v8536_v50   ;;  %5095 = vmatprep.subr.mxu1 %v8559_v7 }
 0x1c7   : > { %2557 = vperm.xlu0 %5227, %v6632_v3   ;;  %5096 = vmatpush3.msra.mxu1 %v8559_v7 }
 0x1c8   : > { %5098 = vmatmul.mubr.f32.vlgmr.msra.gmra.mxu1 %v1339_v23  ;;  %v1346_v10 = vpop.trf.xlu1 }
 0x1c9   : > { %5100 = vmatprep.mubr.f32.mxu1 %v1340_v30 }
 0x1ca   : > { %2437 = vperm.xlu1 %5225, %v6632_v3  }
 0x1cb   : > { %2565 = vperm.xlu0 %5227, %v6622_v22  }
 0x1cc   : > { %5101 = vmatmul.mubr.f32.gmra.mxu1 %v1341_v59  ;;  %v1347_v15 = vpop.trf.xlu1 }
 0x1cd   : > { %5103 = vmatprep.mubr.f32.mxu1 %v1342_v5 }
 0x1ce   : > { %2445 = vperm.xlu1 %5225, %v6622_v22  }
 0x1cf   : > { %5228 = vset.pattern.permute.xlu0 %v5419_v43 }
 0x1d0   : > { %2629 = vperm.xlu0 %5228, %v8551_v56   ;;  %5104 = vmatmul.mubr.f32.gmra.mxu1 %v1343_v33  ;;  %v1348_v7 = vpop.trf.xlu1 }
 0x1d1   : > { %5106 = vmatprep.mubr.f32.mxu1 %v1344_v29 }
 0x1d2   : > { %5226 = vset.pattern.permute.xlu1 %v5418_v19 }
 0x1d3   : > { %2509 = vperm.xlu1 %5226, %v8551_v56  }
 0x1d4   : > { %2641 = vperm.xlu0 %5228, %v8554_v16   ;;  %5107 = vmatmul.mubr.f32.gmra.mxu1 %v1345_v57  ;;  %v1349_v23 = vpop.trf.xlu1 }
 0x1d5   : > { %5109 = vmatprep.mubr.f32.mxu1 %v1346_v10 }
 0x1d7   : > { %2517 = vperm.xlu1 %5226, %v8553_v20  }
 0x1d8   : > { %2649 = vperm.xlu0 %5228, %v8555_v8   ;;  %5110 = vmatmul.mubr.f32.gmra.mxu1 %v1347_v15  ;;  %v1350_v30 = vpop.trf.xlu1  ;;  %v8241_v15 = vmov 10  }
 0x1d9   : > { %5112 = vmatprep.mubr.f32.mxu1 %v1348_v7  ;;  %v2212_v7 = vmul.f32 %v6645_v51, %v8476_v63 }
 0x1db   : > { %2521 = vperm.xlu1 %5226, %v8554_v16   ;;  %v2186_v59 = vpop.permute.xlu0 %2185 }
 0x1dc   : > { %2657 = vperm.xlu0 %5228, %v8556_v58   ;;  %5113 = vmatmul.mubr.f32.gmra.mxu1 %v1349_v23  ;;  %v1351_v19 = vpop.trf.xlu1 }
 0x1dd   : > { %5115 = vmatprep.mubr.f32.mxu1 %v1350_v30  ;;  %v8565_v30 = vld [vmem:[#allocation63_spill] sm:$0xff] }
 0x1df   : > { %2529 = vperm.xlu1 %5226, %v8555_v8  }
 0x1e0   : > { %2665 = vperm.xlu0 %5228, %v8557_v34   ;;  %5116 = vmatmul.mubr.f32.gmra.mxu1 %v1351_v19  ;;  %v1352_v5 = vpop.trf.xlu1  ;;  %v2194_v33 = vpop.permute.xlu0 %2193  ;;  %v2216_v19 = vmul.f32 %v6656_v6, %v8565_v30 }
 0x1e1   : > { %5118 = vmatprep.mubr.f32.mxu1 %v1352_v5  ;;  %v2217_v5 = vmul.f32 %v6669_v61, %v8512_v46  ;;  %v2214_v61 = vmul.f32 %v6619_v13, %v6107_v54 }
 0x1e3   : > { %2537 = vperm.xlu1 %5226, %v8556_v58  }
 0x1e4   : > { %2673 = vperm.xlu0 %5228, %v8558_v2   ;;  %v1353_v29 = vpop.trf.xlu1  ;;  %v2202_v57 = vpop.permute.xlu0 %2201 }
 0x1e5   : > { %5119 = vmatmul.mubr.f32.gmra.mxu1 %v1353_v29  ;;  %v8566_v29 = vld [vmem:[#allocation67_spill] sm:$0xff] }
 0x1e7   : > { %2545 = vperm.xlu1 %5226, %v8557_v34  }
 0x1e8   : > { %2681 = vperm.xlu0 %5228, %v8560_v31   ;;  %v2210_v10 = vpop.permute.xlu0 %2209 }
 0x1eb   : > { %2553 = vperm.xlu1 %5226, %v8558_v2   ;;  %v2232_v2 = vadd.f32 %v2216_v19, %v8495_v24 }
 0x1ec   : > { %2689 = vperm.xlu0 %5228, %v8561_v48  }
 0x1ef   : > { %2561 = vperm.xlu1 %5226, %v8560_v31   ;;  %v6755_v58 = vpop.permute.xlu0 %2273  ;;  %v8567_v31 = vld [vmem:[#allocation54_spill] sm:$0xff] }
 0x1f0   : > { %5231 = vset.pattern.permute.xlu0 %v8241_v15  ;;  %v2218_v15 = vmul.f32 %v6665_v37, %v8566_v29  ;;  %v2213_v51 = vmul.f32 %v6586_v11, %v8567_v31  ;;  %v8569_v37 = vld [vmem:[#allocation70_spill] sm:$0xff] }
 0x1f1   : > { %2753 = vperm.xlu0 %5231, %v8562_v18  }
 0x1f2   : > { %v2234_v13 = vadd.f32 %v2218_v15, %v6265_v40  ;;  %v2229_v24 = vadd.f32 %v2213_v51, %v6087_v4  ;;  %v8571_v15 = vld [vmem:[#allocation81_spill] sm:$0xff] }
 0x1f3   : > { %2569 = vperm.xlu1 %5226, %v8561_v48   ;;  %v6759_v34 = vpop.permute.xlu0 %2285  ;;  %v2228_v48 = vadd.f32 %v2212_v7, %v8497_v9  ;;  %v2220_v7 = vmul.f32 %v6672_v26, %v8569_v37  ;;  %v8570_v9 = vld [vmem:[#allocation75_spill] sm:$0xff] }
 0x1f4   : > { %v2222_v11 = vmul.f32 %v6679_v42, %v8570_v9  ;;  %v2227_v9 = vmul.f32 %v2210_v10, %v6297_v55 }
 0x1f5   : > { %2765 = vperm.xlu0 %5231, %v8563_v62   ;;  %v2244_v19 = vmax.f32 %v2228_v48, %v2232_v2  ;;  %v2224_v2 = vmul.f32 %v6684_v28, %v8571_v15 }
 0x1f7   : > { %5229 = vset.pattern.permute.xlu1 %v5419_v43  ;;  %v6765_v23 = vpop.permute.xlu0 %2293  ;;  %v2221_v43 = vmul.f32 %v2186_v59, %v6231_v38  ;;  %v2223_v59 = vmul.f32 %v2194_v33, %v8518_v53  ;;  %v2236_v33 = vadd.f32 %v2220_v7, %v6288_v49  ;;  %v2243_v7 = vadd.f32 %v2227_v9, %v6342_v44 }
 0x1f8   : > { %2633 = vperm.xlu1 %5229, %v8562_v18   ;;  %v2219_v18 = vmul.f32 %v6675_v21, %v6188_v12  ;;  %v2215_v21 = vmul.f32 %v6660_v17, %v8480_v47 }
 0x1f9   : > { %2773 = vperm.xlu0 %5231, %v8564_v60   ;;  %v2237_v42 = vadd.f32 %v2221_v43, %v6292_v27  ;;  %v2239_v10 = vadd.f32 %v2223_v59, %v8548_v0  ;;  %v2248_v43 = vmax.f32 %v2244_v19, %v2236_v33 }
 0x1fa   : > { %v2235_v26 = vadd.f32 %v2219_v18, %v6278_v52  ;;  %v2231_v48 = vadd.f32 %v2215_v21, %v8527_v25 }
 0x1fb   : > { %v6781_v6 = vpop.permute.xlu0 %2301 }
 0x1fc   : > { %2637 = vperm.xlu1 %5229, %v8553_v20   ;;  %8568 = vst [vmem:[#allocation17_spill] sm:$0xff] %v6781_v6  ;;  %v2233_v20 = vadd.f32 %v2217_v5, %v6243_v41  ;;  %v2225_v6 = vmul.f32 %v2202_v57, %v6241_v35  ;;  %v2230_v5 = vadd.f32 %v2214_v61, %v6117_v45 }
 0x1fd   : > { %2781 = vperm.xlu0 %5231, %v8532_v1   ;;  %v2238_v57 = vadd.f32 %v2222_v11, %v6309_v14  ;;  %v2247_v61 = vmax.f32 %v2231_v48, %v2235_v26 }
 0x1fe   : > { %v2245_v51 = vmax.f32 %v2229_v24, %v2233_v20  ;;  %v2246_v18 = vmax.f32 %v2230_v5, %v2234_v13  ;;  %v2240_v24 = vadd.f32 %v2224_v2, %v8529_v36  ;;  %v8572_v20 = vld [vmem:[#allocation79_spill] sm:$0xff]  ;;  %v6858_v5 = vld [vmem:[%s5646_s18 + $0x50] sm:$0xff] }
 0x1ff   : > { %v6802_v17 = vpop.permute.xlu0 %2309  ;;  %v2251_v21 = vmax.f32 %v2247_v61, %v2239_v10 }
 0x200   : > { %2645 = vperm.xlu1 %5229, %v8563_v62   ;;  %v2241_v62 = vadd.f32 %v2225_v6, %v8530_v32  ;;  %v2249_v35 = vmax.f32 %v2245_v51, %v2237_v42  ;;  %v2252_v13 = vmax.f32 %v2248_v43, %v2240_v24 }
 0x201   : > { %2789 = vperm.xlu0 %5231, %v8536_v50   ;;  %v2250_v50 = vmax.f32 %v2246_v18, %v2238_v57  ;;  %v2255_v19 = vmax.f32 %v2251_v21, %v2243_v7  ;;  %v8251_v57 = vmov 11   ;;  %v8574_v21 = vmov 10  }
 0x202   : > { %v2206_v55 = vpop.permute.xlu1 %2205  ;;  %v2253_v6 = vmax.f32 %v2249_v35, %v2241_v62 }
 0x203   : > { %v2226_v11 = vmul.f32 %v2206_v55, %v8523_v39  ;;  %v6816_v28 = vpop.permute.xlu0 %2317 }
 0x204   : > { %2653 = vperm.xlu1 %5229, %v8564_v60   ;;  %v8573_v60 = vmov 0.0   ;;  %v2256_v35 = vmax.f32 %v2252_v13, %v2253_v6  ;;  %v6878_v13 = vld [vmem:[%s5646_s18 + $0x38] sm:$0xff] }
 0x205   : > { %2797 = vperm.xlu0 %5231, %v6632_v3   ;;  %v2242_v59 = vadd.f32 %v2226_v11, %v8572_v20  ;;  %518 = vst.msk [vmem:[#allocation2 + $0x10] sm:$0xff] %vm515_vm1, %v8573_v60  ;;  %516 = vst.msk [vmem:[#allocation2] sm:$0xff] %vm515_vm1, %v8573_v60 }
 0x206   : > { %517 = vst.msk [vmem:[#allocation2 + $0x8] sm:$0xff] %vm515_vm1, %v8573_v60  ;;  %519 = vst.msk [vmem:[#allocation2 + $0x18] sm:$0xff] %vm515_vm1, %v8573_v60 }
 0x207   : > { %v2254_v26 = vmax.f32 %v2250_v50, %v2242_v59  ;;  %v6822_v9 = vpop.permute.xlu0 %2325  ;;  %520 = vst.msk [vmem:[#allocation2 + $0x20] sm:$0xff] %vm515_vm1, %v8573_v60  ;;  %521 = vst.msk [vmem:[#allocation2 + $0x28] sm:$0xff] %vm515_vm1, %v8573_v60  ;;  %v2265_v50 = vld [vmem:[#allocation4 + $0x5] sm:$0x1] }
 0x208   : > { %2661 = vperm.xlu1 %5229, %v8532_v1   ;;  %v2270_v55 = vpop.permute.xlu1 %2269  ;;  %522 = vst.msk [vmem:[#allocation2 + $0x30] sm:$0xff] %vm515_vm1, %v8573_v60  ;;  %523 = vst.msk [vmem:[#allocation2 + $0x38] sm:$0xff] %vm515_vm1, %v8573_v60 }
 0x209   : > { %524 = vst.msk [vmem:[#allocation2 + $0x40] sm:$0xff] %vm515_vm1, %v8573_v60  ;;  %525 = vst.msk [vmem:[#allocation2 + $0x48] sm:$0xff] %vm515_vm1, %v8573_v60  ;;  %2805 = vperm.xlu0 %5231, %v6622_v22   ;;  %v2257_v1 = vmax.f32 %v2254_v26, %v2255_v19  ;;  %v2332_v19 = vmul.f32 %v2270_v55, %v8476_v63  ;;  %v2338_v55 = vmul.f32 %v6765_v23, %v8566_v29  ;;  %v8578_v23 = vld [vmem:[#allocation71_spill] sm:$0xff] }
 0x20a   : > { %526 = vst.msk [vmem:[#allocation2 + $0x50] sm:$0xff] %vm515_vm1, %v8573_v60  ;;  %527 = vst.msk [vmem:[#allocation2 + $0x58] sm:$0xff] %vm515_vm1, %v8573_v60 }
 0x20b   : > { %528 = vst.msk [vmem:[#allocation2 + $0x60] sm:$0xff] %vm515_vm1, %v8573_v60  ;;  %529 = vst.msk [vmem:[#allocation2 + $0x68] sm:$0xff] %vm515_vm1, %v8573_v60  ;;  %v2258_v42 = vmax.f32 %v2256_v35, %v2257_v1  ;;  %v6884_v35 = vld [vmem:[%s5646_s18 + $0x10] sm:$0xff] }
 0x20c   : > { %530 = vst.msk [vmem:[#allocation2 + $0x70] sm:$0xff] %vm515_vm1, %v8573_v60  ;;  %531 = vst.msk [vmem:[#allocation2 + $0x78] sm:$0xff] %vm515_vm1, %v8573_v60  ;;  %2669 = vperm.xlu1 %5229, %v6858_v5   ;;  %v2278_v33 = vpop.permute.xlu1 %2277  ;;  %v6862_v2 = vpop.permute.xlu0 %2389 }
 0x20d   : > { %5232 = vset.pattern.permute.xlu0 %v8251_v57  ;;  %v2259_v48 = vrot.slane %v2258_v42, 4  ;;  %8575 = vst [vmem:[#allocation19_spill] sm:$0xff] %v6884_v35  ;;  %534 = vst.msk [vmem:[#allocation3 + $0x8] sm:$0xff] %vm532_vm2, %v8573_v60 }
 0x20e   : > { %2869 = vperm.xlu0 %5232, %v8551_v56   ;;  %533 = vst.msk [vmem:[#allocation3] sm:$0xff] %vm532_vm2, %v8573_v60  ;;  %535 = vst.msk [vmem:[#allocation3 + $0x10] sm:$0xff] %vm532_vm2, %v8573_v60 }
 0x20f   : > { %v2260_v51 = vmax.f32 %v2258_v42, %v2259_v48  ;;  %v6892_v42 = vld [vmem:[%s5646_s18 + $0x48] sm:$0xff]  ;;  %536 = vst.msk [vmem:[#allocation3 + $0x18] sm:$0xff] %vm532_vm2, %v8573_v60  ;;  %537 = vst.msk [vmem:[#allocation3 + $0x20] sm:$0xff] %vm532_vm2, %v8573_v60 }
 0x210   : > { %2677 = vperm.xlu1 %5229, %v6632_v3   ;;  %v2282_v10 = vpop.permute.xlu1 %2281  ;;  %v6866_v62 = vpop.permute.xlu0 %2401  ;;  %538 = vst.msk [vmem:[#allocation3 + $0x28] sm:$0xff] %vm532_vm2, %v8573_v60  ;;  %539 = vst.msk [vmem:[#allocation3 + $0x30] sm:$0xff] %vm532_vm2, %v8573_v60 }
 0x211   : > { %v2261_v18 = vrot.slane %v2260_v51, 2  ;;  %540 = vst.msk [vmem:[#allocation3 + $0x38] sm:$0xff] %vm532_vm2, %v8573_v60  ;;  %541 = vst.msk [vmem:[#allocation3 + $0x40] sm:$0xff] %vm532_vm2, %v8573_v60 }
 0x212   : > { %2881 = vperm.xlu0 %5232, %v8554_v16   ;;  %542 = vst.msk [vmem:[#allocation3 + $0x48] sm:$0xff] %vm532_vm2, %v8573_v60  ;;  %543 = vst.msk [vmem:[#allocation3 + $0x50] sm:$0xff] %vm532_vm2, %v8573_v60 }
 0x213   : > { %v2262_v43 = vmax.f32 %v2260_v51, %v2261_v18  ;;  %v8576_v51 = vld [vmem:[#allocation58_spill] sm:$0xff]  ;;  %544 = vst.msk [vmem:[#allocation3 + $0x58] sm:$0xff] %vm532_vm2, %v8573_v60  ;;  %545 = vst.msk [vmem:[#allocation3 + $0x60] sm:$0xff] %vm532_vm2, %v8573_v60 }
 0x214   : > { %2685 = vperm.xlu1 %5229, %v6622_v22   ;;  %v2290_v61 = vpop.permute.xlu1 %2289  ;;  %v6870_v7 = vpop.permute.xlu0 %2409  ;;  %v2348_v18 = vadd.f32 %v2332_v19, %v8576_v51  ;;  %v8580_v19 = vld [vmem:[#allocation75_spill] sm:$0xff]  ;;  %546 = vst.msk [vmem:[#allocation3 + $0x68] sm:$0xff] %vm532_vm2, %v8573_v60  ;;  %547 = vst.msk [vmem:[#allocation3 + $0x70] sm:$0xff] %vm532_vm2, %v8573_v60 }
 0x215   : > { %v2263_v11 = vrot.slane %v2262_v43, 1  ;;  %v2337_v48 = vmul.f32 %v2290_v61, %v8512_v46  ;;  %v2342_v57 = vmul.f32 %v6802_v17, %v8580_v19  ;;  %v8582_v17 = vld [vmem:[#allocation76_spill] sm:$0xff]  ;;  %548 = vst.msk [vmem:[#allocation3 + $0x78] sm:$0xff] %vm532_vm2, %v8573_v60  ;;  %v8263_v60 = vmov 12  }
 0x216   : > { %2889 = vperm.xlu0 %5232, %v8555_v8   ;;  %v2334_v8 = vmul.f32 %v2278_v33, %v6107_v54  ;;  %v2333_v33 = vmul.f32 %v6755_v58, %v8567_v31  ;;  %v8579_v58 = vld [vmem:[#allocation17_spill] sm:$0xff] }
 0x217   : > { %v2264_v24 = vmax.f32 %v2262_v43, %v2263_v11 }
 0x218   : > { %5230 = vset.pattern.permute.xlu1 %v8574_v21  ;;  %v2298_v6 = vpop.permute.xlu1 %2297  ;;  %v6875_v59 = vpop.permute.xlu0 %2417  ;;  %v2350_v11 = vadd.f32 %v2334_v8, %v6117_v45  ;;  %v8581_v8 = vld [vmem:[#allocation52_spill] sm:$0xff]  ;;  %v2353_v45 = vadd.f32 %v2337_v48, %v6243_v41  ;;  %v2349_v22 = vadd.f32 %v2333_v33, %v6087_v4  ;;  %v2358_v48 = vadd.f32 %v2342_v57, %v6309_v14  ;;  %v8585_v14 = vld [vmem:[#allocation85_spill] sm:$0xff] }
 0x219   : > { %2749 = vperm.xlu1 %5230, %v8551_v56   ;;  %v2266_v16 = vmax.f32 %v2265_v50, %v2264_v24  ;;  %v2336_v56 = vmul.f32 %v6759_v34, %v8565_v30  ;;  %v2339_v50 = vmul.f32 %v2298_v6, %v6188_v12  ;;  %v6905_v24 = vld [vmem:[%s5646_s18 + $0x18] sm:$0xff]  ;;  %v2354_v6 = vadd.f32 %v2338_v55, %v6265_v40 }
 0x21a   : > { %2897 = vperm.xlu0 %5232, %v6878_v13   ;;  %8577 = vst [vmem:[#allocation21_spill] sm:$0xff] %v6905_v24  ;;  %v2344_v33 = vmul.f32 %v6816_v28, %v8571_v15 }
 0x21b   : > { %2267 = vst [vmem:[#allocation4 + $0x5] sm:$0x1] %v2266_v16  ;;  %v2352_v61 = vadd.f32 %v2336_v56, %v8578_v23  ;;  %v2340_v16 = vmul.f32 %v8579_v58, %v8569_v37  ;;  %v2366_v23 = vmax.f32 %v2350_v11, %v2354_v6  ;;  %v2355_v58 = vadd.f32 %v2339_v50, %v6278_v52 }
 0x21c   : > { %v2306_v26 = vpop.permute.xlu1 %2305  ;;  %v6887_v1 = vpop.permute.xlu0 %2425  ;;  %v2365_v50 = vmax.f32 %v2349_v22, %v2353_v45  ;;  %v8586_v45 = vld [vmem:[#allocation9_spill] sm:$0xff] }
 0x21d   : > { %2757 = vperm.xlu1 %5230, %v6884_v35   ;;  %v2341_v34 = vmul.f32 %v2306_v26, %v6231_v38  ;;  %v2335_v26 = vmul.f32 %v2282_v10, %v8480_v47  ;;  %v2364_v51 = vmax.f32 %v2348_v18, %v2352_v61  ;;  %v2356_v55 = vadd.f32 %v2340_v16, %v6288_v49 }
 0x21e   : > { %2905 = vperm.xlu0 %5232, %v6892_v42   ;;  %v2346_v18 = vmul.f32 %v6822_v9, %v8523_v39  ;;  %v2370_v16 = vmax.f32 %v2366_v23, %v2358_v48 }
 0x21f   : > { %v2357_v54 = vadd.f32 %v2341_v34, %v6292_v27  ;;  %v2351_v11 = vadd.f32 %v2335_v26, %v8527_v25  ;;  %v2368_v6 = vmax.f32 %v2364_v51, %v2356_v55 }
 0x220   : > { %v2314_v43 = vpop.permute.xlu1 %2313  ;;  %v6908_v21 = vpop.permute.xlu0 %2433  ;;  %v2362_v22 = vadd.f32 %v2346_v18, %v8572_v20 }
 0x221   : > { %2761 = vperm.xlu1 %5230, %v6905_v24   ;;  %v2343_v24 = vmul.f32 %v2314_v43, %v8518_v53  ;;  %v8584_v43 = vld [vmem:[#allocation7_spill] sm:$0xff]  ;;  %v2367_v57 = vmax.f32 %v2351_v11, %v2355_v58  ;;  %v6989_v11 = vld [vmem:[%s5646_s18 + $0x58] sm:$0xff] }
 0x222   : > { %2913 = vperm.xlu0 %5232, %v8581_v8   ;;  %v6925_v8 = vld [vmem:[%s5646_s18 + $0x28] sm:$0xff]  ;;  %v2374_v26 = vmax.f32 %v2370_v16, %v2362_v22 }
 0x223   : > { %8583 = vst [vmem:[#allocation22_spill] sm:$0xff] %v6925_v8  ;;  %v2359_v34 = vadd.f32 %v2343_v24, %v8548_v0  ;;  %v6999_v16 = vld [vmem:[%s5646_s18 + $0x68] sm:$0xff] }
 0x224   : > { %v2322_v56 = vpop.permute.xlu1 %2321  ;;  %v6928_v10 = vpop.permute.xlu0 %2441 }
 0x225   : > { %v2345_v19 = vmul.f32 %v2322_v56, %v8582_v17  ;;  %2769 = vperm.xlu1 %5230, %v6925_v8   ;;  %v2369_v8 = vmax.f32 %v2365_v50, %v2357_v54  ;;  %v2360_v54 = vadd.f32 %v2344_v33, %v8529_v36  ;;  %v2371_v51 = vmax.f32 %v2367_v57, %v2359_v34 }
 0x226   : > { %2921 = vperm.xlu0 %5232, %v8584_v43   ;;  %v6985_v43 = vld [vmem:[%s5646_s18 + $0x8] sm:$0xff] }
 0x227   : > { %v2361_v61 = vadd.f32 %v2345_v19, %v8530_v32  ;;  %v2372_v19 = vmax.f32 %v2368_v6, %v2360_v54  ;;  %8587 = vst [vmem:[#allocation5_spill] sm:$0xff] %v6985_v43  ;;  %v6995_v6 = vld [vmem:[%s5646_s18 + $0x20] sm:$0xff] }
 0x228   : > { %v2330_v56 = vpop.permute.xlu1 %2329  ;;  %v6942_v9 = vpop.permute.xlu0 %2449  ;;  %8588 = vst [vmem:[#allocation24_spill] sm:$0xff] %v6995_v6 }
 0x229   : > { %v2347_v28 = vmul.f32 %v2330_v56, %v8585_v14  ;;  %2777 = vperm.xlu1 %5230, %v6878_v13   ;;  %v2373_v24 = vmax.f32 %v2369_v8, %v2361_v61 }
 0x22a   : > { %2929 = vperm.xlu0 %5232, %v8586_v45   ;;  %v7005_v45 = vld [vmem:[%s5646_s18 + $0x30] sm:$0xff] }
 0x22b   : > { %v2363_v23 = vadd.f32 %v2347_v28, %v6342_v44  ;;  %v2376_v33 = vmax.f32 %v2372_v19, %v2373_v24 }
 0x22d   : > { %v2375_v58 = vmax.f32 %v2371_v51, %v2363_v23  ;;  %2785 = vperm.xlu1 %5230, %v6892_v42   ;;  %v2394_v55 = vpop.permute.xlu1 %2393  ;;  %v6982_v48 = vpop.permute.xlu0 %2513  ;;  %v7009_v51 = vld [vmem:[%s5646_s18 + $0x78] sm:$0xff] }
 0x22e   : > { %5235 = vset.pattern.permute.xlu0 %v8263_v60  ;;  %8589 = vst [vmem:[#allocation26_spill] sm:$0xff] %v7009_v51  ;;  %v2457_v60 = vmul.f32 %v6870_v7, %v8512_v46  ;;  %v2455_v7 = vmul.f32 %v6866_v62, %v8480_v47 }
 0x22f   : > { %v2377_v18 = vmax.f32 %v2374_v26, %v2375_v58  ;;  %2993 = vperm.xlu0 %5235, %v6985_v43   ;;  %v7015_v26 = vld [vmem:[%s5646_s18 + $0x40] sm:$0xff] }
 0x230   : > { %v2385_v58 = vld [vmem:[#allocation4 + $0x6] sm:$0x1] }
 0x231   : > { %v2378_v8 = vmax.f32 %v2376_v33, %v2377_v18  ;;  %2793 = vperm.xlu1 %5230, %v6989_v11   ;;  %v2398_v50 = vpop.permute.xlu1 %2397  ;;  %v6992_v34 = vpop.permute.xlu0 %2525  ;;  %v8590_v18 = vmov 11  }
 0x233   : > { %v2379_v61 = vrot.slane %v2378_v8, 4  ;;  %3005 = vperm.xlu0 %5235, %v6995_v6  }
 0x235   : > { %v2380_v56 = vmax.f32 %v2378_v8, %v2379_v61  ;;  %2801 = vperm.xlu1 %5230, %v6999_v16   ;;  %v2406_v57 = vpop.permute.xlu1 %2405  ;;  %v2453_v61 = vmul.f32 %v2394_v55, %v8567_v31 }
 0x236   : > { %v7002_v28 = vpop.permute.xlu0 %2533 }
 0x237   : > { %v2381_v54 = vrot.slane %v2380_v56, 2  ;;  %3013 = vperm.xlu0 %5235, %v7005_v45  }
 0x239   : > { %v2382_v22 = vmax.f32 %v2380_v56, %v2381_v54  ;;  %2809 = vperm.xlu1 %5230, %v7009_v51   ;;  %v2414_v24 = vpop.permute.xlu1 %2413  ;;  %v2456_v51 = vmul.f32 %v2406_v57, %v8565_v30  ;;  %v2473_v57 = vadd.f32 %v2457_v60, %v6243_v41 }
 0x23a   : > { %v7012_v23 = vpop.permute.xlu0 %2541 }
 0x23b   : > { %v2383_v19 = vrot.slane %v2382_v22, 1  ;;  %3021 = vperm.xlu0 %5235, %v7015_v26  }
 0x23d   : > { %v2384_v33 = vmax.f32 %v2382_v22, %v2383_v19  ;;  %5233 = vset.pattern.permute.xlu1 %v8590_v18  ;;  %v2422_v8 = vpop.permute.xlu1 %2421  ;;  %v2452_v22 = vmul.f32 %v6862_v2, %v8476_v63  ;;  %v2459_v19 = vmul.f32 %v6875_v59, %v6188_v12  ;;  %v2469_v18 = vadd.f32 %v2453_v61, %v6087_v4  ;;  %v8595_v4 = vld [vmem:[#allocation75_spill] sm:$0xff] }
 0x23e   : > { %2873 = vperm.xlu1 %5233, %v6985_v43   ;;  %v7021_v56 = vpop.permute.xlu0 %2549  ;;  %v2458_v43 = vmul.f32 %v2414_v24, %v8566_v29  ;;  %v2461_v2 = vmul.f32 %v6887_v1, %v6231_v38  ;;  %v2463_v59 = vmul.f32 %v6908_v21, %v8518_v53  ;;  %v8593_v24 = vld [vmem:[#allocation56_spill] sm:$0xff]  ;;  %v2467_v1 = vmul.f32 %v6942_v9, %v8585_v14 }
 0x23f   : > { %8591 = vst [vmem:[#allocation28_spill] sm:$0xff] %v7021_v56  ;;  %v2386_v54 = vmax.f32 %v2385_v58, %v2384_v33  ;;  %3029 = vperm.xlu0 %5235, %v6858_v5   ;;  %v2460_v58 = vmul.f32 %v2422_v8, %v8569_v37  ;;  %v2454_v61 = vmul.f32 %v2398_v50, %v8593_v24  ;;  %v8594_v8 = vld [vmem:[#allocation71_spill] sm:$0xff] }
 0x240   : > { %v2475_v62 = vadd.f32 %v2459_v19, %v6278_v52  ;;  %v2485_v38 = vmax.f32 %v2469_v18, %v2473_v57  ;;  %v2474_v21 = vadd.f32 %v2458_v43, %v6265_v40  ;;  %v2479_v19 = vadd.f32 %v2463_v59, %v8548_v0  ;;  %v8599_v43 = vld [vmem:[#allocation59_spill] sm:$0xff] }
 0x241   : > { %2387 = vst [vmem:[#allocation4 + $0x6] sm:$0x1] %v2386_v54  ;;  %v2430_v55 = vpop.permute.xlu1 %2429  ;;  %v2472_v54 = vadd.f32 %v2456_v51, %v8594_v8  ;;  %v2476_v53 = vadd.f32 %v2460_v58, %v6288_v49  ;;  %v2471_v51 = vadd.f32 %v2455_v7, %v8527_v25  ;;  %v2465_v9 = vmul.f32 %v6928_v10, %v8582_v17  ;;  %v8600_v57 = vld [vmem:[#allocation87_spill] sm:$0xff] }
 0x242   : > { %2877 = vperm.xlu1 %5233, %v6884_v35   ;;  %v7035_v33 = vpop.permute.xlu0 %2557  ;;  %v2462_v56 = vmul.f32 %v2430_v55, %v8595_v4  ;;  %v8598_v55 = vld [vmem:[#allocation15_spill] sm:$0xff]  ;;  %v2470_v18 = vadd.f32 %v2454_v61, %v8599_v43  ;;  %v2483_v7 = vadd.f32 %v2467_v1, %v6342_v44  ;;  %v7076_v1 = vld [vmem:[%s5646_s18] sm:$0xff] }
 0x243   : > { %8592 = vst [vmem:[#allocation30_spill] sm:$0xff] %v7035_v33  ;;  %3037 = vperm.xlu0 %5235, %v6632_v3   ;;  %v8596_v33 = vld [vmem:[#allocation58_spill] sm:$0xff]  ;;  %v2487_v14 = vmax.f32 %v2471_v51, %v2475_v62  ;;  %8601 = vst [vmem:[#allocation34_spill] sm:$0xff] %v7076_v1 }
 0x244   : > { %v2468_v12 = vadd.f32 %v2452_v22, %v8596_v33  ;;  %v2477_v22 = vadd.f32 %v2461_v2, %v6292_v27 }
 0x245   : > { %v2438_v47 = vpop.permute.xlu1 %2437  ;;  %v2491_v10 = vmax.f32 %v2487_v14, %v2479_v19 }
 0x246   : > { %v2464_v60 = vmul.f32 %v2438_v47, %v8571_v15  ;;  %2885 = vperm.xlu1 %5233, %v6995_v6   ;;  %v7056_v50 = vpop.permute.xlu0 %2565  ;;  %v2484_v58 = vmax.f32 %v2468_v12, %v2472_v54  ;;  %v2478_v47 = vadd.f32 %v2462_v56, %v8600_v57  ;;  %v2489_v2 = vmax.f32 %v2485_v38, %v2477_v22  ;;  %v8602_v22 = vld [vmem:[#allocation21_spill] sm:$0xff] }
 0x247   : > { %8597 = vst [vmem:[#allocation32_spill] sm:$0xff] %v7056_v50  ;;  %3045 = vperm.xlu0 %5235, %v8598_v55   ;;  %v2486_v50 = vmax.f32 %v2470_v18, %v2474_v21  ;;  %v8281_v55 = vmov 13   ;;  %v2481_v56 = vadd.f32 %v2465_v9, %v8530_v32  ;;  %v2495_v38 = vmax.f32 %v2491_v10, %v2483_v7  ;;  %v8603_v9 = vld [vmem:[#allocation22_spill] sm:$0xff] }
 0x248   : > { %v2480_v6 = vadd.f32 %v2464_v60, %v8529_v36  ;;  %v2488_v59 = vmax.f32 %v2484_v58, %v2476_v53 }
 0x249   : > { %v2446_v25 = vpop.permute.xlu1 %2445  ;;  %v2490_v61 = vmax.f32 %v2486_v50, %v2478_v47  ;;  %v2493_v53 = vmax.f32 %v2489_v2, %v2481_v56 }
 0x24a   : > { %v2466_v0 = vmul.f32 %v2446_v25, %v8523_v39  ;;  %2893 = vperm.xlu1 %5233, %v7005_v45   ;;  %v2492_v54 = vmax.f32 %v2488_v59, %v2480_v6  ;;  %v7092_v59 = vld [vmem:[%s5646_s18 + $0x70] sm:$0xff] }
 0x24b   : > { %5236 = vset.pattern.permute.xlu0 %v8281_v55  ;;  %v7071_v12 = vpop.permute.xlu0 %2629  ;;  %8604 = vst [vmem:[#allocation50_spill] sm:$0xff] %v7092_v59  ;;  %v8609_v55 = vld [vmem:[#allocation69_spill] sm:$0xff] }
 0x24c   : > { %v2482_v62 = vadd.f32 %v2466_v0, %v8572_v20  ;;  %3109 = vperm.xlu0 %5236, %v7076_v1   ;;  %v2496_v60 = vmax.f32 %v2492_v54, %v2493_v53  ;;  %v2505_v54 = vld [vmem:[#allocation4 + $0x7] sm:$0x1] }
 0x24e   : > { %v2494_v25 = vmax.f32 %v2490_v61, %v2482_v62  ;;  %2901 = vperm.xlu1 %5233, %v7015_v26   ;;  %v2510_v14 = vpop.permute.xlu1 %2509 }
 0x24f   : > { %v7080_v21 = vpop.permute.xlu0 %2641 }
 0x250   : > { %v2497_v51 = vmax.f32 %v2494_v25, %v2495_v38  ;;  %3121 = vperm.xlu0 %5236, %v8602_v22  }
 0x252   : > { %v2498_v6 = vmax.f32 %v2496_v60, %v2497_v51  ;;  %2909 = vperm.xlu1 %5233, %v6858_v5   ;;  %v2518_v0 = vpop.permute.xlu1 %2517  ;;  %v2572_v60 = vmul.f32 %v2510_v14, %v8476_v63  ;;  %v2573_v14 = vmul.f32 %v6982_v48, %v8567_v31 }
 0x253   : > { %v7084_v50 = vpop.permute.xlu0 %2649  ;;  %v2574_v51 = vmul.f32 %v2518_v0, %v8593_v24  ;;  %v2580_v0 = vmul.f32 %v7012_v23, %v8569_v37 }
 0x254   : > { %v2499_v19 = vrot.slane %v2498_v6, 4  ;;  %3129 = vperm.xlu0 %5236, %v8603_v9  }
 0x256   : > { %v2500_v18 = vmax.f32 %v2498_v6, %v2499_v19  ;;  %2917 = vperm.xlu1 %5233, %v6632_v3   ;;  %v2522_v58 = vpop.permute.xlu1 %2521  ;;  %v8606_v3 = vmov 12  }
 0x257   : > { %v7088_v47 = vpop.permute.xlu0 %2657 }
 0x258   : > { %v2501_v7 = vrot.slane %v2500_v18, 2  ;;  %3137 = vperm.xlu0 %5236, %v6878_v13  }
 0x25a   : > { %v2502_v2 = vmax.f32 %v2500_v18, %v2501_v7  ;;  %2925 = vperm.xlu1 %5233, %v7092_v59   ;;  %v2530_v10 = vpop.permute.xlu1 %2529  ;;  %v2576_v18 = vmul.f32 %v6992_v34, %v8565_v30  ;;  %v2578_v7 = vmul.f32 %v7002_v28, %v8566_v29 }
 0x25b   : > { %v7095_v56 = vpop.permute.xlu0 %2665 }
 0x25c   : > { %8605 = vst [vmem:[#allocation57_spill] sm:$0xff] %v7095_v56  ;;  %v2503_v61 = vrot.slane %v2502_v2, 1  ;;  %3145 = vperm.xlu0 %5236, %v6892_v42   ;;  %v2592_v48 = vadd.f32 %v2576_v18, %v8594_v8  ;;  %v2594_v23 = vadd.f32 %v2578_v7, %v6265_v40  ;;  %v8614_v56 = vld [vmem:[#allocation26_spill] sm:$0xff]  ;;  %v2596_v7 = vadd.f32 %v2580_v0, %v6288_v49 }
 0x25e   : > { %v2504_v62 = vmax.f32 %v2502_v2, %v2503_v61  ;;  %5234 = vset.pattern.permute.xlu1 %v8606_v3  ;;  %v2538_v38 = vpop.permute.xlu1 %2537  ;;  %v1130_v2 = vld [vmem:[#allocation2 + $0x10] sm:$0xff]  ;;  %v2577_v61 = vmul.f32 %v2530_v10, %v8512_v46 }
 0x25f   : > { %2989 = vperm.xlu1 %5234, %v7076_v1   ;;  %v7100_v53 = vpop.permute.xlu0 %2673  ;;  %v2579_v28 = vmul.f32 %v2538_v38, %v8609_v55  ;;  %v1131_v38 = vld [vmem:[#allocation2 + $0x18] sm:$0xff] }
 0x260   : > { %8607 = vst [vmem:[#allocation51_spill] sm:$0xff] %v7100_v53  ;;  %v2506_v25 = vmax.f32 %v2505_v54, %v2504_v62  ;;  %3153 = vperm.xlu0 %5236, %v6989_v11   ;;  %v2588_v54 = vadd.f32 %v2572_v60, %v8596_v33  ;;  %v2590_v62 = vadd.f32 %v2574_v51, %v8599_v43  ;;  %v8612_v60 = vld [vmem:[#allocation28_spill] sm:$0xff] }
 0x261   : > { %v2582_v53 = vmul.f32 %v8612_v60, %v8595_v4  ;;  %v8613_v51 = vld [vmem:[#allocation60_spill] sm:$0xff]  ;;  %v2595_v8 = vadd.f32 %v2579_v28, %v6278_v52  ;;  %v8296_v28 = vmov 14  }
 0x262   : > { %2507 = vst [vmem:[#allocation4 + $0x7] sm:$0x1] %v2506_v25  ;;  %v2546_v6 = vpop.permute.xlu1 %2545  ;;  %v5051_v34 = vpop.f32.mrf.mxu1  ;;  %v1128_v25 = vld [vmem:[#allocation2] sm:$0xff]  ;;  %v2575_v43 = vmul.f32 %v2522_v58, %v8613_v51  ;;  %v2604_v40 = vmax.f32 %v2588_v54, %v2592_v48  ;;  %v1129_v58 = vld [vmem:[#allocation2 + $0x8] sm:$0xff]  ;;  %v8618_v54 = vld [vmem:[#allocation32_spill] sm:$0xff] }
 0x263   : > { %2997 = vperm.xlu1 %5234, %v6884_v35   ;;  %v7106_v19 = vpop.permute.xlu0 %2681  ;;  %v1275_v24 = vadd.f32 %v5051_v34, %v1130_v2  ;;  %v8616_v34 = vld [vmem:[#allocation53_spill] sm:$0xff] }
 0x264   : > { %8608 = vst [vmem:[#allocation65_spill] sm:$0xff] %v7106_v19  ;;  %3161 = vperm.xlu0 %5236, %v6999_v16   ;;  %v8610_v19 = vld [vmem:[#allocation74_spill] sm:$0xff]  ;;  %v1210_v33 = vpop.f32.mrf.mxu1  ;;  %v2589_v18 = vadd.f32 %v2573_v14, %v8616_v34 }
 0x265   : > { %v2581_v1 = vmul.f32 %v2546_v6, %v8610_v19  ;;  %v2593_v6 = vadd.f32 %v2577_v61, %v6243_v41  ;;  %v8615_v19 = vld [vmem:[#allocation73_spill] sm:$0xff]  ;;  %1292 = vst.msk [vmem:[#allocation2 + $0x10] sm:$0xff] %vm515_vm1, %v1275_v24  ;;  %v1273_v2 = vadd.f32 %v1210_v33, %v1128_v25  ;;  %v2598_v24 = vadd.f32 %v2582_v53, %v8600_v57  ;;  %v8617_v14 = vld [vmem:[#allocation30_spill] sm:$0xff] }
 0x266   : > { %v2554_v3 = vpop.permute.xlu1 %2553  ;;  %v5052_v4 = vpop.f32.mrf.mxu1  ;;  %v2584_v0 = vmul.f32 %v8617_v14, %v8571_v15  ;;  %v1132_v57 = vld [vmem:[#allocation2 + $0x20] sm:$0xff] }
 0x267   : > { %3001 = vperm.xlu1 %5234, %v8602_v22   ;;  %v7123_v10 = vpop.permute.xlu0 %2689  ;;  %v2583_v22 = vmul.f32 %v2554_v3, %v8615_v19  ;;  %v2597_v35 = vadd.f32 %v2581_v1, %v6292_v27  ;;  %1290 = vst.msk [vmem:[#allocation2] sm:$0xff] %vm515_vm1, %v1273_v2  ;;  %v1276_v33 = vadd.f32 %v5052_v4, %v1131_v38  ;;  %v8619_v3 = vld [vmem:[#allocation61_spill] sm:$0xff]  ;;  %v8621_v2 = vld [vmem:[#allocation62_spill] sm:$0xff] }
 0x268   : > { %8611 = vst [vmem:[#allocation37_spill] sm:$0xff] %v7123_v10  ;;  %3169 = vperm.xlu0 %5236, %v8614_v56   ;;  %v2606_v10 = vmax.f32 %v2590_v62, %v2594_v23  ;;  %v2586_v62 = vmul.f32 %v8618_v54, %v8523_v39  ;;  %v2591_v25 = vadd.f32 %v2575_v43, %v8619_v3  ;;  %v1213_v48 = vpop.f32.mrf.mxu1  ;;  %v1134_v23 = vld [vmem:[#allocation2 + $0x30] sm:$0xff]  ;;  %v8622_v38 = vld [vmem:[#allocation5_spill] sm:$0xff] }
 0x269   : > { %v2599_v4 = vadd.f32 %v2583_v22, %v8621_v2  ;;  %1293 = vst.msk [vmem:[#allocation2 + $0x18] sm:$0xff] %vm515_vm1, %v1276_v33  ;;  %v1274_v14 = vadd.f32 %v1213_v48, %v1129_v58  ;;  %v2608_v54 = vmax.f32 %v2604_v40, %v2596_v7 }
 0x26a   : > { %v2562_v60 = vpop.permute.xlu1 %2561  ;;  %v5055_v39 = vpop.f32.mrf.mxu1 }
 0x26b   : > { %v2585_v61 = vmul.f32 %v2562_v60, %v8582_v17  ;;  %3009 = vperm.xlu1 %5234, %v8603_v9   ;;  %v2605_v60 = vmax.f32 %v2589_v18, %v2593_v6  ;;  %v2610_v9 = vmax.f32 %v2606_v10, %v2598_v24  ;;  %1291 = vst.msk [vmem:[#allocation2 + $0x8] sm:$0xff] %vm515_vm1, %v1274_v14  ;;  %v1135_v10 = vld [vmem:[#allocation2 + $0x38] sm:$0xff] }
 0x26c   : > { %5239 = vset.pattern.permute.xlu0 %v8296_v28  ;;  %v7148_v1 = vpop.permute.xlu0 %2753  ;;  %v2607_v28 = vmax.f32 %v2591_v25, %v2595_v8  ;;  %v1279_v22 = vadd.f32 %v5055_v39, %v1134_v23  ;;  %v2600_v6 = vadd.f32 %v2584_v0, %v8529_v36  ;;  %v2602_v18 = vadd.f32 %v2586_v62, %v8572_v20  ;;  %v1226_v40 = vpop.f32.mrf.mxu1  ;;  %v1133_v25 = vld [vmem:[#allocation2 + $0x28] sm:$0xff] }
 0x26d   : > { %8620 = vst [vmem:[#allocation6_spill] sm:$0xff] %v7148_v1  ;;  %v2601_v53 = vadd.f32 %v2585_v61, %v8530_v32  ;;  %3233 = vperm.xlu0 %5239, %v8622_v38   ;;  %v2609_v17 = vmax.f32 %v2605_v60, %v2597_v35  ;;  %v8623_v1 = vld [vmem:[#allocation85_spill] sm:$0xff]  ;;  %v8624_v35 = vld [vmem:[#allocation24_spill] sm:$0xff]  ;;  %v1277_v33 = vadd.f32 %v1226_v40, %v1132_v57 }
 0x26e   : > { %v2570_v43 = vpop.permute.xlu1 %2569  ;;  %v2611_v7 = vmax.f32 %v2607_v28, %v2599_v4  ;;  %1296 = vst.msk [vmem:[#allocation2 + $0x30] sm:$0xff] %vm515_vm1, %v1279_v22  ;;  %v5056_v24 = vpop.f32.mrf.mxu1  ;;  %v2612_v39 = vmax.f32 %v2608_v54, %v2600_v6  ;;  %v2614_v48 = vmax.f32 %v2610_v9, %v2602_v18  ;;  %v1138_v4 = vld [vmem:[#allocation2 + $0x50] sm:$0xff]  ;;  %v1139_v40 = vld [vmem:[#allocation2 + $0x58] sm:$0xff] }
 0x26f   : > { %v2587_v27 = vmul.f32 %v2570_v43, %v8623_v1  ;;  %3017 = vperm.xlu1 %5234, %v6878_v13   ;;  %v2613_v58 = vmax.f32 %v2609_v17, %v2601_v53  ;;  %1294 = vst.msk [vmem:[#allocation2 + $0x20] sm:$0xff] %vm515_vm1, %v1277_v33  ;;  %v1280_v23 = vadd.f32 %v5056_v24, %v1135_v10  ;;  %v1136_v43 = vld [vmem:[#allocation2 + $0x40] sm:$0xff]  ;;  %v1137_v24 = vld [vmem:[#allocation2 + $0x48] sm:$0xff] }
 0x270   : > { %v7159_v61 = vpop.permute.xlu0 %2765  ;;  %v1229_v17 = vpop.f32.mrf.mxu1 }
 0x271   : > { %v2603_v8 = vadd.f32 %v2587_v27, %v6342_v44  ;;  %3245 = vperm.xlu0 %5239, %v8624_v35   ;;  %v2616_v27 = vmax.f32 %v2612_v39, %v2613_v58  ;;  %1297 = vst.msk [vmem:[#allocation2 + $0x38] sm:$0xff] %vm515_vm1, %v1280_v23  ;;  %v1278_v57 = vadd.f32 %v1229_v17, %v1133_v25 }
 0x273   : > { %v2615_v0 = vmax.f32 %v2611_v7, %v2603_v8  ;;  %3025 = vperm.xlu1 %5234, %v6892_v42   ;;  %v2634_v62 = vpop.permute.xlu1 %2633  ;;  %1295 = vst.msk [vmem:[#allocation2 + $0x28] sm:$0xff] %vm515_vm1, %v1278_v57  ;;  %v5059_v54 = vpop.f32.mrf.mxu1 }
 0x274   : > { %v7166_v28 = vpop.permute.xlu0 %2773  ;;  %v1283_v6 = vadd.f32 %v5059_v54, %v1138_v4  ;;  %v1140_v4 = vld [vmem:[#allocation2 + $0x60] sm:$0xff] }
 0x275   : > { %v2617_v60 = vmax.f32 %v2614_v48, %v2615_v0  ;;  %3253 = vperm.xlu0 %5239, %v7005_v45   ;;  %v1242_v18 = vpop.f32.mrf.mxu1  ;;  %v1142_v0 = vld [vmem:[#allocation2 + $0x70] sm:$0xff]  ;;  %v7188_v54 = vld [vmem:[%s5646_s18 + $0x60] sm:$0xff] }
 0x276   : > { %1300 = vst.msk [vmem:[#allocation2 + $0x50] sm:$0xff] %vm515_vm1, %v1283_v6  ;;  %v1281_v58 = vadd.f32 %v1242_v18, %v1136_v43  ;;  %8628 = vst [vmem:[#allocation12_spill] sm:$0xff] %v7188_v54  ;;  %v1143_v18 = vld [vmem:[#allocation2 + $0x78] sm:$0xff] }
 0x277   : > { %v2618_v53 = vmax.f32 %v2616_v27, %v2617_v60  ;;  %3033 = vperm.xlu1 %5234, %v6989_v11   ;;  %v7171_v9 = vpop.permute.xlu1 %2637  ;;  %v5060_v33 = vpop.f32.mrf.mxu1 }
 0x278   : > { %v7174_v14 = vpop.permute.xlu0 %2781  ;;  %1298 = vst.msk [vmem:[#allocation2 + $0x40] sm:$0xff] %vm515_vm1, %v1281_v58  ;;  %v1284_v39 = vadd.f32 %v5060_v33, %v1139_v40 }
 0x279   : > { %8625 = vst [vmem:[#allocation8_spill] sm:$0xff] %v7174_v14  ;;  %v2619_v22 = vrot.slane %v2618_v53, 4  ;;  %3261 = vperm.xlu0 %5239, %v7015_v26   ;;  %v1245_v48 = vpop.f32.mrf.mxu1 }
 0x27a   : > { %1301 = vst.msk [vmem:[#allocation2 + $0x58] sm:$0xff] %vm515_vm1, %v1284_v39  ;;  %v1282_v27 = vadd.f32 %v1245_v48, %v1137_v24  ;;  %v2693_v24 = vmul.f32 %v2634_v62, %v8567_v31  ;;  %v1141_v48 = vld [vmem:[#allocation2 + $0x68] sm:$0xff] }
 0x27b   : > { %v2620_v10 = vmax.f32 %v2618_v53, %v2619_v22  ;;  %3041 = vperm.xlu1 %5234, %v6999_v16   ;;  %v2646_v7 = vpop.permute.xlu1 %2645  ;;  %v2625_v22 = vld [vmem:[#allocation4 + $0x8] sm:$0x1] }
 0x27c   : > { %v7179_v8 = vpop.permute.xlu0 %2789  ;;  %v5063_v57 = vpop.f32.mrf.mxu1  ;;  %1299 = vst.msk [vmem:[#allocation2 + $0x48] sm:$0xff] %vm515_vm1, %v1282_v27  ;;  %v2696_v62 = vmul.f32 %v2646_v7, %v8565_v30  ;;  %v8631_v7 = vld [vmem:[#allocation19_spill] sm:$0xff] }
 0x27d   : > { %8626 = vst [vmem:[#allocation39_spill] sm:$0xff] %v7179_v8  ;;  %v2621_v25 = vrot.slane %v2620_v10, 2  ;;  %3269 = vperm.xlu0 %5239, %v6858_v5   ;;  %v1287_v43 = vadd.f32 %v5063_v57, %v1142_v0  ;;  %v2692_v0 = vmul.f32 %v7071_v12, %v8476_v63  ;;  %v2697_v57 = vmul.f32 %v7084_v50, %v8512_v46  ;;  %v8640_v8 = vld [vmem:[#allocation34_spill] sm:$0xff] }
 0x27e   : > { %v1258_v6 = vpop.f32.mrf.mxu1 }
 0x27f   : > { %v2622_v23 = vmax.f32 %v2620_v10, %v2621_v25  ;;  %3049 = vperm.xlu1 %5234, %v8614_v56   ;;  %v2654_v17 = vpop.permute.xlu1 %2653  ;;  %v8629_v10 = vmov 13   ;;  %1304 = vst.msk [vmem:[#allocation2 + $0x70] sm:$0xff] %vm515_vm1, %v1287_v43  ;;  %v1285_v33 = vadd.f32 %v1258_v6, %v1140_v4  ;;  %v2695_v43 = vmul.f32 %v7080_v21, %v8613_v51 }
 0x280   : > { %v7185_v60 = vpop.permute.xlu0 %2797  ;;  %v5064_v39 = vpop.f32.mrf.mxu1  ;;  %v2699_v6 = vmul.f32 %v7088_v47, %v8609_v55 }
 0x281   : > { %8627 = vst [vmem:[#allocation10_spill] sm:$0xff] %v7185_v60  ;;  %v2623_v53 = vrot.slane %v2622_v23, 1  ;;  %3277 = vperm.xlu0 %5239, %v7188_v54   ;;  %1302 = vst.msk [vmem:[#allocation2 + $0x60] sm:$0xff] %vm515_vm1, %v1285_v33  ;;  %v1306_v33 = vld [vmem:[#allocation3] sm:$0xff]  ;;  %v8634_v60 = vld [vmem:[#allocation57_spill] sm:$0xff] }
 0x282   : > { %v1261_v4 = vpop.f32.mrf.mxu1 }
 0x283   : > { %v2624_v40 = vmax.f32 %v2622_v23, %v2623_v53  ;;  %5237 = vset.pattern.permute.xlu1 %v8629_v10  ;;  %v2662_v58 = vpop.permute.xlu1 %2661  ;;  %v1288_v23 = vadd.f32 %v5064_v39, %v1143_v18  ;;  %v1307_v53 = vld [vmem:[#allocation3 + $0x8] sm:$0xff]  ;;  %v2709_v18 = vadd.f32 %v2693_v24, %v8616_v34  ;;  %v8632_v39 = vld [vmem:[#allocation58_spill] sm:$0xff] }
 0x284   : > { %3113 = vperm.xlu1 %5237, %v8622_v38   ;;  %v7196_v25 = vpop.permute.xlu0 %2805  ;;  %v2700_v50 = vmul.f32 %v2662_v58, %v8569_v37  ;;  %v2708_v21 = vadd.f32 %v2692_v0, %v8632_v39  ;;  %v2713_v58 = vadd.f32 %v2697_v57, %v6243_v41  ;;  %v8638_v0 = vld [vmem:[#allocation71_spill] sm:$0xff]  ;;  %v8642_v41 = vld [vmem:[#allocation80_spill] sm:$0xff] }
 0x285   : > { %8630 = vst [vmem:[#allocation66_spill] sm:$0xff] %v7196_v25  ;;  %v2626_v27 = vmax.f32 %v2625_v22, %v2624_v40  ;;  %3285 = vperm.xlu0 %5239, %v7092_v59   ;;  %1305 = vst.msk [vmem:[#allocation2 + $0x78] sm:$0xff] %vm515_vm1, %v1288_v23  ;;  %v1286_v22 = vadd.f32 %v1261_v4, %v1141_v48  ;;  %v2698_v40 = vmul.f32 %v2654_v17, %v8566_v29  ;;  %v8633_v25 = vld [vmem:[#allocation74_spill] sm:$0xff]  ;;  %v8303_v23 = vmov 15   ;;  %v8637_v48 = vld [vmem:[#allocation56_spill] sm:$0xff] }
 0x286   : > { %v2701_v47 = vmul.f32 %v8634_v60, %v8633_v25  ;;  %v2694_v4 = vmul.f32 %v7171_v9, %v8637_v48  ;;  %v8639_v34 = vld [vmem:[#allocation75_spill] sm:$0xff]  ;;  %v2725_v9 = vmax.f32 %v2709_v18, %v2713_v58 }
 0x287   : > { %2627 = vst [vmem:[#allocation4 + $0x8] sm:$0x1] %v2626_v27  ;;  %v2670_v12 = vpop.permute.xlu1 %2669  ;;  %v8635_v27 = vld [vmem:[#allocation51_spill] sm:$0xff]  ;;  %1303 = vst.msk [vmem:[#allocation2 + $0x68] sm:$0xff] %vm515_vm1, %v1286_v22  ;;  %v8641_v22 = vld [vmem:[#allocation37_spill] sm:$0xff] }
 0x288   : > { %3117 = vperm.xlu1 %5237, %v8631_v7   ;;  %v5099_v10 = vpop.f32.mrf.mxu1  ;;  %v2703_v51 = vmul.f32 %v8635_v27, %v8615_v19  ;;  %v2712_v7 = vadd.f32 %v2696_v62, %v8638_v0  ;;  %v2702_v60 = vmul.f32 %v2670_v12, %v8639_v34  ;;  %v1309_v19 = vld [vmem:[#allocation3 + $0x18] sm:$0xff]  ;;  %v2714_v62 = vadd.f32 %v2698_v40, %v8642_v41  ;;  %v8647_v40 = vld [vmem:[#allocation59_spill] sm:$0xff] }
 0x289   : > { %5240 = vset.pattern.permute.xlu0 %v8303_v23  ;;  %v7220_v24 = vpop.permute.xlu0 %2869  ;;  %v1500_v17 = vadd.f32 %v5099_v10, %v1307_v53  ;;  %v2711_v23 = vadd.f32 %v2695_v43, %v8619_v3  ;;  %v2707_v53 = vmul.f32 %v8641_v22, %v8623_v1  ;;  %v2716_v12 = vadd.f32 %v2700_v50, %v6288_v49  ;;  %v1308_v43 = vld [vmem:[#allocation3 + $0x10] sm:$0xff]  ;;  %v8645_v1 = vld [vmem:[#allocation65_spill] sm:$0xff]  ;;  %v8648_v58 = vld [vmem:[#allocation87_spill] sm:$0xff] }
 0x28a   : > { %8636 = vst [vmem:[#allocation40_spill] sm:$0xff] %v7220_v24  ;;  %3349 = vperm.xlu0 %5240, %v8640_v8   ;;  %v1420_v27 = vpop.f32.mrf.mxu1  ;;  %v2715_v24 = vadd.f32 %v2699_v6, %v6278_v52  ;;  %v8643_v3 = vld [vmem:[#allocation84_spill] sm:$0xff]  ;;  %v2719_v52 = vadd.f32 %v2703_v51, %v8621_v2  ;;  %v2710_v50 = vadd.f32 %v2694_v4, %v8647_v40  ;;  %v1311_v49 = vld [vmem:[#allocation3 + $0x28] sm:$0xff]  ;;  %v8650_v4 = vld [vmem:[#allocation86_spill] sm:$0xff] }
 0x28b   : > { %v2678_v10 = vpop.permute.xlu1 %2677  ;;  %1517 = vst.msk [vmem:[#allocation3 + $0x8] sm:$0xff] %vm532_vm2, %v1500_v17  ;;  %v1499_v57 = vadd.f32 %v1420_v27, %v1306_v33  ;;  %v2717_v6 = vadd.f32 %v2701_v47, %v8643_v3  ;;  %v8644_v22 = vld [vmem:[#allocation76_spill] sm:$0xff]  ;;  %v2724_v33 = vmax.f32 %v2708_v21, %v2712_v7  ;;  %v2718_v27 = vadd.f32 %v2702_v60, %v8648_v58 }
 0x28c   : > { %v2704_v34 = vmul.f32 %v2678_v10, %v8571_v15  ;;  %3125 = vperm.xlu1 %5237, %v8624_v35   ;;  %v5102_v14 = vpop.f32.mrf.mxu1  ;;  %v2705_v37 = vmul.f32 %v8645_v1, %v8644_v22  ;;  %v8649_v15 = vld [vmem:[#allocation21_spill] sm:$0xff]  ;;  %v2727_v51 = vmax.f32 %v2711_v23, %v2715_v24  ;;  %v2723_v2 = vadd.f32 %v2707_v53, %v6342_v44 }
 0x28d   : > { %v7242_v17 = vpop.permute.xlu0 %2881  ;;  %1516 = vst.msk [vmem:[#allocation3] sm:$0xff] %vm532_vm2, %v1499_v57  ;;  %v1502_v18 = vadd.f32 %v5102_v14, %v1309_v19  ;;  %v2729_v57 = vmax.f32 %v2725_v9, %v2717_v6  ;;  %v2726_v19 = vmax.f32 %v2710_v50, %v2714_v62  ;;  %v2728_v14 = vmax.f32 %v2724_v33, %v2716_v12  ;;  %v8651_v62 = vld [vmem:[#allocation22_spill] sm:$0xff] }
 0x28e   : > { %8646 = vst [vmem:[#allocation41_spill] sm:$0xff] %v7242_v17  ;;  %v2720_v10 = vadd.f32 %v2704_v34, %v8529_v36  ;;  %3361 = vperm.xlu0 %5240, %v8649_v15   ;;  %v1430_v47 = vpop.f32.mrf.mxu1  ;;  %v1310_v34 = vld [vmem:[#allocation3 + $0x20] sm:$0xff]  ;;  %v2731_v60 = vmax.f32 %v2727_v51, %v2719_v52  ;;  %v2721_v24 = vadd.f32 %v2705_v37, %v8530_v32  ;;  %v1312_v37 = vld [vmem:[#allocation3 + $0x30] sm:$0xff] }
 0x28f   : > { %v2686_v1 = vpop.permute.xlu1 %2685  ;;  %1519 = vst.msk [vmem:[#allocation3 + $0x18] sm:$0xff] %vm532_vm2, %v1502_v18  ;;  %v1501_v17 = vadd.f32 %v1430_v47, %v1308_v43  ;;  %v2730_v53 = vmax.f32 %v2726_v19, %v2718_v27  ;;  %v1313_v43 = vld [vmem:[#allocation3 + $0x38] sm:$0xff] }
 0x290   : > { %v2706_v21 = vmul.f32 %v2686_v1, %v8650_v4  ;;  %3133 = vperm.xlu1 %5237, %v7005_v45   ;;  %v5105_v7 = vpop.f32.mrf.mxu1  ;;  %v2732_v18 = vmax.f32 %v2728_v14, %v2720_v10  ;;  %v2735_v50 = vmax.f32 %v2731_v60, %v2723_v2  ;;  %v2733_v52 = vmax.f32 %v2729_v57, %v2721_v24  ;;  %v1315_v57 = vld [vmem:[#allocation3 + $0x48] sm:$0xff]  ;;  %v1317_v24 = vld [vmem:[#allocation3 + $0x58] sm:$0xff] }
 0x291   : > { %v7253_v15 = vpop.permute.xlu0 %2889  ;;  %1518 = vst.msk [vmem:[#allocation3 + $0x10] sm:$0xff] %vm532_vm2, %v1501_v17  ;;  %v1504_v23 = vadd.f32 %v5105_v7, %v1311_v49 }
 0x292   : > { %v2722_v9 = vadd.f32 %v2706_v21, %v8572_v20  ;;  %3369 = vperm.xlu0 %5240, %v8651_v62   ;;  %v1440_v12 = vpop.f32.mrf.mxu1  ;;  %v2736_v47 = vmax.f32 %v2732_v18, %v2733_v52  ;;  %v1316_v62 = vld [vmem:[#allocation3 + $0x50] sm:$0xff]  ;;  %v1319_v52 = vld [vmem:[#allocation3 + $0x68] sm:$0xff] }
 0x293   : > { %1521 = vst.msk [vmem:[#allocation3 + $0x28] sm:$0xff] %vm532_vm2, %v1504_v23  ;;  %v1503_v6 = vadd.f32 %v1440_v12, %v1310_v34  ;;  %v1314_v34 = vld [vmem:[#allocation3 + $0x40] sm:$0xff] }
 0x294   : > { %v2734_v33 = vmax.f32 %v2730_v53, %v2722_v9  ;;  %3141 = vperm.xlu1 %5237, %v7015_v26   ;;  %v7261_v17 = vpop.permute.xlu1 %2749  ;;  %v5108_v49 = vpop.f32.mrf.mxu1 }
 0x295   : > { %v7263_v27 = vpop.permute.xlu0 %2897  ;;  %1520 = vst.msk [vmem:[#allocation3 + $0x20] sm:$0xff] %vm532_vm2, %v1503_v6  ;;  %v1506_v10 = vadd.f32 %v5108_v49, %v1313_v43 }
 0x296   : > { %v2737_v51 = vmax.f32 %v2734_v33, %v2735_v50  ;;  %3377 = vperm.xlu0 %5240, %v6878_v13   ;;  %v1450_v1 = vpop.f32.mrf.mxu1 }
 0x297   : > { %1523 = vst.msk [vmem:[#allocation3 + $0x38] sm:$0xff] %vm532_vm2, %v1506_v10  ;;  %v1505_v2 = vadd.f32 %v1450_v1, %v1312_v37  ;;  %v1318_v10 = vld [vmem:[#allocation3 + $0x60] sm:$0xff] }
 0x298   : > { %v2738_v19 = vmax.f32 %v2736_v47, %v2737_v51  ;;  %3149 = vperm.xlu1 %5237, %v6858_v5   ;;  %v2758_v14 = vpop.permute.xlu1 %2757  ;;  %v5111_v21 = vpop.f32.mrf.mxu1 }
 0x299   : > { %v7269_v7 = vpop.permute.xlu0 %2905  ;;  %1522 = vst.msk [vmem:[#allocation3 + $0x30] sm:$0xff] %vm532_vm2, %v1505_v2  ;;  %v1508_v23 = vadd.f32 %v5111_v21, %v1315_v57  ;;  %v2745_v57 = vld [vmem:[#allocation4 + $0x9] sm:$0x1] }
 0x29a   : > { %v2739_v60 = vrot.slane %v2738_v19, 4  ;;  %3385 = vperm.xlu0 %5240, %v6892_v42   ;;  %v1460_v13 = vpop.f32.mrf.mxu1 }
 0x29b   : > { %1525 = vst.msk [vmem:[#allocation3 + $0x48] sm:$0xff] %vm532_vm2, %v1508_v23  ;;  %v1507_v5 = vadd.f32 %v1460_v13, %v1314_v34  ;;  %v8653_v34 = vmov 14   ;;  %v1321_v13 = vld [vmem:[#allocation3 + $0x78] sm:$0xff] }
 0x29c   : > { %v2740_v53 = vmax.f32 %v2738_v19, %v2739_v60  ;;  %3157 = vperm.xlu1 %5237, %v7188_v54   ;;  %v7274_v18 = vpop.permute.xlu1 %2761  ;;  %v5114_v9 = vpop.f32.mrf.mxu1  ;;  %v8665_v54 = vld [vmem:[#allocation82_spill] sm:$0xff] }
 0x29d   : > { %v7277_v12 = vpop.permute.xlu0 %2913  ;;  %1524 = vst.msk [vmem:[#allocation3 + $0x40] sm:$0xff] %vm532_vm2, %v1507_v5  ;;  %v1510_v42 = vadd.f32 %v5114_v9, %v1317_v24  ;;  %v1320_v5 = vld [vmem:[#allocation3 + $0x70] sm:$0xff]  ;;  %v2812_v9 = vmul.f32 %v7261_v17, %v8476_v63 }
 0x29e   : > { %v2741_v43 = vrot.slane %v2740_v53, 2  ;;  %3393 = vperm.xlu0 %5240, %v6989_v11   ;;  %v1470_v6 = vpop.f32.mrf.mxu1 }
 0x29f   : > { %v1509_v50 = vadd.f32 %v1470_v6, %v1316_v62  ;;  %1527 = vst.msk [vmem:[#allocation3 + $0x58] sm:$0xff] %vm532_vm2, %v1510_v42  ;;  %v2814_v42 = vmul.f32 %v2758_v14, %v8637_v48  ;;  %v7298_v6 = vld [vmem:[%s5646_s18 + $0x10] sm:$0xff]  ;;  %v2818_v14 = vmul.f32 %v7166_v28, %v8566_v29  ;;  %v8656_v28 = vld [vmem:[#allocation70_spill] sm:$0xff] }
 0x2a0   : > { %v2742_v33 = vmax.f32 %v2740_v53, %v2741_v43  ;;  %3165 = vperm.xlu1 %5237, %v7092_v59   ;;  %v2770_v49 = vpop.permute.xlu1 %2769  ;;  %v5117_v37 = vpop.f32.mrf.mxu1 }
 0x2a1   : > { %v7283_v47 = vpop.permute.xlu0 %2921  ;;  %1526 = vst.msk [vmem:[#allocation3 + $0x50] sm:$0xff] %vm532_vm2, %v1509_v50  ;;  %v1512_v1 = vadd.f32 %v5117_v37, %v1319_v52  ;;  %v2816_v52 = vmul.f32 %v7159_v61, %v8565_v30  ;;  %v2828_v61 = vadd.f32 %v2812_v9, %v8632_v39 }
 0x2a2   : > { %8652 = vst [vmem:[#allocation14_spill] sm:$0xff] %v7283_v47  ;;  %v2743_v51 = vrot.slane %v2742_v33, 1  ;;  %3401 = vperm.xlu0 %5240, %v6999_v16   ;;  %v1480_v2 = vpop.f32.mrf.mxu1  ;;  %v8671_v47 = vld [vmem:[#allocation62_spill] sm:$0xff] }
 0x2a3   : > { %v1511_v19 = vadd.f32 %v1480_v2, %v1318_v10  ;;  %1529 = vst.msk [vmem:[#allocation3 + $0x68] sm:$0xff] %vm532_vm2, %v1512_v1  ;;  %v2817_v10 = vmul.f32 %v2770_v49, %v8512_v46  ;;  %v8657_v49 = vld [vmem:[#allocation8_spill] sm:$0xff] }
 0x2a4   : > { %v2744_v21 = vmax.f32 %v2742_v33, %v2743_v51  ;;  %5238 = vset.pattern.permute.xlu1 %v8653_v34  ;;  %v2778_v60 = vpop.permute.xlu1 %2777  ;;  %v8315_v33 = vmov 16   ;;  %v8655_v51 = vld [vmem:[#allocation6_spill] sm:$0xff]  ;;  %v7319_v34 = vld [vmem:[%s5646_s18 + $0x18] sm:$0xff] }
 0x2a5   : > { %3229 = vperm.xlu1 %5238, %v8640_v8   ;;  %v7290_v23 = vpop.permute.xlu0 %2929  ;;  %1528 = vst.msk [vmem:[#allocation3 + $0x60] sm:$0xff] %vm532_vm2, %v1511_v19  ;;  %v5120_v53 = vpop.f32.mrf.mxu1  ;;  %v2813_v1 = vmul.f32 %v8655_v51, %v8567_v31  ;;  %v2819_v19 = vmul.f32 %v2778_v60, %v8609_v55  ;;  %v8661_v60 = vld [vmem:[#allocation60_spill] sm:$0xff] }
 0x2a6   : > { %v2746_v24 = vmax.f32 %v2745_v57, %v2744_v21  ;;  %3409 = vperm.xlu0 %5240, %v8614_v56   ;;  %v1514_v43 = vadd.f32 %v5120_v53, %v1321_v13  ;;  %v2830_v57 = vadd.f32 %v2814_v42, %v8647_v40  ;;  %v2820_v13 = vmul.f32 %v8657_v49, %v8656_v28  ;;  %v8659_v53 = vld [vmem:[#allocation39_spill] sm:$0xff]  ;;  %v8662_v42 = vld [vmem:[#allocation77_spill] sm:$0xff] }
 0x2a7   : > { %v1490_v50 = vpop.f32.mrf.mxu1  ;;  %v7340_v40 = vld [vmem:[%s5646_s18 + $0x28] sm:$0xff] }
 0x2a8   : > { %2747 = vst [vmem:[#allocation4 + $0x9] sm:$0x1] %v2746_v24  ;;  %v2786_v62 = vpop.permute.xlu1 %2785  ;;  %1531 = vst.msk [vmem:[#allocation3 + $0x78] sm:$0xff] %vm532_vm2, %v1514_v43  ;;  %v1513_v17 = vadd.f32 %v1490_v50, %v1320_v5  ;;  %v8658_v24 = vld [vmem:[#allocation75_spill] sm:$0xff]  ;;  %v2834_v43 = vadd.f32 %v2818_v14, %v8642_v41  ;;  %v2833_v50 = vadd.f32 %v2817_v10, %v8662_v42 }
 0x2a9   : > { %3237 = vperm.xlu1 %5238, %v7298_v6   ;;  %v2821_v21 = vmul.f32 %v2786_v62, %v8633_v25  ;;  %v2822_v5 = vmul.f32 %v8659_v53, %v8658_v24  ;;  %v2815_v62 = vmul.f32 %v7274_v18, %v8661_v60  ;;  %v2835_v53 = vadd.f32 %v2819_v19, %v8665_v54  ;;  %v8666_v18 = vld [vmem:[#allocation83_spill] sm:$0xff] }
 0x2aa   : > { %5243 = vset.pattern.permute.xlu0 %v8315_v33  ;;  %v7304_v37 = vpop.permute.xlu0 %2993  ;;  %1530 = vst.msk [vmem:[#allocation3 + $0x70] sm:$0xff] %vm532_vm2, %v1513_v17  ;;  %v8663_v17 = vld [vmem:[#allocation73_spill] sm:$0xff]  ;;  %v2846_v59 = vmax.f32 %v2830_v57, %v2834_v43  ;;  %v2836_v10 = vadd.f32 %v2820_v13, %v8666_v18  ;;  %v8669_v57 = vld [vmem:[#allocation66_spill] sm:$0xff] }
 0x2ab   : > { %8654 = vst [vmem:[#allocation42_spill] sm:$0xff] %v7304_v37  ;;  %3473 = vperm.xlu0 %5243, %v8622_v38   ;;  %v2832_v38 = vadd.f32 %v2816_v52, %v8638_v0  ;;  %v8664_v52 = vld [vmem:[#allocation53_spill] sm:$0xff] }
 0x2ac   : > { %v2794_v2 = vpop.permute.xlu1 %2793  ;;  %v2829_v33 = vadd.f32 %v2813_v1, %v8664_v52  ;;  %v8668_v1 = vld [vmem:[#allocation10_spill] sm:$0xff] }
 0x2ad   : > { %3241 = vperm.xlu1 %5238, %v7319_v34   ;;  %v2823_v51 = vmul.f32 %v2794_v2, %v8663_v17  ;;  %v2844_v37 = vmax.f32 %v2828_v61, %v2832_v38  ;;  %v8667_v2 = vld [vmem:[#allocation81_spill] sm:$0xff]  ;;  %v2826_v38 = vmul.f32 %v8669_v57, %v8650_v4 }
 0x2ae   : > { %v7327_v9 = vpop.permute.xlu0 %3005  ;;  %v2824_v61 = vmul.f32 %v8668_v1, %v8667_v2  ;;  %v8672_v2 = vld [vmem:[#allocation85_spill] sm:$0xff] }
 0x2af   : > { %8660 = vst [vmem:[#allocation16_spill] sm:$0xff] %v7327_v9  ;;  %3485 = vperm.xlu0 %5243, %v8624_v35   ;;  %v2837_v9 = vadd.f32 %v2821_v21, %v8643_v3  ;;  %v2838_v35 = vadd.f32 %v2822_v5, %v8648_v58  ;;  %v8670_v21 = vld [vmem:[#allocation61_spill] sm:$0xff]  ;;  %v2848_v13 = vmax.f32 %v2844_v37, %v2836_v10 }
 0x2b0   : > { %v2802_v49 = vpop.permute.xlu1 %2801  ;;  %v2831_v43 = vadd.f32 %v2815_v62, %v8670_v21  ;;  %v7357_v57 = vld [vmem:[%s5646_s18 + $0x38] sm:$0xff] }
 0x2b1   : > { %v2825_v14 = vmul.f32 %v2802_v49, %v8644_v22  ;;  %3249 = vperm.xlu1 %5238, %v7340_v40   ;;  %v2845_v49 = vmax.f32 %v2829_v33, %v2833_v50  ;;  %v2839_v22 = vadd.f32 %v2823_v51, %v8671_v47  ;;  %v2850_v5 = vmax.f32 %v2846_v59, %v2838_v35 }
 0x2b2   : > { %v7349_v19 = vpop.permute.xlu0 %3013  ;;  %v2847_v58 = vmax.f32 %v2831_v43, %v2835_v53  ;;  %8673 = vst [vmem:[#allocation43_spill] sm:$0xff] %v7357_v57  ;;  %v2840_v33 = vadd.f32 %v2824_v61, %v8529_v36  ;;  %v2842_v50 = vadd.f32 %v2826_v38, %v8572_v20  ;;  %v7373_v43 = vld [vmem:[%s5646_s18 + $0x50] sm:$0xff] }
 0x2b3   : > { %v2841_v3 = vadd.f32 %v2825_v14, %v8530_v32  ;;  %3493 = vperm.xlu0 %5243, %v7005_v45   ;;  %v2849_v1 = vmax.f32 %v2845_v49, %v2837_v9  ;;  %v7367_v14 = vld [vmem:[%s5646_s18 + $0x48] sm:$0xff]  ;;  %8675 = vst [vmem:[#allocation44_spill] sm:$0xff] %v7373_v43 }
 0x2b4   : > { %v2810_v18 = vpop.permute.xlu1 %2809  ;;  %v2851_v45 = vmax.f32 %v2847_v58, %v2839_v22  ;;  %v2852_v9 = vmax.f32 %v2848_v13, %v2840_v33  ;;  %v2854_v51 = vmax.f32 %v2850_v5, %v2842_v50  ;;  %8674 = vst [vmem:[#allocation18_spill] sm:$0xff] %v7367_v14  ;;  %v8325_v5 = vmov 17  }
 0x2b5   : > { %v2827_v41 = vmul.f32 %v2810_v18, %v8672_v2  ;;  %3257 = vperm.xlu1 %5238, %v7357_v57   ;;  %v2853_v37 = vmax.f32 %v2849_v1, %v2841_v3 }
 0x2b6   : > { %v7361_v62 = vpop.permute.xlu0 %3021 }
 0x2b7   : > { %v2843_v59 = vadd.f32 %v2827_v41, %v6342_v44  ;;  %3501 = vperm.xlu0 %5243, %v7015_v26   ;;  %v2856_v35 = vmax.f32 %v2852_v9, %v2853_v37  ;;  %v8679_v37 = vmov 15  }
 0x2b9   : > { %v2855_v53 = vmax.f32 %v2851_v45, %v2843_v59  ;;  %3265 = vperm.xlu1 %5238, %v7367_v14   ;;  %v2874_v18 = vpop.permute.xlu1 %2873  ;;  %v2865_v45 = vld [vmem:[#allocation4 + $0xa] sm:$0x1] }
 0x2ba   : > { %v7370_v10 = vpop.permute.xlu0 %3029  ;;  %v2933_v9 = vmul.f32 %v2874_v18, %v8567_v31  ;;  %v2939_v18 = vmul.f32 %v7263_v27, %v8609_v55  ;;  %v2943_v27 = vmul.f32 %v7277_v12, %v8663_v17 }
 0x2bb   : > { %v2857_v61 = vmax.f32 %v2854_v51, %v2855_v53  ;;  %3509 = vperm.xlu0 %5243, %v7373_v43   ;;  %v7392_v51 = vld [vmem:[%s5646_s18 + $0x8] sm:$0xff] }
 0x2bd   : > { %v2858_v3 = vmax.f32 %v2856_v35, %v2857_v61  ;;  %3273 = vperm.xlu1 %5238, %v6989_v11   ;;  %v2878_v41 = vpop.permute.xlu1 %2877  ;;  %v8681_v61 = vld [vmem:[#allocation40_spill] sm:$0xff] }
 0x2be   : > { %v7377_v26 = vpop.permute.xlu0 %3037 }
 0x2bf   : > { %8676 = vst [vmem:[#allocation20_spill] sm:$0xff] %v7377_v26  ;;  %v2859_v22 = vrot.slane %v2858_v3, 4  ;;  %3521 = vperm.xlu0 %5243, %v6999_v16  }
 0x2c1   : > { %v2860_v58 = vmax.f32 %v2858_v3, %v2859_v22  ;;  %3281 = vperm.xlu1 %5238, %v6999_v16   ;;  %v2886_v38 = vpop.permute.xlu1 %2885  ;;  %v2932_v3 = vmul.f32 %v8681_v61, %v8476_v63 }
 0x2c2   : > { %v7381_v49 = vpop.permute.xlu0 %3045  ;;  %v2936_v35 = vmul.f32 %v2886_v38, %v8565_v30 }
 0x2c3   : > { %8677 = vst [vmem:[#allocation45_spill] sm:$0xff] %v7381_v49  ;;  %v2861_v13 = vrot.slane %v2860_v58, 2  ;;  %5254 = vset.pattern.permute.xlu0 %v8325_v5 }
 0x2c4   : > { %3589 = vperm.xlu0 %5254, %v8640_v8  }
 0x2c5   : > { %v2862_v11 = vmax.f32 %v2860_v58, %v2861_v13  ;;  %3289 = vperm.xlu1 %5238, %v8614_v56   ;;  %v2894_v1 = vpop.permute.xlu1 %2893  ;;  %v2937_v56 = vmul.f32 %v7253_v15, %v8512_v46  ;;  %v2949_v58 = vadd.f32 %v2933_v9, %v8664_v52  ;;  %v8682_v15 = vld [vmem:[#allocation41_spill] sm:$0xff]  ;;  %v2948_v9 = vadd.f32 %v2932_v3, %v8632_v39  ;;  %v8687_v3 = vld [vmem:[#allocation84_spill] sm:$0xff] }
 0x2c6   : > { %v2938_v13 = vmul.f32 %v2894_v1, %v8566_v29  ;;  %v2935_v38 = vmul.f32 %v8682_v15, %v8661_v60  ;;  %v2934_v1 = vmul.f32 %v2878_v41, %v8637_v48  ;;  %v8684_v15 = vld [vmem:[#allocation80_spill] sm:$0xff]  ;;  %v8686_v41 = vld [vmem:[#allocation81_spill] sm:$0xff] }
 0x2c7   : > { %v2863_v33 = vrot.slane %v2862_v11, 1  ;;  %v7386_v50 = vpop.permute.xlu0 %3109 }
 0x2c8   : > { %8678 = vst [vmem:[#allocation78_spill] sm:$0xff] %v7386_v50  ;;  %3601 = vperm.xlu0 %5254, %v7319_v34   ;;  %v2954_v5 = vadd.f32 %v2938_v13, %v8684_v15  ;;  %v8691_v13 = vld [vmem:[#allocation59_spill] sm:$0xff] }
 0x2c9   : > { %v2864_v16 = vmax.f32 %v2862_v11, %v2863_v33  ;;  %5241 = vset.pattern.permute.xlu1 %v8679_v37  ;;  %v2902_v59 = vpop.permute.xlu1 %2901  ;;  %v2941_v33 = vmul.f32 %v7269_v7, %v8633_v25  ;;  %v2952_v37 = vadd.f32 %v2936_v35, %v8638_v0  ;;  %v2955_v7 = vadd.f32 %v2939_v18, %v8665_v54  ;;  %v7430_v35 = vld [vmem:[%s5646_s18 + $0x20] sm:$0xff] }
 0x2ca   : > { %3353 = vperm.xlu1 %5241, %v7392_v51   ;;  %v2940_v11 = vmul.f32 %v2902_v59, %v8656_v28  ;;  %v2959_v18 = vadd.f32 %v2943_v27, %v8671_v47 }
 0x2cb   : > { %v2866_v8 = vmax.f32 %v2865_v45, %v2864_v16  ;;  %v7395_v53 = vpop.permute.xlu0 %3121  ;;  %v2953_v16 = vadd.f32 %v2937_v56, %v8662_v42  ;;  %v8685_v56 = vld [vmem:[#allocation83_spill] sm:$0xff] }
 0x2cc   : > { %8680 = vst [vmem:[#allocation72_spill] sm:$0xff] %v7395_v53  ;;  %3609 = vperm.xlu0 %5254, %v7340_v40   ;;  %v2956_v53 = vadd.f32 %v2940_v11, %v8685_v56  ;;  %v2950_v11 = vadd.f32 %v2934_v1, %v8691_v13 }
 0x2cd   : > { %2867 = vst [vmem:[#allocation4 + $0xa] sm:$0x1] %v2866_v8  ;;  %v2910_v22 = vpop.permute.xlu1 %2909  ;;  %v2947_v8 = vmul.f32 %v7290_v23, %v8672_v2  ;;  %v2965_v61 = vmax.f32 %v2949_v58, %v2953_v16  ;;  %v8688_v23 = vld [vmem:[#allocation76_spill] sm:$0xff]  ;;  %v2964_v2 = vmax.f32 %v2948_v9, %v2952_v37 }
 0x2ce   : > { %3357 = vperm.xlu1 %5241, %v7298_v6   ;;  %v2942_v59 = vmul.f32 %v2910_v22, %v8658_v24  ;;  %v2951_v22 = vadd.f32 %v2935_v38, %v8670_v21  ;;  %v2966_v27 = vmax.f32 %v2950_v11, %v2954_v5  ;;  %v7462_v11 = vld [vmem:[%s5646_s18 + $0x78] sm:$0xff] }
 0x2cf   : > { %v7415_v45 = vpop.permute.xlu0 %3129  ;;  %v2968_v47 = vmax.f32 %v2964_v2, %v2956_v53  ;;  %8695 = vst [vmem:[#allocation29_spill] sm:$0xff] %v7462_v11 }
 0x2d0   : > { %8683 = vst [vmem:[#allocation55_spill] sm:$0xff] %v7415_v45  ;;  %3617 = vperm.xlu0 %5254, %v7357_v57   ;;  %v2957_v45 = vadd.f32 %v2941_v33, %v8687_v3  ;;  %v8689_v57 = vld [vmem:[#allocation14_spill] sm:$0xff]  ;;  %v2967_v38 = vmax.f32 %v2951_v22, %v2955_v7  ;;  %v2963_v33 = vadd.f32 %v2947_v8, %v6342_v44 }
 0x2d1   : > { %v2918_v12 = vpop.permute.xlu1 %2917  ;;  %v2945_v58 = vmul.f32 %v8689_v57, %v8688_v23 }
 0x2d2   : > { %v2944_v50 = vmul.f32 %v2918_v12, %v8686_v41  ;;  %3365 = vperm.xlu1 %5241, %v7430_v35   ;;  %v8692_v12 = vld [vmem:[#allocation87_spill] sm:$0xff]  ;;  %v2969_v41 = vmax.f32 %v2965_v61, %v2957_v45  ;;  %v2971_v1 = vmax.f32 %v2967_v38, %v2959_v18  ;;  %v8693_v45 = vld [vmem:[#allocation12_spill] sm:$0xff] }
 0x2d3   : > { %v7438_v16 = vpop.permute.xlu0 %3137  ;;  %v2958_v49 = vadd.f32 %v2942_v59, %v8692_v12 }
 0x2d4   : > { %8690 = vst [vmem:[#allocation89_spill] sm:$0xff] %v7438_v16  ;;  %v2960_v26 = vadd.f32 %v2944_v50, %v8529_v36  ;;  %3625 = vperm.xlu0 %5254, %v7367_v14   ;;  %v7447_v16 = vld [vmem:[%s5646_s18 + $0x30] sm:$0xff]  ;;  %v2961_v50 = vadd.f32 %v2945_v58, %v8530_v32  ;;  %v2975_v5 = vmax.f32 %v2971_v1, %v2963_v33  ;;  %v8332_v58 = vmov 18  }
 0x2d5   : > { %v2926_v21 = vpop.permute.xlu1 %2925  ;;  %v2970_v59 = vmax.f32 %v2966_v27, %v2958_v49 }
 0x2d6   : > { %v2946_v57 = vmul.f32 %v2926_v21, %v8650_v4  ;;  %3373 = vperm.xlu1 %5241, %v7447_v16   ;;  %v2972_v9 = vmax.f32 %v2968_v47, %v2960_v26  ;;  %v2973_v2 = vmax.f32 %v2969_v41, %v2961_v50  ;;  %v7456_v21 = vld [vmem:[%s5646_s18 + $0x40] sm:$0xff] }
 0x2d7   : > { %v7450_v37 = vpop.permute.xlu0 %3145  ;;  %8694 = vst [vmem:[#allocation23_spill] sm:$0xff] %v7456_v21  ;;  %v8697_v50 = vld [vmem:[#allocation50_spill] sm:$0xff] }
 0x2d8   : > { %v2962_v7 = vadd.f32 %v2946_v57, %v8572_v20  ;;  %3637 = vperm.xlu0 %5254, %v8693_v45   ;;  %v2976_v22 = vmax.f32 %v2972_v9, %v2973_v2 }
 0x2da   : > { %v2974_v53 = vmax.f32 %v2970_v59, %v2962_v7  ;;  %3381 = vperm.xlu1 %5241, %v7456_v21   ;;  %v2990_v8 = vpop.permute.xlu1 %2989 }
 0x2db   : > { %v7459_v61 = vpop.permute.xlu0 %3153 }
 0x2dc   : > { %v2977_v18 = vmax.f32 %v2974_v53, %v2975_v5  ;;  %3649 = vperm.xlu0 %5254, %v7462_v11   ;;  %v2985_v5 = vld [vmem:[#allocation4 + $0xb] sm:$0x1]  ;;  %v8699_v53 = vmov 16  }
 0x2de   : > { %v2978_v47 = vmax.f32 %v2976_v22, %v2977_v18  ;;  %3389 = vperm.xlu1 %5241, %v7373_v43   ;;  %v2998_v26 = vpop.permute.xlu1 %2997  ;;  %v7480_v18 = vld [vmem:[%s5646_s18] sm:$0xff]  ;;  %v7497_v43 = vld [vmem:[%s5646_s18 + $0x58] sm:$0xff] }
 0x2df   : > { %v7466_v49 = vpop.permute.xlu0 %3161  ;;  %8703 = vst [vmem:[#allocation33_spill] sm:$0xff] %v7497_v43 }
 0x2e0   : > { %8696 = vst [vmem:[#allocation31_spill] sm:$0xff] %v7466_v49  ;;  %v2979_v41 = vrot.slane %v2978_v47, 4  ;;  %5256 = vset.pattern.permute.xlu0 %v8332_v58  ;;  %v8708_v49 = vld [vmem:[#allocation20_spill] sm:$0xff] }
 0x2e1   : > { %3713 = vperm.xlu0 %5256, %v7392_v51  }
 0x2e2   : > { %v2980_v38 = vmax.f32 %v2978_v47, %v2979_v41  ;;  %3397 = vperm.xlu1 %5241, %v8693_v45   ;;  %v3002_v33 = vpop.permute.xlu1 %3001 }
 0x2e3   : > { %v7471_v27 = vpop.permute.xlu0 %3169 }
 0x2e4   : > { %v2981_v57 = vrot.slane %v2980_v38, 2 }
 0x2e5   : > { %3725 = vperm.xlu0 %5256, %v7430_v35  }
 0x2e6   : > { %v2982_v1 = vmax.f32 %v2980_v38, %v2981_v57  ;;  %3405 = vperm.xlu1 %5241, %v8697_v50   ;;  %v3010_v59 = vpop.permute.xlu1 %3009  ;;  %v3052_v38 = vmul.f32 %v2990_v8, %v8476_v63  ;;  %v3054_v50 = vmul.f32 %v2998_v26, %v8637_v48  ;;  %v8704_v8 = vld [vmem:[#allocation42_spill] sm:$0xff] }
 0x2e7   : > { %v3053_v26 = vmul.f32 %v8704_v8, %v8567_v31 }
 0x2e8   : > { %v2983_v9 = vrot.slane %v2982_v1, 1  ;;  %v7475_v7 = vpop.permute.xlu0 %3233 }
 0x2e9   : > { %8698 = vst [vmem:[#allocation88_spill] sm:$0xff] %v7475_v7  ;;  %3733 = vperm.xlu0 %5256, %v7447_v16  }
 0x2ea   : > { %v2984_v2 = vmax.f32 %v2982_v1, %v2983_v9  ;;  %5242 = vset.pattern.permute.xlu1 %v8699_v53  ;;  %v3018_v22 = vpop.permute.xlu1 %3017  ;;  %v8701_v1 = vld [vmem:[#allocation16_spill] sm:$0xff] }
 0x2eb   : > { %3469 = vperm.xlu1 %5242, %v7480_v18   ;;  %v3056_v9 = vmul.f32 %v8701_v1, %v8565_v30  ;;  %v3070_v1 = vadd.f32 %v3054_v50, %v8691_v13  ;;  %v3059_v7 = vmul.f32 %v3018_v22, %v8609_v55  ;;  %v3055_v50 = vmul.f32 %v3002_v33, %v8661_v60 }
 0x2ec   : > { %v2986_v47 = vmax.f32 %v2985_v5, %v2984_v2  ;;  %v7483_v41 = vpop.permute.xlu0 %3245  ;;  %v3058_v5 = vmul.f32 %v7349_v19, %v8566_v29  ;;  %v3057_v2 = vmul.f32 %v3010_v59, %v8512_v46  ;;  %v3060_v59 = vmul.f32 %v7361_v62, %v8656_v28 }
 0x2ed   : > { %8700 = vst [vmem:[#allocation25_spill] sm:$0xff] %v7483_v41  ;;  %3741 = vperm.xlu0 %5256, %v7456_v21   ;;  %v3072_v19 = vadd.f32 %v3056_v9, %v8638_v0  ;;  %v3062_v41 = vmul.f32 %v7370_v10, %v8658_v24  ;;  %v3069_v9 = vadd.f32 %v3053_v26, %v8664_v52  ;;  %v8709_v26 = vld [vmem:[#allocation45_spill] sm:$0xff] }
 0x2ee   : > { %2987 = vst [vmem:[#allocation4 + $0xb] sm:$0x1] %v2986_v47  ;;  %v3026_v57 = vpop.permute.xlu1 %3025  ;;  %v3068_v47 = vadd.f32 %v3052_v38, %v8632_v39  ;;  %v3074_v38 = vadd.f32 %v3058_v5, %v8684_v15  ;;  %v3073_v22 = vadd.f32 %v3057_v2, %v8662_v42  ;;  %v3075_v10 = vadd.f32 %v3059_v7, %v8665_v54  ;;  %v8707_v2 = vld [vmem:[#allocation81_spill] sm:$0xff] }
 0x2ef   : > { %3477 = vperm.xlu1 %5242, %v7298_v6   ;;  %v3076_v33 = vadd.f32 %v3060_v59, %v8685_v56 }
 0x2f0   : > { %v7491_v58 = vpop.permute.xlu0 %3253  ;;  %v3084_v62 = vmax.f32 %v3068_v47, %v3072_v19  ;;  %v3086_v13 = vmax.f32 %v3070_v1, %v3074_v38  ;;  %v3066_v47 = vmul.f32 %v8709_v26, %v8650_v4  ;;  %v8711_v1 = vld [vmem:[#allocation61_spill] sm:$0xff]  ;;  %v3085_v38 = vmax.f32 %v3069_v9, %v3073_v22 }
 0x2f1   : > { %8702 = vst [vmem:[#allocation27_spill] sm:$0xff] %v7491_v58  ;;  %3753 = vperm.xlu0 %5256, %v7497_v43   ;;  %v3061_v58 = vmul.f32 %v3026_v57, %v8633_v25  ;;  %v7519_v43 = vld [vmem:[%s5646_s18 + $0x68] sm:$0xff]  ;;  %v3071_v7 = vadd.f32 %v3055_v50, %v8711_v1  ;;  %v8713_v26 = vld [vmem:[#allocation85_spill] sm:$0xff] }
 0x2f2   : > { %v3034_v53 = vpop.permute.xlu1 %3033  ;;  %8706 = vst [vmem:[#allocation36_spill] sm:$0xff] %v7519_v43  ;;  %v3088_v59 = vmax.f32 %v3084_v62, %v3076_v33 }
 0x2f3   : > { %3481 = vperm.xlu1 %5242, %v7319_v34   ;;  %v3063_v57 = vmul.f32 %v3034_v53, %v8663_v17  ;;  %v3078_v53 = vadd.f32 %v3062_v41, %v8692_v12  ;;  %v3087_v12 = vmax.f32 %v3071_v7, %v3075_v10 }
 0x2f4   : > { %v7512_v8 = vpop.permute.xlu0 %3261 }
 0x2f5   : > { %8705 = vst [vmem:[#allocation35_spill] sm:$0xff] %v7512_v8  ;;  %3761 = vperm.xlu0 %5256, %v7519_v43   ;;  %v3077_v8 = vadd.f32 %v3061_v58, %v8687_v3  ;;  %v3064_v43 = vmul.f32 %v8708_v49, %v8707_v2  ;;  %v8712_v58 = vld [vmem:[#allocation62_spill] sm:$0xff]  ;;  %v3090_v49 = vmax.f32 %v3086_v13, %v3078_v53 }
 0x2f6   : > { %v3042_v21 = vpop.permute.xlu1 %3041  ;;  %v3079_v3 = vadd.f32 %v3063_v57, %v8712_v58  ;;  %v3082_v57 = vadd.f32 %v3066_v47, %v8572_v20  ;;  %v8717_v47 = vmov 17  }
 0x2f7   : > { %v3065_v5 = vmul.f32 %v3042_v21, %v8688_v23  ;;  %3489 = vperm.xlu1 %5242, %v7340_v40   ;;  %v8347_v23 = vmov 19   ;;  %v3089_v2 = vmax.f32 %v3085_v38, %v3077_v8  ;;  %v3080_v50 = vadd.f32 %v3064_v43, %v8529_v36 }
 0x2f8   : > { %v7533_v19 = vpop.permute.xlu0 %3269  ;;  %v3091_v9 = vmax.f32 %v3087_v12, %v3079_v3  ;;  %v3094_v13 = vmax.f32 %v3090_v49, %v3082_v57 }
 0x2f9   : > { %8710 = vst [vmem:[#allocation38_spill] sm:$0xff] %v7533_v19  ;;  %v3081_v21 = vadd.f32 %v3065_v5, %v8530_v32  ;;  %5258 = vset.pattern.permute.xlu0 %v8347_v23  ;;  %v8714_v19 = vld [vmem:[#allocation43_spill] sm:$0xff]  ;;  %v3092_v33 = vmax.f32 %v3088_v59, %v3080_v50  ;;  %v8725_v23 = vmov 18  }
 0x2fa   : > { %v3050_v41 = vpop.permute.xlu1 %3049  ;;  %3829 = vperm.xlu0 %5258, %v7480_v18  }
 0x2fb   : > { %v3067_v4 = vmul.f32 %v3050_v41, %v8713_v26  ;;  %3497 = vperm.xlu1 %5242, %v8714_v19   ;;  %v3093_v5 = vmax.f32 %v3089_v2, %v3081_v21 }
 0x2fc   : > { %v7543_v22 = vpop.permute.xlu0 %3277 }
 0x2fd   : > { %8715 = vst [vmem:[#allocation47_spill] sm:$0xff] %v7543_v22  ;;  %v3083_v62 = vadd.f32 %v3067_v4, %v6342_v44  ;;  %v3096_v7 = vmax.f32 %v3092_v33, %v3093_v5  ;;  %v3105_v5 = vld [vmem:[#allocation4 + $0xc] sm:$0x1] }
 0x2fe   : > { %3841 = vperm.xlu0 %5258, %v7319_v34  }
 0x2ff   : > { %v3095_v10 = vmax.f32 %v3091_v9, %v3083_v62  ;;  %3505 = vperm.xlu1 %5242, %v7367_v14   ;;  %v3114_v8 = vpop.permute.xlu1 %3113 }
 0x300   : > { %v7549_v53 = vpop.permute.xlu0 %3285 }
 0x301   : > { %8716 = vst [vmem:[#allocation48_spill] sm:$0xff] %v7549_v53  ;;  %v3097_v43 = vmax.f32 %v3094_v13, %v3095_v10  ;;  %v3173_v13 = vmul.f32 %v3114_v8, %v8567_v31  ;;  %v8735_v53 = vld [vmem:[#allocation86_spill] sm:$0xff] }
 0x302   : > { %3849 = vperm.xlu0 %5258, %v7340_v40  }
 0x303   : > { %v3098_v38 = vmax.f32 %v3096_v7, %v3097_v43  ;;  %5244 = vset.pattern.permute.xlu1 %v8717_v47  ;;  %v3118_v3 = vpop.permute.xlu1 %3117  ;;  %v8722_v43 = vld [vmem:[#allocation55_spill] sm:$0xff] }
 0x304   : > { %3593 = vperm.xlu1 %5244, %v7392_v51  }
 0x305   : > { %v3099_v4 = vrot.slane %v3098_v38, 4  ;;  %v7554_v12 = vpop.permute.xlu0 %3349 }
 0x306   : > { %8718 = vst [vmem:[#allocation46_spill] sm:$0xff] %v7554_v12  ;;  %3857 = vperm.xlu0 %5258, %v8714_v19   ;;  %v8731_v12 = vld [vmem:[#allocation31_spill] sm:$0xff] }
 0x307   : > { %v3100_v2 = vmax.f32 %v3098_v38, %v3099_v4  ;;  %v3126_v21 = vpop.permute.xlu1 %3125  ;;  %v3177_v38 = vmul.f32 %v8722_v43, %v8512_v46 }
 0x308   : > { %3597 = vperm.xlu1 %5244, %v7298_v6   ;;  %v3176_v4 = vmul.f32 %v3126_v21, %v8565_v30  ;;  %v8726_v21 = vld [vmem:[#allocation72_spill] sm:$0xff] }
 0x309   : > { %v3101_v59 = vrot.slane %v3100_v2, 2  ;;  %v7558_v41 = vpop.permute.xlu0 %3361  ;;  %v3175_v43 = vmul.f32 %v8726_v21, %v8661_v60 }
 0x30a   : > { %8719 = vst [vmem:[#allocation49_spill] sm:$0xff] %v7558_v41  ;;  %3865 = vperm.xlu0 %5258, %v7367_v14   ;;  %v8352_v14 = vmov 20  }
 0x30b   : > { %v3102_v49 = vmax.f32 %v3100_v2, %v3101_v59  ;;  %v3134_v50 = vpop.permute.xlu1 %3133  ;;  %v8723_v2 = vld [vmem:[#allocation78_spill] sm:$0xff]  ;;  %v3191_v41 = vadd.f32 %v3175_v43, %v8711_v1 }
 0x30c   : > { %3605 = vperm.xlu1 %5244, %v7430_v35   ;;  %v3172_v59 = vmul.f32 %v8723_v2, %v8476_v63  ;;  %v3183_v2 = vmul.f32 %v7459_v61, %v8663_v17  ;;  %v3187_v61 = vmul.f32 %v7471_v27, %v8713_v26 }
 0x30d   : > { %v3103_v57 = vrot.slane %v3102_v49, 1  ;;  %v7562_v9 = vpop.permute.xlu0 %3369 }
 0x30e   : > { %8720 = vst [vmem:[#allocation11_spill] sm:$0xff] %v7562_v9  ;;  %3877 = vperm.xlu0 %5258, %v8693_v45   ;;  %v8724_v45 = vld [vmem:[#allocation89_spill] sm:$0xff] }
 0x30f   : > { %v3104_v62 = vmax.f32 %v3102_v49, %v3103_v57  ;;  %v3142_v33 = vpop.permute.xlu1 %3141  ;;  %v3179_v49 = vmul.f32 %v8724_v45, %v8609_v55  ;;  %v3189_v57 = vadd.f32 %v3173_v13, %v8664_v52  ;;  %v3193_v13 = vadd.f32 %v3177_v38, %v8662_v42 }
 0x310   : > { %3613 = vperm.xlu1 %5244, %v7447_v16  }
 0x311   : > { %v3106_v10 = vmax.f32 %v3105_v5, %v3104_v62  ;;  %v7567_v7 = vpop.permute.xlu0 %3377  ;;  %v3178_v5 = vmul.f32 %v3134_v50, %v8566_v29  ;;  %v3180_v62 = vmul.f32 %v3142_v33, %v8656_v28  ;;  %v3174_v50 = vmul.f32 %v3118_v3, %v8637_v48 }
 0x312   : > { %8721 = vst [vmem:[#allocation96_spill] sm:$0xff] %v7567_v7  ;;  %3889 = vperm.xlu0 %5258, %v7462_v11   ;;  %v3181_v11 = vmul.f32 %v7450_v37, %v8633_v25  ;;  %v3192_v33 = vadd.f32 %v3176_v4, %v8638_v0  ;;  %v3188_v37 = vadd.f32 %v3172_v59, %v8632_v39 }
 0x313   : > { %3107 = vst [vmem:[#allocation4 + $0xc] sm:$0x1] %v3106_v10  ;;  %v3150_v8 = vpop.permute.xlu1 %3149  ;;  %v3195_v21 = vadd.f32 %v3179_v49, %v8665_v54  ;;  %v3205_v38 = vmax.f32 %v3189_v57, %v3193_v13  ;;  %v3194_v3 = vadd.f32 %v3178_v5, %v8684_v15  ;;  %v3196_v4 = vadd.f32 %v3180_v62, %v8685_v56  ;;  %v8730_v49 = vld [vmem:[#allocation76_spill] sm:$0xff]  ;;  %v4071_v57 = vld [vmem:[#allocation3] sm:$0xff]  ;;  %v8733_v13 = vld [vmem:[#allocation59_spill] sm:$0xff] }
 0x314   : > { %5245 = vset.pattern.permute.xlu1 %v8725_v23  ;;  %v3182_v45 = vmul.f32 %v3150_v8, %v8658_v24  ;;  %v3199_v59 = vadd.f32 %v3183_v2, %v8712_v58  ;;  %v3185_v9 = vmul.f32 %v8731_v12, %v8730_v49  ;;  %v3190_v5 = vadd.f32 %v3174_v50, %v8733_v13  ;;  %v8734_v62 = vld [vmem:[#allocation87_spill] sm:$0xff] }
 0x315   : > { %3709 = vperm.xlu1 %5245, %v7480_v18   ;;  %v7588_v10 = vpop.permute.xlu0 %3385  ;;  %v3204_v47 = vmax.f32 %v3188_v37, %v3192_v33  ;;  %v3207_v43 = vmax.f32 %v3191_v41, %v3195_v21  ;;  %v4074_v21 = vld [vmem:[#allocation3 + $0x18] sm:$0xff] }
 0x316   : > { %8727 = vst [vmem:[#allocation13_spill] sm:$0xff] %v7588_v10  ;;  %5260 = vset.pattern.permute.xlu0 %v8352_v14  ;;  %v8728_v10 = vld [vmem:[#allocation81_spill] sm:$0xff]  ;;  %v8729_v14 = vld [vmem:[#allocation84_spill] sm:$0xff]  ;;  %v3198_v26 = vadd.f32 %v3182_v45, %v8734_v62  ;;  %v3206_v12 = vmax.f32 %v3190_v5, %v3194_v3  ;;  %v3201_v33 = vadd.f32 %v3185_v9, %v8530_v32  ;;  %v4090_v3 = vmax.f32 %v4074_v21, 1.0  ;;  %v4076_v9 = vld [vmem:[#allocation3 + $0x28] sm:$0xff] }
 0x317   : > { %v3158_v23 = vpop.permute.xlu1 %3157  ;;  %3953 = vperm.xlu0 %5260, %v7392_v51   ;;  %v3197_v7 = vadd.f32 %v3181_v11, %v8729_v14  ;;  %v3203_v11 = vadd.f32 %v3187_v61, %v6342_v44  ;;  %v3208_v58 = vmax.f32 %v3204_v47, %v3196_v4  ;;  %v4078_v5 = vld [vmem:[#allocation3 + $0x38] sm:$0xff] }
 0x318   : > { %v3184_v8 = vmul.f32 %v3158_v23, %v8728_v10  ;;  %v3211_v10 = vmax.f32 %v3207_v43, %v3199_v59  ;;  %v3210_v45 = vmax.f32 %v3206_v12, %v3198_v26  ;;  %v8736_v26 = vld [vmem:[#allocation23_spill] sm:$0xff] }
 0x319   : > { %3717 = vperm.xlu1 %5245, %v7298_v6   ;;  %v7609_v27 = vpop.permute.xlu0 %3393  ;;  %v3209_v2 = vmax.f32 %v3205_v38, %v3197_v7 }
 0x31a   : > { %8732 = vst [vmem:[#allocation94_spill] sm:$0xff] %v7609_v27  ;;  %v3200_v23 = vadd.f32 %v3184_v8, %v8529_v36  ;;  %v4087_v27 = vmax.f32 %v4071_v57, 1.0  ;;  %v3215_v7 = vmax.f32 %v3211_v10, %v3203_v11  ;;  %v4092_v10 = vmax.f32 %v4076_v9, 1.0 }
 0x31b   : > { %v3166_v1 = vpop.permute.xlu1 %3165  ;;  %3965 = vperm.xlu0 %5260, %v7430_v35   ;;  %v3213_v61 = vmax.f32 %v3209_v2, %v3201_v33  ;;  %v8739_v11 = vmov 19   ;;  %v4094_v2 = vmax.f32 %v4078_v5, 1.0  ;;  %v8743_v9 = vmov 0  }
 0x31c   : > { %v3186_v22 = vmul.f32 %v3166_v1, %v8735_v53  ;;  %v3212_v41 = vmax.f32 %v3208_v58, %v3200_v23  ;;  %5300 = vrcp.f32 %v4087_v27  ;;  %v8738_v23 = vld [vmem:[#allocation33_spill] sm:$0xff] }
 0x31d   : > { %3721 = vperm.xlu1 %5245, %v7319_v34   ;;  %v7618_v50 = vpop.permute.xlu0 %3401  ;;  %5302 = vrcp.f32 %v4090_v3 }
 0x31e   : > { %v3202_v37 = vadd.f32 %v3186_v22, %v8572_v20  ;;  %v3216_v4 = vmax.f32 %v3212_v41, %v3213_v61  ;;  %5304 = vrcp.f32 %v4092_v10  ;;  %v8741_v41 = vld [vmem:[#allocation36_spill] sm:$0xff] }
 0x31f   : > { %3973 = vperm.xlu0 %5260, %v7447_v16   ;;  %5306 = vrcp.f32 %v4094_v2  ;;  %v4084_v2 = vld [vmem:[#allocation3 + $0x68] sm:$0xff] }
 0x320   : > { %v3214_v47 = vmax.f32 %v3210_v45, %v3202_v37  ;;  %v3230_v38 = vpop.permute.xlu1 %3229  ;;  %v4080_v45 = vld [vmem:[#allocation3 + $0x48] sm:$0xff] }
 0x321   : > { %3729 = vperm.xlu1 %5245, %v7340_v40   ;;  %v7624_v1 = vpop.permute.xlu0 %3409 }
 0x322   : > { %v3217_v8 = vmax.f32 %v3214_v47, %v3215_v7  ;;  %v4096_v7 = vmax.f32 %v4080_v45, 1.0 }
 0x323   : > { %3981 = vperm.xlu0 %5260, %v8736_v26  }
 0x324   : > { %v3218_v58 = vmax.f32 %v3216_v4, %v3217_v8  ;;  %v3238_v22 = vpop.permute.xlu1 %3237  ;;  %v4082_v4 = vld [vmem:[#allocation3 + $0x58] sm:$0xff]  ;;  %v3225_v8 = vld [vmem:[#allocation4 + $0xd] sm:$0x1]  ;;  %5308 = vrcp.f32 %v4096_v7 }
 0x325   : > { %3737 = vperm.xlu1 %5245, %v8714_v19   ;;  %v4098_v10 = vmax.f32 %v4082_v4, 1.0  ;;  %v8745_v7 = vld [vmem:[#allocation25_spill] sm:$0xff]  ;;  %v8747_v4 = vld [vmem:[#allocation27_spill] sm:$0xff] }
 0x326   : > { %v3219_v59 = vrot.slane %v3218_v58, 4  ;;  %v7628_v57 = vpop.permute.xlu0 %3473 }
 0x327   : > { %8737 = vst [vmem:[#allocation95_spill] sm:$0xff] %v7628_v57  ;;  %3993 = vperm.xlu0 %5260, %v8738_v23   ;;  %v3294_v57 = vmul.f32 %v3238_v22, %v8637_v48  ;;  %5310 = vrcp.f32 %v4098_v10 }
 0x328   : > { %v3220_v43 = vmax.f32 %v3218_v58, %v3219_v59  ;;  %v3242_v27 = vpop.permute.xlu1 %3241 }
 0x329   : > { %5246 = vset.pattern.permute.xlu1 %v8739_v11  ;;  %v5301_v3 = vpop.eup %5300 }
 0x32a   : > { %v3221_v12 = vrot.slane %v3220_v43, 2  ;;  %3833 = vperm.xlu1 %5246, %v7392_v51   ;;  %v7633_v33 = vpop.permute.xlu0 %3485 }
 0x32b   : > { %8740 = vst [vmem:[#allocation93_spill] sm:$0xff] %v7633_v33  ;;  %4001 = vperm.xlu0 %5260, %v8741_v41   ;;  %v8754_v41 = vld [vmem:[#allocation47_spill] sm:$0xff] }
 0x32c   : > { %v3222_v37 = vmax.f32 %v3220_v43, %v3221_v12  ;;  %v3250_v21 = vpop.permute.xlu1 %3249  ;;  %v5303_v43 = vpop.eup %5302  ;;  %v3292_v12 = vmul.f32 %v3230_v38, %v8476_v63 }
 0x32d   : > { %v3297_v38 = vmul.f32 %v3250_v21, %v8512_v46 }
 0x32e   : > { %v3223_v61 = vrot.slane %v3222_v37, 1  ;;  %3837 = vperm.xlu1 %5246, %v7298_v6   ;;  %v7637_v47 = vpop.permute.xlu0 %3493  ;;  %v3308_v22 = vadd.f32 %v3292_v12, %v8632_v39 }
 0x32f   : > { %8742 = vst [vmem:[#allocation91_spill] sm:$0xff] %v7637_v47  ;;  %5262 = vset.pattern.permute.xlu0 %v8743_v9  ;;  %v4086_v47 = vld [vmem:[#allocation3 + $0x78] sm:$0xff] }
 0x330   : > { %v3224_v51 = vmax.f32 %v3222_v37, %v3223_v61  ;;  %v3258_v58 = vpop.permute.xlu1 %3257  ;;  %4137 = vperm.xlu0 %5262, %v5301_v3   ;;  %v4100_v37 = vmax.f32 %v4084_v2, 1.0  ;;  %v3296_v61 = vmul.f32 %v8745_v7, %v8565_v30  ;;  %v5305_v3 = vpop.eup %5304  ;;  %v3310_v2 = vadd.f32 %v3294_v57, %v8733_v13 }
 0x332   : > { %v3226_v59 = vmax.f32 %v3225_v8, %v3224_v51  ;;  %3845 = vperm.xlu1 %5246, %v7430_v35   ;;  %v7641_v5 = vpop.permute.xlu0 %3501  ;;  %v3298_v8 = vmul.f32 %v8747_v4, %v8566_v29  ;;  %v4102_v51 = vmax.f32 %v4086_v47, 1.0  ;;  %5312 = vrcp.f32 %v4100_v37  ;;  %v8749_v4 = vld [vmem:[#allocation35_spill] sm:$0xff]  ;;  %v8750_v47 = vld [vmem:[#allocation38_spill] sm:$0xff] }
 0x333   : > { %8744 = vst [vmem:[#allocation68_spill] sm:$0xff] %v7641_v5  ;;  %v3300_v21 = vmul.f32 %v8749_v4, %v8656_v28  ;;  %v3302_v5 = vmul.f32 %v8750_v47, %v8658_v24 }
 0x334   : > { %3227 = vst [vmem:[#allocation4 + $0xd] sm:$0x1] %v3226_v59  ;;  %v3266_v45 = vpop.permute.xlu1 %3265  ;;  %4152 = vperm.xlu0 %5262, %v5303_v43   ;;  %v8748_v59 = vld [vmem:[#allocation88_spill] sm:$0xff]  ;;  %v3314_v57 = vadd.f32 %v3298_v8, %v8684_v15  ;;  %5314 = vrcp.f32 %v4102_v51 }
 0x335   : > { %v3293_v43 = vmul.f32 %v8748_v59, %v8567_v31  ;;  %v3301_v7 = vmul.f32 %v3266_v45, %v8633_v25  ;;  %v8751_v59 = vmov 20   ;;  %v3313_v45 = vadd.f32 %v3297_v38, %v8662_v42  ;;  %v8755_v51 = vld [vmem:[#allocation48_spill] sm:$0xff] }
 0x336   : > { %3853 = vperm.xlu1 %5246, %v7447_v16   ;;  %v7648_v35 = vpop.permute.xlu0 %3509  ;;  %v3299_v16 = vmul.f32 %v3258_v58, %v8609_v55  ;;  %v3295_v58 = vmul.f32 %v3242_v27, %v8661_v60  ;;  %v3326_v33 = vmax.f32 %v3310_v2, %v3314_v57  ;;  %v3316_v27 = vadd.f32 %v3300_v21, %v8685_v56  ;;  %v8757_v57 = vld [vmem:[#allocation62_spill] sm:$0xff] }
 0x337   : > { %8746 = vst [vmem:[#allocation64_spill] sm:$0xff] %v7648_v35  ;;  %v3312_v35 = vadd.f32 %v3296_v61, %v8638_v0  ;;  %v3309_v61 = vadd.f32 %v3293_v43, %v8664_v52  ;;  %v3317_v9 = vadd.f32 %v3301_v7, %v8729_v14  ;;  %v3318_v38 = vadd.f32 %v3302_v5, %v8734_v62  ;;  %v8758_v62 = vld [vmem:[#allocation85_spill] sm:$0xff] }
 0x338   : > { %v3274_v10 = vpop.permute.xlu1 %3273  ;;  %4162 = vperm.xlu0 %5262, %v5305_v3   ;;  %v5307_v3 = vpop.eup %5306  ;;  %v3306_v43 = vmul.f32 %v8755_v51, %v8735_v53 }
 0x339   : > { %v3303_v37 = vmul.f32 %v3274_v10, %v8663_v17  ;;  %v3324_v4 = vmax.f32 %v3308_v22, %v3312_v35  ;;  %v8753_v10 = vld [vmem:[#allocation81_spill] sm:$0xff]  ;;  %v5309_v35 = vpop.eup %5308  ;;  %v3325_v2 = vmax.f32 %v3309_v61, %v3313_v45 }
 0x33a   : > { %5247 = vset.pattern.permute.xlu1 %v8751_v59  ;;  %v7665_v12 = vpop.permute.xlu0 %3521  ;;  %v8756_v22 = vld [vmem:[#allocation61_spill] sm:$0xff]  ;;  %v3330_v59 = vmax.f32 %v3326_v33, %v3318_v38  ;;  %v3322_v45 = vadd.f32 %v3306_v43, %v8572_v20 }
 0x33b   : > { %8752 = vst [vmem:[#allocation92_spill] sm:$0xff] %v7665_v12  ;;  %3949 = vperm.xlu1 %5247, %v7480_v18   ;;  %v3315_v12 = vadd.f32 %v3299_v16, %v8665_v54  ;;  %v3304_v18 = vmul.f32 %v8754_v41, %v8753_v10  ;;  %v3319_v16 = vadd.f32 %v3303_v37, %v8757_v57 }
 0x33c   : > { %v3282_v47 = vpop.permute.xlu1 %3281  ;;  %4172 = vperm.xlu0 %5262, %v5307_v3   ;;  %v3311_v3 = vadd.f32 %v3295_v58, %v8756_v22  ;;  %v3328_v21 = vmax.f32 %v3324_v4, %v3316_v27  ;;  %v3329_v11 = vmax.f32 %v3325_v2, %v3317_v9  ;;  %v5311_v58 = vpop.eup %5310  ;;  %v3334_v33 = vmax.f32 %v3330_v59, %v3322_v45 }
 0x33d   : > { %v3305_v8 = vmul.f32 %v3282_v47, %v8730_v49  ;;  %v3320_v53 = vadd.f32 %v3304_v18, %v8529_v36  ;;  %v8760_v45 = vmov 17  }
 0x33e   : > { %v3327_v41 = vmax.f32 %v3311_v3, %v3315_v12 }
 0x33f   : > { %v3321_v7 = vadd.f32 %v3305_v8, %v8530_v32  ;;  %3957 = vperm.xlu1 %5247, %v7298_v6   ;;  %v7686_v47 = vpop.permute.xlu0 %3589  ;;  %v3332_v4 = vmax.f32 %v3328_v21, %v3320_v53  ;;  %v5313_v27 = vpop.eup %5312 }
 0x340   : > { %v3290_v5 = vpop.permute.xlu1 %3289  ;;  %4182 = vperm.xlu0 %5262, %v5309_v35   ;;  %v3331_v37 = vmax.f32 %v3327_v41, %v3319_v16 }
 0x341   : > { %v3307_v51 = vmul.f32 %v3290_v5, %v8758_v62  ;;  %v3333_v61 = vmax.f32 %v3329_v11, %v3321_v7  ;;  %v5315_v11 = vpop.eup %5314  ;;  %v8759_v7 = vmov 16  }
 0x343   : > { %v3323_v8 = vadd.f32 %v3307_v51, %v6342_v44  ;;  %3961 = vperm.xlu1 %5247, %v7319_v34   ;;  %v7693_v6 = vpop.permute.xlu0 %3601  ;;  %v3336_v38 = vmax.f32 %v3332_v4, %v3333_v61 }
 0x344   : > { %4192 = vperm.xlu0 %5262, %v5311_v58   ;;  %v3345_v58 = vld [vmem:[#allocation4 + $0xe] sm:$0x1] }
 0x345   : > { %v3335_v12 = vmax.f32 %v3331_v37, %v3323_v8  ;;  %v3354_v9 = vpop.permute.xlu1 %3353 }
 0x346   : > { %v3413_v61 = vmul.f32 %v3354_v9, %v8567_v31 }
 0x347   : > { %v3337_v35 = vmax.f32 %v3334_v33, %v3335_v12  ;;  %3969 = vperm.xlu1 %5247, %v7340_v40   ;;  %v7696_v18 = vpop.permute.xlu0 %3609  ;;  %v8761_v33 = vld [vmem:[#allocation11_spill] sm:$0xff] }
 0x348   : > { %4202 = vperm.xlu0 %5262, %v5313_v27   ;;  %v3417_v12 = vmul.f32 %v8761_v33, %v8512_v46  ;;  %v3429_v9 = vadd.f32 %v3413_v61, %v8664_v52  ;;  %v8767_v33 = vld [vmem:[#allocation94_spill] sm:$0xff]  ;;  %v8768_v52 = vld [vmem:[#allocation87_spill] sm:$0xff] }
 0x349   : > { %v3338_v43 = vmax.f32 %v3336_v38, %v3337_v35  ;;  %v3358_v3 = vpop.permute.xlu1 %3357  ;;  %v8762_v38 = vld [vmem:[#allocation46_spill] sm:$0xff] }
 0x34a   : > { %v3412_v35 = vmul.f32 %v8762_v38, %v8476_v63  ;;  %v3423_v38 = vmul.f32 %v8767_v33, %v8663_v17 }
 0x34b   : > { %v3339_v2 = vrot.slane %v3338_v43, 4  ;;  %3977 = vperm.xlu1 %5247, %v8714_v19   ;;  %v7699_v34 = vpop.permute.xlu0 %3617 }
 0x34c   : > { %4212 = vperm.xlu0 %5262, %v5315_v11   ;;  %v8763_v11 = vld [vmem:[#allocation96_spill] sm:$0xff] }
 0x34d   : > { %v3340_v53 = vmax.f32 %v3338_v43, %v3339_v2  ;;  %v3366_v59 = vpop.permute.xlu1 %3365  ;;  %v3419_v43 = vmul.f32 %v8763_v11, %v8609_v55  ;;  %v8764_v2 = vld [vmem:[#allocation44_spill] sm:$0xff]  ;;  %v3414_v11 = vmul.f32 %v3358_v3, %v8637_v48 }
 0x34e   : > { %v3416_v27 = vmul.f32 %v3366_v59, %v8565_v30  ;;  %v8766_v59 = vld [vmem:[#allocation13_spill] sm:$0xff] }
 0x34f   : > { %v3341_v16 = vrot.slane %v3340_v53, 2  ;;  %5248 = vset.pattern.permute.xlu1 %v8759_v7  ;;  %v7702_v21 = vpop.permute.xlu0 %3625 }
 0x350   : > { %3513 = vperm.xlu1 %5248, %v8738_v23  }
 0x351   : > { %v3342_v40 = vmax.f32 %v3340_v53, %v3341_v16  ;;  %v3374_v5 = vpop.permute.xlu1 %3373 }
 0x352   : > { %v3418_v16 = vmul.f32 %v3374_v5, %v8566_v29 }
 0x353   : > { %v3343_v41 = vrot.slane %v3342_v40, 1  ;;  %v7705_v51 = vpop.permute.xlu0 %3637 }
 0x354   : > { %5249 = vset.pattern.permute.xlu1 %v8760_v45  ;;  %v3432_v45 = vadd.f32 %v3416_v27, %v8638_v0 }
 0x355   : > { %v3344_v19 = vmax.f32 %v3342_v40, %v3343_v41  ;;  %3621 = vperm.xlu1 %5249, %v8736_v26   ;;  %v3382_v37 = vpop.permute.xlu1 %3381  ;;  %v8765_v41 = vld [vmem:[#allocation49_spill] sm:$0xff] }
 0x356   : > { %v3420_v40 = vmul.f32 %v3382_v37, %v8656_v28  ;;  %v3428_v37 = vadd.f32 %v3412_v35, %v8632_v39  ;;  %v3439_v35 = vadd.f32 %v3423_v38, %v8757_v57 }
 0x357   : > { %v3346_v8 = vmax.f32 %v3345_v58, %v3344_v19  ;;  %v7710_v4 = vpop.permute.xlu0 %3649  ;;  %v3415_v58 = vmul.f32 %v8765_v41, %v8661_v60  ;;  %v3421_v19 = vmul.f32 %v8766_v59, %v8633_v25  ;;  %v3435_v41 = vadd.f32 %v3419_v43, %v8665_v54 }
 0x358   : > { %v3427_v59 = vmul.f32 %v7624_v1, %v8758_v62  ;;  %v3436_v3 = vadd.f32 %v3420_v40, %v8685_v56  ;;  %v3425_v43 = vmul.f32 %v7618_v50, %v8730_v49  ;;  %v3430_v1 = vadd.f32 %v3414_v11, %v8733_v13  ;;  %v8771_v49 = vld [vmem:[#allocation18_spill] sm:$0xff] }
 0x359   : > { %3347 = vst [vmem:[#allocation4 + $0xe] sm:$0x1] %v3346_v8  ;;  %3629 = vperm.xlu1 %5249, %v8764_v2   ;;  %v3390_v53 = vpop.permute.xlu1 %3389  ;;  %v3433_v8 = vadd.f32 %v3417_v12, %v8662_v42  ;;  %v3434_v12 = vadd.f32 %v3418_v16, %v8684_v15  ;;  %v3444_v48 = vmax.f32 %v3428_v37, %v3432_v45  ;;  %v8770_v15 = vld [vmem:[#allocation86_spill] sm:$0xff] }
 0x35a   : > { %v3422_v61 = vmul.f32 %v3390_v53, %v8658_v24  ;;  %v3431_v53 = vadd.f32 %v3415_v58, %v8756_v22  ;;  %v3437_v24 = vadd.f32 %v3421_v19, %v8729_v14  ;;  %v3443_v40 = vadd.f32 %v3427_v59, %v6342_v44 }
 0x35b   : > { %v3445_v17 = vmax.f32 %v3429_v9, %v3433_v8  ;;  %v3446_v38 = vmax.f32 %v3430_v1, %v3434_v12  ;;  %v3448_v57 = vmax.f32 %v3444_v48, %v3436_v3  ;;  %v3441_v11 = vadd.f32 %v3425_v43, %v8530_v32 }
 0x35c   : > { %v7733_v5 = vpop.permute.xlu0 %3713  ;;  %v3438_v9 = vadd.f32 %v3422_v61, %v8768_v52  ;;  %v3447_v8 = vmax.f32 %v3431_v53, %v3435_v41  ;;  %v8772_v3 = vmov 19  }
 0x35d   : > { %3633 = vperm.xlu1 %5249, %v8738_v23   ;;  %v3398_v33 = vpop.permute.xlu1 %3397  ;;  %v3449_v19 = vmax.f32 %v3445_v17, %v3437_v24 }
 0x35e   : > { %v3424_v27 = vmul.f32 %v3398_v33, %v8753_v10  ;;  %v8769_v33 = vmov 18   ;;  %v3451_v45 = vmax.f32 %v3447_v8, %v3439_v35  ;;  %v3450_v61 = vmax.f32 %v3446_v38, %v3438_v9 }
 0x360   : > { %v3440_v16 = vadd.f32 %v3424_v27, %v8529_v36  ;;  %v7753_v56 = vpop.permute.xlu0 %3725  ;;  %v3455_v59 = vmax.f32 %v3451_v45, %v3443_v40  ;;  %v3453_v27 = vmax.f32 %v3449_v19, %v3441_v11  ;;  %v3465_v19 = vld [vmem:[#allocation4 + $0xf] sm:$0x1]  ;;  %v3659_v45 = vmul.f32 %v7699_v34, %v8609_v55  ;;  %v5379_v34 = vld [vmem:[%s5646_s18 + $0x50] sm:$0xff] }
 0x361   : > { %5250 = vset.pattern.permute.xlu1 %v8769_v33  ;;  %v3406_v58 = vpop.permute.xlu1 %3405 }
 0x362   : > { %v3426_v50 = vmul.f32 %v3406_v58, %v8770_v15  ;;  %3745 = vperm.xlu1 %5250, %v8771_v49   ;;  %v3452_v37 = vmax.f32 %v3448_v57, %v3440_v16  ;;  %v8781_v15 = vld [vmem:[#allocation83_spill] sm:$0xff] }
 0x364   : > { %v3442_v41 = vadd.f32 %v3426_v50, %v8572_v20  ;;  %v3734_v24 = vpop.permute.xlu0 %3733  ;;  %v3456_v48 = vmax.f32 %v3452_v37, %v3453_v27  ;;  %v8774_v50 = vmov 20   ;;  %v3655_v37 = vmul.f32 %v7693_v6, %v8661_v60 }
 0x365   : > { %v3675_v27 = vadd.f32 %v3659_v45, %v8665_v54 }
 0x366   : > { %v3454_v53 = vmax.f32 %v3450_v61, %v3442_v41  ;;  %3749 = vperm.xlu1 %5250, %v8764_v2   ;;  %v7760_v52 = vpop.permute.xlu1 %3469 }
 0x368   : > { %v3457_v17 = vmax.f32 %v3454_v53, %v3455_v59  ;;  %v3742_v35 = vpop.permute.xlu0 %3741  ;;  %v3652_v59 = vmul.f32 %v7686_v47, %v8476_v63  ;;  %v3671_v53 = vadd.f32 %v3655_v37, %v8756_v22  ;;  %v7797_v47 = vld [vmem:[%s5646_s18 + $0x60] sm:$0xff]  ;;  %v3778_v37 = vmul.f32 %v3734_v24, %v8566_v29  ;;  %v8779_v24 = vld [vmem:[#allocation80_spill] sm:$0xff] }
 0x36a   : > { %v3458_v12 = vmax.f32 %v3456_v48, %v3457_v17  ;;  %5251 = vset.pattern.permute.xlu1 %v8772_v3  ;;  %v7763_v49 = vpop.permute.xlu1 %3477 }
 0x36b   : > { %3861 = vperm.xlu1 %5251, %v8736_v26  }
 0x36c   : > { %v3459_v57 = vrot.slane %v3458_v12, 4  ;;  %v3754_v40 = vpop.permute.xlu0 %3753 }
 0x36e   : > { %v3460_v43 = vmax.f32 %v3458_v12, %v3459_v57  ;;  %v7766_v1 = vpop.permute.xlu1 %3481  ;;  %v3687_v12 = vmax.f32 %v3671_v53, %v3675_v27  ;;  %v3661_v57 = vmul.f32 %v7702_v21, %v8633_v25  ;;  %v3776_v21 = vmul.f32 %v7753_v56, %v8565_v30  ;;  %v8776_v53 = vld [vmem:[#allocation29_spill] sm:$0xff] }
 0x36f   : > { %3869 = vperm.xlu1 %5251, %v8764_v2   ;;  %v5378_v2 = vld [vmem:[%s5646_s18 + $0x48] sm:$0xff] }
 0x370   : > { %v3461_v9 = vrot.slane %v3460_v43, 2  ;;  %v3762_v61 = vpop.permute.xlu0 %3761  ;;  %v3792_v27 = vadd.f32 %v3776_v21, %v8638_v0 }
 0x372   : > { %v3462_v16 = vmax.f32 %v3460_v43, %v3461_v9  ;;  %v7769_v8 = vpop.permute.xlu1 %3489  ;;  %v3664_v9 = vmul.f32 %v7705_v51, %v8753_v10  ;;  %v3773_v51 = vmul.f32 %v7733_v5, %v8567_v31 }
 0x373   : > { %8773 = vst [vmem:[#allocation90_spill] sm:$0xff] %v7769_v8  ;;  %3873 = vperm.xlu1 %5251, %v8738_v23   ;;  %v3657_v23 = vmul.f32 %v7696_v18, %v8512_v46  ;;  %v3668_v18 = vadd.f32 %v3652_v59, %v8632_v39 }
 0x374   : > { %v3463_v58 = vrot.slane %v3462_v16, 1 }
 0x375   : > { %v3673_v48 = vadd.f32 %v3657_v23, %v8662_v42  ;;  %v7790_v17 = vpop.permute.xlu0 %3829 }
 0x376   : > { %v3464_v38 = vmax.f32 %v3462_v16, %v3463_v58  ;;  %v7772_v26 = vpop.permute.xlu1 %3497 }
 0x377   : > { %5252 = vset.pattern.permute.xlu1 %v8774_v50  ;;  %v3685_v43 = vmax.f32 %v3668_v18, %v3673_v48  ;;  %v8777_v18 = vld [vmem:[#allocation53_spill] sm:$0xff] }
 0x378   : > { %v3466_v11 = vmax.f32 %v3465_v19, %v3464_v38  ;;  %3985 = vperm.xlu1 %5252, %v5378_v2   ;;  %v3677_v19 = vadd.f32 %v3661_v57, %v8729_v14  ;;  %v3667_v38 = vmul.f32 %v7710_v4, %v8758_v62  ;;  %v3789_v5 = vadd.f32 %v3773_v51, %v8777_v18 }
 0x379   : > { %v3684_v58 = vmax.f32 %v3687_v12, %v3685_v43  ;;  %v3842_v45 = vpop.permute.xlu0 %3841  ;;  %v8778_v12 = vld [vmem:[#allocation56_spill] sm:$0xff]  ;;  %v3794_v43 = vadd.f32 %v3778_v37, %v8779_v24 }
 0x37a   : > { %3467 = vst [vmem:[#allocation4 + $0xf] sm:$0x1] %v3466_v11  ;;  %v7782_v41 = vpop.permute.xlu1 %3505  ;;  %v3680_v11 = vadd.f32 %v3664_v9, %v8529_v36  ;;  %v3683_v4 = vadd.f32 %v3667_v38, %v6342_v44  ;;  %v8780_v9 = vld [vmem:[#allocation73_spill] sm:$0xff]  ;;  %v3804_v20 = vmax.f32 %v3789_v5, %v3792_v27 }
 0x37b   : > { %8775 = vst [vmem:[#allocation63_spill] sm:$0xff] %v7782_v41  ;;  %v3688_v59 = vmax.f32 %v3684_v58, %v3677_v19  ;;  %v3783_v58 = vmul.f32 %v3754_v40, %v8780_v9  ;;  %v8783_v41 = vmov 17   ;;  %v8784_v40 = vld [vmem:[#allocation36_spill] sm:$0xff] }
 0x37c   : > { %3989 = vperm.xlu1 %5252, %v5379_v34   ;;  %v3780_v34 = vmul.f32 %v3742_v35, %v8656_v28  ;;  %v3806_v9 = vmax.f32 %v3804_v20, %v3794_v43 }
 0x37d   : > { %v3692_v48 = vmax.f32 %v3688_v59, %v3680_v11  ;;  %v3850_v19 = vpop.permute.xlu0 %3849  ;;  %v8782_v59 = vld [vmem:[#allocation76_spill] sm:$0xff] }
 0x37e   : > { %v3796_v11 = vadd.f32 %v3780_v34, %v8781_v15 }
 0x37f   : > { %v3594_v6 = vpop.permute.xlu1 %3593 }
 0x380   : > { %5253 = vset.pattern.permute.xlu1 %v8759_v7  ;;  %v7808_v7 = vld [vmem:[%s5646_s18 + $0x70] sm:$0xff]  ;;  %v3653_v2 = vmul.f32 %v3594_v6, %v8567_v31  ;;  %v3805_v27 = vmax.f32 %v3796_v11, %v3806_v9 }
 0x381   : > { %3517 = vperm.xlu1 %5253, %v7797_v47   ;;  %v3858_v5 = vpop.permute.xlu0 %3857 }
 0x382   : > { %v3669_v6 = vadd.f32 %v3653_v2, %v8777_v18  ;;  %v3785_v2 = vmul.f32 %v3762_v61, %v8782_v59  ;;  %v3899_v11 = vmul.f32 %v3858_v5, %v8609_v55 }
 0x383   : > { %v3598_v16 = vpop.permute.xlu1 %3597 }
 0x384   : > { %v3654_v57 = vmul.f32 %v3598_v16, %v8778_v12  ;;  %v3801_v34 = vadd.f32 %v3785_v2, %v8530_v32  ;;  %v3895_v2 = vmul.f32 %v3842_v45, %v8661_v60 }
 0x385   : > { %3525 = vperm.xlu1 %5253, %v7808_v7  }
 0x386   : > { %v3670_v51 = vadd.f32 %v3654_v57, %v8733_v13 }
 0x387   : > { %v3606_v23 = vpop.permute.xlu1 %3605 }
 0x388   : > { %v3656_v56 = vmul.f32 %v3606_v23, %v8565_v30  ;;  %v3690_v23 = vmax.f32 %v3683_v4, %v3692_v48  ;;  %v8785_v4 = vld [vmem:[#allocation62_spill] sm:$0xff] }
 0x389   : > { %3529 = vperm.xlu1 %5253, %v8776_v53   ;;  %v3799_v48 = vadd.f32 %v3783_v58, %v8785_v4  ;;  %v3866_v58 = vpop.permute.xlu0 %3865 }
 0x38a   : > { %v3672_v21 = vadd.f32 %v3656_v56, %v8638_v0  ;;  %v3691_v16 = vmax.f32 %v3669_v6, %v3690_v23 }
 0x38b   : > { %v3614_v38 = vpop.permute.xlu1 %3613  ;;  %v3809_v6 = vmax.f32 %v3805_v27, %v3799_v48  ;;  %v3892_v48 = vmul.f32 %v7790_v17, %v8476_v63  ;;  %v3901_v17 = vmul.f32 %v3866_v58, %v8633_v25 }
 0x38c   : > { %v3658_v35 = vmul.f32 %v3614_v38, %v8566_v29  ;;  %v3695_v56 = vmax.f32 %v3691_v16, %v3672_v21  ;;  %v3897_v16 = vmul.f32 %v3850_v19, %v8512_v46 }
 0x38d   : > { %5255 = vset.pattern.permute.xlu1 %v8783_v41  ;;  %v3813_v20 = vmax.f32 %v3809_v6, %v3801_v34  ;;  %v3911_v34 = vadd.f32 %v3895_v2, %v8756_v22  ;;  %v3908_v6 = vadd.f32 %v3892_v48, %v8632_v39  ;;  %v3917_v2 = vadd.f32 %v3901_v17, %v8729_v14 }
 0x38e   : > { %v3674_v37 = vadd.f32 %v3658_v35, %v8779_v24  ;;  %3641 = vperm.xlu1 %5255, %v8784_v40   ;;  %v3913_v45 = vadd.f32 %v3897_v16, %v8662_v42 }
 0x390   : > { %v3686_v8 = vmax.f32 %v3670_v51, %v3674_v37  ;;  %v3710_v38 = vpop.permute.xlu1 %3709  ;;  %v3878_v37 = vpop.permute.xlu0 %3877 }
 0x391   : > { %v3772_v61 = vmul.f32 %v3710_v38, %v8476_v63 }
 0x392   : > { %v7837_v41 = vmax.f32 %v3686_v8, %v3695_v56  ;;  %3645 = vperm.xlu1 %5255, %v7808_v7   ;;  %v3915_v56 = vadd.f32 %v3899_v11, %v8665_v54 }
 0x393   : > { %v3788_v57 = vadd.f32 %v3772_v61, %v8632_v39 }
 0x394   : > { %v3718_v23 = vpop.permute.xlu1 %3717 }
 0x395   : > { %v3774_v43 = vmul.f32 %v3718_v23, %v8778_v12  ;;  %v3810_v9 = vmax.f32 %v3788_v57, %v3813_v20  ;;  %v3927_v57 = vmax.f32 %v3911_v34, %v3915_v56  ;;  %v3890_v23 = vpop.permute.xlu0 %3889 }
 0x396   : > { %5257 = vset.pattern.permute.xlu1 %v8769_v33  ;;  %v3907_v58 = vmul.f32 %v3890_v23, %v8758_v62 }
 0x397   : > { %v3790_v21 = vadd.f32 %v3774_v43, %v8733_v13  ;;  %3757 = vperm.xlu1 %5257, %v7797_v47  }
 0x398   : > { %v3722_v35 = vpop.permute.xlu1 %3721  ;;  %v3923_v56 = vadd.f32 %v3907_v58, %v6342_v44 }
 0x399   : > { %v3808_v8 = vmax.f32 %v3790_v21, %v3810_v9  ;;  %v3775_v38 = vmul.f32 %v3722_v35, %v8661_v60  ;;  %v3904_v9 = vmul.f32 %v3878_v37, %v8753_v10  ;;  %v4072_v21 = vld [vmem:[#allocation3 + $0x8] sm:$0xff] }
 0x39b   : > { %3765 = vperm.xlu1 %5257, %v7808_v7   ;;  %v3791_v20 = vadd.f32 %v3775_v38, %v8756_v22  ;;  %v3920_v48 = vadd.f32 %v3904_v9, %v8529_v36 }
 0x39c   : > { %v3730_v51 = vpop.permute.xlu1 %3729 }
 0x39d   : > { %v3777_v33 = vmul.f32 %v3730_v51, %v8512_v46  ;;  %v4088_v51 = vmax.f32 %v4072_v21, 1.0 }
 0x39f   : > { %v3793_v27 = vadd.f32 %v3777_v33, %v8662_v42  ;;  %3769 = vperm.xlu1 %5257, %v8776_v53   ;;  %v3925_v53 = vmax.f32 %v3908_v6, %v3913_v45  ;;  %v4073_v33 = vld [vmem:[#allocation3 + $0x10] sm:$0xff]  ;;  %5316 = vrcp.f32 %v4088_v51  ;;  %v4075_v45 = vld [vmem:[#allocation3 + $0x20] sm:$0xff] }
 0x3a0   : > { %v3738_v19 = vpop.permute.xlu1 %3737  ;;  %v4089_v38 = vmax.f32 %v4073_v33, 1.0  ;;  %v4091_v6 = vmax.f32 %v4075_v45, 1.0  ;;  %v4081_v33 = vld [vmem:[#allocation3 + $0x50] sm:$0xff] }
 0x3a1   : > { %v3812_v5 = vmax.f32 %v3808_v8, %v3793_v27  ;;  %v3779_v61 = vmul.f32 %v3738_v19, %v8609_v55  ;;  %v3924_v11 = vmax.f32 %v3927_v57, %v3925_v53  ;;  %v4085_v45 = vld [vmem:[#allocation3 + $0x70] sm:$0xff] }
 0x3a2   : > { %5318 = vrcp.f32 %v4089_v38 }
 0x3a3   : > { %v3795_v43 = vadd.f32 %v3779_v61, %v8665_v54  ;;  %5259 = vset.pattern.permute.xlu1 %v8772_v3  ;;  %5320 = vrcp.f32 %v4091_v6 }
 0x3a4   : > { %3881 = vperm.xlu1 %5259, %v8784_v40   ;;  %v3928_v40 = vmax.f32 %v3924_v11, %v3917_v2 }
 0x3a5   : > { %v3807_v35 = vmax.f32 %v3791_v20, %v3795_v43  ;;  %v3834_v8 = vpop.permute.xlu1 %3833  ;;  %v4077_v20 = vld [vmem:[#allocation3 + $0x30] sm:$0xff] }
 0x3a6   : > { %v3893_v3 = vmul.f32 %v3834_v8, %v8567_v31  ;;  %v3932_v27 = vmax.f32 %v3928_v40, %v3920_v48  ;;  %v5382_v8 = vld [vmem:[%s5646_s18 + $0x78] sm:$0xff]  ;;  %v8786_v48 = vmov 0   ;;  %v4097_v40 = vmax.f32 %v4081_v33, 1.0 }
 0x3a7   : > { %v7868_v16 = vmax.f32 %v3812_v5, %v3807_v35  ;;  %v4079_v35 = vld [vmem:[#allocation3 + $0x40] sm:$0xff] }
 0x3a8   : > { %3885 = vperm.xlu1 %5259, %v7808_v7   ;;  %v3909_v34 = vadd.f32 %v3893_v3, %v8777_v18  ;;  %v3930_v5 = vmax.f32 %v3923_v56, %v3932_v27  ;;  %v4095_v58 = vmax.f32 %v4079_v35, 1.0  ;;  %v4083_v56 = vld [vmem:[#allocation3 + $0x60] sm:$0xff] }
 0x3a9   : > { %v3838_v37 = vpop.permute.xlu1 %3837  ;;  %v4099_v27 = vmax.f32 %v4083_v56, 1.0 }
 0x3aa   : > { %v3931_v57 = vmax.f32 %v3909_v34, %v3930_v5  ;;  %v3894_v17 = vmul.f32 %v3838_v37, %v8778_v12  ;;  %v4101_v5 = vmax.f32 %v4085_v45, 1.0 }
 0x3ac   : > { %5261 = vset.pattern.permute.xlu1 %v8774_v50  ;;  %v3910_v9 = vadd.f32 %v3894_v17, %v8733_v13 }
 0x3ad   : > { %3997 = vperm.xlu1 %5261, %v7797_v47   ;;  %v3846_v19 = vpop.permute.xlu1 %3845  ;;  %v4093_v47 = vmax.f32 %v4077_v20, 1.0 }
 0x3ae   : > { %v3896_v61 = vmul.f32 %v3846_v19, %v8565_v30 }
 0x3af   : > { %5322 = vrcp.f32 %v4093_v47 }
 0x3b0   : > { %v3912_v23 = vadd.f32 %v3896_v61, %v8638_v0  ;;  %5324 = vrcp.f32 %v4095_v58 }
 0x3b1   : > { %4005 = vperm.xlu1 %5261, %v7808_v7   ;;  %v3854_v43 = vpop.permute.xlu1 %3853  ;;  %v5317_v7 = vpop.eup %5316  ;;  %5326 = vrcp.f32 %v4097_v40  ;;  %v5266_v40 = vld [vmem:[%s8164_s7 + $0x8] ss:$0 sps:$4 sm:$0x77]  }
 0x3b2   : > { %v3935_v50 = vmax.f32 %v3931_v57, %v3912_v23  ;;  %v3898_v53 = vmul.f32 %v3854_v43, %v8566_v29  ;;  %v5319_v37 = vpop.eup %5318  ;;  %5328 = vrcp.f32 %v4099_v27  ;;  %v5267_v27 = vld [vmem:[%s8164_s7] sm:$0xff]  }
 0x3b3   : > { %v5321_v34 = vpop.eup %5320  ;;  %5330 = vrcp.f32 %v4101_v5  ;;  %v8789_v5 = vld [vmem:[#allocation93_spill] sm:$0xff] }
 0x3b4   : > { %v3914_v21 = vadd.f32 %v3898_v53, %v8779_v24  ;;  %v5431_v53 = vmov 65535  }
 0x3b5   : > { %4009 = vperm.xlu1 %5261, %v5382_v8   ;;  %v4277_v47 = vsel %vm4275_vm3, 4294967295, %v5431_v53 }
 0x3b6   : > { %v3926_v11 = vmax.f32 %v3910_v9, %v3914_v21  ;;  %v7885_v2 = vpop.permute.xlu1 %3949  ;;  %v4278_v35 = vsel %vm4276_vm4, %v4277_v47, 0  ;;  %v8792_v47 = vld [vmem:[#allocation68_spill] sm:$0xff]  ;;  %v8796_v9 = vld [vmem:[#allocation87_spill] sm:$0xff] }
 0x3b8   : > { %v7887_v51 = vmax.f32 %v3926_v11, %v3935_v50  ;;  %v5264_v50 = vld [vmem:[%s8163_s6 + $0x8] ss:$0 sps:$4 sm:$0x77]   ;;  %v5265_v11 = vld [vmem:[%s8163_s6] sm:$0xff]  }
 0x3b9   : > { %5263 = vset.pattern.permute.xlu1 %v8786_v48  ;;  %v4280_v8 = vand.u32 %v5264_v50, %v4278_v35 }
 0x3ba   : > { %v7890_v3 = vpop.permute.xlu1 %3957  ;;  %4142 = vperm.xlu1 %5263, %v5317_v7  }
 0x3bb   : > { %5121 = vmatprep.subr.bf16.mxu0 %v4280_v8 }
 0x3bc   : > { %v5323_v6 = vpop.eup %5322  ;;  %5122 = vmatpush3.bf16.msra.mxu0 %v4280_v8 }
 0x3bd   : > { %v5325_v20 = vpop.eup %5324  ;;  %5123 = vmatprep.subr.bf16.mxu0 %v5265_v11 }
 0x3be   : > { %v3962_v38 = vpop.permute.xlu1 %3961  ;;  %4147 = vperm.xlu1 %5263, %v5319_v37   ;;  %v5327_v58 = vpop.eup %5326 }
 0x3bf   : > { %v4015_v61 = vmul.f32 %v3962_v38, %v8661_v60  ;;  %v5329_v33 = vpop.eup %5328  ;;  %v4437_v38 = vand.u32 %v5266_v40, %v4278_v35  ;;  %v3540_v35 = vmul.f32 %v8792_v47, %v8656_v28 }
 0x3c0   : > { %5124 = vmatpush3.bf16.msra.mxu0 %v5265_v11  ;;  %v5331_v37 = vpop.eup %5330 }
 0x3c1   : > { %v7897_v23 = vadd.f32 %v4015_v61, %v8756_v22  ;;  %5141 = vmatprep.subr.bf16.mxu1 %v4437_v38  ;;  %v3536_v61 = vmul.f32 %v8789_v5, %v8565_v30  ;;  %v8795_v5 = vld [vmem:[#allocation92_spill] sm:$0xff] }
 0x3c2   : > { %v7892_v19 = vpop.permute.xlu1 %3969  ;;  %4157 = vperm.xlu1 %5263, %v5321_v34   ;;  %5142 = vmatpush3.bf16.msra.mxu1 %v4437_v38 }
 0x3c3   : > { %8787 = vst [vmem:[#allocation67_spill] sm:$0xff] %v7897_v23  ;;  %5143 = vmatprep.subr.bf16.mxu1 %v5267_v27  ;;  %v3552_v53 = vadd.f32 %v3536_v61, %v8638_v0 }
 0x3c6   : > { %v3978_v57 = vpop.permute.xlu1 %3977  ;;  %4167 = vperm.xlu1 %5263, %v5323_v6   ;;  %5144 = vmatpush3.bf16.msra.mxu1 %v5267_v27  ;;  %v3556_v27 = vadd.f32 %v3540_v35, %v8781_v15 }
 0x3c7   : > { %v4019_v17 = vmul.f32 %v3978_v57, %v8609_v55  ;;  %v8790_v57 = vld [vmem:[#allocation95_spill] sm:$0xff] }
 0x3c9   : > { %v7900_v43 = vadd.f32 %v4019_v17, %v8665_v54  ;;  %v3533_v17 = vmul.f32 %v8790_v57, %v8567_v31  ;;  %v3545_v57 = vmul.f32 %v8795_v5, %v8782_v59 }
 0x3ca   : > { %4177 = vperm.xlu1 %5263, %v5325_v20   ;;  %v8791_v20 = vld [vmem:[#allocation91_spill] sm:$0xff] }
 0x3cb   : > { %8788 = vst [vmem:[#allocation54_spill] sm:$0xff] %v7900_v43  ;;  %v7907_v21 = vpop.permute.xlu1 %3513  ;;  %v3538_v50 = vmul.f32 %v8791_v20, %v8566_v29  ;;  %v3549_v11 = vadd.f32 %v3533_v17, %v8777_v18  ;;  %v3532_v43 = vmul.f32 %v7760_v52, %v8476_v63  ;;  %v4380_v52 = vld [vmem:[#allocation4 + $0x8] sm:$0xff] }
 0x3cd   : > { %v3564_v38 = vmax.f32 %v3549_v11, %v3552_v53  ;;  %v3539_v53 = vmul.f32 %v7772_v26, %v8609_v55  ;;  %v3548_v11 = vadd.f32 %v3532_v43, %v8632_v39 }
 0x3ce   : > { %4187 = vperm.xlu1 %5263, %v5327_v58   ;;  %v3554_v58 = vadd.f32 %v3538_v50, %v8779_v24  ;;  %v3561_v50 = vadd.f32 %v3545_v57, %v8530_v32 }
 0x3d0   : > { %v7912_v7 = vpop.permute.xlu1 %3621  ;;  %v3566_v61 = vmax.f32 %v3564_v38, %v3554_v58  ;;  %v3535_v58 = vmul.f32 %v7766_v1, %v8661_v60 }
 0x3d2   : > { %4197 = vperm.xlu1 %5263, %v5329_v33   ;;  %v8793_v33 = vld [vmem:[#allocation75_spill] sm:$0xff]  ;;  %v3565_v17 = vmax.f32 %v3556_v27, %v3566_v61  ;;  %v4379_v61 = vld [vmem:[#allocation4] sm:$0xff]  ;;  %v3551_v55 = vadd.f32 %v3535_v58, %v8756_v22 }
 0x3d3   : > { %v4382_v60 = vpack.c.bf16 %v4380_v52, %v4379_v61  ;;  %v3660_v61 = vmul.f32 %v7912_v7, %v8656_v28 }
 0x3d4   : > { %v7914_v48 = vpop.permute.xlu1 %3629 }
 0x3d6   : > { %4207 = vperm.xlu1 %5263, %v5331_v37   ;;  %v8794_v37 = vld [vmem:[#allocation64_spill] sm:$0xff] }
 0x3d7   : > { %v3542_v40 = vmul.f32 %v8794_v37, %v8793_v33  ;;  %v3534_v37 = vmul.f32 %v7763_v49, %v8778_v12  ;;  %v3555_v49 = vadd.f32 %v3539_v53, %v8665_v54 }
 0x3d8   : > { %v7919_v56 = vpop.permute.xlu1 %3633 }
 0x3d9   : > { %v3558_v47 = vadd.f32 %v3542_v40, %v8796_v9  ;;  %v8797_v40 = vld [vmem:[#allocation90_spill] sm:$0xff]  ;;  %v3550_v57 = vadd.f32 %v3534_v37, %v8733_v13 }
 0x3da   : > { %v3537_v38 = vmul.f32 %v8797_v40, %v8512_v46 }
 0x3db   : > { %v3569_v35 = vmax.f32 %v3565_v17, %v3558_v47  ;;  %v3567_v47 = vmax.f32 %v3551_v55, %v3555_v49  ;;  %v8798_v17 = vld [vmem:[#allocation63_spill] sm:$0xff] }
 0x3dc   : > { %v3553_v26 = vadd.f32 %v3537_v38, %v8662_v42  ;;  %v3541_v40 = vmul.f32 %v8798_v17, %v8633_v25  ;;  %v8801_v55 = vld [vmem:[#allocation79_spill] sm:$0xff] }
 0x3dd   : > { %v7924_v34 = vpop.permute.xlu1 %3745  ;;  %v3573_v27 = vmax.f32 %v3569_v35, %v3561_v50  ;;  %v8799_v35 = vld [vmem:[#allocation73_spill] sm:$0xff] }
 0x3de   : > { %v3543_v37 = vmul.f32 %v7907_v21, %v8799_v35 }
 0x3df   : > { %v3571_v23 = vmax.f32 %v3548_v11, %v3573_v27  ;;  %v3557_v11 = vadd.f32 %v3541_v40, %v8729_v14  ;;  %v3676_v40 = vadd.f32 %v3660_v61, %v8781_v15 }
 0x3e0   : > { %v3559_v58 = vadd.f32 %v3543_v37, %v8785_v4 }
 0x3e1   : > { %v7926_v45 = vpop.permute.xlu1 %3749  ;;  %v3568_v1 = vmax.f32 %v3550_v57, %v3571_v23  ;;  %v7978_v23 = vpop.permute.xlu0 %3953  ;;  %v8800_v57 = vld [vmem:[#allocation86_spill] sm:$0xff] }
 0x3e3   : > { %v3572_v50 = vmax.f32 %v3568_v1, %v3553_v26 }
 0x3e5   : > { %v3576_v53 = vmax.f32 %v3572_v50, %v3567_v47  ;;  %v3663_v50 = vmul.f32 %v7919_v56, %v8799_v35  ;;  %v7991_v37 = vpop.permute.xlu0 %3965 }
 0x3e6   : > { %v7930_v6 = vpop.permute.xlu1 %3861 }
 0x3e7   : > { %v3570_v52 = vmax.f32 %v3557_v11, %v3576_v53 }
 0x3e9   : > { %v3574_v21 = vmax.f32 %v3570_v52, %v3559_v58  ;;  %v3679_v58 = vadd.f32 %v3663_v50, %v8785_v4  ;;  %v7999_v56 = vpop.permute.xlu0 %3973 }
 0x3ea   : > { %v7939_v8 = vpop.permute.xlu1 %3869 }
 0x3ee   : > { %v7948_v20 = vpop.permute.xlu1 %3873 }
 0x3f3   : > { %v7963_v5 = vpop.permute.xlu1 %3985 }
 0x3f7   : > { %v7969_v43 = vpop.permute.xlu1 %3989 }
 0x3f9   : > { %4387 = vxpose.xlu1.c.b16.start [1/2] (short) %v4382_v60, 128  ;;  %v3662_v60 = vmul.f32 %v7914_v48, %v8793_v33  ;;  %v3693_v48 = vmax.f32 %v7837_v41, %v3676_v40  ;;  %v3782_v40 = vmul.f32 %v7926_v45, %v8793_v33 }
 0x3fb   : > { %v3678_v53 = vadd.f32 %v3662_v60, %v8796_v9  ;;  %v3781_v60 = vmul.f32 %v7924_v34, %v8633_v25  ;;  %v3798_v34 = vadd.f32 %v3782_v40, %v8796_v9  ;;  %v3902_v40 = vmul.f32 %v7939_v8, %v8793_v33 }
 0x3fc   : > { %v3518_v54 = vpop.permute.xlu1 %3517  ;;  %v4013_v8 = vmul.f32 %v7978_v23, %v8567_v31  ;;  %v4021_v31 = vmul.f32 %v7963_v5, %v8633_v25 }
 0x3fd   : > { %v3544_v22 = vmul.f32 %v3518_v54, %v8753_v10 }
 0x3ff   : > { %v3560_v27 = vadd.f32 %v3544_v22, %v8529_v36 }
 0x400   : > { %v3526_v38 = vpop.permute.xlu1 %3525 }
 0x401   : > { %v3546_v49 = vmul.f32 %v3526_v38, %v8800_v57  ;;  %v3575_v47 = vmax.f32 %v3560_v27, %v3574_v21  ;;  %v3696_v27 = vmax.f32 %v3678_v53, %v3693_v48  ;;  %v3982_v53 = vpop.permute.xlu0 %3981 }
 0x402   : > { %v4020_v25 = vmul.f32 %v3982_v53, %v8656_v28 }
 0x403   : > { %v3562_v26 = vadd.f32 %v3546_v49, %v8801_v55 }
 0x404   : > { %v3530_v1 = vpop.permute.xlu1 %3529 }
 0x405   : > { %v3547_v17 = vmul.f32 %v3530_v1, %v8758_v62  ;;  %v3577_v54 = vmax.f32 %v3562_v26, %v3575_v47  ;;  %v3694_v26 = vmax.f32 %v3679_v58, %v3696_v27  ;;  %v3585_v58 = vld [vmem:[#allocation4 + $0x10] sm:$0x1] }
 0x407   : > { %v3563_v7 = vadd.f32 %v3547_v17, %v6342_v44 }
 0x409   : > { %v3578_v11 = vmax.f32 %v3563_v7, %v3577_v54  ;;  %v3642_v22 = vpop.permute.xlu1 %3641 }
 0x40a   : > { %v3665_v38 = vmul.f32 %v3642_v22, %v8782_v59 }
 0x40b   : > { %v3579_v52 = vrot.slane %v3578_v11, 4 }
 0x40c   : > { %v3681_v49 = vadd.f32 %v3665_v38, %v8530_v32 }
 0x40d   : > { %v3580_v61 = vmax.f32 %v3578_v11, %v3579_v52  ;;  %v3646_v21 = vpop.permute.xlu1 %3645  ;;  %v3797_v11 = vadd.f32 %v3781_v60, %v8729_v14 }
 0x40e   : > { %v3666_v1 = vmul.f32 %v3646_v21, %v8800_v57  ;;  %v3697_v41 = vmax.f32 %v3694_v26, %v3681_v49 }
 0x40f   : > { %v3581_v47 = vrot.slane %v3580_v61, 2  ;;  %v3814_v21 = vmax.f32 %v3797_v11, %v7868_v16 }
 0x410   : > { %v3682_v17 = vadd.f32 %v3666_v1, %v8801_v55  ;;  %v3900_v1 = vmul.f32 %v7930_v6, %v8656_v28  ;;  %v3903_v6 = vmul.f32 %v7948_v20, %v8799_v35 }
 0x411   : > { %v3582_v50 = vmax.f32 %v3580_v61, %v3581_v47  ;;  %v8015_v47 = vpop.permute.xlu0 %3993 }
 0x412   : > { %v3698_v54 = vmax.f32 %v3682_v17, %v3697_v41  ;;  %v3758_v7 = vpop.permute.xlu1 %3757  ;;  %v3811_v41 = vmax.f32 %v3798_v34, %v3814_v21  ;;  %v3916_v11 = vadd.f32 %v3900_v1, %v8781_v15  ;;  %v3918_v34 = vadd.f32 %v3902_v40, %v8796_v9 }
 0x413   : > { %v3583_v22 = vrot.slane %v3582_v50, 1  ;;  %v3784_v48 = vmul.f32 %v3758_v7, %v8753_v10  ;;  %v4017_v21 = vmul.f32 %v7892_v19, %v8512_v46  ;;  %v4029_v40 = vadd.f32 %v4013_v8, %v8777_v18 }
 0x414   : > { %v3699_v38 = vrot.slane %v3698_v54, 4  ;;  %v4014_v18 = vmul.f32 %v7890_v3, %v8778_v12 }
 0x415   : > { %v3584_v52 = vmax.f32 %v3582_v50, %v3583_v22  ;;  %v3800_v45 = vadd.f32 %v3784_v48, %v8529_v36  ;;  %v3705_v48 = vld [vmem:[#allocation4 + $0x11] sm:$0x1] }
 0x416   : > { %v3700_v27 = vmax.f32 %v3698_v54, %v3699_v38  ;;  %v3766_v49 = vpop.permute.xlu1 %3765 }
 0x417   : > { %v3586_v26 = vmax.f32 %v3585_v58, %v3584_v52  ;;  %v3786_v61 = vmul.f32 %v3766_v49, %v8800_v57  ;;  %v3815_v54 = vmax.f32 %v3811_v41, %v3800_v45  ;;  %v4012_v49 = vmul.f32 %v7885_v2, %v8476_v63 }
 0x418   : > { %v3701_v60 = vrot.slane %v3700_v27, 2  ;;  %v3933_v45 = vmax.f32 %v7887_v51, %v3916_v11  ;;  %v4016_v41 = vmul.f32 %v7991_v37, %v8565_v30  ;;  %v4033_v51 = vadd.f32 %v4017_v21, %v8662_v42 }
 0x419   : > { %3587 = vst [vmem:[#allocation4 + $0x10] sm:$0x1] %v3586_v26  ;;  %v3802_v17 = vadd.f32 %v3786_v61, %v8801_v55  ;;  %v3919_v61 = vadd.f32 %v3903_v6, %v8785_v4  ;;  %v4028_v2 = vadd.f32 %v4012_v49, %v8632_v39  ;;  %v4037_v37 = vadd.f32 %v4021_v31, %v8729_v14 }
 0x41a   : > { %v3702_v50 = vmax.f32 %v3700_v27, %v3701_v60  ;;  %v3770_v16 = vpop.permute.xlu1 %3769  ;;  %v4002_v27 = vpop.permute.xlu0 %4001  ;;  %v3936_v63 = vmax.f32 %v3918_v34, %v3933_v45  ;;  %v4032_v30 = vadd.f32 %v4016_v41, %v8638_v0  ;;  %v4045_v6 = vmax.f32 %v4029_v40, %v4033_v51  ;;  %v3825_v34 = vld [vmem:[#allocation4 + $0x12] sm:$0x1] }
 0x41b   : > { %v3787_v7 = vmul.f32 %v3770_v16, %v8758_v62  ;;  %v3817_v58 = vmax.f32 %v3802_v17, %v3815_v54  ;;  %v4036_v0 = vadd.f32 %v4020_v25, %v8781_v15  ;;  %v4023_v15 = vmul.f32 %v8015_v47, %v8799_v35 }
 0x41c   : > { %v3703_v22 = vrot.slane %v3702_v50, 1  ;;  %v4044_v11 = vmax.f32 %v4028_v2, %v4032_v30  ;;  %v4049_v28 = vmax.f32 %v4045_v6, %v4037_v37 }
 0x41d   : > { %v3803_v38 = vadd.f32 %v3787_v7, %v6342_v44  ;;  %v4025_v7 = vmul.f32 %v4002_v27, %v8782_v59  ;;  %v4022_v27 = vmul.f32 %v7969_v43, %v8793_v33  ;;  %v4039_v35 = vadd.f32 %v4023_v15, %v8785_v4  ;;  %v4120_v4 = vld [vmem:[#allocation2 + $0x8] sm:$0xff]  ;;  %v4065_v15 = vld [vmem:[#allocation4 + $0x14] sm:$0x1] }
 0x41e   : > { %v3704_v52 = vmax.f32 %v3702_v50, %v3703_v22  ;;  %v3934_v50 = vmax.f32 %v3919_v61, %v3936_v63  ;;  %v4138_v5 = vpop.permute.xlu0 %4137  ;;  %v4048_v49 = vmax.f32 %v4044_v11, %v4036_v0 }
 0x41f   : > { %v3818_v26 = vmax.f32 %v3803_v38, %v3817_v58  ;;  %v3882_v20 = vpop.permute.xlu1 %3881  ;;  %v4041_v38 = vadd.f32 %v4025_v7, %v8530_v32  ;;  %v4038_v33 = vadd.f32 %v4022_v27, %v8796_v9 }
 0x420   : > { %v3706_v1 = vmax.f32 %v3705_v48, %v3704_v52  ;;  %v3905_v60 = vmul.f32 %v3882_v20, %v8782_v59  ;;  %v4018_v59 = vmul.f32 %v7999_v56, %v8566_v29 }
 0x421   : > { %v3819_v23 = vrot.slane %v3818_v26, 4  ;;  %v4053_v29 = vmax.f32 %v4049_v28, %v4041_v38  ;;  %v4126_v38 = vld [vmem:[#allocation2 + $0x38] sm:$0xff] }
 0x422   : > { %3707 = vst [vmem:[#allocation4 + $0x11] sm:$0x1] %v3706_v1  ;;  %v3921_v46 = vadd.f32 %v3905_v60, %v8530_v32  ;;  %v4153_v8 = vpop.permute.xlu0 %4152  ;;  %v4034_v61 = vadd.f32 %v4018_v59, %v8779_v24  ;;  %v8802_v24 = vld [vmem:[#allocation67_spill] sm:$0xff] }
 0x423   : > { %v3820_v19 = vmax.f32 %v3818_v26, %v3819_v23  ;;  %v3886_v17 = vpop.permute.xlu1 %3885 }
 0x424   : > { %v3906_v16 = vmul.f32 %v3886_v17, %v8800_v57  ;;  %v3937_v39 = vmax.f32 %v3934_v50, %v3921_v46  ;;  %v8803_v46 = vld [vmem:[#allocation54_spill] sm:$0xff] }
 0x425   : > { %v3821_v54 = vrot.slane %v3820_v19, 2  ;;  %v8804_v9 = vmax.f32 %v8802_v24, %v8803_v46 }
 0x426   : > { %v3922_v42 = vadd.f32 %v3906_v16, %v8801_v55  ;;  %v4163_v47 = vpop.permute.xlu0 %4162 }
 0x427   : > { %v3822_v22 = vmax.f32 %v3820_v19, %v3821_v54  ;;  %v4051_v2 = vmax.f32 %v8804_v9, %v4039_v35  ;;  %v4119_v19 = vld [vmem:[#allocation2] sm:$0xff]  ;;  %v4122_v54 = vld [vmem:[#allocation2 + $0x18] sm:$0xff] }
 0x428   : > { %v3938_v48 = vmax.f32 %v3922_v42, %v3937_v39  ;;  %v3998_v58 = vpop.permute.xlu1 %3997  ;;  %v4215_v16 = vmul.f32 %v4138_v5, %v4119_v19  ;;  %v4218_v42 = vmul.f32 %v4153_v8, %v4122_v54  ;;  %v4123_v5 = vld [vmem:[#allocation2 + $0x20] sm:$0xff]  ;;  %v4134_v9 = vld [vmem:[#allocation2 + $0x78] sm:$0xff] }
 0x429   : > { %v3823_v53 = vrot.slane %v3822_v22, 1  ;;  %v4024_v14 = vmul.f32 %v3998_v58, %v8753_v10  ;;  %v4030_v10 = vadd.f32 %v4014_v18, %v8733_v13  ;;  %v4124_v18 = vld [vmem:[#allocation2 + $0x28] sm:$0xff] }
 0x42a   : > { %v3939_v52 = vrot.slane %v3938_v48, 4  ;;  %v4173_v25 = vpop.permute.xlu0 %4172  ;;  %v4220_v28 = vmul.f32 %v4163_v47, %v4124_v18 }
 0x42b   : > { %v3824_v12 = vmax.f32 %v3822_v22, %v3823_v53  ;;  %v4040_v3 = vadd.f32 %v4024_v14, %v8529_v36  ;;  %v4046_v13 = vmax.f32 %v4030_v10, %v4034_v61  ;;  %v4222_v27 = vmul.f32 %v4173_v25, %v4126_v38  ;;  %v4537_v38 = vld [vmem:[%s8092_s17 + $0x8] sm:$0xff] }
 0x42c   : > { %v3940_v21 = vmax.f32 %v3938_v48, %v3939_v52  ;;  %v4006_v26 = vpop.permute.xlu1 %4005  ;;  %v4125_v52 = vld [vmem:[#allocation2 + $0x30] sm:$0xff] }
 0x42d   : > { %v3826_v56 = vmax.f32 %v3825_v34, %v3824_v12  ;;  %v4052_v32 = vmax.f32 %v4048_v49, %v4040_v3  ;;  %v4026_v20 = vmul.f32 %v4006_v26, %v8800_v57  ;;  %v4050_v23 = vmax.f32 %v4046_v13, %v4038_v33  ;;  %v3945_v57 = vld [vmem:[#allocation4 + $0x13] sm:$0x1]  ;;  %v4130_v33 = vld [vmem:[#allocation2 + $0x58] sm:$0xff] }
 0x42e   : > { %v3941_v45 = vrot.slane %v3940_v21, 2  ;;  %v4183_v48 = vpop.permute.xlu0 %4182 }
 0x42f   : > { %3827 = vst [vmem:[#allocation4 + $0x12] sm:$0x1] %v3826_v56  ;;  %v4056_v36 = vmax.f32 %v4052_v32, %v4053_v29  ;;  %v4042_v60 = vadd.f32 %v4026_v20, %v8801_v55  ;;  %v4127_v29 = vld [vmem:[#allocation2 + $0x40] sm:$0xff] }
 0x430   : > { %v3942_v43 = vmax.f32 %v3940_v21, %v3941_v45  ;;  %v4010_v1 = vpop.permute.xlu1 %4009  ;;  %v4128_v21 = vld [vmem:[#allocation2 + $0x48] sm:$0xff] }
 0x431   : > { %v4027_v41 = vmul.f32 %v4010_v1, %v8758_v62  ;;  %v4054_v17 = vmax.f32 %v4050_v23, %v4042_v60  ;;  %v4224_v32 = vmul.f32 %v4183_v48, %v4128_v21  ;;  %v4132_v60 = vld [vmem:[#allocation2 + $0x68] sm:$0xff]  ;;  %v4538_v48 = vld [vmem:[%s8092_s17 + $0x10] sm:$0xff] }
 0x432   : > { %v3943_v31 = vrot.slane %v3942_v43, 1  ;;  %v4193_v3 = vpop.permute.xlu0 %4192 }
 0x433   : > { %v4043_v63 = vadd.f32 %v4027_v41, %v6342_v44  ;;  %v4121_v44 = vld [vmem:[#allocation2 + $0x10] sm:$0xff]  ;;  %v4226_v35 = vmul.f32 %v4193_v3, %v4130_v33  ;;  %v4131_v41 = vld [vmem:[#allocation2 + $0x60] sm:$0xff]  ;;  %v4541_v33 = vld [vmem:[%s8092_s17 + $0x28] sm:$0xff] }
 0x434   : > { %v3944_v51 = vmax.f32 %v3942_v43, %v3943_v31  ;;  %v4129_v43 = vld [vmem:[#allocation2 + $0x50] sm:$0xff] }
 0x435   : > { %v4055_v40 = vmax.f32 %v4051_v2, %v4043_v63  ;;  %v4143_v50 = vpop.permute.xlu1 %4142  ;;  %v4133_v2 = vld [vmem:[#allocation2 + $0x70] sm:$0xff] }
 0x436   : > { %v3946_v30 = vmax.f32 %v3945_v57, %v3944_v51  ;;  %v4216_v55 = vmul.f32 %v4143_v50, %v4120_v4 }
 0x437   : > { %v4057_v62 = vmax.f32 %v4054_v17, %v4055_v40 }
 0x438   : > { %3947 = vst [vmem:[#allocation4 + $0x13] sm:$0x1] %v3946_v30  ;;  %v4231_v37 = vpack.c.bf16 %v4216_v55, %v4215_v16 }
 0x439   : > { %v4058_v7 = vmax.f32 %v4056_v36, %v4057_v62  ;;  %v4148_v39 = vpop.permute.xlu1 %4147  ;;  %v4203_v36 = vpop.permute.xlu0 %4202 }
 0x43a   : > { %v4217_v11 = vmul.f32 %v4148_v39, %v4121_v44  ;;  %5125 = vmatprep.mubr.msk.bf16.mxu0 %vm515_vm1, %v4231_v37  ;;  %v4228_v23 = vmul.f32 %v4203_v36, %v4132_v60 }
 0x43b   : > { %v4059_v6 = vrot.slane %v4058_v7, 4 }
 0x43c   : > { %v4232_v22 = vpack.c.bf16 %v4218_v42, %v4217_v11 }
 0x43d   : > { %v4060_v58 = vmax.f32 %v4058_v7, %v4059_v6  ;;  %v4158_v0 = vpop.permute.xlu1 %4157  ;;  %v4213_v63 = vpop.permute.xlu0 %4212 }
 0x43e   : > { %v4219_v53 = vmul.f32 %v4158_v0, %v4123_v5  ;;  %5126 = vmatmul.mubr.msk.bf16.vlgmr.msra.gmra.mxu0 %vm515_vm1, %v4232_v22  ;;  %v4230_v17 = vmul.f32 %v4213_v63, %v4134_v9 }
 0x43f   : > { %v4061_v14 = vrot.slane %v4060_v58, 2 }
 0x440   : > { %v4233_v59 = vpack.c.bf16 %v4220_v28, %v4219_v53  ;;  %v4539_v28 = vld [vmem:[%s8092_s17 + $0x18] sm:$0xff] }
 0x441   : > { %v4062_v34 = vmax.f32 %v4060_v58, %v4061_v14  ;;  %v4168_v8 = vpop.permute.xlu1 %4167  ;;  %v4536_v58 = vld [vmem:[%s8092_s17] sm:$0xff] }
 0x442   : > { %v4221_v12 = vmul.f32 %v4168_v8, %v4125_v52  ;;  %5129 = vmatprep.mubr.msk.bf16.mxu0 %vm515_vm1, %v4233_v59 }
 0x443   : > { %v4063_v49 = vrot.slane %v4062_v34, 1 }
 0x444   : > { %v4234_v10 = vpack.c.bf16 %v4222_v27, %v4221_v12  ;;  %v4542_v12 = vld [vmem:[%s8092_s17 + $0x30] sm:$0xff] }
 0x445   : > { %v4064_v26 = vmax.f32 %v4062_v34, %v4063_v49  ;;  %v4178_v56 = vpop.permute.xlu1 %4177 }
 0x446   : > { %v4223_v20 = vmul.f32 %v4178_v56, %v4127_v29  ;;  %5130 = vmatmul.mubr.msk.bf16.gmra.mxu0 %vm515_vm1, %v4234_v10  ;;  %v4540_v10 = vld [vmem:[%s8092_s17 + $0x20] sm:$0xff] }
 0x447   : > { %v4066_v45 = vmax.f32 %v4065_v15, %v4064_v26 }
 0x448   : > { %v4235_v61 = vpack.c.bf16 %v4224_v32, %v4223_v20  ;;  %v4543_v32 = vld [vmem:[%s8092_s17 + $0x38] sm:$0xff] }
 0x449   : > { %4067 = vst [vmem:[#allocation4 + $0x14] sm:$0x1] %v4066_v45  ;;  %v4188_v1 = vpop.permute.xlu1 %4187 }
 0x44a   : > { %v4225_v47 = vmul.f32 %v4188_v1, %v4129_v43  ;;  %5133 = vmatprep.mubr.msk.bf16.mxu0 %vm515_vm1, %v4235_v61 }
 0x44c   : > { %v4236_v13 = vpack.c.bf16 %v4226_v35, %v4225_v47  ;;  %v4546_v47 = vld [vmem:[%s8092_s17 + $0x50] sm:$0xff] }
 0x44d   : > { %v4198_v31 = vpop.permute.xlu1 %4197 }
 0x44e   : > { %v4227_v57 = vmul.f32 %v4198_v31, %v4131_v41  ;;  %5134 = vmatmul.mubr.msk.bf16.gmra.mxu0 %vm515_vm1, %v4236_v13  ;;  %v4544_v31 = vld [vmem:[%s8092_s17 + $0x40] sm:$0xff] }
 0x450   : > { %v4237_v24 = vpack.c.bf16 %v4228_v23, %v4227_v57  ;;  %v4381_v46 = vld [vmem:[#allocation4 + $0x10] sm:$0x1f] }
 0x451   : > { %v4208_v51 = vpop.permute.xlu1 %4207  ;;  %v4383_v19 = vpack.c.bf16 %v4381_v46, %v4381_v46  ;;  %v4547_v46 = vld [vmem:[%s8092_s17 + $0x58] sm:$0xff] }
 0x452   : > { %v4229_v40 = vmul.f32 %v4208_v51, %v4133_v2  ;;  %5137 = vmatprep.mubr.msk.bf16.mxu0 %vm515_vm1, %v4237_v24 }
 0x453   : > { %4388 = vxpose.xlu1.c.b16.end [2/2] (short) %v4383_v19, 128  ;;  %v4545_v19 = vld [vmem:[%s8092_s17 + $0x48] sm:$0xff] }
 0x454   : > { %v4238_v4 = vpack.c.bf16 %v4230_v17, %v4229_v40 }
 0x456   : > { %5138 = vmatmul.mubr.msk.bf16.gmra.mxu0 %vm515_vm1, %v4238_v4 }
 0x4b1   : > { %v4395_v50 = vpop.trf.xlu1 }
 0x4b2   : > { %5145 = vmatprep.mubr.msk.bf16.mxu1 %vm515_vm1, %v4395_v50 }
 0x4b5   : > { %v4396_v16 = vpop.trf.xlu1 }
 0x4b6   : > { %5146 = vmatmul.mubr.msk.bf16.vlgmr.msra.gmra.mxu1 %vm515_vm1, %v4396_v16  ;;  %v4550_v16 = vld [vmem:[%s8092_s17 + $0x70] sm:$0xff] }
 0x4b9   : > { %v4397_v30 = vpop.trf.xlu1 }
 0x4ba   : > { %5149 = vmatprep.mubr.msk.bf16.mxu1 %vm515_vm1, %v4397_v30 }
 0x4bd   : > { %v4398_v55 = vpop.trf.xlu1 }
 0x4be   : > { %5150 = vmatmul.mubr.msk.bf16.gmra.mxu1 %vm515_vm1, %v4398_v55 }
 0x4c1   : > { %v4399_v25 = vpop.trf.xlu1 }
 0x4c2   : > { %5153 = vmatprep.mubr.msk.bf16.mxu1 %vm515_vm1, %v4399_v25 }
 0x4c5   : > { %v4400_v62 = vpop.trf.xlu1 }
 0x4c6   : > { %5154 = vmatmul.mubr.msk.bf16.gmra.mxu1 %vm515_vm1, %v4400_v62  ;;  %v4548_v62 = vld [vmem:[%s8092_s17 + $0x60] sm:$0xff] }
 0x4c9   : > { %v4401_v37 = vpop.trf.xlu1 }
 0x4ca   : > { %5157 = vmatprep.mubr.msk.bf16.mxu1 %vm515_vm1, %v4401_v37 }
 0x4cd   : > { %v4402_v54 = vpop.trf.xlu1 }
 0x4ce   : > { %5158 = vmatmul.mubr.msk.bf16.gmra.mxu1 %vm515_vm1, %v4402_v54 }
 0x4fe   : > { %v5127_v7 = vpop.f32.mrf.mxu0 }
 0x4ff   : > { %v4554_v0 = vadd.f32 %v5127_v7, %v4538_v48 }
 0x500   : > { %v4316_v44 = vpop.f32.mrf.mxu0 }
 0x501   : > { %v4552_v14 = vadd.f32 %v4536_v58, %v4316_v44 }
 0x502   : > { %v5128_v39 = vpop.f32.mrf.mxu0 }
 0x503   : > { %v4555_v8 = vadd.f32 %v5128_v39, %v4539_v28  ;;  %v4551_v39 = vld [vmem:[%s8092_s17 + $0x78] sm:$0xff] }
 0x504   : > { %v4319_v42 = vpop.f32.mrf.mxu0 }
 0x505   : > { %v4553_v49 = vadd.f32 %v4537_v38, %v4319_v42 }
 0x506   : > { %v5131_v11 = vpop.f32.mrf.mxu0 }
 0x507   : > { %v4558_v29 = vadd.f32 %v5131_v11, %v4542_v12 }
 0x508   : > { %v4332_v6 = vpop.f32.mrf.mxu0 }
 0x509   : > { %v4556_v45 = vadd.f32 %v4540_v10, %v4332_v6 }
 0x50a   : > { %v5132_v22 = vpop.f32.mrf.mxu0 }
 0x50b   : > { %v4559_v1 = vadd.f32 %v5132_v22, %v4543_v32 }
 0x50c   : > { %v4335_v18 = vpop.f32.mrf.mxu0 }
 0x50d   : > { %v4557_v60 = vadd.f32 %v4541_v33, %v4335_v18  ;;  %v4549_v18 = vld [vmem:[%s8092_s17 + $0x68] sm:$0xff] }
 0x50e   : > { %v5135_v5 = vpop.f32.mrf.mxu0 }
 0x50f   : > { %v4562_v63 = vadd.f32 %v5135_v5, %v4546_v47 }
 0x510   : > { %v4348_v34 = vpop.f32.mrf.mxu0 }
 0x511   : > { %v4560_v2 = vadd.f32 %v4544_v31, %v4348_v34 }
 0x512   : > { %v5136_v21 = vpop.f32.mrf.mxu0 }
 0x513   : > { %v4563_v4 = vadd.f32 %v5136_v21, %v4547_v46 }
 0x514   : > { %v4351_v36 = vpop.f32.mrf.mxu0 }
 0x515   : > { %v4561_v55 = vadd.f32 %v4545_v19, %v4351_v36 }
 0x516   : > { %v5139_v23 = vpop.f32.mrf.mxu0 }
 0x517   : > { %v4566_v7 = vadd.f32 %v5139_v23, %v4550_v16 }
 0x518   : > { %v4364_v17 = vpop.f32.mrf.mxu0 }
 0x519   : > { %v4564_v11 = vadd.f32 %v4548_v62, %v4364_v17 }
 0x51a   : > { %v5140_v37 = vpop.f32.mrf.mxu0 }
 0x51b   : > { %v4567_v58 = vadd.f32 %v5140_v37, %v4551_v39 }
 0x51c   : > { %v4367_v22 = vpop.f32.mrf.mxu0 }
 0x51d   : > { %v4565_v28 = vadd.f32 %v4549_v18, %v4367_v22 }
 0x576   : > { %v5147_v53 = vpop.f32.mrf.mxu1 }
 0x577   : > { %v4570_v59 = vadd.f32 %v5147_v53, %v4554_v0 }
 0x578   : > { %v4473_v52 = vpop.f32.mrf.mxu1 }
 0x579   : > { %4587 = vst.msk [vmem:[%s8101_s20 + $0x10] sm:$0xff] %vm4584_vm5, %v4570_v59  ;;  %v4568_v27 = vadd.f32 %v4552_v14, %v4473_v52 }
 0x57a   : > { %v5148_v3 = vpop.f32.mrf.mxu1 }
 0x57b   : > { %4585 = vst.msk [vmem:[%s8101_s20] sm:$0xff] %vm4584_vm5, %v4568_v27  ;;  %v4571_v15 = vadd.f32 %v5148_v3, %v4555_v8 }
 0x57c   : > { %v4476_v26 = vpop.f32.mrf.mxu1 }
 0x57d   : > { %4588 = vst.msk [vmem:[%s8101_s20 + $0x18] sm:$0xff] %vm4584_vm5, %v4571_v15  ;;  %v4569_v56 = vadd.f32 %v4553_v49, %v4476_v26 }
 0x57e   : > { %v5151_v20 = vpop.f32.mrf.mxu1 }
 0x57f   : > { %4586 = vst.msk [vmem:[%s8101_s20 + $0x8] sm:$0xff] %vm4584_vm5, %v4569_v56  ;;  %v4574_v61 = vadd.f32 %v5151_v20, %v4558_v29 }
 0x580   : > { %v4489_v43 = vpop.f32.mrf.mxu1 }
 0x581   : > { %4591 = vst.msk [vmem:[%s8101_s20 + $0x30] sm:$0xff] %vm4584_vm5, %v4574_v61  ;;  %v4572_v35 = vadd.f32 %v4556_v45, %v4489_v43 }
 0x582   : > { %v5152_v13 = vpop.f32.mrf.mxu1 }
 0x583   : > { %4589 = vst.msk [vmem:[%s8101_s20 + $0x20] sm:$0xff] %vm4584_vm5, %v4572_v35  ;;  %v4575_v41 = vadd.f32 %v5152_v13, %v4559_v1 }
 0x584   : > { %v4492_v57 = vpop.f32.mrf.mxu1 }
 0x585   : > { %4592 = vst.msk [vmem:[%s8101_s20 + $0x38] sm:$0xff] %vm4584_vm5, %v4575_v41  ;;  %v4573_v24 = vadd.f32 %v4557_v60, %v4492_v57 }
 0x586   : > { %v5155_v9 = vpop.f32.mrf.mxu1 }
 0x587   : > { %4590 = vst.msk [vmem:[%s8101_s20 + $0x28] sm:$0xff] %vm4584_vm5, %v4573_v24  ;;  %v4578_v51 = vadd.f32 %v5155_v9, %v4562_v63 }
 0x588   : > { %v4505_v40 = vpop.f32.mrf.mxu1 }
 0x589   : > { %4595 = vst.msk [vmem:[%s8101_s20 + $0x50] sm:$0xff] %vm4584_vm5, %v4578_v51  ;;  %v4576_v50 = vadd.f32 %v4560_v2, %v4505_v40 }
 0x58a   : > { %v5156_v30 = vpop.f32.mrf.mxu1 }
 0x58b   : > { %4593 = vst.msk [vmem:[%s8101_s20 + $0x40] sm:$0xff] %vm4584_vm5, %v4576_v50  ;;  %v4579_v25 = vadd.f32 %v5156_v30, %v4563_v4 }
 0x58c   : > { %v4508_v54 = vpop.f32.mrf.mxu1 }
 0x58d   : > { %4596 = vst.msk [vmem:[%s8101_s20 + $0x58] sm:$0xff] %vm4584_vm5, %v4579_v25  ;;  %v4577_v44 = vadd.f32 %v4561_v55, %v4508_v54 }
 0x58e   : > { %v5159_v42 = vpop.f32.mrf.mxu1 }
 0x58f   : > { %4594 = vst.msk [vmem:[%s8101_s20 + $0x48] sm:$0xff] %vm4584_vm5, %v4577_v44  ;;  %v4582_v6 = vadd.f32 %v5159_v42, %v4566_v7 }
 0x590   : > { %v4521_v48 = vpop.f32.mrf.mxu1 }
 0x591   : > { %4599 = vst.msk [vmem:[%s8101_s20 + $0x70] sm:$0xff] %vm4584_vm5, %v4582_v6  ;;  %v4580_v5 = vadd.f32 %v4564_v11, %v4521_v48 }
 0x592   : > { %v5160_v0 = vpop.f32.mrf.mxu1 }
 0x593   : > { %4597 = vst.msk [vmem:[%s8101_s20 + $0x60] sm:$0xff] %vm4584_vm5, %v4580_v5  ;;  %v4583_v53 = vadd.f32 %v5160_v0, %v4567_v58 }
 0x594   : > { %v4524_v14 = vpop.f32.mrf.mxu1 }
 0x595   : > { %4600 = vst.msk [vmem:[%s8101_s20 + $0x78] sm:$0xff] %vm4584_vm5, %v4583_v53  ;;  %v4581_v59 = vadd.f32 %v4565_v28, %v4524_v14 }
 0x597   : > { %4598 = vst.msk [vmem:[%s8101_s20 + $0x68] sm:$0xff] %vm4584_vm5, %v4581_v59 }
 0x598 PF: > { %s18_s29 = sadd.s32 1, %s5405_s29   ;;  %s8805_s27 = smov %s5401_s28 }
 0x599   : > { %p15_p5 = scmp.ge.s32.totalorder %s18_s29, 4   ;;  %s8806_s28 = smov %s8808_s30 }
 0x59b   :  { %17 = sbr.rel (!%p15_p5) target bundleno = 2 (0x2), region = 105 }

// kernel: forward.25
= control target key start
LH: loop header
LB: loop body
LE: loop exit
PB: predicated region body
PF: predicated region fallthrough
CT: control target
= control target key end

     0   :  { %vm213_vm0 = vcmask 1044480   ;;  %vm164_vm1 = vcmask 343040   ;;  %vm1427_vm6 = vcmask 523264   ;;  %s3191_s5 = inlined_call_operand.vmem [shape: bf16[42,64], index: 5, kind: input, shape index: {}]   ;;  %s3192_s1 = inlined_call_operand.vmem [shape: f32[256,42], index: 1, kind: input, shape index: {}]   ;;  %s3193_s4 = inlined_call_operand.vmem [shape: bf16[42,64], index: 4, kind: input, shape index: {}]   ;;  %s3194_s6 = inlined_call_operand.vmem [shape: bf16[42,64], index: 6, kind: input, shape index: {}]   ;;  %s3195_s7 = inlined_call_operand.vmem [shape: bf16[42,64], index: 7, kind: input, shape index: {}]   ;;  %s3196_s0 = inlined_call_operand.vmem [shape: f32[256,42], index: 0, kind: input, shape index: {}]   ;;  %s3197_s2 = inlined_call_operand.vmem [shape: f32[256,42], index: 2, kind: input, shape index: {}]   ;;  %s3198_s3 = inlined_call_operand.vmem [shape: f32[256,42], index: 3, kind: input, shape index: {}]   ;;  %s3199_s9 = inlined_call_operand.vmem [shape: bf16[64,100], index: 9, kind: input, shape index: {}]   ;;  %s3200_s8 = inlined_call_operand.vmem [shape: f32[1,64], index: 8, kind: input, shape index: {}]   ;;  %s3201_s10 = inlined_call_operand.vmem [shape: f32[1,100], index: 10, kind: input, shape index: {}]   ;;  %s3202_s11 = inlined_call_operand.vmem [shape: f32[256,100], index: 11, kind: output, shape index: {}]  }
   0x1   :  { %v2167_v0 = vld [vmem:[%s3191_s5 + $0x10] sm:$0x1f]   ;;  %v2168_v1 = vld [vmem:[%s3191_s5 + $0x8] sm:$0xff]   ;;  %v109_v3 = vld [vmem:[%s3192_s1 + $0x80] sm:$0xff] }
   0x2   :  { %2163 = vmatprep.subr.msk.bf16.mxu1 %vm213_vm0, %v2167_v0  ;;  %v215_v2 = vsel %vm213_vm0, %v2167_v0, 0  ;;  %2162 = vmatprep.subr.msk.bf16.mxu0 %vm213_vm0, %v2167_v0  ;;  %v110_v4 = vld [vmem:[%s3192_s1 + $0x88] sm:$0xff]  ;;  %v2169_v5 = vld [vmem:[%s3191_s5] sm:$0xff]   ;;  %v111_v9 = vld [vmem:[%s3192_s1 + $0x90] sm:$0xff] }
   0x3   :  { %2159 = vmatpush3.bf16.msra.mxu1 %v215_v2  ;;  %1965 = vmatpush3.bf16.msra.mxu0 %v215_v2  ;;  %v133_v6 = vpack.c.bf16 %v110_v4, %v109_v3  ;;  %v93_v7 = vld [vmem:[%s3192_s1] sm:$0xff]  ;;  %v94_v8 = vld [vmem:[%s3192_s1 + $0x8] sm:$0xff]  ;;  %v112_v10 = vld [vmem:[%s3192_s1 + $0x98] sm:$0xff] }
   0x4   :  { %2157 = vmatprep.subr.bf16.mxu1 %v2168_v1  ;;  %1966 = vmatprep.subr.bf16.mxu0 %v2168_v1  ;;  %v125_v11 = vpack.c.bf16 %v94_v8, %v93_v7  ;;  %v2170_v12 = vld [vmem:[%s3193_s4 + $0x10] sm:$0x1f]   ;;  %v96_v14 = vld [vmem:[%s3192_s1 + $0x18] sm:$0xff]  ;;  %v113_v15 = vld [vmem:[%s3192_s1 + $0xa0] sm:$0xff]  ;;  %v134_v19 = vpack.c.bf16 %v112_v10, %v111_v9 }
   0x5   :  { %1986 = vmatprep.mubr.msk.bf16.mxu1 %vm164_vm1, %v133_v6  ;;  %v95_v13 = vld [vmem:[%s3192_s1 + $0x10] sm:$0xff]  ;;  %v114_v16 = vld [vmem:[%s3192_s1 + $0xa8] sm:$0xff]  ;;  %v97_v17 = vld [vmem:[%s3192_s1 + $0x20] sm:$0xff]  ;;  %v444_v22 = vsel %vm213_vm0, %v2170_v12, 0 }
   0x6   :  { %1970 = vmatprep.mubr.msk.bf16.mxu0 %vm164_vm1, %v125_v11  ;;  %v98_v18 = vld [vmem:[%s3192_s1 + $0x28] sm:$0xff]  ;;  %v126_v20 = vpack.c.bf16 %v96_v14, %v95_v13  ;;  %v135_v21 = vpack.c.bf16 %v114_v16, %v113_v15  ;;  %v115_v25 = vld [vmem:[%s3192_s1 + $0xb0] sm:$0xff]  ;;  %v116_v26 = vld [vmem:[%s3192_s1 + $0xb8] sm:$0xff] }
   0x7   :  { %2160 = vmatpush3.bf16.msra.mxu1 %v2168_v1  ;;  %1967 = vmatpush3.bf16.msra.mxu0 %v2168_v1  ;;  %v127_v23 = vpack.c.bf16 %v98_v18, %v97_v17  ;;  %v2171_v24 = vld [vmem:[%s3193_s4 + $0x8] sm:$0xff]   ;;  %v99_v27 = vld [vmem:[%s3192_s1 + $0x30] sm:$0xff]  ;;  %v100_v29 = vld [vmem:[%s3192_s1 + $0x38] sm:$0xff]  ;;  %v136_v36 = vpack.c.bf16 %v116_v26, %v115_v25 }
   0x8   :  { %2158 = vmatprep.subr.bf16.mxu1 %v2169_v5  ;;  %1968 = vmatprep.subr.bf16.mxu0 %v2169_v5  ;;  %v2173_v28 = vld [vmem:[%s3194_s6 + $0x10] sm:$0x1f]   ;;  %v117_v30 = vld [vmem:[%s3192_s1 + $0xc0] sm:$0xff]  ;;  %v118_v31 = vld [vmem:[%s3192_s1 + $0xc8] sm:$0xff]  ;;  %v128_v37 = vpack.c.bf16 %v100_v29, %v99_v27 }
   0x9   :  { %v101_v32 = vld [vmem:[%s3192_s1 + $0x40] sm:$0xff]  ;;  %v102_v33 = vld [vmem:[%s3192_s1 + $0x48] sm:$0xff]  ;;  %v727_v35 = vsel %vm213_vm0, %v2173_v28, 0  ;;  %v137_v39 = vpack.c.bf16 %v118_v31, %v117_v30  ;;  %v2176_v42 = vld [vmem:[%s3195_s7 + $0x10] sm:$0x1f]  }
   0xa   :  { %v2172_v34 = vld [vmem:[%s3193_s4] sm:$0xff]   ;;  %v2174_v38 = vld [vmem:[%s3194_s6 + $0x8] sm:$0xff]   ;;  %v129_v40 = vpack.c.bf16 %v102_v33, %v101_v32  ;;  %v119_v43 = vld [vmem:[%s3192_s1 + $0xd0] sm:$0xff]  ;;  %v1042_v14 = vsel %vm213_vm0, %v2176_v42, 0 }
   0xb   :  { %2161 = vmatpush3.bf16.msra.mxu1 %v2169_v5  ;;  %1969 = vmatpush3.bf16.msra.mxu0 %v2169_v5  ;;  %v2175_v41 = vld [vmem:[%s3194_s6] sm:$0xff]   ;;  %v120_v44 = vld [vmem:[%s3192_s1 + $0xd8] sm:$0xff]  ;;  %v103_v45 = vld [vmem:[%s3192_s1 + $0x50] sm:$0xff] }
   0xc   :  { %2164 = vmatprep.subr.msk.bf16.mxu1 %vm213_vm0, %v2170_v12  ;;  %2165 = vmatprep.subr.msk.bf16.mxu0 %vm213_vm0, %v2173_v28  ;;  %v104_v46 = vld [vmem:[%s3192_s1 + $0x58] sm:$0xff]  ;;  %v121_v47 = vld [vmem:[%s3192_s1 + $0xe0] sm:$0xff]  ;;  %v122_v48 = vld [vmem:[%s3192_s1 + $0xe8] sm:$0xff]  ;;  %v138_v51 = vpack.c.bf16 %v120_v44, %v119_v43 }
   0xd   :  { %v105_v49 = vld [vmem:[%s3192_s1 + $0x60] sm:$0xff]  ;;  %v106_v50 = vld [vmem:[%s3192_s1 + $0x68] sm:$0xff]  ;;  %v130_v52 = vpack.c.bf16 %v104_v46, %v103_v45  ;;  %v139_v53 = vpack.c.bf16 %v122_v48, %v121_v47  ;;  %v123_v55 = vld [vmem:[%s3192_s1 + $0xf0] sm:$0xff] }
   0xe   :  { %1987 = vmatmul.mubr.msk.bf16.vlgmr.msra.gmra.mxu1 %vm164_vm1, %v134_v19  ;;  %1971 = vmatmul.mubr.msk.bf16.vlgmr.msra.gmra.mxu0 %vm164_vm1, %v126_v20  ;;  %v131_v54 = vpack.c.bf16 %v106_v50, %v105_v49  ;;  %v124_v56 = vld [vmem:[%s3192_s1 + $0xf8] sm:$0xff]  ;;  %v107_v57 = vld [vmem:[%s3192_s1 + $0x70] sm:$0xff]  ;;  %v39_v59 = vld [vmem:[%s3196_s0] sm:$0xff] }
   0xf   :  { %2003 = vmatpush3.bf16.msra.mxu1 %v444_v22  ;;  %1990 = vmatprep.mubr.msk.bf16.mxu1 %vm164_vm1, %v135_v21  ;;  %v108_v58 = vld [vmem:[%s3192_s1 + $0x78] sm:$0xff]  ;;  %v40_v60 = vld [vmem:[%s3196_s0 + $0x8] sm:$0xff]  ;;  %v607_v61 = vld [vmem:[%s3197_s2] sm:$0xff]  ;;  %v140_v63 = vpack.c.bf16 %v124_v56, %v123_v55 }
  0x10   :  { %1974 = vmatprep.mubr.msk.bf16.mxu0 %vm164_vm1, %v127_v23  ;;  %2004 = vmatprep.subr.bf16.mxu1 %v2171_v24  ;;  %v608_v62 = vld [vmem:[%s3197_s2 + $0x8] sm:$0xff]  ;;  %v132_v0 = vpack.c.bf16 %v108_v58, %v107_v57  ;;  %v71_v1 = vpack.c.bf16 %v40_v60, %v39_v59  ;;  %v41_v3 = vld [vmem:[%s3196_s0 + $0x10] sm:$0xff]  ;;  %v42_v4 = vld [vmem:[%s3196_s0 + $0x18] sm:$0xff] }
  0x11   :  { %2041 = vmatpush3.bf16.msra.mxu0 %v727_v35  ;;  %v639_v2 = vpack.c.bf16 %v608_v62, %v607_v61  ;;  %v609_v5 = vld [vmem:[%s3197_s2 + $0x10] sm:$0xff]  ;;  %v610_v6 = vld [vmem:[%s3197_s2 + $0x18] sm:$0xff]  ;;  %v43_v7 = vld [vmem:[%s3196_s0 + $0x20] sm:$0xff]  ;;  %v72_v11 = vpack.c.bf16 %v42_v4, %v41_v3 }
  0x12   :  { %2042 = vmatprep.subr.bf16.mxu0 %v2174_v38  ;;  %v44_v8 = vld [vmem:[%s3196_s0 + $0x28] sm:$0xff]  ;;  %v611_v9 = vld [vmem:[%s3197_s2 + $0x20] sm:$0xff]  ;;  %v640_v12 = vpack.c.bf16 %v610_v6, %v609_v5  ;;  %v45_v17 = vld [vmem:[%s3196_s0 + $0x30] sm:$0xff] }
  0x13   :  { %2005 = vmatpush3.bf16.msra.mxu1 %v2171_v24  ;;  %v612_v10 = vld [vmem:[%s3197_s2 + $0x28] sm:$0xff]  ;;  %v73_v13 = vpack.c.bf16 %v44_v8, %v43_v7  ;;  %v46_v18 = vld [vmem:[%s3196_s0 + $0x38] sm:$0xff]  ;;  %v613_v19 = vld [vmem:[%s3197_s2 + $0x30] sm:$0xff] }
  0x14   :  { %2006 = vmatprep.subr.bf16.mxu1 %v2172_v34  ;;  %v641_v15 = vpack.c.bf16 %v612_v10, %v611_v9  ;;  %v2177_v16 = vld [vmem:[%s3195_s7 + $0x8] sm:$0xff]   ;;  %v614_v20 = vld [vmem:[%s3197_s2 + $0x38] sm:$0xff]  ;;  %v47_v21 = vld [vmem:[%s3196_s0 + $0x40] sm:$0xff]  ;;  %v74_v26 = vpack.c.bf16 %v46_v18, %v45_v17 }
  0x15   :  { %2043 = vmatpush3.bf16.msra.mxu0 %v2174_v38  ;;  %v48_v22 = vld [vmem:[%s3196_s0 + $0x48] sm:$0xff]  ;;  %v615_v23 = vld [vmem:[%s3197_s2 + $0x40] sm:$0xff]  ;;  %v642_v27 = vpack.c.bf16 %v614_v20, %v613_v19  ;;  %v49_v30 = vld [vmem:[%s3196_s0 + $0x50] sm:$0xff] }
  0x16   :  { %1991 = vmatmul.mubr.msk.bf16.gmra.mxu1 %vm164_vm1, %v136_v36  ;;  %1975 = vmatmul.mubr.msk.bf16.gmra.mxu0 %vm164_vm1, %v128_v37  ;;  %v616_v24 = vld [vmem:[%s3197_s2 + $0x48] sm:$0xff]  ;;  %v2178_v25 = vld [vmem:[%s3195_s7] sm:$0xff]   ;;  %v75_v28 = vpack.c.bf16 %v48_v22, %v47_v21  ;;  %v50_v31 = vld [vmem:[%s3196_s0 + $0x58] sm:$0xff] }
  0x17   :  { %1994 = vmatprep.mubr.msk.bf16.mxu1 %vm164_vm1, %v137_v39  ;;  %1978 = vmatprep.mubr.msk.bf16.mxu0 %vm164_vm1, %v129_v40  ;;  %v643_v29 = vpack.c.bf16 %v616_v24, %v615_v23  ;;  %v617_v32 = vld [vmem:[%s3197_s2 + $0x50] sm:$0xff]  ;;  %v618_v33 = vld [vmem:[%s3197_s2 + $0x58] sm:$0xff]  ;;  %v52_v35 = vld [vmem:[%s3196_s0 + $0x68] sm:$0xff]  ;;  %v76_v38 = vpack.c.bf16 %v50_v31, %v49_v30 }
  0x18   :  { %2007 = vmatpush3.bf16.msra.mxu1 %v2172_v34  ;;  %2044 = vmatprep.subr.bf16.mxu0 %v2175_v41  ;;  %v51_v34 = vld [vmem:[%s3196_s0 + $0x60] sm:$0xff]  ;;  %v620_v37 = vld [vmem:[%s3197_s2 + $0x68] sm:$0xff]  ;;  %v644_v39 = vpack.c.bf16 %v618_v33, %v617_v32  ;;  %v54_v43 = vld [vmem:[%s3196_s0 + $0x78] sm:$0xff] }
  0x19   :  { %2166 = vmatprep.subr.msk.bf16.mxu1 %vm213_vm0, %v2176_v42  ;;  %2045 = vmatpush3.bf16.msra.mxu0 %v2175_v41  ;;  %v619_v36 = vld [vmem:[%s3197_s2 + $0x60] sm:$0xff]  ;;  %v77_v40 = vpack.c.bf16 %v52_v35, %v51_v34  ;;  %v53_v42 = vld [vmem:[%s3196_s0 + $0x70] sm:$0xff]  ;;  %v622_v45 = vld [vmem:[%s3197_s2 + $0x78] sm:$0xff] }
  0x1a   :  { %v645_v41 = vpack.c.bf16 %v620_v37, %v619_v36  ;;  %v621_v44 = vld [vmem:[%s3197_s2 + $0x70] sm:$0xff]  ;;  %v55_v46 = vld [vmem:[%s3196_s0 + $0x80] sm:$0xff]  ;;  %v56_v47 = vld [vmem:[%s3196_s0 + $0x88] sm:$0xff]  ;;  %v78_v50 = vpack.c.bf16 %v54_v43, %v53_v42 }
  0x1b   :  { %v623_v48 = vld [vmem:[%s3197_s2 + $0x80] sm:$0xff]  ;;  %v624_v49 = vld [vmem:[%s3197_s2 + $0x88] sm:$0xff]  ;;  %v58_v55 = vld [vmem:[%s3196_s0 + $0x98] sm:$0xff] }
  0x1c   :  { %v625_v56 = vld [vmem:[%s3197_s2 + $0x90] sm:$0xff]  ;;  %v626_v57 = vld [vmem:[%s3197_s2 + $0x98] sm:$0xff]  ;;  %v59_v58 = vld [vmem:[%s3196_s0 + $0xa0] sm:$0xff] }
  0x1d   :  { %v60_v59 = vld [vmem:[%s3196_s0 + $0xa8] sm:$0xff]  ;;  %v627_v60 = vld [vmem:[%s3197_s2 + $0xa0] sm:$0xff]  ;;  %v62_v3 = vld [vmem:[%s3196_s0 + $0xb8] sm:$0xff] }
  0x1e   :  { %1995 = vmatmul.mubr.msk.bf16.gmra.mxu1 %vm164_vm1, %v138_v51  ;;  %1979 = vmatmul.mubr.msk.bf16.gmra.mxu0 %vm164_vm1, %v130_v52  ;;  %v646_v51 = vpack.c.bf16 %v622_v45, %v621_v44  ;;  %v79_v52 = vpack.c.bf16 %v56_v47, %v55_v46  ;;  %v628_v61 = vld [vmem:[%s3197_s2 + $0xa8] sm:$0xff]  ;;  %v629_v4 = vld [vmem:[%s3197_s2 + $0xb0] sm:$0xff]  ;;  %v630_v5 = vld [vmem:[%s3197_s2 + $0xb8] sm:$0xff] }
  0x1f   :  { %1998 = vmatprep.mubr.msk.bf16.mxu1 %vm164_vm1, %v139_v53  ;;  %1982 = vmatprep.mubr.msk.bf16.mxu0 %vm164_vm1, %v131_v54  ;;  %v647_v53 = vpack.c.bf16 %v624_v49, %v623_v48  ;;  %v57_v54 = vld [vmem:[%s3196_s0 + $0x90] sm:$0xff]  ;;  %v63_v6 = vld [vmem:[%s3196_s0 + $0xc0] sm:$0xff]  ;;  %v64_v7 = vld [vmem:[%s3196_s0 + $0xc8] sm:$0xff] }
  0x20   :  { %v80_v62 = vpack.c.bf16 %v58_v55, %v57_v54  ;;  %v631_v8 = vld [vmem:[%s3197_s2 + $0xc0] sm:$0xff]  ;;  %v632_v9 = vld [vmem:[%s3197_s2 + $0xc8] sm:$0xff]  ;;  %v634_v17 = vld [vmem:[%s3197_s2 + $0xd8] sm:$0xff] }
  0x21   :  { %v67_v18 = vld [vmem:[%s3196_s0 + $0xe0] sm:$0xff]  ;;  %v68_v19 = vld [vmem:[%s3196_s0 + $0xe8] sm:$0xff]  ;;  %v924_v35 = vld [vmem:[%s3198_s3 + $0x10] sm:$0xff] }
  0x22   :  { %v635_v20 = vld [vmem:[%s3197_s2 + $0xe0] sm:$0xff]  ;;  %v636_v21 = vld [vmem:[%s3197_s2 + $0xe8] sm:$0xff]  ;;  %v85_v24 = vpack.c.bf16 %v68_v19, %v67_v18  ;;  %v925_v36 = vld [vmem:[%s3198_s3 + $0x18] sm:$0xff] }
  0x23   :  { %v922_v30 = vld [vmem:[%s3198_s3] sm:$0xff]  ;;  %v923_v31 = vld [vmem:[%s3198_s3 + $0x8] sm:$0xff]  ;;  %v929_v42 = vld [vmem:[%s3198_s3 + $0x38] sm:$0xff] }
  0x24   :  { %v954_v34 = vpack.c.bf16 %v923_v31, %v922_v30  ;;  %v926_v37 = vld [vmem:[%s3198_s3 + $0x20] sm:$0xff]  ;;  %v931_v44 = vld [vmem:[%s3198_s3 + $0x48] sm:$0xff]  ;;  %v932_v47 = vld [vmem:[%s3198_s3 + $0x50] sm:$0xff] }
  0x25   :  { %v930_v43 = vld [vmem:[%s3198_s3 + $0x40] sm:$0xff]  ;;  %v933_v48 = vld [vmem:[%s3198_s3 + $0x58] sm:$0xff] }
  0x26   :  { %1999 = vmatmul.mubr.msk.bf16.gmra.mxu1 %vm164_vm1, %v140_v63  ;;  %1983 = vmatmul.mubr.msk.bf16.gmra.mxu0 %vm164_vm1, %v132_v0  ;;  %v648_v63 = vpack.c.bf16 %v626_v57, %v625_v56  ;;  %v81_v0 = vpack.c.bf16 %v60_v59, %v59_v58  ;;  %v958_v46 = vpack.c.bf16 %v931_v44, %v930_v43  ;;  %v934_v49 = vld [vmem:[%s3198_s3 + $0x60] sm:$0xff]  ;;  %v937_v54 = vld [vmem:[%s3198_s3 + $0x78] sm:$0xff]  ;;  %v939_v56 = vld [vmem:[%s3198_s3 + $0x88] sm:$0xff] }
  0x27   :  { %2008 = vmatprep.mubr.msk.bf16.mxu1 %vm164_vm1, %v71_v1  ;;  %2046 = vmatprep.mubr.msk.bf16.mxu0 %vm164_vm1, %v639_v2  ;;  %v649_v1 = vpack.c.bf16 %v628_v61, %v627_v60  ;;  %v61_v2 = vld [vmem:[%s3196_s0 + $0xb0] sm:$0xff]  ;;  %v938_v55 = vld [vmem:[%s3198_s3 + $0x80] sm:$0xff]  ;;  %v2179_v57 = vld [vmem:[%s3199_s9 + $0x18] sm:$0xff]  }
  0x28   :  { %v82_v10 = vpack.c.bf16 %v62_v3, %v61_v2  ;;  %2116 = vmatprep.subr.bf16.mxu0 %v2179_v57  ;;  %v962_v59 = vpack.c.bf16 %v939_v56, %v938_v55  ;;  %v940_v60 = vld [vmem:[%s3198_s3 + $0x90] sm:$0xff]  ;;  %v941_v61 = vld [vmem:[%s3198_s3 + $0x98] sm:$0xff]  ;;  %v2182_v19 = vld [vmem:[%s3199_s9] sm:$0xff]  }
  0x29   :  { %v944_v2 = vld [vmem:[%s3198_s3 + $0xb0] sm:$0xff]  ;;  %v945_v3 = vld [vmem:[%s3198_s3 + $0xb8] sm:$0xff] }
  0x2e   :  { %2009 = vmatmul.mubr.msk.bf16.vlgmr.msra.gmra.mxu1 %vm164_vm1, %v72_v11  ;;  %2047 = vmatmul.mubr.msk.bf16.vlgmr.msra.gmra.mxu0 %vm164_vm1, %v640_v12  ;;  %v650_v11 = vpack.c.bf16 %v630_v5, %v629_v4  ;;  %v83_v12 = vpack.c.bf16 %v64_v7, %v63_v6  ;;  %v2180_v4 = vld [vmem:[%s3199_s9 + $0x10] sm:$0xff]   ;;  %v946_v5 = vld [vmem:[%s3198_s3 + $0xc0] sm:$0xff]  ;;  %v947_v6 = vld [vmem:[%s3198_s3 + $0xc8] sm:$0xff]  ;;  %v965_v7 = vpack.c.bf16 %v945_v3, %v944_v2 }
  0x2f   :  { %2079 = vmatpush3.bf16.msra.mxu1 %v1042_v14  ;;  %2012 = vmatprep.mubr.msk.bf16.mxu1 %vm164_vm1, %v73_v13  ;;  %v651_v13 = vpack.c.bf16 %v632_v9, %v631_v8  ;;  %v65_v14 = vld [vmem:[%s3196_s0 + $0xd0] sm:$0xff]  ;;  %v966_v8 = vpack.c.bf16 %v947_v6, %v946_v5 }
  0x30   :  { %2050 = vmatprep.mubr.msk.bf16.mxu0 %vm164_vm1, %v641_v15  ;;  %2080 = vmatprep.subr.bf16.mxu1 %v2177_v16  ;;  %v66_v15 = vld [vmem:[%s3196_s0 + $0xd8] sm:$0xff]  ;;  %v948_v9 = vld [vmem:[%s3198_s3 + $0xd0] sm:$0xff] }
  0x31   :  { %v84_v22 = vpack.c.bf16 %v66_v15, %v65_v14  ;;  %2117 = vmatpush3.bf16.msra.mxu0 %v2179_v57  ;;  %v952_v15 = vld [vmem:[%s3198_s3 + $0xf0] sm:$0xff] }
  0x32   :  { %2118 = vmatprep.subr.bf16.mxu0 %v2180_v4 }
  0x33   :  { %2081 = vmatpush3.bf16.msra.mxu1 %v2177_v16  ;;  %v633_v16 = vld [vmem:[%s3197_s2 + $0xd0] sm:$0xff] }
  0x34   :  { %2082 = vmatprep.subr.bf16.mxu1 %v2178_v25  ;;  %v652_v23 = vpack.c.bf16 %v634_v17, %v633_v16  ;;  %v953_v16 = vld [vmem:[%s3198_s3 + $0xf8] sm:$0xff]  ;;  %v2181_v17 = vld [vmem:[%s3199_s9 + $0x8] sm:$0xff]  }
  0x35   :  { %2119 = vmatpush3.bf16.msra.mxu0 %v2180_v4  ;;  %v969_v18 = vpack.c.bf16 %v953_v16, %v952_v15 }
  0x36   :  { %2013 = vmatmul.mubr.msk.bf16.gmra.mxu1 %vm164_vm1, %v74_v26  ;;  %2051 = vmatmul.mubr.msk.bf16.gmra.mxu0 %vm164_vm1, %v642_v27  ;;  %v69_v26 = vld [vmem:[%s3196_s0 + $0xf0] sm:$0xff]  ;;  %v70_v27 = vld [vmem:[%s3196_s0 + $0xf8] sm:$0xff] }
  0x37   :  { %2016 = vmatprep.mubr.msk.bf16.mxu1 %vm164_vm1, %v75_v28  ;;  %2054 = vmatprep.mubr.msk.bf16.mxu0 %vm164_vm1, %v643_v29  ;;  %v637_v28 = vld [vmem:[%s3197_s2 + $0xf0] sm:$0xff]  ;;  %v638_v29 = vld [vmem:[%s3197_s2 + $0xf8] sm:$0xff]  ;;  %v86_v32 = vpack.c.bf16 %v70_v27, %v69_v26 }
  0x38   :  { %2083 = vmatpush3.bf16.msra.mxu1 %v2178_v25  ;;  %v653_v25 = vpack.c.bf16 %v636_v21, %v635_v20  ;;  %v654_v33 = vpack.c.bf16 %v638_v29, %v637_v28  ;;  %2120 = vmatprep.subr.bf16.mxu0 %v2181_v17 }
  0x39   :  { %2121 = vmatpush3.bf16.msra.mxu0 %v2181_v17 }
  0x3a   :  { %2122 = vmatprep.subr.bf16.mxu0 %v2182_v19 }
  0x3d   :  { %2123 = vmatpush3.bf16.msra.mxu0 %v2182_v19 }
  0x3e   :  { %2017 = vmatmul.mubr.msk.bf16.gmra.mxu1 %vm164_vm1, %v76_v38  ;;  %2055 = vmatmul.mubr.msk.bf16.gmra.mxu0 %vm164_vm1, %v644_v39  ;;  %v927_v38 = vld [vmem:[%s3198_s3 + $0x28] sm:$0xff]  ;;  %v955_v39 = vpack.c.bf16 %v925_v36, %v924_v35 }
  0x3f   :  { %2020 = vmatprep.mubr.msk.bf16.mxu1 %vm164_vm1, %v77_v40  ;;  %2058 = vmatprep.mubr.msk.bf16.mxu0 %vm164_vm1, %v645_v41  ;;  %v956_v40 = vpack.c.bf16 %v927_v38, %v926_v37  ;;  %v928_v41 = vld [vmem:[%s3198_s3 + $0x30] sm:$0xff] }
  0x40   :  { %v957_v45 = vpack.c.bf16 %v929_v42, %v928_v41 }
  0x46   :  { %2021 = vmatmul.mubr.msk.bf16.gmra.mxu1 %vm164_vm1, %v78_v50  ;;  %2059 = vmatmul.mubr.msk.bf16.gmra.mxu0 %vm164_vm1, %v646_v51  ;;  %v935_v50 = vld [vmem:[%s3198_s3 + $0x68] sm:$0xff]  ;;  %v959_v51 = vpack.c.bf16 %v933_v48, %v932_v47 }
  0x47   :  { %2024 = vmatprep.mubr.msk.bf16.mxu1 %vm164_vm1, %v79_v52  ;;  %2062 = vmatprep.mubr.msk.bf16.mxu0 %vm164_vm1, %v647_v53  ;;  %v960_v52 = vpack.c.bf16 %v935_v50, %v934_v49  ;;  %v936_v53 = vld [vmem:[%s3198_s3 + $0x70] sm:$0xff] }
  0x48   :  { %v961_v58 = vpack.c.bf16 %v937_v54, %v936_v53 }
  0x4e   :  { %2025 = vmatmul.mubr.msk.bf16.gmra.mxu1 %vm164_vm1, %v80_v62  ;;  %2063 = vmatmul.mubr.msk.bf16.gmra.mxu0 %vm164_vm1, %v648_v63  ;;  %v942_v62 = vld [vmem:[%s3198_s3 + $0xa0] sm:$0xff]  ;;  %v943_v63 = vld [vmem:[%s3198_s3 + $0xa8] sm:$0xff] }
  0x4f   :  { %2028 = vmatprep.mubr.msk.bf16.mxu1 %vm164_vm1, %v81_v0  ;;  %2066 = vmatprep.mubr.msk.bf16.mxu0 %vm164_vm1, %v649_v1  ;;  %v963_v0 = vpack.c.bf16 %v941_v61, %v940_v60  ;;  %v964_v1 = vpack.c.bf16 %v943_v63, %v942_v62 }
  0x56   :  { %2029 = vmatmul.mubr.msk.bf16.gmra.mxu1 %vm164_vm1, %v82_v10  ;;  %2067 = vmatmul.mubr.msk.bf16.gmra.mxu0 %vm164_vm1, %v650_v11  ;;  %v949_v10 = vld [vmem:[%s3198_s3 + $0xd8] sm:$0xff]  ;;  %v950_v11 = vld [vmem:[%s3198_s3 + $0xe0] sm:$0xff] }
  0x57   :  { %2032 = vmatprep.mubr.msk.bf16.mxu1 %vm164_vm1, %v83_v12  ;;  %2070 = vmatprep.mubr.msk.bf16.mxu0 %vm164_vm1, %v651_v13  ;;  %v951_v12 = vld [vmem:[%s3198_s3 + $0xe8] sm:$0xff]  ;;  %v967_v13 = vpack.c.bf16 %v949_v10, %v948_v9 }
  0x58   :  { %v968_v14 = vpack.c.bf16 %v951_v12, %v950_v11 }
  0x5e   :  { %2033 = vmatmul.mubr.msk.bf16.gmra.mxu1 %vm164_vm1, %v84_v22  ;;  %2071 = vmatmul.mubr.msk.bf16.gmra.mxu0 %vm164_vm1, %v652_v23 }
  0x5f   :  { %2036 = vmatprep.mubr.msk.bf16.mxu1 %vm164_vm1, %v85_v24  ;;  %2074 = vmatprep.mubr.msk.bf16.mxu0 %vm164_vm1, %v653_v25 }
  0x66   :  { %2037 = vmatmul.mubr.msk.bf16.gmra.mxu1 %vm164_vm1, %v86_v32  ;;  %2075 = vmatmul.mubr.msk.bf16.gmra.mxu0 %vm164_vm1, %v654_v33 }
  0x67   :  { %2084 = vmatprep.mubr.msk.bf16.mxu1 %vm164_vm1, %v954_v34 }
  0x6e   :  { %2085 = vmatmul.mubr.msk.bf16.vlgmr.msra.gmra.mxu1 %vm164_vm1, %v955_v39 }
  0x6f   :  { %2088 = vmatprep.mubr.msk.bf16.mxu1 %vm164_vm1, %v956_v40 }
  0x76   :  { %2089 = vmatmul.mubr.msk.bf16.gmra.mxu1 %vm164_vm1, %v957_v45 }
  0x77   :  { %2092 = vmatprep.mubr.msk.bf16.mxu1 %vm164_vm1, %v958_v46 }
  0x7e   :  { %2093 = vmatmul.mubr.msk.bf16.gmra.mxu1 %vm164_vm1, %v959_v51 }
  0x7f   :  { %2096 = vmatprep.mubr.msk.bf16.mxu1 %vm164_vm1, %v960_v52 }
  0x86   :  { %2097 = vmatmul.mubr.msk.bf16.gmra.mxu1 %vm164_vm1, %v961_v58 }
  0x87   :  { %2100 = vmatprep.mubr.msk.bf16.mxu1 %vm164_vm1, %v962_v59 }
  0x8e   :  { %2101 = vmatmul.mubr.msk.bf16.gmra.mxu1 %vm164_vm1, %v963_v0 }
  0x8f   :  { %2104 = vmatprep.mubr.msk.bf16.mxu1 %vm164_vm1, %v964_v1 }
  0x96   :  { %2105 = vmatmul.mubr.msk.bf16.gmra.mxu1 %vm164_vm1, %v965_v7 }
  0x97   :  { %2108 = vmatprep.mubr.msk.bf16.mxu1 %vm164_vm1, %v966_v8 }
  0x9e   :  { %2109 = vmatmul.mubr.msk.bf16.gmra.mxu1 %vm164_vm1, %v967_v13 }
  0x9f   :  { %2112 = vmatprep.mubr.msk.bf16.mxu1 %vm164_vm1, %v968_v14 }
  0xa6   :  { %2113 = vmatmul.mubr.msk.bf16.gmra.mxu1 %vm164_vm1, %v969_v18 }
  0xce   :  { %v1988_v20 = vpop.f32.mrf.mxu1  ;;  %v2748_v21 = vpop.f32.mrf.mxu0 }
  0xd0   :  { %v315_v22 = vpop.f32.mrf.mxu1  ;;  %v2750_v23 = vpop.f32.mrf.mxu0 }
  0xd2   :  { %v1989_v24 = vpop.f32.mrf.mxu1  ;;  %v2752_v25 = vpop.f32.mrf.mxu0 }
  0xd4   :  { %v2754_v26 = vpop.f32.mrf.mxu1  ;;  %v2756_v27 = vpop.f32.mrf.mxu0 }
  0xd5   :  { %3203 = vst [vmem:[#allocation2_spill] sm:$0xff] %v2754_v26 }
  0xd6   :  { %v1992_v28 = vpop.f32.mrf.mxu1  ;;  %v2758_v29 = vpop.f32.mrf.mxu0 }
  0xd8   :  { %v331_v30 = vpop.f32.mrf.mxu1  ;;  %v2760_v31 = vpop.f32.mrf.mxu0 }
  0xda   :  { %v1993_v32 = vpop.f32.mrf.mxu1  ;;  %v2762_v33 = vpop.f32.mrf.mxu0 }
  0xdc   :  { %v2764_v34 = vpop.f32.mrf.mxu1  ;;  %v2766_v35 = vpop.f32.mrf.mxu0 }
  0xdd   :  { %3204 = vst [vmem:[#allocation3_spill] sm:$0xff] %v2764_v34 }
  0xde   :  { %v1996_v36 = vpop.f32.mrf.mxu1  ;;  %v2768_v37 = vpop.f32.mrf.mxu0 }
  0xe0   :  { %v347_v38 = vpop.f32.mrf.mxu1  ;;  %v2770_v39 = vpop.f32.mrf.mxu0 }
  0xe2   :  { %v1997_v40 = vpop.f32.mrf.mxu1  ;;  %v2772_v41 = vpop.f32.mrf.mxu0 }
  0xe4   :  { %v2774_v42 = vpop.f32.mrf.mxu1  ;;  %v2776_v43 = vpop.f32.mrf.mxu0 }
  0xe5   :  { %3205 = vst [vmem:[#allocation4_spill] sm:$0xff] %v2774_v42 }
  0xe6   :  { %v2000_v44 = vpop.f32.mrf.mxu1  ;;  %v2778_v45 = vpop.f32.mrf.mxu0 }
  0xe8   :  { %v2780_v46 = vpop.f32.mrf.mxu1  ;;  %v2782_v47 = vpop.f32.mrf.mxu0 }
  0xea   :  { %v2784_v48 = vpop.f32.mrf.mxu1  ;;  %v2786_v49 = vpop.f32.mrf.mxu0 }
  0xec   :  { %v2788_v50 = vpop.f32.mrf.mxu1  ;;  %v2790_v51 = vpop.f32.mrf.mxu0 }
  0xed   :  { %3206 = vst [vmem:[#allocation5_spill] sm:$0xff] %v2788_v50  ;;  %3207 = vst [vmem:[#allocation6_spill] sm:$0xff] %v2790_v51 }
  0xee   :  { %v2010_v52 = vpop.f32.mrf.mxu1  ;;  %v2048_v53 = vpop.f32.mrf.mxu0 }
  0xf0   :  { %v480_v54 = vpop.f32.mrf.mxu1  ;;  %v2792_v55 = vpop.f32.mrf.mxu0 }
  0xf2   :  { %v2011_v56 = vpop.f32.mrf.mxu1  ;;  %v2796_v58 = vpop.f32.mrf.mxu0 }
  0xf4   :  { %v2794_v57 = vpop.f32.mrf.mxu1  ;;  %v2802_v61 = vpop.f32.mrf.mxu0 }
  0xf6   :  { %v2798_v59 = vpop.f32.mrf.mxu1  ;;  %v2808_v0 = vpop.f32.mrf.mxu0 }
  0xf8   :  { %v2800_v60 = vpop.f32.mrf.mxu1  ;;  %v2814_v3 = vpop.f32.mrf.mxu0 }
  0xfa   :  { %v2804_v62 = vpop.f32.mrf.mxu1  ;;  %v2820_v6 = vpop.f32.mrf.mxu0 }
  0xfc   :  { %v2806_v63 = vpop.f32.mrf.mxu1  ;;  %v2826_v9 = vpop.f32.mrf.mxu0 }
  0xfe   :  { %v2810_v1 = vpop.f32.mrf.mxu1  ;;  %v2832_v12 = vpop.f32.mrf.mxu0 }
 0x100   :  { %v2812_v2 = vpop.f32.mrf.mxu1  ;;  %v2836_v16 = vpop.f32.mrf.mxu0 }
 0x102   :  { %v2816_v4 = vpop.f32.mrf.mxu1  ;;  %v2844_v42 = vpop.f32.mrf.mxu0 }
 0x104   :  { %v2818_v5 = vpop.f32.mrf.mxu1  ;;  %v2848_v51 = vpop.f32.mrf.mxu0 }
 0x106   :  { %v2822_v7 = vpop.f32.mrf.mxu1 }
 0x108   :  { %v2824_v8 = vpop.f32.mrf.mxu1 }
 0x10a   :  { %v2828_v10 = vpop.f32.mrf.mxu1 }
 0x10c   :  { %v2830_v11 = vpop.f32.mrf.mxu1 }
 0x10d   :  { %3208 = vst [vmem:[#allocation7_spill] sm:$0xff] %v2830_v11 }
 0x10e   :  { %v2026_v13 = vpop.f32.mrf.mxu1 }
 0x10f   :  { %v2834_v14 = vadd.f32 %v2026_v13, %v1988_v20 }
 0x110   :  { %v544_v15 = vpop.f32.mrf.mxu1 }
 0x111   :  { %3209 = vst [vmem:[#allocation8_spill] sm:$0xff] %v2834_v14  ;;  %v2838_v17 = vadd.f32 %v544_v15, %v315_v22  ;;  %v2856_v15 = vpop.f32.mrf.mxu0 }
 0x112   :  { %v2027_v18 = vpop.f32.mrf.mxu1 }
 0x113   :  { %v2840_v19 = vadd.f32 %v2027_v18, %v1989_v24 }
 0x114   :  { %v2842_v50 = vpop.f32.mrf.mxu1 }
 0x115   :  { %3210 = vst [vmem:[#allocation9_spill] sm:$0xff] %v2840_v19  ;;  %3211 = vst [vmem:[#allocation10_spill] sm:$0xff] %v2842_v50  ;;  %v2860_v50 = vpop.f32.mrf.mxu0 }
 0x116   :  { %v2030_v34 = vpop.f32.mrf.mxu1 }
 0x117   :  { %v2846_v26 = vadd.f32 %v2030_v34, %v1992_v28 }
 0x118   :  { %v560_v11 = vpop.f32.mrf.mxu1 }
 0x119   :  { %3212 = vst [vmem:[#allocation11_spill] sm:$0xff] %v2846_v26  ;;  %v2850_v20 = vadd.f32 %v560_v11, %v331_v30  ;;  %v2868_v11 = vpop.f32.mrf.mxu0 }
 0x11a   :  { %v2031_v13 = vpop.f32.mrf.mxu1 }
 0x11b   :  { %v2852_v14 = vadd.f32 %v2031_v13, %v1993_v32 }
 0x11c   :  { %v2854_v22 = vpop.f32.mrf.mxu1 }
 0x11d   :  { %3213 = vst [vmem:[#allocation12_spill] sm:$0xff] %v2852_v14  ;;  %3214 = vst [vmem:[#allocation13_spill] sm:$0xff] %v2854_v22  ;;  %v489_v22 = vadd.f32 %v2010_v52, %v2748_v21  ;;  %v2890_v21 = vld [vmem:[%s3200_s8] ss:$0 sm:$0xff] }
 0x11e   :  { %v2034_v24 = vpop.f32.mrf.mxu1 }
 0x11f   :  { %v2858_v18 = vadd.f32 %v2034_v24, %v1996_v36  ;;  %v2873_v36 = vpop.f32.mrf.mxu0 }
 0x120   :  { %v576_v19 = vpop.f32.mrf.mxu1 }
 0x121   :  { %v2862_v28 = vadd.f32 %v576_v19, %v347_v38  ;;  %v481_v19 = vadd.f32 %v480_v54, %v2750_v23  ;;  %v484_v23 = vadd.f32 %v2794_v57, %v2756_v27 }
 0x122   :  { %v2035_v34 = vpop.f32.mrf.mxu1 }
 0x123   :  { %v2864_v26 = vadd.f32 %v2035_v34, %v1997_v40  ;;  %v891_v27 = vadd.f32 %v2802_v61, %v484_v23 }
 0x124   :  { %v2866_v30 = vpop.f32.mrf.mxu1 }
 0x125   :  { %3215 = vst [vmem:[#allocation14_spill] sm:$0xff] %v2864_v26  ;;  %v892_v26 = vadd.f32 %v2048_v53, %v489_v22  ;;  %v497_v22 = vadd.f32 %v2800_v60, %v2760_v31  ;;  %v500_v60 = vadd.f32 %v2806_v63, %v2766_v35 }
 0x126   :  { %v2038_v32 = vpop.f32.mrf.mxu1 }
 0x127   :  { %v2870_v13 = vadd.f32 %v2038_v32, %v2000_v44  ;;  %v492_v44 = vadd.f32 %v2011_v56, %v2752_v25  ;;  %v2885_v32 = vpop.f32.mrf.mxu0  ;;  %v505_v25 = vadd.f32 %v2798_v59, %v2758_v29  ;;  %v894_v31 = vadd.f32 %v2814_v3, %v497_v22 }
 0x128   :  { %v592_v14 = vpop.f32.mrf.mxu1 }
 0x129   :  { %3216 = vst [vmem:[#allocation15_spill] sm:$0xff] %v2870_v13  ;;  %v2876_v24 = vadd.f32 %v592_v14, %v2780_v46  ;;  %v890_v46 = vadd.f32 %v2792_v55, %v481_v19  ;;  %v893_v54 = vadd.f32 %v2796_v58, %v492_v44  ;;  %v2898_v53 = vpop.f32.mrf.mxu0 }
 0x12a   :  { %v2039_v38 = vpop.f32.mrf.mxu1 }
 0x12b   :  { %v2880_v40 = vadd.f32 %v2039_v38, %v2784_v48  ;;  %v2907_v29 = vpop.f32.mrf.mxu0 }
 0x12c   :  { %v2882_v34 = vpop.f32.mrf.mxu1 }
 0x12e   :  { %v2086_v13 = vpop.f32.mrf.mxu1 }
 0x12f   :  { %v1207_v52 = vadd.f32 %v2086_v13, %v892_v26  ;;  %v508_v26 = vadd.f32 %v2804_v62, %v2762_v33  ;;  %v896_v13 = vadd.f32 %v2808_v0, %v505_v25  ;;  %v521_v0 = vadd.f32 %v2810_v1, %v2768_v37 }
 0x130   :  { %v1078_v48 = vpop.f32.mrf.mxu1  ;;  %v895_v37 = vadd.f32 %v2826_v9, %v500_v60 }
 0x131   :  { %v1246_v56 = vadd.f32 %v2890_v21, %v1207_v52  ;;  %v1205_v14 = vadd.f32 %v1078_v48, %v890_v46  ;;  %v897_v61 = vadd.f32 %v2820_v6, %v508_v26  ;;  %v513_v52 = vadd.f32 %v2812_v2, %v2770_v39 }
 0x132   :  { %v2087_v38 = vpop.f32.mrf.mxu1  ;;  %v900_v39 = vadd.f32 %v2832_v12, %v521_v0  ;;  %v524_v2 = vadd.f32 %v2816_v4, %v2772_v41  ;;  %v516_v12 = vadd.f32 %v2818_v5, %v2776_v43 }
 0x133   :  { %v1208_v55 = vadd.f32 %v2087_v38, %v893_v54  ;;  %v1310_v57 = vmul.f32 0.01, %v1246_v56  ;;  %vm1278_vm2 = vcmp.ge.f32.partialorder %v1246_v56, 0.0  ;;  %v1244_v59 = vadd.f32 %v2890_v21, %v1205_v14  ;;  %v2920_v54 = vpop.f32.mrf.mxu0 }
 0x134   :  { %v1081_v58 = vpop.f32.mrf.mxu1  ;;  %v898_v9 = vadd.f32 %v2836_v16, %v513_v52 }
 0x135   :  { %v1247_v19 = vadd.f32 %v2890_v21, %v1208_v55  ;;  %v1206_v33 = vadd.f32 %v1081_v58, %v891_v27  ;;  %v1342_v23 = vsel %vm1278_vm2, %v1246_v56, %v1310_v57  ;;  %v1308_v35 = vmul.f32 0.01, %v1244_v59  ;;  %v2927_v27 = vpop.f32.mrf.mxu0 }
 0x136   :  { %v2090_v62 = vpop.f32.mrf.mxu1  ;;  %vm1276_vm4 = vcmp.ge.f32.partialorder %v1244_v59, 0.0 }
 0x137   :  { %vm1279_vm3 = vcmp.ge.f32.partialorder %v1247_v19, 0.0  ;;  %v1311_v44 = vmul.f32 0.01, %v1247_v19  ;;  %v1211_v46 = vadd.f32 %v2090_v62, %v896_v13  ;;  %v1245_v48 = vadd.f32 %v2890_v21, %v1206_v33 }
 0x138   :  { %v1094_v3 = vpop.f32.mrf.mxu1  ;;  %v1340_v57 = vsel %vm1276_vm4, %v1244_v59, %v1308_v35  ;;  %v901_v33 = vadd.f32 %v2844_v42, %v524_v2  ;;  %v537_v59 = vadd.f32 %v2822_v7, %v2778_v45  ;;  %v899_v7 = vadd.f32 %v2848_v51, %v516_v12 }
 0x139   :  { %v1343_v63 = vsel %vm1279_vm3, %v1247_v19, %v1311_v44  ;;  %v1250_v25 = vadd.f32 %v2890_v21, %v1211_v46  ;;  %v1209_v6 = vadd.f32 %v1094_v3, %v894_v31  ;;  %vm1277_vm5 = vcmp.ge.f32.partialorder %v1245_v48, 0.0  ;;  %v2939_v44 = vpop.f32.mrf.mxu0 }
 0x13a   :  { %v1373_v14 = vpack.c.bf16 %v1343_v63, %v1342_v23  ;;  %v1309_v22 = vmul.f32 0.01, %v1245_v48  ;;  %v2091_v38 = vpop.f32.mrf.mxu1  ;;  %v529_v23 = vadd.f32 %v2824_v8, %v2782_v47  ;;  %v904_v3 = vadd.f32 %v2856_v15, %v537_v59 }
 0x13b   :  { %v1212_v1 = vadd.f32 %v2091_v38, %v897_v61  ;;  %v1314_v26 = vmul.f32 0.01, %v1250_v25  ;;  %vm1282_vm7 = vcmp.ge.f32.partialorder %v1250_v25, 0.0  ;;  %v1248_v58 = vadd.f32 %v2890_v21, %v1209_v6 }
 0x13c   :  { %v1341_v56 = vsel %vm1277_vm5, %v1245_v48, %v1309_v22  ;;  %v1097_v55 = vpop.f32.mrf.mxu1  ;;  %v540_v35 = vadd.f32 %v2828_v10, %v2786_v49  ;;  %v902_v8 = vadd.f32 %v2860_v50, %v529_v23  ;;  %v3217_v49 = vld [vmem:[#allocation6_spill] sm:$0xff]  ;;  %v3218_v10 = vld [vmem:[#allocation7_spill] sm:$0xff] }
 0x13d   :  { %v1251_v13 = vadd.f32 %v2890_v21, %v1212_v1  ;;  %v1210_v19 = vadd.f32 %v1097_v55, %v895_v37  ;;  %v1372_v60 = vpack.c.bf16 %v1341_v56, %v1340_v57  ;;  %v1346_v62 = vsel %vm1282_vm7, %v1250_v25, %v1314_v26  ;;  %v3221_v23 = vld [vmem:[#allocation10_spill] sm:$0xff] }
 0x13e   :  { %v2094_v31 = vpop.f32.mrf.mxu1  ;;  %v1312_v46 = vmul.f32 0.01, %v1248_v58  ;;  %vm1280_vm9 = vcmp.ge.f32.partialorder %v1248_v58, 0.0  ;;  %v532_v2 = vadd.f32 %v3218_v10, %v3217_v49  ;;  %v905_v56 = vadd.f32 %v2868_v11, %v540_v35 }
 0x13f   :  { %vm1283_vm8 = vcmp.ge.f32.partialorder %v1251_v13, 0.0  ;;  %v1315_v41 = vmul.f32 0.01, %v1251_v13  ;;  %v1215_v4 = vadd.f32 %v2094_v31, %v900_v39  ;;  %v1249_v61 = vadd.f32 %v2890_v21, %v1210_v19  ;;  %2124 = vmatprep.mubr.msk.bf16.mxu0 %vm1427_vm6, %v1372_v60 }
 0x140   :  { %v1110_v16 = vpop.f32.mrf.mxu1  ;;  %2125 = vmatmul.mubr.msk.bf16.vlgmr.msra.gmra.mxu0 %vm1427_vm6, %v1373_v14  ;;  %v2949_v14 = vpop.f32.mrf.mxu0  ;;  %v1344_v22 = vsel %vm1280_vm9, %v1248_v58, %v1312_v46 }
 0x141   :  { %v1347_v0 = vsel %vm1283_vm8, %v1251_v13, %v1315_v41  ;;  %v1254_v43 = vadd.f32 %v2890_v21, %v1215_v4  ;;  %v1213_v5 = vadd.f32 %v1110_v16, %v898_v9  ;;  %vm1281_vm10 = vcmp.ge.f32.partialorder %v1249_v61, 0.0  ;;  %v3219_v4 = vld [vmem:[#allocation8_spill] sm:$0xff] }
 0x142   :  { %v1313_v42 = vmul.f32 0.01, %v1249_v61  ;;  %v2095_v52 = vpop.f32.mrf.mxu1  ;;  %v1375_v45 = vpack.c.bf16 %v1347_v0, %v1346_v62  ;;  %v2959_v58 = vpop.f32.mrf.mxu0  ;;  %v903_v41 = vadd.f32 %v2873_v36, %v532_v2  ;;  %v906_v36 = vadd.f32 %v2898_v53, %v2838_v17 }
 0x143   :  { %v1216_v48 = vadd.f32 %v2095_v52, %v901_v33  ;;  %v1318_v25 = vmul.f32 0.01, %v1254_v43  ;;  %vm1286_vm11 = vcmp.ge.f32.partialorder %v1254_v43, 0.0  ;;  %v1252_v38 = vadd.f32 %v2890_v21, %v1213_v5 }
 0x144   :  { %v1345_v63 = vsel %vm1281_vm10, %v1249_v61, %v1313_v42  ;;  %v1113_v6 = vpop.f32.mrf.mxu1  ;;  %v908_v33 = vadd.f32 %v2885_v32, %v3219_v4  ;;  %v2966_v16 = vpop.f32.mrf.mxu0 }
 0x145   :  { %v1255_v51 = vadd.f32 %v2890_v21, %v1216_v48  ;;  %v1214_v37 = vadd.f32 %v1113_v6, %v899_v7  ;;  %v1374_v47 = vpack.c.bf16 %v1345_v63, %v1344_v22  ;;  %v1350_v26 = vsel %vm1286_vm11, %v1254_v43, %v1318_v25  ;;  %v3220_v7 = vld [vmem:[#allocation2_spill] sm:$0xff] }
 0x146   :  { %v2098_v1 = vpop.f32.mrf.mxu1  ;;  %v1316_v13 = vmul.f32 0.01, %v1252_v38  ;;  %vm1284_vm13 = vcmp.ge.f32.partialorder %v1252_v38, 0.0  ;;  %v548_v48 = vadd.f32 %v3221_v23, %v3220_v7  ;;  %v859_v22 = vpop.f32.mrf.mxu0 }
 0x147   :  { %vm1287_vm12 = vcmp.ge.f32.partialorder %v1255_v51, 0.0  ;;  %v1319_v15 = vmul.f32 0.01, %v1255_v51  ;;  %v1219_v39 = vadd.f32 %v2098_v1, %v904_v3  ;;  %v1253_v55 = vadd.f32 %v2890_v21, %v1214_v37  ;;  %2128 = vmatprep.mubr.msk.bf16.mxu0 %vm1427_vm6, %v1374_v47  ;;  %v3222_v3 = vld [vmem:[#allocation9_spill] sm:$0xff] }
 0x148   :  { %v1126_v57 = vpop.f32.mrf.mxu1  ;;  %2129 = vmatmul.mubr.msk.bf16.gmra.mxu0 %vm1427_vm6, %v1375_v45  ;;  %v1348_v46 = vsel %vm1284_vm13, %v1252_v38, %v1316_v13  ;;  %v909_v35 = vadd.f32 %v2907_v29, %v3222_v3 }
 0x149   :  { %v1351_v9 = vsel %vm1287_vm12, %v1255_v51, %v1319_v15  ;;  %v1258_v50 = vadd.f32 %v2890_v21, %v1219_v39  ;;  %v1217_v19 = vadd.f32 %v1126_v57, %v902_v8  ;;  %vm1285_vm14 = vcmp.ge.f32.partialorder %v1253_v55, 0.0  ;;  %v3223_v15 = vld [vmem:[#allocation11_spill] sm:$0xff] }
 0x14a   :  { %v1317_v31 = vmul.f32 0.01, %v1253_v55  ;;  %v2099_v60 = vpop.f32.mrf.mxu1  ;;  %v1377_v11 = vpack.c.bf16 %v1351_v9, %v1350_v26  ;;  %v907_v8 = vadd.f32 %v2920_v54, %v548_v48  ;;  %v912_v39 = vadd.f32 %v2927_v27, %v3223_v15  ;;  %v3224_v27 = vld [vmem:[#allocation3_spill] sm:$0xff] }
 0x14b   :  { %v1220_v12 = vadd.f32 %v2099_v60, %v905_v56  ;;  %v1322_v62 = vmul.f32 0.01, %v1258_v50  ;;  %vm1290_vm15 = vcmp.ge.f32.partialorder %v1258_v50, 0.0  ;;  %v1256_v0 = vadd.f32 %v2890_v21, %v1217_v19  ;;  %v2073_v56 = vpop.f32.mrf.mxu0  ;;  %v3225_v60 = vld [vmem:[#allocation13_spill] sm:$0xff] }
 0x14c   :  { %v1349_v59 = vsel %vm1285_vm14, %v1253_v55, %v1317_v31  ;;  %v1129_v61 = vpop.f32.mrf.mxu1  ;;  %v910_v19 = vadd.f32 %v2939_v44, %v2850_v20 }
 0x14d   :  { %v1259_v43 = vadd.f32 %v2890_v21, %v1220_v12  ;;  %v1218_v5 = vadd.f32 %v1129_v61, %v903_v41  ;;  %v1376_v52 = vpack.c.bf16 %v1349_v59, %v1348_v46  ;;  %v1354_v63 = vsel %vm1290_vm15, %v1258_v50, %v1322_v62  ;;  %v3226_v12 = vld [vmem:[#allocation12_spill] sm:$0xff]  ;;  %v862_v62 = vpop.f32.mrf.mxu0 }
 0x14e   :  { %v2102_v42 = vpop.f32.mrf.mxu1  ;;  %v1320_v38 = vmul.f32 0.01, %v1256_v0  ;;  %vm1288_vm1 = vcmp.ge.f32.partialorder %v1256_v0, 0.0  ;;  %v913_v41 = vadd.f32 %v2949_v14, %v3226_v12 }
 0x14f   :  { %vm1291_vm0 = vcmp.ge.f32.partialorder %v1259_v43, 0.0  ;;  %v1323_v45 = vmul.f32 0.01, %v1259_v43  ;;  %v1223_v32 = vadd.f32 %v2102_v42, %v908_v33  ;;  %v1257_v25 = vadd.f32 %v2890_v21, %v1218_v5  ;;  %2132 = vmatprep.mubr.msk.bf16.mxu0 %vm1427_vm6, %v1376_v52  ;;  %v2076_v7 = vpop.f32.mrf.mxu0 }
 0x150   :  { %v1142_v6 = vpop.f32.mrf.mxu1  ;;  %2133 = vmatmul.mubr.msk.bf16.gmra.mxu0 %vm1427_vm6, %v1377_v11  ;;  %v1352_v26 = vsel %vm1288_vm1, %v1256_v0, %v1320_v38  ;;  %v564_v11 = vadd.f32 %v3225_v60, %v3224_v27  ;;  %v916_v52 = vadd.f32 %v2966_v16, %v2858_v18  ;;  %v3228_v16 = vld [vmem:[#allocation14_spill] sm:$0xff] }
 0x151   :  { %v1355_v51 = vsel %vm1291_vm0, %v1259_v43, %v1323_v45  ;;  %v1262_v17 = vadd.f32 %v2890_v21, %v1223_v32  ;;  %v1221_v53 = vadd.f32 %v1142_v6, %v906_v36  ;;  %vm1289_vm2 = vcmp.ge.f32.partialorder %v1257_v25, 0.0 }
 0x152   :  { %v1321_v37 = vmul.f32 0.01, %v1257_v25  ;;  %v2103_v1 = vpop.f32.mrf.mxu1  ;;  %v1379_v47 = vpack.c.bf16 %v1355_v51, %v1354_v63  ;;  %v911_v42 = vadd.f32 %v2959_v58, %v564_v11  ;;  %v914_v6 = vadd.f32 %v859_v22, %v2862_v28  ;;  %v3227_v51 = vld [vmem:[#allocation4_spill] sm:$0xff] }
 0x153   :  { %v1224_v29 = vadd.f32 %v2103_v1, %v909_v35  ;;  %v1326_v10 = vmul.f32 0.01, %v1262_v17  ;;  %vm1294_vm3 = vcmp.ge.f32.partialorder %v1262_v17, 0.0  ;;  %v1260_v55 = vadd.f32 %v2890_v21, %v1221_v53 }
 0x154   :  { %v1353_v49 = vsel %vm1289_vm2, %v1257_v25, %v1321_v37  ;;  %v1145_v2 = vpop.f32.mrf.mxu1  ;;  %v580_v18 = vadd.f32 %v2866_v30, %v3227_v51 }
 0x155   :  { %v1263_v57 = vadd.f32 %v2890_v21, %v1224_v29  ;;  %v1222_v13 = vadd.f32 %v1145_v2, %v907_v8  ;;  %v1378_v50 = vpack.c.bf16 %v1353_v49, %v1352_v26  ;;  %v1358_v4 = vsel %vm1294_vm3, %v1262_v17, %v1326_v10  ;;  %v3229_v2 = vld [vmem:[#allocation15_spill] sm:$0xff] }
 0x156   :  { %v2106_v9 = vpop.f32.mrf.mxu1  ;;  %v1324_v61 = vmul.f32 0.01, %v1260_v55  ;;  %vm1292_vm5 = vcmp.ge.f32.partialorder %v1260_v55, 0.0  ;;  %v917_v17 = vadd.f32 %v2073_v56, %v3228_v16  ;;  %v915_v10 = vadd.f32 %v862_v62, %v580_v18 }
 0x157   :  { %vm1295_vm4 = vcmp.ge.f32.partialorder %v1263_v57, 0.0  ;;  %v1327_v54 = vmul.f32 0.01, %v1263_v57  ;;  %v1227_v31 = vadd.f32 %v2106_v9, %v912_v39  ;;  %v1261_v33 = vadd.f32 %v2890_v21, %v1222_v13  ;;  %2136 = vmatprep.mubr.msk.bf16.mxu0 %vm1427_vm6, %v1378_v50 }
 0x158   :  { %v1158_v59 = vpop.f32.mrf.mxu1  ;;  %2137 = vmatmul.mubr.msk.bf16.gmra.mxu0 %vm1427_vm6, %v1379_v47  ;;  %v1356_v23 = vsel %vm1292_vm5, %v1260_v55, %v1324_v61  ;;  %v875_v47 = vpop.f32.mrf.mxu0  ;;  %v920_v56 = vadd.f32 %v2076_v7, %v3229_v2  ;;  %vm1733_vm5 = vcmask 818176  }
 0x159   :  { %v1359_v46 = vsel %vm1295_vm4, %v1263_v57, %v1327_v54  ;;  %v1266_v20 = vadd.f32 %v2890_v21, %v1227_v31  ;;  %v1225_v44 = vadd.f32 %v1158_v59, %v910_v19  ;;  %vm1293_vm7 = vcmp.ge.f32.partialorder %v1261_v33, 0.0 }
 0x15a   :  { %v1325_v0 = vmul.f32 0.01, %v1261_v33  ;;  %v2107_v43 = vpop.f32.mrf.mxu1  ;;  %v1381_v5 = vpack.c.bf16 %v1359_v46, %v1358_v4  ;;  %v2077_v13 = vpop.f32.mrf.mxu0  ;;  %v918_v60 = vadd.f32 %v875_v47, %v2876_v24 }
 0x15b   :  { %v1228_v14 = vadd.f32 %v2107_v43, %v913_v41  ;;  %v1330_v45 = vmul.f32 0.01, %v1266_v20  ;;  %vm1298_vm8 = vcmp.ge.f32.partialorder %v1266_v20, 0.0  ;;  %v1264_v48 = vadd.f32 %v2890_v21, %v1225_v44  ;;  %v3230_v41 = vld [vmem:[#allocation5_spill] sm:$0xff] }
 0x15c   :  { %v1357_v36 = vsel %vm1293_vm7, %v1261_v33, %v1325_v0  ;;  %v1161_v32 = vpop.f32.mrf.mxu1  ;;  %v596_v4 = vadd.f32 %v2882_v34, %v3230_v41  ;;  %v921_v33 = vadd.f32 %v2077_v13, %v2880_v40  ;;  %v878_v46 = vpop.f32.mrf.mxu0 }
 0x15d   :  { %v1267_v3 = vadd.f32 %v2890_v21, %v1228_v14  ;;  %v1226_v35 = vadd.f32 %v1161_v32, %v911_v42  ;;  %v1380_v25 = vpack.c.bf16 %v1357_v36, %v1356_v23  ;;  %v1362_v53 = vsel %vm1298_vm8, %v1266_v20, %v1330_v45 }
 0x15e   :  { %v2110_v63 = vpop.f32.mrf.mxu1  ;;  %v1328_v29 = vmul.f32 0.01, %v1264_v48  ;;  %vm1296_vm10 = vcmp.ge.f32.partialorder %v1264_v48, 0.0  ;;  %v919_v14 = vadd.f32 %v878_v46, %v596_v4 }
 0x15f   :  { %vm1299_vm9 = vcmp.ge.f32.partialorder %v1267_v3, 0.0  ;;  %v1331_v58 = vmul.f32 0.01, %v1267_v3  ;;  %v1231_v38 = vadd.f32 %v2110_v63, %v916_v52  ;;  %v1265_v37 = vadd.f32 %v2890_v21, %v1226_v35  ;;  %2140 = vmatprep.mubr.msk.bf16.mxu0 %vm1427_vm6, %v1380_v25 }
 0x160   :  { %v1174_v1 = vpop.f32.mrf.mxu1  ;;  %2141 = vmatmul.mubr.msk.bf16.gmra.mxu0 %vm1427_vm6, %v1381_v5  ;;  %v1360_v9 = vsel %vm1296_vm10, %v1264_v48, %v1328_v29 }
 0x161   :  { %v1363_v8 = vsel %vm1299_vm9, %v1267_v3, %v1331_v58  ;;  %v1270_v15 = vadd.f32 %v2890_v21, %v1231_v38  ;;  %v1229_v28 = vadd.f32 %v1174_v1, %v914_v6  ;;  %vm1297_vm11 = vcmp.ge.f32.partialorder %v1265_v37, 0.0 }
 0x162   :  { %v1329_v22 = vmul.f32 0.01, %v1265_v37  ;;  %v2111_v30 = vpop.f32.mrf.mxu1  ;;  %v1383_v39 = vpack.c.bf16 %v1363_v8, %v1362_v53 }
 0x163   :  { %v1232_v49 = vadd.f32 %v2111_v30, %v917_v17  ;;  %v1334_v55 = vmul.f32 0.01, %v1270_v15  ;;  %vm1302_vm12 = vcmp.ge.f32.partialorder %v1270_v15, 0.0  ;;  %v1268_v50 = vadd.f32 %v2890_v21, %v1229_v28 }
 0x164   :  { %v1361_v26 = vsel %vm1297_vm11, %v1265_v37, %v1329_v22  ;;  %v1177_v57 = vpop.f32.mrf.mxu1 }
 0x165   :  { %v1271_v19 = vadd.f32 %v2890_v21, %v1232_v49  ;;  %v1230_v54 = vadd.f32 %v1177_v57, %v915_v10  ;;  %v1382_v27 = vpack.c.bf16 %v1361_v26, %v1360_v9  ;;  %v1366_v59 = vsel %vm1302_vm12, %v1270_v15, %v1334_v55 }
 0x166   :  { %v2114_v31 = vpop.f32.mrf.mxu1  ;;  %v1332_v20 = vmul.f32 0.01, %v1268_v50  ;;  %vm1300_vm14 = vcmp.ge.f32.partialorder %v1268_v50, 0.0 }
 0x167   :  { %vm1303_vm13 = vcmp.ge.f32.partialorder %v1271_v19, 0.0  ;;  %v1335_v11 = vmul.f32 0.01, %v1271_v19  ;;  %v1235_v12 = vadd.f32 %v2114_v31, %v920_v56  ;;  %v1269_v62 = vadd.f32 %v2890_v21, %v1230_v54  ;;  %2144 = vmatprep.mubr.msk.bf16.mxu0 %vm1427_vm6, %v1382_v27 }
 0x168   :  { %v1190_v61 = vpop.f32.mrf.mxu1  ;;  %2145 = vmatmul.mubr.msk.bf16.gmra.mxu0 %vm1427_vm6, %v1383_v39  ;;  %v1364_v45 = vsel %vm1300_vm14, %v1268_v50, %v1332_v20 }
 0x169   :  { %v1367_v44 = vsel %vm1303_vm13, %v1271_v19, %v1335_v11  ;;  %v1274_v0 = vadd.f32 %v2890_v21, %v1235_v12  ;;  %v1233_v24 = vadd.f32 %v1190_v61, %v918_v60  ;;  %vm1301_vm15 = vcmp.ge.f32.partialorder %v1269_v62, 0.0 }
 0x16a   :  { %v1333_v43 = vmul.f32 0.01, %v1269_v62  ;;  %v2115_v34 = vpop.f32.mrf.mxu1  ;;  %v1385_v5 = vpack.c.bf16 %v1367_v44, %v1366_v59 }
 0x16b   :  { %v1236_v40 = vadd.f32 %v2115_v34, %v921_v33  ;;  %v1272_v52 = vadd.f32 %v2890_v21, %v1233_v24  ;;  %v1338_v32 = vmul.f32 0.01, %v1274_v0  ;;  %vm1306_vm0 = vcmp.ge.f32.partialorder %v1274_v0, 0.0 }
 0x16c   :  { %v1365_v42 = vsel %vm1301_vm15, %v1269_v62, %v1333_v43  ;;  %v1193_v36 = vpop.f32.mrf.mxu1 }
 0x16d   :  { %v1275_v7 = vadd.f32 %v2890_v21, %v1236_v40  ;;  %v1234_v23 = vadd.f32 %v1193_v36, %v919_v14  ;;  %v1384_v48 = vpack.c.bf16 %v1365_v42, %v1364_v45  ;;  %v1336_v35 = vmul.f32 0.01, %v1272_v52 }
 0x16e   :  { %v1370_v25 = vsel %vm1306_vm0, %v1274_v0, %v1338_v32  ;;  %vm1304_vm2 = vcmp.ge.f32.partialorder %v1272_v52, 0.0 }
 0x16f   :  { %vm1307_vm1 = vcmp.ge.f32.partialorder %v1275_v7, 0.0  ;;  %v1339_v3 = vmul.f32 0.01, %v1275_v7  ;;  %v1273_v63 = vadd.f32 %v2890_v21, %v1234_v23  ;;  %2148 = vmatprep.mubr.msk.bf16.mxu0 %vm1427_vm6, %v1384_v48  ;;  %v1368_v51 = vsel %vm1304_vm2, %v1272_v52, %v1336_v35  ;;  %v3029_v21 = vld [vmem:[%s3201_s10] ss:$0 sm:$0xff] }
 0x170   :  { %2149 = vmatmul.mubr.msk.bf16.gmra.mxu0 %vm1427_vm6, %v1385_v5 }
 0x171   :  { %v1371_v6 = vsel %vm1307_vm1, %v1275_v7, %v1339_v3  ;;  %vm1305_vm3 = vcmp.ge.f32.partialorder %v1273_v63, 0.0  ;;  %v1337_v58 = vmul.f32 0.01, %v1273_v63 }
 0x172   :  { %v1387_v38 = vpack.c.bf16 %v1371_v6, %v1370_v25 }
 0x173   :  { %v1369_v18 = vsel %vm1305_vm3, %v1273_v63, %v1337_v58 }
 0x174   :  { %v1386_v16 = vpack.c.bf16 %v1369_v18, %v1368_v51 }
 0x176   :  { %2152 = vmatprep.mubr.msk.bf16.mxu0 %vm1427_vm6, %v1386_v16 }
 0x178   :  { %2153 = vmatmul.mubr.msk.bf16.gmra.mxu0 %vm1427_vm6, %v1387_v38 }
 0x200   :  { %v2126_v17 = vpop.f32.mrf.mxu0 }
 0x201   :  { %v1519_v53 = vadd.f32 %v2126_v17, %v3029_v21 }
 0x202   :  { %v1510_v37 = vpop.f32.mrf.mxu0 }
 0x203   :  { %vm1639_vm4 = vcmp.ge.f32.partialorder %v1519_v53, 0.0  ;;  %v1671_v1 = vmul.f32 0.01, %v1519_v53  ;;  %v1511_v47 = vadd.f32 %v3029_v21, %v1510_v37 }
 0x204   :  { %v2127_v29 = vpop.f32.mrf.mxu0 }
 0x205   :  { %v1703_v8 = vsel %vm1639_vm4, %v1519_v53, %v1671_v1  ;;  %vm1637_vm7 = vcmp.ge.f32.partialorder %v1511_v47, 0.0  ;;  %v1669_v15 = vmul.f32 0.01, %v1511_v47  ;;  %v1522_v28 = vadd.f32 %v2127_v29, %v3029_v21 }
 0x206   :  { %1736 = vst.msk [vmem:[%s3202_s11 + $0x10] sm:$0xff] %vm1733_vm5, %v1703_v8  ;;  %v1513_v22 = vpop.f32.mrf.mxu0 }
 0x207   :  { %v1701_v30 = vsel %vm1637_vm7, %v1511_v47, %v1669_v15  ;;  %vm1640_vm6 = vcmp.ge.f32.partialorder %v1522_v28, 0.0  ;;  %v1672_v39 = vmul.f32 0.01, %v1522_v28  ;;  %v1514_v49 = vadd.f32 %v3029_v21, %v1513_v22 }
 0x208   :  { %1734 = vst.msk [vmem:[%s3202_s11] sm:$0xff] %vm1733_vm5, %v1701_v30  ;;  %v2130_v10 = vpop.f32.mrf.mxu0 }
 0x209   :  { %v1704_v2 = vsel %vm1640_vm6, %v1522_v28, %v1672_v39  ;;  %vm1638_vm8 = vcmp.ge.f32.partialorder %v1514_v49, 0.0  ;;  %v1670_v56 = vmul.f32 0.01, %v1514_v49  ;;  %v1535_v26 = vadd.f32 %v2130_v10, %v3029_v21 }
 0x20a   :  { %1737 = vst.msk [vmem:[%s3202_s11 + $0x18] sm:$0xff] %vm1733_vm5, %v1704_v2  ;;  %v1526_v55 = vpop.f32.mrf.mxu0 }
 0x20b   :  { %v1702_v57 = vsel %vm1638_vm8, %v1514_v49, %v1670_v56  ;;  %vm1643_vm9 = vcmp.ge.f32.partialorder %v1535_v26, 0.0  ;;  %v1675_v13 = vmul.f32 0.01, %v1535_v26  ;;  %v1527_v9 = vadd.f32 %v3029_v21, %v1526_v55 }
 0x20c   :  { %1735 = vst.msk [vmem:[%s3202_s11 + $0x8] sm:$0xff] %vm1733_vm5, %v1702_v57  ;;  %v2131_v50 = vpop.f32.mrf.mxu0 }
 0x20d   :  { %v1707_v19 = vsel %vm1643_vm9, %v1535_v26, %v1675_v13  ;;  %vm1641_vm10 = vcmp.ge.f32.partialorder %v1527_v9, 0.0  ;;  %v1673_v54 = vmul.f32 0.01, %v1527_v9  ;;  %v1538_v31 = vadd.f32 %v2131_v50, %v3029_v21 }
 0x20e   :  { %1740 = vst.msk [vmem:[%s3202_s11 + $0x30] sm:$0xff] %vm1733_vm5, %v1707_v19  ;;  %v1529_v27 = vpop.f32.mrf.mxu0 }
 0x20f   :  { %v1705_v60 = vsel %vm1641_vm10, %v1527_v9, %v1673_v54  ;;  %vm1644_vm11 = vcmp.ge.f32.partialorder %v1538_v31, 0.0  ;;  %v1676_v11 = vmul.f32 0.01, %v1538_v31  ;;  %v1530_v12 = vadd.f32 %v3029_v21, %v1529_v27 }
 0x210   :  { %1738 = vst.msk [vmem:[%s3202_s11 + $0x20] sm:$0xff] %vm1733_vm5, %v1705_v60  ;;  %v2134_v41 = vpop.f32.mrf.mxu0 }
 0x211   :  { %v1708_v4 = vsel %vm1644_vm11, %v1538_v31, %v1676_v11  ;;  %vm1642_vm12 = vcmp.ge.f32.partialorder %v1530_v12, 0.0  ;;  %v1674_v33 = vmul.f32 0.01, %v1530_v12  ;;  %v1551_v59 = vadd.f32 %v2134_v41, %v3029_v21 }
 0x212   :  { %1741 = vst.msk [vmem:[%s3202_s11 + $0x38] sm:$0xff] %vm1733_vm5, %v1708_v4  ;;  %v1542_v62 = vpop.f32.mrf.mxu0 }
 0x213   :  { %v1706_v61 = vsel %vm1642_vm12, %v1530_v12, %v1674_v33  ;;  %vm1647_vm13 = vcmp.ge.f32.partialorder %v1551_v59, 0.0  ;;  %v1679_v46 = vmul.f32 0.01, %v1551_v59  ;;  %v1543_v20 = vadd.f32 %v3029_v21, %v1542_v62 }
 0x214   :  { %1739 = vst.msk [vmem:[%s3202_s11 + $0x28] sm:$0xff] %vm1733_vm5, %v1706_v61  ;;  %v2135_v44 = vpop.f32.mrf.mxu0 }
 0x215   :  { %v1711_v0 = vsel %vm1647_vm13, %v1551_v59, %v1679_v46  ;;  %vm1645_vm14 = vcmp.ge.f32.partialorder %v1543_v20, 0.0  ;;  %v1677_v24 = vmul.f32 0.01, %v1543_v20  ;;  %v1554_v43 = vadd.f32 %v2135_v44, %v3029_v21 }
 0x216   :  { %1744 = vst.msk [vmem:[%s3202_s11 + $0x50] sm:$0xff] %vm1733_vm5, %v1711_v0  ;;  %v1545_v34 = vpop.f32.mrf.mxu0 }
 0x217   :  { %v1709_v5 = vsel %vm1645_vm14, %v1543_v20, %v1677_v24  ;;  %vm1648_vm15 = vcmp.ge.f32.partialorder %v1554_v43, 0.0  ;;  %v1680_v40 = vmul.f32 0.01, %v1554_v43  ;;  %v1546_v14 = vadd.f32 %v3029_v21, %v1545_v34 }
 0x218   :  { %1742 = vst.msk [vmem:[%s3202_s11 + $0x40] sm:$0xff] %vm1733_vm5, %v1709_v5  ;;  %v2138_v42 = vpop.f32.mrf.mxu0 }
 0x219   :  { %v1712_v52 = vsel %vm1648_vm15, %v1554_v43, %v1680_v40  ;;  %vm1646_vm0 = vcmp.ge.f32.partialorder %v1546_v14, 0.0  ;;  %v1678_v36 = vmul.f32 0.01, %v1546_v14  ;;  %v1567_v45 = vadd.f32 %v2138_v42, %v3029_v21 }
 0x21a   :  { %1745 = vst.msk [vmem:[%s3202_s11 + $0x58] sm:$0xff] %vm1733_vm5, %v1712_v52  ;;  %v1558_v32 = vpop.f32.mrf.mxu0 }
 0x21b   :  { %v1710_v7 = vsel %vm1646_vm0, %v1546_v14, %v1678_v36  ;;  %vm1651_vm1 = vcmp.ge.f32.partialorder %v1567_v45, 0.0  ;;  %v1683_v23 = vmul.f32 0.01, %v1567_v45  ;;  %v1559_v48 = vadd.f32 %v3029_v21, %v1558_v32 }
 0x21c   :  { %1743 = vst.msk [vmem:[%s3202_s11 + $0x48] sm:$0xff] %vm1733_vm5, %v1710_v7  ;;  %v2139_v3 = vpop.f32.mrf.mxu0 }
 0x21d   :  { %v1715_v35 = vsel %vm1651_vm1, %v1567_v45, %v1683_v23  ;;  %vm1649_vm2 = vcmp.ge.f32.partialorder %v1559_v48, 0.0  ;;  %v1681_v63 = vmul.f32 0.01, %v1559_v48  ;;  %v1570_v25 = vadd.f32 %v2139_v3, %v3029_v21 }
 0x21e   :  { %1748 = vst.msk [vmem:[%s3202_s11 + $0x70] sm:$0xff] %vm1733_vm5, %v1715_v35  ;;  %v1561_v6 = vpop.f32.mrf.mxu0 }
 0x21f   :  { %v1713_v58 = vsel %vm1649_vm2, %v1559_v48, %v1681_v63  ;;  %vm1652_vm3 = vcmp.ge.f32.partialorder %v1570_v25, 0.0  ;;  %v1684_v38 = vmul.f32 0.01, %v1570_v25  ;;  %v1562_v51 = vadd.f32 %v3029_v21, %v1561_v6 }
 0x220   :  { %1746 = vst.msk [vmem:[%s3202_s11 + $0x60] sm:$0xff] %vm1733_vm5, %v1713_v58  ;;  %v2142_v18 = vpop.f32.mrf.mxu0 }
 0x221   :  { %v1716_v16 = vsel %vm1652_vm3, %v1570_v25, %v1684_v38  ;;  %vm1650_vm4 = vcmp.ge.f32.partialorder %v1562_v51, 0.0  ;;  %v1682_v17 = vmul.f32 0.01, %v1562_v51  ;;  %v1583_v53 = vadd.f32 %v2142_v18, %v3029_v21 }
 0x222   :  { %1749 = vst.msk [vmem:[%s3202_s11 + $0x78] sm:$0xff] %vm1733_vm5, %v1716_v16  ;;  %v1574_v37 = vpop.f32.mrf.mxu0 }
 0x223   :  { %v1714_v1 = vsel %vm1650_vm4, %v1562_v51, %v1682_v17  ;;  %vm1655_vm7 = vcmp.ge.f32.partialorder %v1583_v53, 0.0  ;;  %v1687_v47 = vmul.f32 0.01, %v1583_v53  ;;  %v1575_v29 = vadd.f32 %v3029_v21, %v1574_v37 }
 0x224   :  { %1747 = vst.msk [vmem:[%s3202_s11 + $0x68] sm:$0xff] %vm1733_vm5, %v1714_v1  ;;  %v2143_v8 = vpop.f32.mrf.mxu0 }
 0x225   :  { %v1719_v15 = vsel %vm1655_vm7, %v1583_v53, %v1687_v47  ;;  %vm1653_vm6 = vcmp.ge.f32.partialorder %v1575_v29, 0.0  ;;  %v1685_v28 = vmul.f32 0.01, %v1575_v29  ;;  %v1586_v22 = vadd.f32 %v2143_v8, %v3029_v21 }
 0x226   :  { %1752 = vst.msk [vmem:[%s3202_s11 + $0x90] sm:$0xff] %vm1733_vm5, %v1719_v15  ;;  %v1577_v30 = vpop.f32.mrf.mxu0 }
 0x227   :  { %v1717_v39 = vsel %vm1653_vm6, %v1575_v29, %v1685_v28  ;;  %vm1656_vm8 = vcmp.ge.f32.partialorder %v1586_v22, 0.0  ;;  %v1688_v49 = vmul.f32 0.01, %v1586_v22  ;;  %v1578_v10 = vadd.f32 %v3029_v21, %v1577_v30 }
 0x228   :  { %1750 = vst.msk [vmem:[%s3202_s11 + $0x80] sm:$0xff] %vm1733_vm5, %v1717_v39  ;;  %v2146_v2 = vpop.f32.mrf.mxu0 }
 0x229   :  { %v1720_v56 = vsel %vm1656_vm8, %v1586_v22, %v1688_v49  ;;  %vm1654_vm9 = vcmp.ge.f32.partialorder %v1578_v10, 0.0  ;;  %v1686_v26 = vmul.f32 0.01, %v1578_v10  ;;  %v1599_v55 = vadd.f32 %v2146_v2, %v3029_v21 }
 0x22a   :  { %1753 = vst.msk [vmem:[%s3202_s11 + $0x98] sm:$0xff] %vm1733_vm5, %v1720_v56  ;;  %v1590_v57 = vpop.f32.mrf.mxu0 }
 0x22b   :  { %v1718_v13 = vsel %vm1654_vm9, %v1578_v10, %v1686_v26  ;;  %vm1659_vm10 = vcmp.ge.f32.partialorder %v1599_v55, 0.0  ;;  %v1691_v9 = vmul.f32 0.01, %v1599_v55  ;;  %v1591_v50 = vadd.f32 %v3029_v21, %v1590_v57 }
 0x22c   :  { %1751 = vst.msk [vmem:[%s3202_s11 + $0x88] sm:$0xff] %vm1733_vm5, %v1718_v13  ;;  %v2147_v19 = vpop.f32.mrf.mxu0 }
 0x22d   :  { %v1723_v54 = vsel %vm1659_vm10, %v1599_v55, %v1691_v9  ;;  %vm1657_vm11 = vcmp.ge.f32.partialorder %v1591_v50, 0.0  ;;  %v1689_v31 = vmul.f32 0.01, %v1591_v50  ;;  %v1602_v27 = vadd.f32 %v2147_v19, %v3029_v21 }
 0x22e   :  { %1756 = vst.msk [vmem:[%s3202_s11 + $0xb0] sm:$0xff] %vm1733_vm5, %v1723_v54  ;;  %v1593_v60 = vpop.f32.mrf.mxu0 }
 0x22f   :  { %v1721_v11 = vsel %vm1657_vm11, %v1591_v50, %v1689_v31  ;;  %vm1660_vm12 = vcmp.ge.f32.partialorder %v1602_v27, 0.0  ;;  %v1692_v12 = vmul.f32 0.01, %v1602_v27  ;;  %v1594_v41 = vadd.f32 %v3029_v21, %v1593_v60 }
 0x230   :  { %1754 = vst.msk [vmem:[%s3202_s11 + $0xa0] sm:$0xff] %vm1733_vm5, %v1721_v11  ;;  %v2150_v4 = vpop.f32.mrf.mxu0 }
 0x231   :  { %v1724_v33 = vsel %vm1660_vm12, %v1602_v27, %v1692_v12  ;;  %vm1658_vm13 = vcmp.ge.f32.partialorder %v1594_v41, 0.0  ;;  %v1690_v59 = vmul.f32 0.01, %v1594_v41  ;;  %v1615_v62 = vadd.f32 %v2150_v4, %v3029_v21 }
 0x232   :  { %1757 = vst.msk [vmem:[%s3202_s11 + $0xb8] sm:$0xff] %vm1733_vm5, %v1724_v33  ;;  %v1606_v61 = vpop.f32.mrf.mxu0 }
 0x233   :  { %v1722_v46 = vsel %vm1658_vm13, %v1594_v41, %v1690_v59  ;;  %vm1663_vm14 = vcmp.ge.f32.partialorder %v1615_v62, 0.0  ;;  %v1695_v20 = vmul.f32 0.01, %v1615_v62  ;;  %v1607_v44 = vadd.f32 %v3029_v21, %v1606_v61 }
 0x234   :  { %1755 = vst.msk [vmem:[%s3202_s11 + $0xa8] sm:$0xff] %vm1733_vm5, %v1722_v46  ;;  %v2151_v0 = vpop.f32.mrf.mxu0 }
 0x235   :  { %v1727_v24 = vsel %vm1663_vm14, %v1615_v62, %v1695_v20  ;;  %vm1661_vm15 = vcmp.ge.f32.partialorder %v1607_v44, 0.0  ;;  %v1693_v43 = vmul.f32 0.01, %v1607_v44  ;;  %v1618_v34 = vadd.f32 %v2151_v0, %v3029_v21 }
 0x236   :  { %1760 = vst.msk [vmem:[%s3202_s11 + $0xd0] sm:$0xff] %vm1733_vm5, %v1727_v24  ;;  %v1609_v5 = vpop.f32.mrf.mxu0 }
 0x237   :  { %v1725_v40 = vsel %vm1661_vm15, %v1607_v44, %v1693_v43  ;;  %vm1664_vm0 = vcmp.ge.f32.partialorder %v1618_v34, 0.0  ;;  %v1696_v14 = vmul.f32 0.01, %v1618_v34  ;;  %v1610_v42 = vadd.f32 %v3029_v21, %v1609_v5 }
 0x238   :  { %1758 = vst.msk [vmem:[%s3202_s11 + $0xc0] sm:$0xff] %vm1733_vm5, %v1725_v40  ;;  %v2154_v52 = vpop.f32.mrf.mxu0 }
 0x239   :  { %v1728_v36 = vsel %vm1664_vm0, %v1618_v34, %v1696_v14  ;;  %vm1662_vm1 = vcmp.ge.f32.partialorder %v1610_v42, 0.0  ;;  %v1694_v45 = vmul.f32 0.01, %v1610_v42  ;;  %v1631_v32 = vadd.f32 %v2154_v52, %v3029_v21 }
 0x23a   :  { %1761 = vst.msk [vmem:[%s3202_s11 + $0xd8] sm:$0xff] %vm1733_vm5, %v1728_v36  ;;  %v1622_v7 = vpop.f32.mrf.mxu0 }
 0x23b   :  { %v1726_v23 = vsel %vm1662_vm1, %v1610_v42, %v1694_v45  ;;  %vm1667_vm2 = vcmp.ge.f32.partialorder %v1631_v32, 0.0  ;;  %v1699_v48 = vmul.f32 0.01, %v1631_v32  ;;  %v1623_v3 = vadd.f32 %v3029_v21, %v1622_v7 }
 0x23c   :  { %1759 = vst.msk [vmem:[%s3202_s11 + $0xc8] sm:$0xff] %vm1733_vm5, %v1726_v23  ;;  %v2155_v35 = vpop.f32.mrf.mxu0 }
 0x23d   :  { %v1731_v63 = vsel %vm1667_vm2, %v1631_v32, %v1699_v48  ;;  %vm1665_vm3 = vcmp.ge.f32.partialorder %v1623_v3, 0.0  ;;  %v1697_v25 = vmul.f32 0.01, %v1623_v3  ;;  %v1634_v6 = vadd.f32 %v2155_v35, %v3029_v21 }
 0x23e   :  { %1764 = vst.msk [vmem:[%s3202_s11 + $0xf0] sm:$0xff] %vm1733_vm5, %v1731_v63  ;;  %v1625_v58 = vpop.f32.mrf.mxu0 }
 0x23f   :  { %v1729_v38 = vsel %vm1665_vm3, %v1623_v3, %v1697_v25  ;;  %vm1668_vm4 = vcmp.ge.f32.partialorder %v1634_v6, 0.0  ;;  %v1700_v51 = vmul.f32 0.01, %v1634_v6  ;;  %v1626_v18 = vadd.f32 %v3029_v21, %v1625_v58 }
 0x240   :  { %1762 = vst.msk [vmem:[%s3202_s11 + $0xe0] sm:$0xff] %vm1733_vm5, %v1729_v38 }
 0x241   :  { %v1732_v16 = vsel %vm1668_vm4, %v1634_v6, %v1700_v51  ;;  %vm1666_vm7 = vcmp.ge.f32.partialorder %v1626_v18, 0.0  ;;  %v1698_v17 = vmul.f32 0.01, %v1626_v18 }
 0x242   :  { %1765 = vst.msk [vmem:[%s3202_s11 + $0xf8] sm:$0xff] %vm1733_vm5, %v1732_v16 }
 0x243   :  { %v1730_v53 = vsel %vm1666_vm7, %v1626_v18, %v1698_v17 }
 0x244   :  { %1763 = vst.msk [vmem:[%s3202_s11 + $0xe8] sm:$0xff] %vm1733_vm5, %v1730_v53 }

</bundles_post_ra>
